<compile_context>
chip_gen: v7x
topology: tpu7x:2x2x1
jax: 0.10.0
libtpu: 0.0.40
codegen_flags: <defaults>
</compile_context>

<pallas_src>
import jax
import jax.numpy as jnp
from jax.experimental import pallas as pl
from jax.experimental.pallas import tpu as pltpu

LATENT_DIM = 32
HIDDEN_DIM = 128


def _sigmoid(x):
    # Exact identity: sigmoid(x) == 0.5*tanh(0.5*x) + 0.5.  One EUP push +
    # cheap VPU scale/shift, instead of exp + reciprocal on the serial chain.
    return 0.5 * jnp.tanh(0.5 * x) + 0.5


def _cell(gates, c, H):
    """One LSTM cell update from pre-activations. PyTorch gate order: i, f, g, o."""
    i = _sigmoid(gates[:, 0 * H:1 * H])
    f = _sigmoid(gates[:, 1 * H:2 * H])
    g = jnp.tanh(gates[:, 2 * H:3 * H])
    o = _sigmoid(gates[:, 3 * H:4 * H])
    c_new = f * c + i * g
    h_new = o * jnp.tanh(c_new)
    return h_new, c_new


def bilstm_kernel(x_ref,        # (T*B, D)   bf16 time-major flattened input
                  wih0_ref,     # (D, 8H)    bf16 [W_ih_l0_fwd.T | W_ih_l0_bwd.T]
                  b0_ref,       # (1, 8H)    f32  summed biases, both directions
                  whh0f_ref,    # (H, 4H)    bf16
                  whh0b_ref,    # (H, 4H)    bf16
                  w1_ref,       # (2H, 8H)   bf16 [W_ih_l1_fwd.T | W_ih_l1_bwd.T]
                  b1_ref,       # (1, 8H)    f32
                  whh1f_ref,    # (H, 4H)    bf16
                  whh1b_ref,    # (H, 4H)    bf16
                  out_ref,      # (B, 2H)    f32
                  gx0_ref,      # scratch (T*B, 8H) f32: layer-0 input gates
                  gx1_ref):     # scratch (T*B, 8H) f32: layer-1 input gates
    TB = x_ref.shape[0]
    B = out_ref.shape[0]
    T = TB // B
    H = whh0f_ref.shape[0]
    f32 = jnp.float32
    bf16 = jnp.bfloat16

    # ---- layer 0: one bulk input projection, both directions, all steps ----
    gx0_ref[...] = (jnp.dot(x_ref[...], wih0_ref[...],
                            preferred_element_type=f32) + b0_ref[...])

    zeros = jnp.zeros((B, H), f32)

    # ---- layer 0 recurrence: fwd (time t) and bwd (time T-1-t) interleaved ----
    hf, cf = zeros, zeros
    hb, cb = zeros, zeros
    hf_steps = []
    hb_steps = []
    for t in range(T):                      # T is static -> full unroll, static slices
        tb = T - 1 - t
        gf = (gx0_ref[t * B:(t + 1) * B, 0:4 * H]
              + jnp.dot(hf.astype(bf16), whh0f_ref[...], preferred_element_type=f32))
        gb = (gx0_ref[tb * B:(tb + 1) * B, 4 * H:8 * H]
              + jnp.dot(hb.astype(bf16), whh0b_ref[...], preferred_element_type=f32))
        hf, cf = _cell(gf, cf, H)
        hb, cb = _cell(gb, cb, H)
        hf_steps.append(hf)
        hb_steps.append(hb)

    # Dense, time-ordered layer-0 output (fwd in lanes 0:H, bwd in lanes H:2H),
    # built as a value: no masked per-step stores, no scratch round-trip.
    l0f = jnp.concatenate(hf_steps, axis=0)            # (T*B, H)
    l0b = jnp.concatenate(hb_steps[::-1], axis=0)      # (T*B, H), time order
    l0 = jnp.concatenate([l0f, l0b], axis=1)           # (T*B, 2H)

    # ---- layer 1: single bulk input projection (K = 2H = 256) ----
    gx1_ref[...] = (jnp.dot(l0.astype(bf16), w1_ref[...],
                            preferred_element_type=f32) + b1_ref[...])

    # ---- layer 1 recurrence: only the final hidden states matter ----
    hf, cf = zeros, zeros
    hb, cb = zeros, zeros
    for t in range(T):
        tb = T - 1 - t
        gf = (gx1_ref[t * B:(t + 1) * B, 0:4 * H]
              + jnp.dot(hf.astype(bf16), whh1f_ref[...], preferred_element_type=f32))
        gb = (gx1_ref[tb * B:(tb + 1) * B, 4 * H:8 * H]
              + jnp.dot(hb.astype(bf16), whh1b_ref[...], preferred_element_type=f32))
        hf, cf = _cell(gf, cf, H)
        hb, cb = _cell(gb, cb, H)

    out_ref[:, 0:H] = hf        # h_n[-2]: layer-1 forward final hidden state
    out_ref[:, H:2 * H] = hb    # h_n[-1]: layer-1 backward final hidden state


def init_params(key, latent_dim=LATENT_DIM, hidden_dim=HIDDEN_DIM):
    """PyTorch-style uniform(-1/sqrt(H), 1/sqrt(H)) init, raw PyTorch layout.

    Returns [layer0_fwd, layer0_bwd, layer1_fwd, layer1_bwd], each a tuple
    (w_ih (4H,in), w_hh (4H,H), b_ih (4H,), b_hh (4H,)).
    """
    stdv = 1.0 / (hidden_dim ** 0.5)
    in_dims = [latent_dim, latent_dim, 2 * hidden_dim, 2 * hidden_dim]
    params = []
    for in_dim in in_dims:
        key, k1, k2, k3, k4 = jax.random.split(key, 5)
        w_ih = jax.random.uniform(k1, (4 * hidden_dim, in_dim), jnp.float32, -stdv, stdv)
        w_hh = jax.random.uniform(k2, (4 * hidden_dim, hidden_dim), jnp.float32, -stdv, stdv)
        b_ih = jax.random.uniform(k3, (4 * hidden_dim,), jnp.float32, -stdv, stdv)
        b_hh = jax.random.uniform(k4, (4 * hidden_dim,), jnp.float32, -stdv, stdv)
        params.append((w_ih, w_hh, b_ih, b_hh))
    return params


def _pack_params(params, hidden_dim=HIDDEN_DIM):
    """Pre-transpose / concat weights into the kernel's layout; weights -> bf16."""
    H = hidden_dim
    bf16 = jnp.bfloat16
    wih0f, whh0f, bih0f, bhh0f = params[0]
    wih0b, whh0b, bih0b, bhh0b = params[1]
    wih1f, whh1f, bih1f, bhh1f = params[2]
    wih1b, whh1b, bih1b, bhh1b = params[3]

    wih0 = jnp.concatenate([wih0f.T, wih0b.T], axis=1).astype(bf16)          # (D, 8H)
    b0 = jnp.concatenate([bih0f + bhh0f, bih0b + bhh0b]).reshape(1, 8 * H)   # f32

    # Layer-1 input is cat([l0_fwd, l0_bwd], -1) -> one (2H, 8H) projection,
    # columns 0:4H = forward-direction gates, 4H:8H = backward-direction gates.
    w1 = jnp.concatenate([wih1f.T, wih1b.T], axis=1).astype(bf16)            # (2H, 8H)
    b1 = jnp.concatenate([bih1f + bhh1f, bih1b + bhh1b]).reshape(1, 8 * H)   # f32

    return (wih0, b0, whh0f.T.astype(bf16), whh0b.T.astype(bf16),
            w1, b1, whh1f.T.astype(bf16), whh1b.T.astype(bf16))


def temporal_aggregator_forward(x, params, hidden_dim=HIDDEN_DIM):
    """x: (B, T, C, H, W) with C*H*W == latent_dim  ->  (B, 2*hidden_dim)."""
    B, T, C, Hh, W = x.shape
    D = C * Hh * W
    H = hidden_dim
    # (B,T,C,H,W) -> time-major flat (T*B, D): row t*B + b.  bf16 matmul LHS.
    x_flat = jnp.transpose(x.reshape(B, T, D), (1, 0, 2)).reshape(T * B, D)
    x_flat = x_flat.astype(jnp.bfloat16)

    packed = _pack_params(params, H)

    return pl.pallas_call(
        bilstm_kernel,
        out_shape=jax.ShapeDtypeStruct((B, 2 * H), jnp.float32),
        scratch_shapes=[
            pltpu.VMEM((T * B, 8 * H), jnp.float32),   # layer-0 precomputed gates
            pltpu.VMEM((T * B, 8 * H), jnp.float32),   # layer-1 precomputed gates
        ],
    )(x_flat, *packed)


def _reference(x, params, hidden_dim=HIDDEN_DIM):
    """Pure-JAX f32 reference (same math as the PyTorch module, eval mode)."""
    B, T, C, Hh, W = x.shape
    xs = x.reshape(B, T, C * Hh * W).astype(jnp.float32)
    H = hidden_dim

    def run_dir(seq, p, reverse):
        w_ih, w_hh, b_ih, b_hh = p
        wih, whh, b = w_ih.T, w_hh.T, (b_ih + b_hh)[None, :]
        h = jnp.zeros((B, H), jnp.float32)
        c = jnp.zeros((B, H), jnp.float32)
        order = range(T - 1, -1, -1) if reverse else range(T)
        outs = [None] * T
        for t in order:
            g = seq[:, t, :] @ wih + h @ whh + b
            i = jax.nn.sigmoid(g[:, :H]); f = jax.nn.sigmoid(g[:, H:2 * H])
            gg = jnp.tanh(g[:, 2 * H:3 * H]); o = jax.nn.sigmoid(g[:, 3 * H:])
            c = f * c + i * gg
            h = o * jnp.tanh(c)
            outs[t] = h
        return jnp.stack(outs, axis=1), h

    o0f, _ = run_dir(xs, params[0], False)
    o0b, _ = run_dir(xs, params[1], True)
    l0 = jnp.concatenate([o0f, o0b], axis=-1)
    _, hf = run_dir(l0, params[2], False)
    _, hb = run_dir(l0, params[3], True)
    return jnp.concatenate([hf, hb], axis=-1)


if __name__ == "__main__":
    key = jax.random.PRNGKey(0)
    k_x, k_p = jax.random.split(key)

    # (batch=2, seq=8, channels=2, height=4, width=4) -> C*H*W = 32 = latent_dim
    B, T, C, Hh, W = 2, 8, 2, 4, 4
    x = jax.random.normal(k_x, (B, T, C, Hh, W), jnp.float32)
    params = init_params(k_p)

    out = jax.block_until_ready(temporal_aggregator_forward(x, params))
    assert out.shape == (B, 2 * HIDDEN_DIM)

    # bf16 weight operands (with f32 accumulation) vs. the f32 reference:
    # tolerance relaxed accordingly.
    ref = _reference(x, params)
    assert jnp.allclose(out, ref, atol=1e-2, rtol=1e-2), "mismatch vs JAX reference"

    print("KERNEL_OK")
</pallas_src>

<mosaic_0001>
module attributes {stable_mosaic.version = 11 : i64} {
  func.func @bilstm_kernel(%arg0: memref<16x32xbf16, #tpu.memory_space<vmem>>, %arg1: memref<32x1024xbf16, #tpu.memory_space<vmem>>, %arg2: memref<1x1024xf32, #tpu.memory_space<vmem>>, %arg3: memref<128x512xbf16, #tpu.memory_space<vmem>>, %arg4: memref<128x512xbf16, #tpu.memory_space<vmem>>, %arg5: memref<256x1024xbf16, #tpu.memory_space<vmem>>, %arg6: memref<1x1024xf32, #tpu.memory_space<vmem>>, %arg7: memref<128x512xbf16, #tpu.memory_space<vmem>>, %arg8: memref<128x512xbf16, #tpu.memory_space<vmem>>, %arg9: memref<2x256xf32, #tpu.memory_space<vmem>>, %arg10: memref<16x1024xf32, #tpu.memory_space<vmem>>, %arg11: memref<16x1024xf32, #tpu.memory_space<vmem>>) attributes {dimension_semantics = [], scalar_prefetch = 0 : i64, scratch_operands = 2 : i64, tpu.core_type = #tpu.core_type<tc>} {
    %c0 = arith.constant 0 : index
    %c0_0 = arith.constant 0 : index
    %0 = vector.load %arg0[%c0, %c0_0] : memref<16x32xbf16, #tpu.memory_space<vmem>>, vector<16x32xbf16>
    %c0_1 = arith.constant 0 : index
    %c0_2 = arith.constant 0 : index
    %1 = vector.load %arg1[%c0_1, %c0_2] : memref<32x1024xbf16, #tpu.memory_space<vmem>>, vector<32x1024xbf16>
    %cst = arith.constant dense<0.000000e+00> : vector<16x1024xf32>
    %2 = tpu.matmul %0, %1, %cst {dimension_numbers = #tpu.dot_dimension_numbers<[1], [0], [0], [1], [0, 0, 1, 1], [], []>} : vector<16x32xbf16>, vector<32x1024xbf16>, vector<16x1024xf32> -> vector<16x1024xf32>
    %c0_3 = arith.constant 0 : index
    %c0_4 = arith.constant 0 : index
    %3 = vector.load %arg2[%c0_3, %c0_4] : memref<1x1024xf32, #tpu.memory_space<vmem>>, vector<1x1024xf32>
    %4 = vector.broadcast %3 : vector<1x1024xf32> to vector<16x1024xf32>
    %5 = arith.addf %2, %4 : vector<16x1024xf32>
    %c0_5 = arith.constant 0 : index
    %c0_6 = arith.constant 0 : index
    %6 = vector.load %arg10[%c0_5, %c0_6] : memref<16x1024xf32, #tpu.memory_space<vmem>>, vector<16x1024xf32>
    tpu.vector_store %arg10[%c0_5, %c0_6], %5 {strides = array<i32>} : memref<16x1024xf32, #tpu.memory_space<vmem>>, vector<16x1024xf32>,
    %cst_7 = arith.constant 0.000000e+00 : f32
    %7 = vector.broadcast %cst_7 : f32 to vector<2x128xf32>
    %c0_8 = arith.constant 0 : index
    %c0_9 = arith.constant 0 : index
    %8 = vector.load %arg10[%c0_8, %c0_9] : memref<16x1024xf32, #tpu.memory_space<vmem>>, vector<2x512xf32>
    %9 = arith.truncf %7 : vector<2x128xf32> to vector<2x128xbf16>
    %c0_10 = arith.constant 0 : index
    %c0_11 = arith.constant 0 : index
    %10 = vector.load %arg3[%c0_10, %c0_11] : memref<128x512xbf16, #tpu.memory_space<vmem>>, vector<128x512xbf16>
    %cst_12 = arith.constant dense<0.000000e+00> : vector<2x512xf32>
    %11 = tpu.matmul %9, %10, %cst_12 {dimension_numbers = #tpu.dot_dimension_numbers<[1], [0], [0], [1], [0, 0, 1, 1], [], []>} : vector<2x128xbf16>, vector<128x512xbf16>, vector<2x512xf32> -> vector<2x512xf32>
    %12 = arith.addf %8, %11 : vector<2x512xf32>
    %c14 = arith.constant 14 : index
    %c512 = arith.constant 512 : index
    %13 = vector.load %arg10[%c14, %c512] : memref<16x1024xf32, #tpu.memory_space<vmem>>, vector<2x512xf32>
    %14 = arith.truncf %7 : vector<2x128xf32> to vector<2x128xbf16>
    %c0_13 = arith.constant 0 : index
    %c0_14 = arith.constant 0 : index
    %15 = vector.load %arg4[%c0_13, %c0_14] : memref<128x512xbf16, #tpu.memory_space<vmem>>, vector<128x512xbf16>
    %cst_15 = arith.constant dense<0.000000e+00> : vector<2x512xf32>
    %16 = tpu.matmul %14, %15, %cst_15 {dimension_numbers = #tpu.dot_dimension_numbers<[1], [0], [0], [1], [0, 0, 1, 1], [], []>} : vector<2x128xbf16>, vector<128x512xbf16>, vector<2x512xf32> -> vector<2x512xf32>
    %17 = arith.addf %13, %16 : vector<2x512xf32>
    %18 = vector.extract_strided_slice %12 {offsets = [0, 0], sizes = [2, 128], strides = [1, 1]} : vector<2x512xf32> to vector<2x128xf32>
    %cst_16 = arith.constant 5.000000e-01 : f32
    %19 = vector.broadcast %cst_16 : f32 to vector<2x128xf32>
    %20 = arith.mulf %19, %18 : vector<2x128xf32>
    %21 = math.tanh %20 : vector<2x128xf32>
    %cst_17 = arith.constant 5.000000e-01 : f32
    %22 = vector.broadcast %cst_17 : f32 to vector<2x128xf32>
    %23 = arith.mulf %22, %21 : vector<2x128xf32>
    %cst_18 = arith.constant 5.000000e-01 : f32
    %24 = vector.broadcast %cst_18 : f32 to vector<2x128xf32>
    %25 = arith.addf %23, %24 : vector<2x128xf32>
    %26 = vector.extract_strided_slice %12 {offsets = [0, 128], sizes = [2, 128], strides = [1, 1]} : vector<2x512xf32> to vector<2x128xf32>
    %cst_19 = arith.constant 5.000000e-01 : f32
    %27 = vector.broadcast %cst_19 : f32 to vector<2x128xf32>
    %28 = arith.mulf %27, %26 : vector<2x128xf32>
    %29 = math.tanh %28 : vector<2x128xf32>
    %cst_20 = arith.constant 5.000000e-01 : f32
    %30 = vector.broadcast %cst_20 : f32 to vector<2x128xf32>
    %31 = arith.mulf %30, %29 : vector<2x128xf32>
    %cst_21 = arith.constant 5.000000e-01 : f32
    %32 = vector.broadcast %cst_21 : f32 to vector<2x128xf32>
    %33 = arith.addf %31, %32 : vector<2x128xf32>
    %34 = vector.extract_strided_slice %12 {offsets = [0, 256], sizes = [2, 128], strides = [1, 1]} : vector<2x512xf32> to vector<2x128xf32>
    %35 = math.tanh %34 : vector<2x128xf32>
    %36 = vector.extract_strided_slice %12 {offsets = [0, 384], sizes = [2, 128], strides = [1, 1]} : vector<2x512xf32> to vector<2x128xf32>
    %cst_22 = arith.constant 5.000000e-01 : f32
    %37 = vector.broadcast %cst_22 : f32 to vector<2x128xf32>
    %38 = arith.mulf %37, %36 : vector<2x128xf32>
    %39 = math.tanh %38 : vector<2x128xf32>
    %cst_23 = arith.constant 5.000000e-01 : f32
    %40 = vector.broadcast %cst_23 : f32 to vector<2x128xf32>
    %41 = arith.mulf %40, %39 : vector<2x128xf32>
    %cst_24 = arith.constant 5.000000e-01 : f32
    %42 = vector.broadcast %cst_24 : f32 to vector<2x128xf32>
    %43 = arith.addf %41, %42 : vector<2x128xf32>
    %44 = arith.mulf %33, %7 : vector<2x128xf32>
    %45 = arith.mulf %25, %35 : vector<2x128xf32>
    %46 = arith.addf %44, %45 : vector<2x128xf32>
    %47 = math.tanh %46 : vector<2x128xf32>
    %48 = arith.mulf %43, %47 : vector<2x128xf32>
    %49 = vector.extract_strided_slice %17 {offsets = [0, 0], sizes = [2, 128], strides = [1, 1]} : vector<2x512xf32> to vector<2x128xf32>
    %cst_25 = arith.constant 5.000000e-01 : f32
    %50 = vector.broadcast %cst_25 : f32 to vector<2x128xf32>
    %51 = arith.mulf %50, %49 : vector<2x128xf32>
    %52 = math.tanh %51 : vector<2x128xf32>
    %cst_26 = arith.constant 5.000000e-01 : f32
    %53 = vector.broadcast %cst_26 : f32 to vector<2x128xf32>
    %54 = arith.mulf %53, %52 : vector<2x128xf32>
    %cst_27 = arith.constant 5.000000e-01 : f32
    %55 = vector.broadcast %cst_27 : f32 to vector<2x128xf32>
    %56 = arith.addf %54, %55 : vector<2x128xf32>
    %57 = vector.extract_strided_slice %17 {offsets = [0, 128], sizes = [2, 128], strides = [1, 1]} : vector<2x512xf32> to vector<2x128xf32>
    %cst_28 = arith.constant 5.000000e-01 : f32
    %58 = vector.broadcast %cst_28 : f32 to vector<2x128xf32>
    %59 = arith.mulf %58, %57 : vector<2x128xf32>
    %60 = math.tanh %59 : vector<2x128xf32>
    %cst_29 = arith.constant 5.000000e-01 : f32
    %61 = vector.broadcast %cst_29 : f32 to vector<2x128xf32>
    %62 = arith.mulf %61, %60 : vector<2x128xf32>
    %cst_30 = arith.constant 5.000000e-01 : f32
    %63 = vector.broadcast %cst_30 : f32 to vector<2x128xf32>
    %64 = arith.addf %62, %63 : vector<2x128xf32>
    %65 = vector.extract_strided_slice %17 {offsets = [0, 256], sizes = [2, 128], strides = [1, 1]} : vector<2x512xf32> to vector<2x128xf32>
    %66 = math.tanh %65 : vector<2x128xf32>
    %67 = vector.extract_strided_slice %17 {offsets = [0, 384], sizes = [2, 128], strides = [1, 1]} : vector<2x512xf32> to vector<2x128xf32>
    %cst_31 = arith.constant 5.000000e-01 : f32
    %68 = vector.broadcast %cst_31 : f32 to vector<2x128xf32>
    %69 = arith.mulf %68, %67 : vector<2x128xf32>
    %70 = math.tanh %69 : vector<2x128xf32>
    %cst_32 = arith.constant 5.000000e-01 : f32
    %71 = vector.broadcast %cst_32 : f32 to vector<2x128xf32>
    %72 = arith.mulf %71, %70 : vector<2x128xf32>
    %cst_33 = arith.constant 5.000000e-01 : f32
    %73 = vector.broadcast %cst_33 : f32 to vector<2x128xf32>
    %74 = arith.addf %72, %73 : vector<2x128xf32>
    %75 = arith.mulf %64, %7 : vector<2x128xf32>
    %76 = arith.mulf %56, %66 : vector<2x128xf32>
    %77 = arith.addf %75, %76 : vector<2x128xf32>
    %78 = math.tanh %77 : vector<2x128xf32>
    %79 = arith.mulf %74, %78 : vector<2x128xf32>
    %c2 = arith.constant 2 : index
    %c0_34 = arith.constant 0 : index
    %80 = vector.load %arg10[%c2, %c0_34] : memref<16x1024xf32, #tpu.memory_space<vmem>>, vector<2x512xf32>
    %81 = arith.truncf %48 : vector<2x128xf32> to vector<2x128xbf16>
    %c0_35 = arith.constant 0 : index
    %c0_36 = arith.constant 0 : index
    %82 = vector.load %arg3[%c0_35, %c0_36] : memref<128x512xbf16, #tpu.memory_space<vmem>>, vector<128x512xbf16>
    %cst_37 = arith.constant dense<0.000000e+00> : vector<2x512xf32>
    %83 = tpu.matmul %81, %82, %cst_37 {dimension_numbers = #tpu.dot_dimension_numbers<[1], [0], [0], [1], [0, 0, 1, 1], [], []>} : vector<2x128xbf16>, vector<128x512xbf16>, vector<2x512xf32> -> vector<2x512xf32>
    %84 = arith.addf %80, %83 : vector<2x512xf32>
    %c12 = arith.constant 12 : index
    %c512_38 = arith.constant 512 : index
    %85 = vector.load %arg10[%c12, %c512_38] : memref<16x1024xf32, #tpu.memory_space<vmem>>, vector<2x512xf32>
    %86 = arith.truncf %79 : vector<2x128xf32> to vector<2x128xbf16>
    %c0_39 = arith.constant 0 : index
    %c0_40 = arith.constant 0 : index
    %87 = vector.load %arg4[%c0_39, %c0_40] : memref<128x512xbf16, #tpu.memory_space<vmem>>, vector<128x512xbf16>
    %cst_41 = arith.constant dense<0.000000e+00> : vector<2x512xf32>
    %88 = tpu.matmul %86, %87, %cst_41 {dimension_numbers = #tpu.dot_dimension_numbers<[1], [0], [0], [1], [0, 0, 1, 1], [], []>} : vector<2x128xbf16>, vector<128x512xbf16>, vector<2x512xf32> -> vector<2x512xf32>
    %89 = arith.addf %85, %88 : vector<2x512xf32>
    %90 = vector.extract_strided_slice %84 {offsets = [0, 0], sizes = [2, 128], strides = [1, 1]} : vector<2x512xf32> to vector<2x128xf32>
    %cst_42 = arith.constant 5.000000e-01 : f32
    %91 = vector.broadcast %cst_42 : f32 to vector<2x128xf32>
    %92 = arith.mulf %91, %90 : vector<2x128xf32>
    %93 = math.tanh %92 : vector<2x128xf32>
    %cst_43 = arith.constant 5.000000e-01 : f32
    %94 = vector.broadcast %cst_43 : f32 to vector<2x128xf32>
    %95 = arith.mulf %94, %93 : vector<2x128xf32>
    %cst_44 = arith.constant 5.000000e-01 : f32
    %96 = vector.broadcast %cst_44 : f32 to vector<2x128xf32>
    %97 = arith.addf %95, %96 : vector<2x128xf32>
    %98 = vector.extract_strided_slice %84 {offsets = [0, 128], sizes = [2, 128], strides = [1, 1]} : vector<2x512xf32> to vector<2x128xf32>
    %cst_45 = arith.constant 5.000000e-01 : f32
    %99 = vector.broadcast %cst_45 : f32 to vector<2x128xf32>
    %100 = arith.mulf %99, %98 : vector<2x128xf32>
    %101 = math.tanh %100 : vector<2x128xf32>
    %cst_46 = arith.constant 5.000000e-01 : f32
    %102 = vector.broadcast %cst_46 : f32 to vector<2x128xf32>
    %103 = arith.mulf %102, %101 : vector<2x128xf32>
    %cst_47 = arith.constant 5.000000e-01 : f32
    %104 = vector.broadcast %cst_47 : f32 to vector<2x128xf32>
    %105 = arith.addf %103, %104 : vector<2x128xf32>
    %106 = vector.extract_strided_slice %84 {offsets = [0, 256], sizes = [2, 128], strides = [1, 1]} : vector<2x512xf32> to vector<2x128xf32>
    %107 = math.tanh %106 : vector<2x128xf32>
    %108 = vector.extract_strided_slice %84 {offsets = [0, 384], sizes = [2, 128], strides = [1, 1]} : vector<2x512xf32> to vector<2x128xf32>
    %cst_48 = arith.constant 5.000000e-01 : f32
    %109 = vector.broadcast %cst_48 : f32 to vector<2x128xf32>
    %110 = arith.mulf %109, %108 : vector<2x128xf32>
    %111 = math.tanh %110 : vector<2x128xf32>
    %cst_49 = arith.constant 5.000000e-01 : f32
    %112 = vector.broadcast %cst_49 : f32 to vector<2x128xf32>
    %113 = arith.mulf %112, %111 : vector<2x128xf32>
    %cst_50 = arith.constant 5.000000e-01 : f32
    %114 = vector.broadcast %cst_50 : f32 to vector<2x128xf32>
    %115 = arith.addf %113, %114 : vector<2x128xf32>
    %116 = arith.mulf %105, %46 : vector<2x128xf32>
    %117 = arith.mulf %97, %107 : vector<2x128xf32>
    %118 = arith.addf %116, %117 : vector<2x128xf32>
    %119 = math.tanh %118 : vector<2x128xf32>
    %120 = arith.mulf %115, %119 : vector<2x128xf32>
    %121 = vector.extract_strided_slice %89 {offsets = [0, 0], sizes = [2, 128], strides = [1, 1]} : vector<2x512xf32> to vector<2x128xf32>
    %cst_51 = arith.constant 5.000000e-01 : f32
    %122 = vector.broadcast %cst_51 : f32 to vector<2x128xf32>
    %123 = arith.mulf %122, %121 : vector<2x128xf32>
    %124 = math.tanh %123 : vector<2x128xf32>
    %cst_52 = arith.constant 5.000000e-01 : f32
    %125 = vector.broadcast %cst_52 : f32 to vector<2x128xf32>
    %126 = arith.mulf %125, %124 : vector<2x128xf32>
    %cst_53 = arith.constant 5.000000e-01 : f32
    %127 = vector.broadcast %cst_53 : f32 to vector<2x128xf32>
    %128 = arith.addf %126, %127 : vector<2x128xf32>
    %129 = vector.extract_strided_slice %89 {offsets = [0, 128], sizes = [2, 128], strides = [1, 1]} : vector<2x512xf32> to vector<2x128xf32>
    %cst_54 = arith.constant 5.000000e-01 : f32
    %130 = vector.broadcast %cst_54 : f32 to vector<2x128xf32>
    %131 = arith.mulf %130, %129 : vector<2x128xf32>
    %132 = math.tanh %131 : vector<2x128xf32>
    %cst_55 = arith.constant 5.000000e-01 : f32
    %133 = vector.broadcast %cst_55 : f32 to vector<2x128xf32>
    %134 = arith.mulf %133, %132 : vector<2x128xf32>
    %cst_56 = arith.constant 5.000000e-01 : f32
    %135 = vector.broadcast %cst_56 : f32 to vector<2x128xf32>
    %136 = arith.addf %134, %135 : vector<2x128xf32>
    %137 = vector.extract_strided_slice %89 {offsets = [0, 256], sizes = [2, 128], strides = [1, 1]} : vector<2x512xf32> to vector<2x128xf32>
    %138 = math.tanh %137 : vector<2x128xf32>
    %139 = vector.extract_strided_slice %89 {offsets = [0, 384], sizes = [2, 128], strides = [1, 1]} : vector<2x512xf32> to vector<2x128xf32>
    %cst_57 = arith.constant 5.000000e-01 : f32
    %140 = vector.broadcast %cst_57 : f32 to vector<2x128xf32>
    %141 = arith.mulf %140, %139 : vector<2x128xf32>
    %142 = math.tanh %141 : vector<2x128xf32>
    %cst_58 = arith.constant 5.000000e-01 : f32
    %143 = vector.broadcast %cst_58 : f32 to vector<2x128xf32>
    %144 = arith.mulf %143, %142 : vector<2x128xf32>
    %cst_59 = arith.constant 5.000000e-01 : f32
    %145 = vector.broadcast %cst_59 : f32 to vector<2x128xf32>
    %146 = arith.addf %144, %145 : vector<2x128xf32>
    %147 = arith.mulf %136, %77 : vector<2x128xf32>
    %148 = arith.mulf %128, %138 : vector<2x128xf32>
    %149 = arith.addf %147, %148 : vector<2x128xf32>
    %150 = math.tanh %149 : vector<2x128xf32>
    %151 = arith.mulf %146, %150 : vector<2x128xf32>
    %c4 = arith.constant 4 : index
    %c0_60 = arith.constant 0 : index
    %152 = vector.load %arg10[%c4, %c0_60] : memref<16x1024xf32, #tpu.memory_space<vmem>>, vector<2x512xf32>
    %153 = arith.truncf %120 : vector<2x128xf32> to vector<2x128xbf16>
    %c0_61 = arith.constant 0 : index
    %c0_62 = arith.constant 0 : index
    %154 = vector.load %arg3[%c0_61, %c0_62] : memref<128x512xbf16, #tpu.memory_space<vmem>>, vector<128x512xbf16>
    %cst_63 = arith.constant dense<0.000000e+00> : vector<2x512xf32>
    %155 = tpu.matmul %153, %154, %cst_63 {dimension_numbers = #tpu.dot_dimension_numbers<[1], [0], [0], [1], [0, 0, 1, 1], [], []>} : vector<2x128xbf16>, vector<128x512xbf16>, vector<2x512xf32> -> vector<2x512xf32>
    %156 = arith.addf %152, %155 : vector<2x512xf32>
    %c10 = arith.constant 10 : index
    %c512_64 = arith.constant 512 : index
    %157 = vector.load %arg10[%c10, %c512_64] : memref<16x1024xf32, #tpu.memory_space<vmem>>, vector<2x512xf32>
    %158 = arith.truncf %151 : vector<2x128xf32> to vector<2x128xbf16>
    %c0_65 = arith.constant 0 : index
    %c0_66 = arith.constant 0 : index
    %159 = vector.load %arg4[%c0_65, %c0_66] : memref<128x512xbf16, #tpu.memory_space<vmem>>, vector<128x512xbf16>
    %cst_67 = arith.constant dense<0.000000e+00> : vector<2x512xf32>
    %160 = tpu.matmul %158, %159, %cst_67 {dimension_numbers = #tpu.dot_dimension_numbers<[1], [0], [0], [1], [0, 0, 1, 1], [], []>} : vector<2x128xbf16>, vector<128x512xbf16>, vector<2x512xf32> -> vector<2x512xf32>
    %161 = arith.addf %157, %160 : vector<2x512xf32>
    %162 = vector.extract_strided_slice %156 {offsets = [0, 0], sizes = [2, 128], strides = [1, 1]} : vector<2x512xf32> to vector<2x128xf32>
    %cst_68 = arith.constant 5.000000e-01 : f32
    %163 = vector.broadcast %cst_68 : f32 to vector<2x128xf32>
    %164 = arith.mulf %163, %162 : vector<2x128xf32>
    %165 = math.tanh %164 : vector<2x128xf32>
    %cst_69 = arith.constant 5.000000e-01 : f32
    %166 = vector.broadcast %cst_69 : f32 to vector<2x128xf32>
    %167 = arith.mulf %166, %165 : vector<2x128xf32>
    %cst_70 = arith.constant 5.000000e-01 : f32
    %168 = vector.broadcast %cst_70 : f32 to vector<2x128xf32>
    %169 = arith.addf %167, %168 : vector<2x128xf32>
    %170 = vector.extract_strided_slice %156 {offsets = [0, 128], sizes = [2, 128], strides = [1, 1]} : vector<2x512xf32> to vector<2x128xf32>
    %cst_71 = arith.constant 5.000000e-01 : f32
    %171 = vector.broadcast %cst_71 : f32 to vector<2x128xf32>
    %172 = arith.mulf %171, %170 : vector<2x128xf32>
    %173 = math.tanh %172 : vector<2x128xf32>
    %cst_72 = arith.constant 5.000000e-01 : f32
    %174 = vector.broadcast %cst_72 : f32 to vector<2x128xf32>
    %175 = arith.mulf %174, %173 : vector<2x128xf32>
    %cst_73 = arith.constant 5.000000e-01 : f32
    %176 = vector.broadcast %cst_73 : f32 to vector<2x128xf32>
    %177 = arith.addf %175, %176 : vector<2x128xf32>
    %178 = vector.extract_strided_slice %156 {offsets = [0, 256], sizes = [2, 128], strides = [1, 1]} : vector<2x512xf32> to vector<2x128xf32>
    %179 = math.tanh %178 : vector<2x128xf32>
    %180 = vector.extract_strided_slice %156 {offsets = [0, 384], sizes = [2, 128], strides = [1, 1]} : vector<2x512xf32> to vector<2x128xf32>
    %cst_74 = arith.constant 5.000000e-01 : f32
    %181 = vector.broadcast %cst_74 : f32 to vector<2x128xf32>
    %182 = arith.mulf %181, %180 : vector<2x128xf32>
    %183 = math.tanh %182 : vector<2x128xf32>
    %cst_75 = arith.constant 5.000000e-01 : f32
    %184 = vector.broadcast %cst_75 : f32 to vector<2x128xf32>
    %185 = arith.mulf %184, %183 : vector<2x128xf32>
    %cst_76 = arith.constant 5.000000e-01 : f32
    %186 = vector.broadcast %cst_76 : f32 to vector<2x128xf32>
    %187 = arith.addf %185, %186 : vector<2x128xf32>
    %188 = arith.mulf %177, %118 : vector<2x128xf32>
    %189 = arith.mulf %169, %179 : vector<2x128xf32>
    %190 = arith.addf %188, %189 : vector<2x128xf32>
    %191 = math.tanh %190 : vector<2x128xf32>
    %192 = arith.mulf %187, %191 : vector<2x128xf32>
    %193 = vector.extract_strided_slice %161 {offsets = [0, 0], sizes = [2, 128], strides = [1, 1]} : vector<2x512xf32> to vector<2x128xf32>
    %cst_77 = arith.constant 5.000000e-01 : f32
    %194 = vector.broadcast %cst_77 : f32 to vector<2x128xf32>
    %195 = arith.mulf %194, %193 : vector<2x128xf32>
    %196 = math.tanh %195 : vector<2x128xf32>
    %cst_78 = arith.constant 5.000000e-01 : f32
    %197 = vector.broadcast %cst_78 : f32 to vector<2x128xf32>
    %198 = arith.mulf %197, %196 : vector<2x128xf32>
    %cst_79 = arith.constant 5.000000e-01 : f32
    %199 = vector.broadcast %cst_79 : f32 to vector<2x128xf32>
    %200 = arith.addf %198, %199 : vector<2x128xf32>
    %201 = vector.extract_strided_slice %161 {offsets = [0, 128], sizes = [2, 128], strides = [1, 1]} : vector<2x512xf32> to vector<2x128xf32>
    %cst_80 = arith.constant 5.000000e-01 : f32
    %202 = vector.broadcast %cst_80 : f32 to vector<2x128xf32>
    %203 = arith.mulf %202, %201 : vector<2x128xf32>
    %204 = math.tanh %203 : vector<2x128xf32>
    %cst_81 = arith.constant 5.000000e-01 : f32
    %205 = vector.broadcast %cst_81 : f32 to vector<2x128xf32>
    %206 = arith.mulf %205, %204 : vector<2x128xf32>
    %cst_82 = arith.constant 5.000000e-01 : f32
    %207 = vector.broadcast %cst_82 : f32 to vector<2x128xf32>
    %208 = arith.addf %206, %207 : vector<2x128xf32>
    %209 = vector.extract_strided_slice %161 {offsets = [0, 256], sizes = [2, 128], strides = [1, 1]} : vector<2x512xf32> to vector<2x128xf32>
    %210 = math.tanh %209 : vector<2x128xf32>
    %211 = vector.extract_strided_slice %161 {offsets = [0, 384], sizes = [2, 128], strides = [1, 1]} : vector<2x512xf32> to vector<2x128xf32>
    %cst_83 = arith.constant 5.000000e-01 : f32
    %212 = vector.broadcast %cst_83 : f32 to vector<2x128xf32>
    %213 = arith.mulf %212, %211 : vector<2x128xf32>
    %214 = math.tanh %213 : vector<2x128xf32>
    %cst_84 = arith.constant 5.000000e-01 : f32
    %215 = vector.broadcast %cst_84 : f32 to vector<2x128xf32>
    %216 = arith.mulf %215, %214 : vector<2x128xf32>
    %cst_85 = arith.constant 5.000000e-01 : f32
    %217 = vector.broadcast %cst_85 : f32 to vector<2x128xf32>
    %218 = arith.addf %216, %217 : vector<2x128xf32>
    %219 = arith.mulf %208, %149 : vector<2x128xf32>
    %220 = arith.mulf %200, %210 : vector<2x128xf32>
    %221 = arith.addf %219, %220 : vector<2x128xf32>
    %222 = math.tanh %221 : vector<2x128xf32>
    %223 = arith.mulf %218, %222 : vector<2x128xf32>
    %c6 = arith.constant 6 : index
    %c0_86 = arith.constant 0 : index
    %224 = vector.load %arg10[%c6, %c0_86] : memref<16x1024xf32, #tpu.memory_space<vmem>>, vector<2x512xf32>
    %225 = arith.truncf %192 : vector<2x128xf32> to vector<2x128xbf16>
    %c0_87 = arith.constant 0 : index
    %c0_88 = arith.constant 0 : index
    %226 = vector.load %arg3[%c0_87, %c0_88] : memref<128x512xbf16, #tpu.memory_space<vmem>>, vector<128x512xbf16>
    %cst_89 = arith.constant dense<0.000000e+00> : vector<2x512xf32>
    %227 = tpu.matmul %225, %226, %cst_89 {dimension_numbers = #tpu.dot_dimension_numbers<[1], [0], [0], [1], [0, 0, 1, 1], [], []>} : vector<2x128xbf16>, vector<128x512xbf16>, vector<2x512xf32> -> vector<2x512xf32>
    %228 = arith.addf %224, %227 : vector<2x512xf32>
    %c8 = arith.constant 8 : index
    %c512_90 = arith.constant 512 : index
    %229 = vector.load %arg10[%c8, %c512_90] : memref<16x1024xf32, #tpu.memory_space<vmem>>, vector<2x512xf32>
    %230 = arith.truncf %223 : vector<2x128xf32> to vector<2x128xbf16>
    %c0_91 = arith.constant 0 : index
    %c0_92 = arith.constant 0 : index
    %231 = vector.load %arg4[%c0_91, %c0_92] : memref<128x512xbf16, #tpu.memory_space<vmem>>, vector<128x512xbf16>
    %cst_93 = arith.constant dense<0.000000e+00> : vector<2x512xf32>
    %232 = tpu.matmul %230, %231, %cst_93 {dimension_numbers = #tpu.dot_dimension_numbers<[1], [0], [0], [1], [0, 0, 1, 1], [], []>} : vector<2x128xbf16>, vector<128x512xbf16>, vector<2x512xf32> -> vector<2x512xf32>
    %233 = arith.addf %229, %232 : vector<2x512xf32>
    %234 = vector.extract_strided_slice %228 {offsets = [0, 0], sizes = [2, 128], strides = [1, 1]} : vector<2x512xf32> to vector<2x128xf32>
    %cst_94 = arith.constant 5.000000e-01 : f32
    %235 = vector.broadcast %cst_94 : f32 to vector<2x128xf32>
    %236 = arith.mulf %235, %234 : vector<2x128xf32>
    %237 = math.tanh %236 : vector<2x128xf32>
    %cst_95 = arith.constant 5.000000e-01 : f32
    %238 = vector.broadcast %cst_95 : f32 to vector<2x128xf32>
    %239 = arith.mulf %238, %237 : vector<2x128xf32>
    %cst_96 = arith.constant 5.000000e-01 : f32
    %240 = vector.broadcast %cst_96 : f32 to vector<2x128xf32>
    %241 = arith.addf %239, %240 : vector<2x128xf32>
    %242 = vector.extract_strided_slice %228 {offsets = [0, 128], sizes = [2, 128], strides = [1, 1]} : vector<2x512xf32> to vector<2x128xf32>
    %cst_97 = arith.constant 5.000000e-01 : f32
    %243 = vector.broadcast %cst_97 : f32 to vector<2x128xf32>
    %244 = arith.mulf %243, %242 : vector<2x128xf32>
    %245 = math.tanh %244 : vector<2x128xf32>
    %cst_98 = arith.constant 5.000000e-01 : f32
    %246 = vector.broadcast %cst_98 : f32 to vector<2x128xf32>
    %247 = arith.mulf %246, %245 : vector<2x128xf32>
    %cst_99 = arith.constant 5.000000e-01 : f32
    %248 = vector.broadcast %cst_99 : f32 to vector<2x128xf32>
    %249 = arith.addf %247, %248 : vector<2x128xf32>
    %250 = vector.extract_strided_slice %228 {offsets = [0, 256], sizes = [2, 128], strides = [1, 1]} : vector<2x512xf32> to vector<2x128xf32>
    %251 = math.tanh %250 : vector<2x128xf32>
    %252 = vector.extract_strided_slice %228 {offsets = [0, 384], sizes = [2, 128], strides = [1, 1]} : vector<2x512xf32> to vector<2x128xf32>
    %cst_100 = arith.constant 5.000000e-01 : f32
    %253 = vector.broadcast %cst_100 : f32 to vector<2x128xf32>
    %254 = arith.mulf %253, %252 : vector<2x128xf32>
    %255 = math.tanh %254 : vector<2x128xf32>
    %cst_101 = arith.constant 5.000000e-01 : f32
    %256 = vector.broadcast %cst_101 : f32 to vector<2x128xf32>
    %257 = arith.mulf %256, %255 : vector<2x128xf32>
    %cst_102 = arith.constant 5.000000e-01 : f32
    %258 = vector.broadcast %cst_102 : f32 to vector<2x128xf32>
    %259 = arith.addf %257, %258 : vector<2x128xf32>
    %260 = arith.mulf %249, %190 : vector<2x128xf32>
    %261 = arith.mulf %241, %251 : vector<2x128xf32>
    %262 = arith.addf %260, %261 : vector<2x128xf32>
    %263 = math.tanh %262 : vector<2x128xf32>
    %264 = arith.mulf %259, %263 : vector<2x128xf32>
    %265 = vector.extract_strided_slice %233 {offsets = [0, 0], sizes = [2, 128], strides = [1, 1]} : vector<2x512xf32> to vector<2x128xf32>
    %cst_103 = arith.constant 5.000000e-01 : f32
    %266 = vector.broadcast %cst_103 : f32 to vector<2x128xf32>
    %267 = arith.mulf %266, %265 : vector<2x128xf32>
    %268 = math.tanh %267 : vector<2x128xf32>
    %cst_104 = arith.constant 5.000000e-01 : f32
    %269 = vector.broadcast %cst_104 : f32 to vector<2x128xf32>
    %270 = arith.mulf %269, %268 : vector<2x128xf32>
    %cst_105 = arith.constant 5.000000e-01 : f32
    %271 = vector.broadcast %cst_105 : f32 to vector<2x128xf32>
    %272 = arith.addf %270, %271 : vector<2x128xf32>
    %273 = vector.extract_strided_slice %233 {offsets = [0, 128], sizes = [2, 128], strides = [1, 1]} : vector<2x512xf32> to vector<2x128xf32>
    %cst_106 = arith.constant 5.000000e-01 : f32
    %274 = vector.broadcast %cst_106 : f32 to vector<2x128xf32>
    %275 = arith.mulf %274, %273 : vector<2x128xf32>
    %276 = math.tanh %275 : vector<2x128xf32>
    %cst_107 = arith.constant 5.000000e-01 : f32
    %277 = vector.broadcast %cst_107 : f32 to vector<2x128xf32>
    %278 = arith.mulf %277, %276 : vector<2x128xf32>
    %cst_108 = arith.constant 5.000000e-01 : f32
    %279 = vector.broadcast %cst_108 : f32 to vector<2x128xf32>
    %280 = arith.addf %278, %279 : vector<2x128xf32>
    %281 = vector.extract_strided_slice %233 {offsets = [0, 256], sizes = [2, 128], strides = [1, 1]} : vector<2x512xf32> to vector<2x128xf32>
    %282 = math.tanh %281 : vector<2x128xf32>
    %283 = vector.extract_strided_slice %233 {offsets = [0, 384], sizes = [2, 128], strides = [1, 1]} : vector<2x512xf32> to vector<2x128xf32>
    %cst_109 = arith.constant 5.000000e-01 : f32
    %284 = vector.broadcast %cst_109 : f32 to vector<2x128xf32>
    %285 = arith.mulf %284, %283 : vector<2x128xf32>
    %286 = math.tanh %285 : vector<2x128xf32>
    %cst_110 = arith.constant 5.000000e-01 : f32
    %287 = vector.broadcast %cst_110 : f32 to vector<2x128xf32>
    %288 = arith.mulf %287, %286 : vector<2x128xf32>
    %cst_111 = arith.constant 5.000000e-01 : f32
    %289 = vector.broadcast %cst_111 : f32 to vector<2x128xf32>
    %290 = arith.addf %288, %289 : vector<2x128xf32>
    %291 = arith.mulf %280, %221 : vector<2x128xf32>
    %292 = arith.mulf %272, %282 : vector<2x128xf32>
    %293 = arith.addf %291, %292 : vector<2x128xf32>
    %294 = math.tanh %293 : vector<2x128xf32>
    %295 = arith.mulf %290, %294 : vector<2x128xf32>
    %c8_112 = arith.constant 8 : index
    %c0_113 = arith.constant 0 : index
    %296 = vector.load %arg10[%c8_112, %c0_113] : memref<16x1024xf32, #tpu.memory_space<vmem>>, vector<2x512xf32>
    %297 = arith.truncf %264 : vector<2x128xf32> to vector<2x128xbf16>
    %c0_114 = arith.constant 0 : index
    %c0_115 = arith.constant 0 : index
    %298 = vector.load %arg3[%c0_114, %c0_115] : memref<128x512xbf16, #tpu.memory_space<vmem>>, vector<128x512xbf16>
    %cst_116 = arith.constant dense<0.000000e+00> : vector<2x512xf32>
    %299 = tpu.matmul %297, %298, %cst_116 {dimension_numbers = #tpu.dot_dimension_numbers<[1], [0], [0], [1], [0, 0, 1, 1], [], []>} : vector<2x128xbf16>, vector<128x512xbf16>, vector<2x512xf32> -> vector<2x512xf32>
    %300 = arith.addf %296, %299 : vector<2x512xf32>
    %c6_117 = arith.constant 6 : index
    %c512_118 = arith.constant 512 : index
    %301 = vector.load %arg10[%c6_117, %c512_118] : memref<16x1024xf32, #tpu.memory_space<vmem>>, vector<2x512xf32>
    %302 = arith.truncf %295 : vector<2x128xf32> to vector<2x128xbf16>
    %c0_119 = arith.constant 0 : index
    %c0_120 = arith.constant 0 : index
    %303 = vector.load %arg4[%c0_119, %c0_120] : memref<128x512xbf16, #tpu.memory_space<vmem>>, vector<128x512xbf16>
    %cst_121 = arith.constant dense<0.000000e+00> : vector<2x512xf32>
    %304 = tpu.matmul %302, %303, %cst_121 {dimension_numbers = #tpu.dot_dimension_numbers<[1], [0], [0], [1], [0, 0, 1, 1], [], []>} : vector<2x128xbf16>, vector<128x512xbf16>, vector<2x512xf32> -> vector<2x512xf32>
    %305 = arith.addf %301, %304 : vector<2x512xf32>
    %306 = vector.extract_strided_slice %300 {offsets = [0, 0], sizes = [2, 128], strides = [1, 1]} : vector<2x512xf32> to vector<2x128xf32>
    %cst_122 = arith.constant 5.000000e-01 : f32
    %307 = vector.broadcast %cst_122 : f32 to vector<2x128xf32>
    %308 = arith.mulf %307, %306 : vector<2x128xf32>
    %309 = math.tanh %308 : vector<2x128xf32>
    %cst_123 = arith.constant 5.000000e-01 : f32
    %310 = vector.broadcast %cst_123 : f32 to vector<2x128xf32>
    %311 = arith.mulf %310, %309 : vector<2x128xf32>
    %cst_124 = arith.constant 5.000000e-01 : f32
    %312 = vector.broadcast %cst_124 : f32 to vector<2x128xf32>
    %313 = arith.addf %311, %312 : vector<2x128xf32>
    %314 = vector.extract_strided_slice %300 {offsets = [0, 128], sizes = [2, 128], strides = [1, 1]} : vector<2x512xf32> to vector<2x128xf32>
    %cst_125 = arith.constant 5.000000e-01 : f32
    %315 = vector.broadcast %cst_125 : f32 to vector<2x128xf32>
    %316 = arith.mulf %315, %314 : vector<2x128xf32>
    %317 = math.tanh %316 : vector<2x128xf32>
    %cst_126 = arith.constant 5.000000e-01 : f32
    %318 = vector.broadcast %cst_126 : f32 to vector<2x128xf32>
    %319 = arith.mulf %318, %317 : vector<2x128xf32>
    %cst_127 = arith.constant 5.000000e-01 : f32
    %320 = vector.broadcast %cst_127 : f32 to vector<2x128xf32>
    %321 = arith.addf %319, %320 : vector<2x128xf32>
    %322 = vector.extract_strided_slice %300 {offsets = [0, 256], sizes = [2, 128], strides = [1, 1]} : vector<2x512xf32> to vector<2x128xf32>
    %323 = math.tanh %322 : vector<2x128xf32>
    %324 = vector.extract_strided_slice %300 {offsets = [0, 384], sizes = [2, 128], strides = [1, 1]} : vector<2x512xf32> to vector<2x128xf32>
    %cst_128 = arith.constant 5.000000e-01 : f32
    %325 = vector.broadcast %cst_128 : f32 to vector<2x128xf32>
    %326 = arith.mulf %325, %324 : vector<2x128xf32>
    %327 = math.tanh %326 : vector<2x128xf32>
    %cst_129 = arith.constant 5.000000e-01 : f32
    %328 = vector.broadcast %cst_129 : f32 to vector<2x128xf32>
    %329 = arith.mulf %328, %327 : vector<2x128xf32>
    %cst_130 = arith.constant 5.000000e-01 : f32
    %330 = vector.broadcast %cst_130 : f32 to vector<2x128xf32>
    %331 = arith.addf %329, %330 : vector<2x128xf32>
    %332 = arith.mulf %321, %262 : vector<2x128xf32>
    %333 = arith.mulf %313, %323 : vector<2x128xf32>
    %334 = arith.addf %332, %333 : vector<2x128xf32>
    %335 = math.tanh %334 : vector<2x128xf32>
    %336 = arith.mulf %331, %335 : vector<2x128xf32>
    %337 = vector.extract_strided_slice %305 {offsets = [0, 0], sizes = [2, 128], strides = [1, 1]} : vector<2x512xf32> to vector<2x128xf32>
    %cst_131 = arith.constant 5.000000e-01 : f32
    %338 = vector.broadcast %cst_131 : f32 to vector<2x128xf32>
    %339 = arith.mulf %338, %337 : vector<2x128xf32>
    %340 = math.tanh %339 : vector<2x128xf32>
    %cst_132 = arith.constant 5.000000e-01 : f32
    %341 = vector.broadcast %cst_132 : f32 to vector<2x128xf32>
    %342 = arith.mulf %341, %340 : vector<2x128xf32>
    %cst_133 = arith.constant 5.000000e-01 : f32
    %343 = vector.broadcast %cst_133 : f32 to vector<2x128xf32>
    %344 = arith.addf %342, %343 : vector<2x128xf32>
    %345 = vector.extract_strided_slice %305 {offsets = [0, 128], sizes = [2, 128], strides = [1, 1]} : vector<2x512xf32> to vector<2x128xf32>
    %cst_134 = arith.constant 5.000000e-01 : f32
    %346 = vector.broadcast %cst_134 : f32 to vector<2x128xf32>
    %347 = arith.mulf %346, %345 : vector<2x128xf32>
    %348 = math.tanh %347 : vector<2x128xf32>
    %cst_135 = arith.constant 5.000000e-01 : f32
    %349 = vector.broadcast %cst_135 : f32 to vector<2x128xf32>
    %350 = arith.mulf %349, %348 : vector<2x128xf32>
    %cst_136 = arith.constant 5.000000e-01 : f32
    %351 = vector.broadcast %cst_136 : f32 to vector<2x128xf32>
    %352 = arith.addf %350, %351 : vector<2x128xf32>
    %353 = vector.extract_strided_slice %305 {offsets = [0, 256], sizes = [2, 128], strides = [1, 1]} : vector<2x512xf32> to vector<2x128xf32>
    %354 = math.tanh %353 : vector<2x128xf32>
    %355 = vector.extract_strided_slice %305 {offsets = [0, 384], sizes = [2, 128], strides = [1, 1]} : vector<2x512xf32> to vector<2x128xf32>
    %cst_137 = arith.constant 5.000000e-01 : f32
    %356 = vector.broadcast %cst_137 : f32 to vector<2x128xf32>
    %357 = arith.mulf %356, %355 : vector<2x128xf32>
    %358 = math.tanh %357 : vector<2x128xf32>
    %cst_138 = arith.constant 5.000000e-01 : f32
    %359 = vector.broadcast %cst_138 : f32 to vector<2x128xf32>
    %360 = arith.mulf %359, %358 : vector<2x128xf32>
    %cst_139 = arith.constant 5.000000e-01 : f32
    %361 = vector.broadcast %cst_139 : f32 to vector<2x128xf32>
    %362 = arith.addf %360, %361 : vector<2x128xf32>
    %363 = arith.mulf %352, %293 : vector<2x128xf32>
    %364 = arith.mulf %344, %354 : vector<2x128xf32>
    %365 = arith.addf %363, %364 : vector<2x128xf32>
    %366 = math.tanh %365 : vector<2x128xf32>
    %367 = arith.mulf %362, %366 : vector<2x128xf32>
    %c10_140 = arith.constant 10 : index
    %c0_141 = arith.constant 0 : index
    %368 = vector.load %arg10[%c10_140, %c0_141] : memref<16x1024xf32, #tpu.memory_space<vmem>>, vector<2x512xf32>
    %369 = arith.truncf %336 : vector<2x128xf32> to vector<2x128xbf16>
    %c0_142 = arith.constant 0 : index
    %c0_143 = arith.constant 0 : index
    %370 = vector.load %arg3[%c0_142, %c0_143] : memref<128x512xbf16, #tpu.memory_space<vmem>>, vector<128x512xbf16>
    %cst_144 = arith.constant dense<0.000000e+00> : vector<2x512xf32>
    %371 = tpu.matmul %369, %370, %cst_144 {dimension_numbers = #tpu.dot_dimension_numbers<[1], [0], [0], [1], [0, 0, 1, 1], [], []>} : vector<2x128xbf16>, vector<128x512xbf16>, vector<2x512xf32> -> vector<2x512xf32>
    %372 = arith.addf %368, %371 : vector<2x512xf32>
    %c4_145 = arith.constant 4 : index
    %c512_146 = arith.constant 512 : index
    %373 = vector.load %arg10[%c4_145, %c512_146] : memref<16x1024xf32, #tpu.memory_space<vmem>>, vector<2x512xf32>
    %374 = arith.truncf %367 : vector<2x128xf32> to vector<2x128xbf16>
    %c0_147 = arith.constant 0 : index
    %c0_148 = arith.constant 0 : index
    %375 = vector.load %arg4[%c0_147, %c0_148] : memref<128x512xbf16, #tpu.memory_space<vmem>>, vector<128x512xbf16>
    %cst_149 = arith.constant dense<0.000000e+00> : vector<2x512xf32>
    %376 = tpu.matmul %374, %375, %cst_149 {dimension_numbers = #tpu.dot_dimension_numbers<[1], [0], [0], [1], [0, 0, 1, 1], [], []>} : vector<2x128xbf16>, vector<128x512xbf16>, vector<2x512xf32> -> vector<2x512xf32>
    %377 = arith.addf %373, %376 : vector<2x512xf32>
    %378 = vector.extract_strided_slice %372 {offsets = [0, 0], sizes = [2, 128], strides = [1, 1]} : vector<2x512xf32> to vector<2x128xf32>
    %cst_150 = arith.constant 5.000000e-01 : f32
    %379 = vector.broadcast %cst_150 : f32 to vector<2x128xf32>
    %380 = arith.mulf %379, %378 : vector<2x128xf32>
    %381 = math.tanh %380 : vector<2x128xf32>
    %cst_151 = arith.constant 5.000000e-01 : f32
    %382 = vector.broadcast %cst_151 : f32 to vector<2x128xf32>
    %383 = arith.mulf %382, %381 : vector<2x128xf32>
    %cst_152 = arith.constant 5.000000e-01 : f32
    %384 = vector.broadcast %cst_152 : f32 to vector<2x128xf32>
    %385 = arith.addf %383, %384 : vector<2x128xf32>
    %386 = vector.extract_strided_slice %372 {offsets = [0, 128], sizes = [2, 128], strides = [1, 1]} : vector<2x512xf32> to vector<2x128xf32>
    %cst_153 = arith.constant 5.000000e-01 : f32
    %387 = vector.broadcast %cst_153 : f32 to vector<2x128xf32>
    %388 = arith.mulf %387, %386 : vector<2x128xf32>
    %389 = math.tanh %388 : vector<2x128xf32>
    %cst_154 = arith.constant 5.000000e-01 : f32
    %390 = vector.broadcast %cst_154 : f32 to vector<2x128xf32>
    %391 = arith.mulf %390, %389 : vector<2x128xf32>
    %cst_155 = arith.constant 5.000000e-01 : f32
    %392 = vector.broadcast %cst_155 : f32 to vector<2x128xf32>
    %393 = arith.addf %391, %392 : vector<2x128xf32>
    %394 = vector.extract_strided_slice %372 {offsets = [0, 256], sizes = [2, 128], strides = [1, 1]} : vector<2x512xf32> to vector<2x128xf32>
    %395 = math.tanh %394 : vector<2x128xf32>
    %396 = vector.extract_strided_slice %372 {offsets = [0, 384], sizes = [2, 128], strides = [1, 1]} : vector<2x512xf32> to vector<2x128xf32>
    %cst_156 = arith.constant 5.000000e-01 : f32
    %397 = vector.broadcast %cst_156 : f32 to vector<2x128xf32>
    %398 = arith.mulf %397, %396 : vector<2x128xf32>
    %399 = math.tanh %398 : vector<2x128xf32>
    %cst_157 = arith.constant 5.000000e-01 : f32
    %400 = vector.broadcast %cst_157 : f32 to vector<2x128xf32>
    %401 = arith.mulf %400, %399 : vector<2x128xf32>
    %cst_158 = arith.constant 5.000000e-01 : f32
    %402 = vector.broadcast %cst_158 : f32 to vector<2x128xf32>
    %403 = arith.addf %401, %402 : vector<2x128xf32>
    %404 = arith.mulf %393, %334 : vector<2x128xf32>
    %405 = arith.mulf %385, %395 : vector<2x128xf32>
    %406 = arith.addf %404, %405 : vector<2x128xf32>
    %407 = math.tanh %406 : vector<2x128xf32>
    %408 = arith.mulf %403, %407 : vector<2x128xf32>
    %409 = vector.extract_strided_slice %377 {offsets = [0, 0], sizes = [2, 128], strides = [1, 1]} : vector<2x512xf32> to vector<2x128xf32>
    %cst_159 = arith.constant 5.000000e-01 : f32
    %410 = vector.broadcast %cst_159 : f32 to vector<2x128xf32>
    %411 = arith.mulf %410, %409 : vector<2x128xf32>
    %412 = math.tanh %411 : vector<2x128xf32>
    %cst_160 = arith.constant 5.000000e-01 : f32
    %413 = vector.broadcast %cst_160 : f32 to vector<2x128xf32>
    %414 = arith.mulf %413, %412 : vector<2x128xf32>
    %cst_161 = arith.constant 5.000000e-01 : f32
    %415 = vector.broadcast %cst_161 : f32 to vector<2x128xf32>
    %416 = arith.addf %414, %415 : vector<2x128xf32>
    %417 = vector.extract_strided_slice %377 {offsets = [0, 128], sizes = [2, 128], strides = [1, 1]} : vector<2x512xf32> to vector<2x128xf32>
    %cst_162 = arith.constant 5.000000e-01 : f32
    %418 = vector.broadcast %cst_162 : f32 to vector<2x128xf32>
    %419 = arith.mulf %418, %417 : vector<2x128xf32>
    %420 = math.tanh %419 : vector<2x128xf32>
    %cst_163 = arith.constant 5.000000e-01 : f32
    %421 = vector.broadcast %cst_163 : f32 to vector<2x128xf32>
    %422 = arith.mulf %421, %420 : vector<2x128xf32>
    %cst_164 = arith.constant 5.000000e-01 : f32
    %423 = vector.broadcast %cst_164 : f32 to vector<2x128xf32>
    %424 = arith.addf %422, %423 : vector<2x128xf32>
    %425 = vector.extract_strided_slice %377 {offsets = [0, 256], sizes = [2, 128], strides = [1, 1]} : vector<2x512xf32> to vector<2x128xf32>
    %426 = math.tanh %425 : vector<2x128xf32>
    %427 = vector.extract_strided_slice %377 {offsets = [0, 384], sizes = [2, 128], strides = [1, 1]} : vector<2x512xf32> to vector<2x128xf32>
    %cst_165 = arith.constant 5.000000e-01 : f32
    %428 = vector.broadcast %cst_165 : f32 to vector<2x128xf32>
    %429 = arith.mulf %428, %427 : vector<2x128xf32>
    %430 = math.tanh %429 : vector<2x128xf32>
    %cst_166 = arith.constant 5.000000e-01 : f32
    %431 = vector.broadcast %cst_166 : f32 to vector<2x128xf32>
    %432 = arith.mulf %431, %430 : vector<2x128xf32>
    %cst_167 = arith.constant 5.000000e-01 : f32
    %433 = vector.broadcast %cst_167 : f32 to vector<2x128xf32>
    %434 = arith.addf %432, %433 : vector<2x128xf32>
    %435 = arith.mulf %424, %365 : vector<2x128xf32>
    %436 = arith.mulf %416, %426 : vector<2x128xf32>
    %437 = arith.addf %435, %436 : vector<2x128xf32>
    %438 = math.tanh %437 : vector<2x128xf32>
    %439 = arith.mulf %434, %438 : vector<2x128xf32>
    %c12_168 = arith.constant 12 : index
    %c0_169 = arith.constant 0 : index
    %440 = vector.load %arg10[%c12_168, %c0_169] : memref<16x1024xf32, #tpu.memory_space<vmem>>, vector<2x512xf32>
    %441 = arith.truncf %408 : vector<2x128xf32> to vector<2x128xbf16>
    %c0_170 = arith.constant 0 : index
    %c0_171 = arith.constant 0 : index
    %442 = vector.load %arg3[%c0_170, %c0_171] : memref<128x512xbf16, #tpu.memory_space<vmem>>, vector<128x512xbf16>
    %cst_172 = arith.constant dense<0.000000e+00> : vector<2x512xf32>
    %443 = tpu.matmul %441, %442, %cst_172 {dimension_numbers = #tpu.dot_dimension_numbers<[1], [0], [0], [1], [0, 0, 1, 1], [], []>} : vector<2x128xbf16>, vector<128x512xbf16>, vector<2x512xf32> -> vector<2x512xf32>
    %444 = arith.addf %440, %443 : vector<2x512xf32>
    %c2_173 = arith.constant 2 : index
    %c512_174 = arith.constant 512 : index
    %445 = vector.load %arg10[%c2_173, %c512_174] : memref<16x1024xf32, #tpu.memory_space<vmem>>, vector<2x512xf32>
    %446 = arith.truncf %439 : vector<2x128xf32> to vector<2x128xbf16>
    %c0_175 = arith.constant 0 : index
    %c0_176 = arith.constant 0 : index
    %447 = vector.load %arg4[%c0_175, %c0_176] : memref<128x512xbf16, #tpu.memory_space<vmem>>, vector<128x512xbf16>
    %cst_177 = arith.constant dense<0.000000e+00> : vector<2x512xf32>
    %448 = tpu.matmul %446, %447, %cst_177 {dimension_numbers = #tpu.dot_dimension_numbers<[1], [0], [0], [1], [0, 0, 1, 1], [], []>} : vector<2x128xbf16>, vector<128x512xbf16>, vector<2x512xf32> -> vector<2x512xf32>
    %449 = arith.addf %445, %448 : vector<2x512xf32>
    %450 = vector.extract_strided_slice %444 {offsets = [0, 0], sizes = [2, 128], strides = [1, 1]} : vector<2x512xf32> to vector<2x128xf32>
    %cst_178 = arith.constant 5.000000e-01 : f32
    %451 = vector.broadcast %cst_178 : f32 to vector<2x128xf32>
    %452 = arith.mulf %451, %450 : vector<2x128xf32>
    %453 = math.tanh %452 : vector<2x128xf32>
    %cst_179 = arith.constant 5.000000e-01 : f32
    %454 = vector.broadcast %cst_179 : f32 to vector<2x128xf32>
    %455 = arith.mulf %454, %453 : vector<2x128xf32>
    %cst_180 = arith.constant 5.000000e-01 : f32
    %456 = vector.broadcast %cst_180 : f32 to vector<2x128xf32>
    %457 = arith.addf %455, %456 : vector<2x128xf32>
    %458 = vector.extract_strided_slice %444 {offsets = [0, 128], sizes = [2, 128], strides = [1, 1]} : vector<2x512xf32> to vector<2x128xf32>
    %cst_181 = arith.constant 5.000000e-01 : f32
    %459 = vector.broadcast %cst_181 : f32 to vector<2x128xf32>
    %460 = arith.mulf %459, %458 : vector<2x128xf32>
    %461 = math.tanh %460 : vector<2x128xf32>
    %cst_182 = arith.constant 5.000000e-01 : f32
    %462 = vector.broadcast %cst_182 : f32 to vector<2x128xf32>
    %463 = arith.mulf %462, %461 : vector<2x128xf32>
    %cst_183 = arith.constant 5.000000e-01 : f32
    %464 = vector.broadcast %cst_183 : f32 to vector<2x128xf32>
    %465 = arith.addf %463, %464 : vector<2x128xf32>
    %466 = vector.extract_strided_slice %444 {offsets = [0, 256], sizes = [2, 128], strides = [1, 1]} : vector<2x512xf32> to vector<2x128xf32>
    %467 = math.tanh %466 : vector<2x128xf32>
    %468 = vector.extract_strided_slice %444 {offsets = [0, 384], sizes = [2, 128], strides = [1, 1]} : vector<2x512xf32> to vector<2x128xf32>
    %cst_184 = arith.constant 5.000000e-01 : f32
    %469 = vector.broadcast %cst_184 : f32 to vector<2x128xf32>
    %470 = arith.mulf %469, %468 : vector<2x128xf32>
    %471 = math.tanh %470 : vector<2x128xf32>
    %cst_185 = arith.constant 5.000000e-01 : f32
    %472 = vector.broadcast %cst_185 : f32 to vector<2x128xf32>
    %473 = arith.mulf %472, %471 : vector<2x128xf32>
    %cst_186 = arith.constant 5.000000e-01 : f32
    %474 = vector.broadcast %cst_186 : f32 to vector<2x128xf32>
    %475 = arith.addf %473, %474 : vector<2x128xf32>
    %476 = arith.mulf %465, %406 : vector<2x128xf32>
    %477 = arith.mulf %457, %467 : vector<2x128xf32>
    %478 = arith.addf %476, %477 : vector<2x128xf32>
    %479 = math.tanh %478 : vector<2x128xf32>
    %480 = arith.mulf %475, %479 : vector<2x128xf32>
    %481 = vector.extract_strided_slice %449 {offsets = [0, 0], sizes = [2, 128], strides = [1, 1]} : vector<2x512xf32> to vector<2x128xf32>
    %cst_187 = arith.constant 5.000000e-01 : f32
    %482 = vector.broadcast %cst_187 : f32 to vector<2x128xf32>
    %483 = arith.mulf %482, %481 : vector<2x128xf32>
    %484 = math.tanh %483 : vector<2x128xf32>
    %cst_188 = arith.constant 5.000000e-01 : f32
    %485 = vector.broadcast %cst_188 : f32 to vector<2x128xf32>
    %486 = arith.mulf %485, %484 : vector<2x128xf32>
    %cst_189 = arith.constant 5.000000e-01 : f32
    %487 = vector.broadcast %cst_189 : f32 to vector<2x128xf32>
    %488 = arith.addf %486, %487 : vector<2x128xf32>
    %489 = vector.extract_strided_slice %449 {offsets = [0, 128], sizes = [2, 128], strides = [1, 1]} : vector<2x512xf32> to vector<2x128xf32>
    %cst_190 = arith.constant 5.000000e-01 : f32
    %490 = vector.broadcast %cst_190 : f32 to vector<2x128xf32>
    %491 = arith.mulf %490, %489 : vector<2x128xf32>
    %492 = math.tanh %491 : vector<2x128xf32>
    %cst_191 = arith.constant 5.000000e-01 : f32
    %493 = vector.broadcast %cst_191 : f32 to vector<2x128xf32>
    %494 = arith.mulf %493, %492 : vector<2x128xf32>
    %cst_192 = arith.constant 5.000000e-01 : f32
    %495 = vector.broadcast %cst_192 : f32 to vector<2x128xf32>
    %496 = arith.addf %494, %495 : vector<2x128xf32>
    %497 = vector.extract_strided_slice %449 {offsets = [0, 256], sizes = [2, 128], strides = [1, 1]} : vector<2x512xf32> to vector<2x128xf32>
    %498 = math.tanh %497 : vector<2x128xf32>
    %499 = vector.extract_strided_slice %449 {offsets = [0, 384], sizes = [2, 128], strides = [1, 1]} : vector<2x512xf32> to vector<2x128xf32>
    %cst_193 = arith.constant 5.000000e-01 : f32
    %500 = vector.broadcast %cst_193 : f32 to vector<2x128xf32>
    %501 = arith.mulf %500, %499 : vector<2x128xf32>
    %502 = math.tanh %501 : vector<2x128xf32>
    %cst_194 = arith.constant 5.000000e-01 : f32
    %503 = vector.broadcast %cst_194 : f32 to vector<2x128xf32>
    %504 = arith.mulf %503, %502 : vector<2x128xf32>
    %cst_195 = arith.constant 5.000000e-01 : f32
    %505 = vector.broadcast %cst_195 : f32 to vector<2x128xf32>
    %506 = arith.addf %504, %505 : vector<2x128xf32>
    %507 = arith.mulf %496, %437 : vector<2x128xf32>
    %508 = arith.mulf %488, %498 : vector<2x128xf32>
    %509 = arith.addf %507, %508 : vector<2x128xf32>
    %510 = math.tanh %509 : vector<2x128xf32>
    %511 = arith.mulf %506, %510 : vector<2x128xf32>
    %c14_196 = arith.constant 14 : index
    %c0_197 = arith.constant 0 : index
    %512 = vector.load %arg10[%c14_196, %c0_197] : memref<16x1024xf32, #tpu.memory_space<vmem>>, vector<2x512xf32>
    %513 = arith.truncf %480 : vector<2x128xf32> to vector<2x128xbf16>
    %c0_198 = arith.constant 0 : index
    %c0_199 = arith.constant 0 : index
    %514 = vector.load %arg3[%c0_198, %c0_199] : memref<128x512xbf16, #tpu.memory_space<vmem>>, vector<128x512xbf16>
    %cst_200 = arith.constant dense<0.000000e+00> : vector<2x512xf32>
    %515 = tpu.matmul %513, %514, %cst_200 {dimension_numbers = #tpu.dot_dimension_numbers<[1], [0], [0], [1], [0, 0, 1, 1], [], []>} : vector<2x128xbf16>, vector<128x512xbf16>, vector<2x512xf32> -> vector<2x512xf32>
    %516 = arith.addf %512, %515 : vector<2x512xf32>
    %c0_201 = arith.constant 0 : index
    %c512_202 = arith.constant 512 : index
    %517 = vector.load %arg10[%c0_201, %c512_202] : memref<16x1024xf32, #tpu.memory_space<vmem>>, vector<2x512xf32>
    %518 = arith.truncf %511 : vector<2x128xf32> to vector<2x128xbf16>
    %c0_203 = arith.constant 0 : index
    %c0_204 = arith.constant 0 : index
    %519 = vector.load %arg4[%c0_203, %c0_204] : memref<128x512xbf16, #tpu.memory_space<vmem>>, vector<128x512xbf16>
    %cst_205 = arith.constant dense<0.000000e+00> : vector<2x512xf32>
    %520 = tpu.matmul %518, %519, %cst_205 {dimension_numbers = #tpu.dot_dimension_numbers<[1], [0], [0], [1], [0, 0, 1, 1], [], []>} : vector<2x128xbf16>, vector<128x512xbf16>, vector<2x512xf32> -> vector<2x512xf32>
    %521 = arith.addf %517, %520 : vector<2x512xf32>
    %522 = vector.extract_strided_slice %516 {offsets = [0, 0], sizes = [2, 128], strides = [1, 1]} : vector<2x512xf32> to vector<2x128xf32>
    %cst_206 = arith.constant 5.000000e-01 : f32
    %523 = vector.broadcast %cst_206 : f32 to vector<2x128xf32>
    %524 = arith.mulf %523, %522 : vector<2x128xf32>
    %525 = math.tanh %524 : vector<2x128xf32>
    %cst_207 = arith.constant 5.000000e-01 : f32
    %526 = vector.broadcast %cst_207 : f32 to vector<2x128xf32>
    %527 = arith.mulf %526, %525 : vector<2x128xf32>
    %cst_208 = arith.constant 5.000000e-01 : f32
    %528 = vector.broadcast %cst_208 : f32 to vector<2x128xf32>
    %529 = arith.addf %527, %528 : vector<2x128xf32>
    %530 = vector.extract_strided_slice %516 {offsets = [0, 128], sizes = [2, 128], strides = [1, 1]} : vector<2x512xf32> to vector<2x128xf32>
    %cst_209 = arith.constant 5.000000e-01 : f32
    %531 = vector.broadcast %cst_209 : f32 to vector<2x128xf32>
    %532 = arith.mulf %531, %530 : vector<2x128xf32>
    %533 = math.tanh %532 : vector<2x128xf32>
    %cst_210 = arith.constant 5.000000e-01 : f32
    %534 = vector.broadcast %cst_210 : f32 to vector<2x128xf32>
    %535 = arith.mulf %534, %533 : vector<2x128xf32>
    %cst_211 = arith.constant 5.000000e-01 : f32
    %536 = vector.broadcast %cst_211 : f32 to vector<2x128xf32>
    %537 = arith.addf %535, %536 : vector<2x128xf32>
    %538 = vector.extract_strided_slice %516 {offsets = [0, 256], sizes = [2, 128], strides = [1, 1]} : vector<2x512xf32> to vector<2x128xf32>
    %539 = math.tanh %538 : vector<2x128xf32>
    %540 = vector.extract_strided_slice %516 {offsets = [0, 384], sizes = [2, 128], strides = [1, 1]} : vector<2x512xf32> to vector<2x128xf32>
    %cst_212 = arith.constant 5.000000e-01 : f32
    %541 = vector.broadcast %cst_212 : f32 to vector<2x128xf32>
    %542 = arith.mulf %541, %540 : vector<2x128xf32>
    %543 = math.tanh %542 : vector<2x128xf32>
    %cst_213 = arith.constant 5.000000e-01 : f32
    %544 = vector.broadcast %cst_213 : f32 to vector<2x128xf32>
    %545 = arith.mulf %544, %543 : vector<2x128xf32>
    %cst_214 = arith.constant 5.000000e-01 : f32
    %546 = vector.broadcast %cst_214 : f32 to vector<2x128xf32>
    %547 = arith.addf %545, %546 : vector<2x128xf32>
    %548 = arith.mulf %537, %478 : vector<2x128xf32>
    %549 = arith.mulf %529, %539 : vector<2x128xf32>
    %550 = arith.addf %548, %549 : vector<2x128xf32>
    %551 = math.tanh %550 : vector<2x128xf32>
    %552 = arith.mulf %547, %551 : vector<2x128xf32>
    %553 = vector.extract_strided_slice %521 {offsets = [0, 0], sizes = [2, 128], strides = [1, 1]} : vector<2x512xf32> to vector<2x128xf32>
    %cst_215 = arith.constant 5.000000e-01 : f32
    %554 = vector.broadcast %cst_215 : f32 to vector<2x128xf32>
    %555 = arith.mulf %554, %553 : vector<2x128xf32>
    %556 = math.tanh %555 : vector<2x128xf32>
    %cst_216 = arith.constant 5.000000e-01 : f32
    %557 = vector.broadcast %cst_216 : f32 to vector<2x128xf32>
    %558 = arith.mulf %557, %556 : vector<2x128xf32>
    %cst_217 = arith.constant 5.000000e-01 : f32
    %559 = vector.broadcast %cst_217 : f32 to vector<2x128xf32>
    %560 = arith.addf %558, %559 : vector<2x128xf32>
    %561 = vector.extract_strided_slice %521 {offsets = [0, 128], sizes = [2, 128], strides = [1, 1]} : vector<2x512xf32> to vector<2x128xf32>
    %cst_218 = arith.constant 5.000000e-01 : f32
    %562 = vector.broadcast %cst_218 : f32 to vector<2x128xf32>
    %563 = arith.mulf %562, %561 : vector<2x128xf32>
    %564 = math.tanh %563 : vector<2x128xf32>
    %cst_219 = arith.constant 5.000000e-01 : f32
    %565 = vector.broadcast %cst_219 : f32 to vector<2x128xf32>
    %566 = arith.mulf %565, %564 : vector<2x128xf32>
    %cst_220 = arith.constant 5.000000e-01 : f32
    %567 = vector.broadcast %cst_220 : f32 to vector<2x128xf32>
    %568 = arith.addf %566, %567 : vector<2x128xf32>
    %569 = vector.extract_strided_slice %521 {offsets = [0, 256], sizes = [2, 128], strides = [1, 1]} : vector<2x512xf32> to vector<2x128xf32>
    %570 = math.tanh %569 : vector<2x128xf32>
    %571 = vector.extract_strided_slice %521 {offsets = [0, 384], sizes = [2, 128], strides = [1, 1]} : vector<2x512xf32> to vector<2x128xf32>
    %cst_221 = arith.constant 5.000000e-01 : f32
    %572 = vector.broadcast %cst_221 : f32 to vector<2x128xf32>
    %573 = arith.mulf %572, %571 : vector<2x128xf32>
    %574 = math.tanh %573 : vector<2x128xf32>
    %cst_222 = arith.constant 5.000000e-01 : f32
    %575 = vector.broadcast %cst_222 : f32 to vector<2x128xf32>
    %576 = arith.mulf %575, %574 : vector<2x128xf32>
    %cst_223 = arith.constant 5.000000e-01 : f32
    %577 = vector.broadcast %cst_223 : f32 to vector<2x128xf32>
    %578 = arith.addf %576, %577 : vector<2x128xf32>
    %579 = arith.mulf %568, %509 : vector<2x128xf32>
    %580 = arith.mulf %560, %570 : vector<2x128xf32>
    %581 = arith.addf %579, %580 : vector<2x128xf32>
    %582 = math.tanh %581 : vector<2x128xf32>
    %583 = arith.mulf %578, %582 : vector<2x128xf32>
    %584 = tpu.concatenate %48, %120, %192, %264, %336, %408, %480, %552 in 0 : vector<2x128xf32>, vector<2x128xf32>, vector<2x128xf32>, vector<2x128xf32>, vector<2x128xf32>, vector<2x128xf32>, vector<2x128xf32>, vector<2x128xf32> -> vector<16x128xf32>
    %585 = tpu.concatenate %583, %511, %439, %367, %295, %223, %151, %79 in 0 : vector<2x128xf32>, vector<2x128xf32>, vector<2x128xf32>, vector<2x128xf32>, vector<2x128xf32>, vector<2x128xf32>, vector<2x128xf32>, vector<2x128xf32> -> vector<16x128xf32>
    %586 = tpu.concatenate %584, %585 in 1 : vector<16x128xf32>, vector<16x128xf32> -> vector<16x256xf32>
    %587 = arith.truncf %586 : vector<16x256xf32> to vector<16x256xbf16>
    %c0_224 = arith.constant 0 : index
    %c0_225 = arith.constant 0 : index
    %588 = vector.load %arg5[%c0_224, %c0_225] : memref<256x1024xbf16, #tpu.memory_space<vmem>>, vector<256x1024xbf16>
    %cst_226 = arith.constant dense<0.000000e+00> : vector<16x1024xf32>
    %589 = tpu.matmul %587, %588, %cst_226 {dimension_numbers = #tpu.dot_dimension_numbers<[1], [0], [0], [1], [0, 0, 1, 1], [], []>} : vector<16x256xbf16>, vector<256x1024xbf16>, vector<16x1024xf32> -> vector<16x1024xf32>
    %c0_227 = arith.constant 0 : index
    %c0_228 = arith.constant 0 : index
    %590 = vector.load %arg6[%c0_227, %c0_228] : memref<1x1024xf32, #tpu.memory_space<vmem>>, vector<1x1024xf32>
    %591 = vector.broadcast %590 : vector<1x1024xf32> to vector<16x1024xf32>
    %592 = arith.addf %589, %591 : vector<16x1024xf32>
    %c0_229 = arith.constant 0 : index
    %c0_230 = arith.constant 0 : index
    %593 = vector.load %arg11[%c0_229, %c0_230] : memref<16x1024xf32, #tpu.memory_space<vmem>>, vector<16x1024xf32>
    tpu.vector_store %arg11[%c0_229, %c0_230], %592 {strides = array<i32>} : memref<16x1024xf32, #tpu.memory_space<vmem>>, vector<16x1024xf32>,
    %c0_231 = arith.constant 0 : index
    %c0_232 = arith.constant 0 : index
    %594 = vector.load %arg11[%c0_231, %c0_232] : memref<16x1024xf32, #tpu.memory_space<vmem>>, vector<2x512xf32>
    %595 = arith.truncf %7 : vector<2x128xf32> to vector<2x128xbf16>
    %c0_233 = arith.constant 0 : index
    %c0_234 = arith.constant 0 : index
    %596 = vector.load %arg7[%c0_233, %c0_234] : memref<128x512xbf16, #tpu.memory_space<vmem>>, vector<128x512xbf16>
    %cst_235 = arith.constant dense<0.000000e+00> : vector<2x512xf32>
    %597 = tpu.matmul %595, %596, %cst_235 {dimension_numbers = #tpu.dot_dimension_numbers<[1], [0], [0], [1], [0, 0, 1, 1], [], []>} : vector<2x128xbf16>, vector<128x512xbf16>, vector<2x512xf32> -> vector<2x512xf32>
    %598 = arith.addf %594, %597 : vector<2x512xf32>
    %c14_236 = arith.constant 14 : index
    %c512_237 = arith.constant 512 : index
    %599 = vector.load %arg11[%c14_236, %c512_237] : memref<16x1024xf32, #tpu.memory_space<vmem>>, vector<2x512xf32>
    %600 = arith.truncf %7 : vector<2x128xf32> to vector<2x128xbf16>
    %c0_238 = arith.constant 0 : index
    %c0_239 = arith.constant 0 : index
    %601 = vector.load %arg8[%c0_238, %c0_239] : memref<128x512xbf16, #tpu.memory_space<vmem>>, vector<128x512xbf16>
    %cst_240 = arith.constant dense<0.000000e+00> : vector<2x512xf32>
    %602 = tpu.matmul %600, %601, %cst_240 {dimension_numbers = #tpu.dot_dimension_numbers<[1], [0], [0], [1], [0, 0, 1, 1], [], []>} : vector<2x128xbf16>, vector<128x512xbf16>, vector<2x512xf32> -> vector<2x512xf32>
    %603 = arith.addf %599, %602 : vector<2x512xf32>
    %604 = vector.extract_strided_slice %598 {offsets = [0, 0], sizes = [2, 128], strides = [1, 1]} : vector<2x512xf32> to vector<2x128xf32>
    %cst_241 = arith.constant 5.000000e-01 : f32
    %605 = vector.broadcast %cst_241 : f32 to vector<2x128xf32>
    %606 = arith.mulf %605, %604 : vector<2x128xf32>
    %607 = math.tanh %606 : vector<2x128xf32>
    %cst_242 = arith.constant 5.000000e-01 : f32
    %608 = vector.broadcast %cst_242 : f32 to vector<2x128xf32>
    %609 = arith.mulf %608, %607 : vector<2x128xf32>
    %cst_243 = arith.constant 5.000000e-01 : f32
    %610 = vector.broadcast %cst_243 : f32 to vector<2x128xf32>
    %611 = arith.addf %609, %610 : vector<2x128xf32>
    %612 = vector.extract_strided_slice %598 {offsets = [0, 128], sizes = [2, 128], strides = [1, 1]} : vector<2x512xf32> to vector<2x128xf32>
    %cst_244 = arith.constant 5.000000e-01 : f32
    %613 = vector.broadcast %cst_244 : f32 to vector<2x128xf32>
    %614 = arith.mulf %613, %612 : vector<2x128xf32>
    %615 = math.tanh %614 : vector<2x128xf32>
    %cst_245 = arith.constant 5.000000e-01 : f32
    %616 = vector.broadcast %cst_245 : f32 to vector<2x128xf32>
    %617 = arith.mulf %616, %615 : vector<2x128xf32>
    %cst_246 = arith.constant 5.000000e-01 : f32
    %618 = vector.broadcast %cst_246 : f32 to vector<2x128xf32>
    %619 = arith.addf %617, %618 : vector<2x128xf32>
    %620 = vector.extract_strided_slice %598 {offsets = [0, 256], sizes = [2, 128], strides = [1, 1]} : vector<2x512xf32> to vector<2x128xf32>
    %621 = math.tanh %620 : vector<2x128xf32>
    %622 = vector.extract_strided_slice %598 {offsets = [0, 384], sizes = [2, 128], strides = [1, 1]} : vector<2x512xf32> to vector<2x128xf32>
    %cst_247 = arith.constant 5.000000e-01 : f32
    %623 = vector.broadcast %cst_247 : f32 to vector<2x128xf32>
    %624 = arith.mulf %623, %622 : vector<2x128xf32>
    %625 = math.tanh %624 : vector<2x128xf32>
    %cst_248 = arith.constant 5.000000e-01 : f32
    %626 = vector.broadcast %cst_248 : f32 to vector<2x128xf32>
    %627 = arith.mulf %626, %625 : vector<2x128xf32>
    %cst_249 = arith.constant 5.000000e-01 : f32
    %628 = vector.broadcast %cst_249 : f32 to vector<2x128xf32>
    %629 = arith.addf %627, %628 : vector<2x128xf32>
    %630 = arith.mulf %619, %7 : vector<2x128xf32>
    %631 = arith.mulf %611, %621 : vector<2x128xf32>
    %632 = arith.addf %630, %631 : vector<2x128xf32>
    %633 = math.tanh %632 : vector<2x128xf32>
    %634 = arith.mulf %629, %633 : vector<2x128xf32>
    %635 = vector.extract_strided_slice %603 {offsets = [0, 0], sizes = [2, 128], strides = [1, 1]} : vector<2x512xf32> to vector<2x128xf32>
    %cst_250 = arith.constant 5.000000e-01 : f32
    %636 = vector.broadcast %cst_250 : f32 to vector<2x128xf32>
    %637 = arith.mulf %636, %635 : vector<2x128xf32>
    %638 = math.tanh %637 : vector<2x128xf32>
    %cst_251 = arith.constant 5.000000e-01 : f32
    %639 = vector.broadcast %cst_251 : f32 to vector<2x128xf32>
    %640 = arith.mulf %639, %638 : vector<2x128xf32>
    %cst_252 = arith.constant 5.000000e-01 : f32
    %641 = vector.broadcast %cst_252 : f32 to vector<2x128xf32>
    %642 = arith.addf %640, %641 : vector<2x128xf32>
    %643 = vector.extract_strided_slice %603 {offsets = [0, 128], sizes = [2, 128], strides = [1, 1]} : vector<2x512xf32> to vector<2x128xf32>
    %cst_253 = arith.constant 5.000000e-01 : f32
    %644 = vector.broadcast %cst_253 : f32 to vector<2x128xf32>
    %645 = arith.mulf %644, %643 : vector<2x128xf32>
    %646 = math.tanh %645 : vector<2x128xf32>
    %cst_254 = arith.constant 5.000000e-01 : f32
    %647 = vector.broadcast %cst_254 : f32 to vector<2x128xf32>
    %648 = arith.mulf %647, %646 : vector<2x128xf32>
    %cst_255 = arith.constant 5.000000e-01 : f32
    %649 = vector.broadcast %cst_255 : f32 to vector<2x128xf32>
    %650 = arith.addf %648, %649 : vector<2x128xf32>
    %651 = vector.extract_strided_slice %603 {offsets = [0, 256], sizes = [2, 128], strides = [1, 1]} : vector<2x512xf32> to vector<2x128xf32>
    %652 = math.tanh %651 : vector<2x128xf32>
    %653 = vector.extract_strided_slice %603 {offsets = [0, 384], sizes = [2, 128], strides = [1, 1]} : vector<2x512xf32> to vector<2x128xf32>
    %cst_256 = arith.constant 5.000000e-01 : f32
    %654 = vector.broadcast %cst_256 : f32 to vector<2x128xf32>
    %655 = arith.mulf %654, %653 : vector<2x128xf32>
    %656 = math.tanh %655 : vector<2x128xf32>
    %cst_257 = arith.constant 5.000000e-01 : f32
    %657 = vector.broadcast %cst_257 : f32 to vector<2x128xf32>
    %658 = arith.mulf %657, %656 : vector<2x128xf32>
    %cst_258 = arith.constant 5.000000e-01 : f32
    %659 = vector.broadcast %cst_258 : f32 to vector<2x128xf32>
    %660 = arith.addf %658, %659 : vector<2x128xf32>
    %661 = arith.mulf %650, %7 : vector<2x128xf32>
    %662 = arith.mulf %642, %652 : vector<2x128xf32>
    %663 = arith.addf %661, %662 : vector<2x128xf32>
    %664 = math.tanh %663 : vector<2x128xf32>
    %665 = arith.mulf %660, %664 : vector<2x128xf32>
    %c2_259 = arith.constant 2 : index
    %c0_260 = arith.constant 0 : index
    %666 = vector.load %arg11[%c2_259, %c0_260] : memref<16x1024xf32, #tpu.memory_space<vmem>>, vector<2x512xf32>
    %667 = arith.truncf %634 : vector<2x128xf32> to vector<2x128xbf16>
    %c0_261 = arith.constant 0 : index
    %c0_262 = arith.constant 0 : index
    %668 = vector.load %arg7[%c0_261, %c0_262] : memref<128x512xbf16, #tpu.memory_space<vmem>>, vector<128x512xbf16>
    %cst_263 = arith.constant dense<0.000000e+00> : vector<2x512xf32>
    %669 = tpu.matmul %667, %668, %cst_263 {dimension_numbers = #tpu.dot_dimension_numbers<[1], [0], [0], [1], [0, 0, 1, 1], [], []>} : vector<2x128xbf16>, vector<128x512xbf16>, vector<2x512xf32> -> vector<2x512xf32>
    %670 = arith.addf %666, %669 : vector<2x512xf32>
    %c12_264 = arith.constant 12 : index
    %c512_265 = arith.constant 512 : index
    %671 = vector.load %arg11[%c12_264, %c512_265] : memref<16x1024xf32, #tpu.memory_space<vmem>>, vector<2x512xf32>
    %672 = arith.truncf %665 : vector<2x128xf32> to vector<2x128xbf16>
    %c0_266 = arith.constant 0 : index
    %c0_267 = arith.constant 0 : index
    %673 = vector.load %arg8[%c0_266, %c0_267] : memref<128x512xbf16, #tpu.memory_space<vmem>>, vector<128x512xbf16>
    %cst_268 = arith.constant dense<0.000000e+00> : vector<2x512xf32>
    %674 = tpu.matmul %672, %673, %cst_268 {dimension_numbers = #tpu.dot_dimension_numbers<[1], [0], [0], [1], [0, 0, 1, 1], [], []>} : vector<2x128xbf16>, vector<128x512xbf16>, vector<2x512xf32> -> vector<2x512xf32>
    %675 = arith.addf %671, %674 : vector<2x512xf32>
    %676 = vector.extract_strided_slice %670 {offsets = [0, 0], sizes = [2, 128], strides = [1, 1]} : vector<2x512xf32> to vector<2x128xf32>
    %cst_269 = arith.constant 5.000000e-01 : f32
    %677 = vector.broadcast %cst_269 : f32 to vector<2x128xf32>
    %678 = arith.mulf %677, %676 : vector<2x128xf32>
    %679 = math.tanh %678 : vector<2x128xf32>
    %cst_270 = arith.constant 5.000000e-01 : f32
    %680 = vector.broadcast %cst_270 : f32 to vector<2x128xf32>
    %681 = arith.mulf %680, %679 : vector<2x128xf32>
    %cst_271 = arith.constant 5.000000e-01 : f32
    %682 = vector.broadcast %cst_271 : f32 to vector<2x128xf32>
    %683 = arith.addf %681, %682 : vector<2x128xf32>
    %684 = vector.extract_strided_slice %670 {offsets = [0, 128], sizes = [2, 128], strides = [1, 1]} : vector<2x512xf32> to vector<2x128xf32>
    %cst_272 = arith.constant 5.000000e-01 : f32
    %685 = vector.broadcast %cst_272 : f32 to vector<2x128xf32>
    %686 = arith.mulf %685, %684 : vector<2x128xf32>
    %687 = math.tanh %686 : vector<2x128xf32>
    %cst_273 = arith.constant 5.000000e-01 : f32
    %688 = vector.broadcast %cst_273 : f32 to vector<2x128xf32>
    %689 = arith.mulf %688, %687 : vector<2x128xf32>
    %cst_274 = arith.constant 5.000000e-01 : f32
    %690 = vector.broadcast %cst_274 : f32 to vector<2x128xf32>
    %691 = arith.addf %689, %690 : vector<2x128xf32>
    %692 = vector.extract_strided_slice %670 {offsets = [0, 256], sizes = [2, 128], strides = [1, 1]} : vector<2x512xf32> to vector<2x128xf32>
    %693 = math.tanh %692 : vector<2x128xf32>
    %694 = vector.extract_strided_slice %670 {offsets = [0, 384], sizes = [2, 128], strides = [1, 1]} : vector<2x512xf32> to vector<2x128xf32>
    %cst_275 = arith.constant 5.000000e-01 : f32
    %695 = vector.broadcast %cst_275 : f32 to vector<2x128xf32>
    %696 = arith.mulf %695, %694 : vector<2x128xf32>
    %697 = math.tanh %696 : vector<2x128xf32>
    %cst_276 = arith.constant 5.000000e-01 : f32
    %698 = vector.broadcast %cst_276 : f32 to vector<2x128xf32>
    %699 = arith.mulf %698, %697 : vector<2x128xf32>
    %cst_277 = arith.constant 5.000000e-01 : f32
    %700 = vector.broadcast %cst_277 : f32 to vector<2x128xf32>
    %701 = arith.addf %699, %700 : vector<2x128xf32>
    %702 = arith.mulf %691, %632 : vector<2x128xf32>
    %703 = arith.mulf %683, %693 : vector<2x128xf32>
    %704 = arith.addf %702, %703 : vector<2x128xf32>
    %705 = math.tanh %704 : vector<2x128xf32>
    %706 = arith.mulf %701, %705 : vector<2x128xf32>
    %707 = vector.extract_strided_slice %675 {offsets = [0, 0], sizes = [2, 128], strides = [1, 1]} : vector<2x512xf32> to vector<2x128xf32>
    %cst_278 = arith.constant 5.000000e-01 : f32
    %708 = vector.broadcast %cst_278 : f32 to vector<2x128xf32>
    %709 = arith.mulf %708, %707 : vector<2x128xf32>
    %710 = math.tanh %709 : vector<2x128xf32>
    %cst_279 = arith.constant 5.000000e-01 : f32
    %711 = vector.broadcast %cst_279 : f32 to vector<2x128xf32>
    %712 = arith.mulf %711, %710 : vector<2x128xf32>
    %cst_280 = arith.constant 5.000000e-01 : f32
    %713 = vector.broadcast %cst_280 : f32 to vector<2x128xf32>
    %714 = arith.addf %712, %713 : vector<2x128xf32>
    %715 = vector.extract_strided_slice %675 {offsets = [0, 128], sizes = [2, 128], strides = [1, 1]} : vector<2x512xf32> to vector<2x128xf32>
    %cst_281 = arith.constant 5.000000e-01 : f32
    %716 = vector.broadcast %cst_281 : f32 to vector<2x128xf32>
    %717 = arith.mulf %716, %715 : vector<2x128xf32>
    %718 = math.tanh %717 : vector<2x128xf32>
    %cst_282 = arith.constant 5.000000e-01 : f32
    %719 = vector.broadcast %cst_282 : f32 to vector<2x128xf32>
    %720 = arith.mulf %719, %718 : vector<2x128xf32>
    %cst_283 = arith.constant 5.000000e-01 : f32
    %721 = vector.broadcast %cst_283 : f32 to vector<2x128xf32>
    %722 = arith.addf %720, %721 : vector<2x128xf32>
    %723 = vector.extract_strided_slice %675 {offsets = [0, 256], sizes = [2, 128], strides = [1, 1]} : vector<2x512xf32> to vector<2x128xf32>
    %724 = math.tanh %723 : vector<2x128xf32>
    %725 = vector.extract_strided_slice %675 {offsets = [0, 384], sizes = [2, 128], strides = [1, 1]} : vector<2x512xf32> to vector<2x128xf32>
    %cst_284 = arith.constant 5.000000e-01 : f32
    %726 = vector.broadcast %cst_284 : f32 to vector<2x128xf32>
    %727 = arith.mulf %726, %725 : vector<2x128xf32>
    %728 = math.tanh %727 : vector<2x128xf32>
    %cst_285 = arith.constant 5.000000e-01 : f32
    %729 = vector.broadcast %cst_285 : f32 to vector<2x128xf32>
    %730 = arith.mulf %729, %728 : vector<2x128xf32>
    %cst_286 = arith.constant 5.000000e-01 : f32
    %731 = vector.broadcast %cst_286 : f32 to vector<2x128xf32>
    %732 = arith.addf %730, %731 : vector<2x128xf32>
    %733 = arith.mulf %722, %663 : vector<2x128xf32>
    %734 = arith.mulf %714, %724 : vector<2x128xf32>
    %735 = arith.addf %733, %734 : vector<2x128xf32>
    %736 = math.tanh %735 : vector<2x128xf32>
    %737 = arith.mulf %732, %736 : vector<2x128xf32>
    %c4_287 = arith.constant 4 : index
    %c0_288 = arith.constant 0 : index
    %738 = vector.load %arg11[%c4_287, %c0_288] : memref<16x1024xf32, #tpu.memory_space<vmem>>, vector<2x512xf32>
    %739 = arith.truncf %706 : vector<2x128xf32> to vector<2x128xbf16>
    %c0_289 = arith.constant 0 : index
    %c0_290 = arith.constant 0 : index
    %740 = vector.load %arg7[%c0_289, %c0_290] : memref<128x512xbf16, #tpu.memory_space<vmem>>, vector<128x512xbf16>
    %cst_291 = arith.constant dense<0.000000e+00> : vector<2x512xf32>
    %741 = tpu.matmul %739, %740, %cst_291 {dimension_numbers = #tpu.dot_dimension_numbers<[1], [0], [0], [1], [0, 0, 1, 1], [], []>} : vector<2x128xbf16>, vector<128x512xbf16>, vector<2x512xf32> -> vector<2x512xf32>
    %742 = arith.addf %738, %741 : vector<2x512xf32>
    %c10_292 = arith.constant 10 : index
    %c512_293 = arith.constant 512 : index
    %743 = vector.load %arg11[%c10_292, %c512_293] : memref<16x1024xf32, #tpu.memory_space<vmem>>, vector<2x512xf32>
    %744 = arith.truncf %737 : vector<2x128xf32> to vector<2x128xbf16>
    %c0_294 = arith.constant 0 : index
    %c0_295 = arith.constant 0 : index
    %745 = vector.load %arg8[%c0_294, %c0_295] : memref<128x512xbf16, #tpu.memory_space<vmem>>, vector<128x512xbf16>
    %cst_296 = arith.constant dense<0.000000e+00> : vector<2x512xf32>
    %746 = tpu.matmul %744, %745, %cst_296 {dimension_numbers = #tpu.dot_dimension_numbers<[1], [0], [0], [1], [0, 0, 1, 1], [], []>} : vector<2x128xbf16>, vector<128x512xbf16>, vector<2x512xf32> -> vector<2x512xf32>
    %747 = arith.addf %743, %746 : vector<2x512xf32>
    %748 = vector.extract_strided_slice %742 {offsets = [0, 0], sizes = [2, 128], strides = [1, 1]} : vector<2x512xf32> to vector<2x128xf32>
    %cst_297 = arith.constant 5.000000e-01 : f32
    %749 = vector.broadcast %cst_297 : f32 to vector<2x128xf32>
    %750 = arith.mulf %749, %748 : vector<2x128xf32>
    %751 = math.tanh %750 : vector<2x128xf32>
    %cst_298 = arith.constant 5.000000e-01 : f32
    %752 = vector.broadcast %cst_298 : f32 to vector<2x128xf32>
    %753 = arith.mulf %752, %751 : vector<2x128xf32>
    %cst_299 = arith.constant 5.000000e-01 : f32
    %754 = vector.broadcast %cst_299 : f32 to vector<2x128xf32>
    %755 = arith.addf %753, %754 : vector<2x128xf32>
    %756 = vector.extract_strided_slice %742 {offsets = [0, 128], sizes = [2, 128], strides = [1, 1]} : vector<2x512xf32> to vector<2x128xf32>
    %cst_300 = arith.constant 5.000000e-01 : f32
    %757 = vector.broadcast %cst_300 : f32 to vector<2x128xf32>
    %758 = arith.mulf %757, %756 : vector<2x128xf32>
    %759 = math.tanh %758 : vector<2x128xf32>
    %cst_301 = arith.constant 5.000000e-01 : f32
    %760 = vector.broadcast %cst_301 : f32 to vector<2x128xf32>
    %761 = arith.mulf %760, %759 : vector<2x128xf32>
    %cst_302 = arith.constant 5.000000e-01 : f32
    %762 = vector.broadcast %cst_302 : f32 to vector<2x128xf32>
    %763 = arith.addf %761, %762 : vector<2x128xf32>
    %764 = vector.extract_strided_slice %742 {offsets = [0, 256], sizes = [2, 128], strides = [1, 1]} : vector<2x512xf32> to vector<2x128xf32>
    %765 = math.tanh %764 : vector<2x128xf32>
    %766 = vector.extract_strided_slice %742 {offsets = [0, 384], sizes = [2, 128], strides = [1, 1]} : vector<2x512xf32> to vector<2x128xf32>
    %cst_303 = arith.constant 5.000000e-01 : f32
    %767 = vector.broadcast %cst_303 : f32 to vector<2x128xf32>
    %768 = arith.mulf %767, %766 : vector<2x128xf32>
    %769 = math.tanh %768 : vector<2x128xf32>
    %cst_304 = arith.constant 5.000000e-01 : f32
    %770 = vector.broadcast %cst_304 : f32 to vector<2x128xf32>
    %771 = arith.mulf %770, %769 : vector<2x128xf32>
    %cst_305 = arith.constant 5.000000e-01 : f32
    %772 = vector.broadcast %cst_305 : f32 to vector<2x128xf32>
    %773 = arith.addf %771, %772 : vector<2x128xf32>
    %774 = arith.mulf %763, %704 : vector<2x128xf32>
    %775 = arith.mulf %755, %765 : vector<2x128xf32>
    %776 = arith.addf %774, %775 : vector<2x128xf32>
    %777 = math.tanh %776 : vector<2x128xf32>
    %778 = arith.mulf %773, %777 : vector<2x128xf32>
    %779 = vector.extract_strided_slice %747 {offsets = [0, 0], sizes = [2, 128], strides = [1, 1]} : vector<2x512xf32> to vector<2x128xf32>
    %cst_306 = arith.constant 5.000000e-01 : f32
    %780 = vector.broadcast %cst_306 : f32 to vector<2x128xf32>
    %781 = arith.mulf %780, %779 : vector<2x128xf32>
    %782 = math.tanh %781 : vector<2x128xf32>
    %cst_307 = arith.constant 5.000000e-01 : f32
    %783 = vector.broadcast %cst_307 : f32 to vector<2x128xf32>
    %784 = arith.mulf %783, %782 : vector<2x128xf32>
    %cst_308 = arith.constant 5.000000e-01 : f32
    %785 = vector.broadcast %cst_308 : f32 to vector<2x128xf32>
    %786 = arith.addf %784, %785 : vector<2x128xf32>
    %787 = vector.extract_strided_slice %747 {offsets = [0, 128], sizes = [2, 128], strides = [1, 1]} : vector<2x512xf32> to vector<2x128xf32>
    %cst_309 = arith.constant 5.000000e-01 : f32
    %788 = vector.broadcast %cst_309 : f32 to vector<2x128xf32>
    %789 = arith.mulf %788, %787 : vector<2x128xf32>
    %790 = math.tanh %789 : vector<2x128xf32>
    %cst_310 = arith.constant 5.000000e-01 : f32
    %791 = vector.broadcast %cst_310 : f32 to vector<2x128xf32>
    %792 = arith.mulf %791, %790 : vector<2x128xf32>
    %cst_311 = arith.constant 5.000000e-01 : f32
    %793 = vector.broadcast %cst_311 : f32 to vector<2x128xf32>
    %794 = arith.addf %792, %793 : vector<2x128xf32>
    %795 = vector.extract_strided_slice %747 {offsets = [0, 256], sizes = [2, 128], strides = [1, 1]} : vector<2x512xf32> to vector<2x128xf32>
    %796 = math.tanh %795 : vector<2x128xf32>
    %797 = vector.extract_strided_slice %747 {offsets = [0, 384], sizes = [2, 128], strides = [1, 1]} : vector<2x512xf32> to vector<2x128xf32>
    %cst_312 = arith.constant 5.000000e-01 : f32
    %798 = vector.broadcast %cst_312 : f32 to vector<2x128xf32>
    %799 = arith.mulf %798, %797 : vector<2x128xf32>
    %800 = math.tanh %799 : vector<2x128xf32>
    %cst_313 = arith.constant 5.000000e-01 : f32
    %801 = vector.broadcast %cst_313 : f32 to vector<2x128xf32>
    %802 = arith.mulf %801, %800 : vector<2x128xf32>
    %cst_314 = arith.constant 5.000000e-01 : f32
    %803 = vector.broadcast %cst_314 : f32 to vector<2x128xf32>
    %804 = arith.addf %802, %803 : vector<2x128xf32>
    %805 = arith.mulf %794, %735 : vector<2x128xf32>
    %806 = arith.mulf %786, %796 : vector<2x128xf32>
    %807 = arith.addf %805, %806 : vector<2x128xf32>
    %808 = math.tanh %807 : vector<2x128xf32>
    %809 = arith.mulf %804, %808 : vector<2x128xf32>
    %c6_315 = arith.constant 6 : index
    %c0_316 = arith.constant 0 : index
    %810 = vector.load %arg11[%c6_315, %c0_316] : memref<16x1024xf32, #tpu.memory_space<vmem>>, vector<2x512xf32>
    %811 = arith.truncf %778 : vector<2x128xf32> to vector<2x128xbf16>
    %c0_317 = arith.constant 0 : index
    %c0_318 = arith.constant 0 : index
    %812 = vector.load %arg7[%c0_317, %c0_318] : memref<128x512xbf16, #tpu.memory_space<vmem>>, vector<128x512xbf16>
    %cst_319 = arith.constant dense<0.000000e+00> : vector<2x512xf32>
    %813 = tpu.matmul %811, %812, %cst_319 {dimension_numbers = #tpu.dot_dimension_numbers<[1], [0], [0], [1], [0, 0, 1, 1], [], []>} : vector<2x128xbf16>, vector<128x512xbf16>, vector<2x512xf32> -> vector<2x512xf32>
    %814 = arith.addf %810, %813 : vector<2x512xf32>
    %c8_320 = arith.constant 8 : index
    %c512_321 = arith.constant 512 : index
    %815 = vector.load %arg11[%c8_320, %c512_321] : memref<16x1024xf32, #tpu.memory_space<vmem>>, vector<2x512xf32>
    %816 = arith.truncf %809 : vector<2x128xf32> to vector<2x128xbf16>
    %c0_322 = arith.constant 0 : index
    %c0_323 = arith.constant 0 : index
    %817 = vector.load %arg8[%c0_322, %c0_323] : memref<128x512xbf16, #tpu.memory_space<vmem>>, vector<128x512xbf16>
    %cst_324 = arith.constant dense<0.000000e+00> : vector<2x512xf32>
    %818 = tpu.matmul %816, %817, %cst_324 {dimension_numbers = #tpu.dot_dimension_numbers<[1], [0], [0], [1], [0, 0, 1, 1], [], []>} : vector<2x128xbf16>, vector<128x512xbf16>, vector<2x512xf32> -> vector<2x512xf32>
    %819 = arith.addf %815, %818 : vector<2x512xf32>
    %820 = vector.extract_strided_slice %814 {offsets = [0, 0], sizes = [2, 128], strides = [1, 1]} : vector<2x512xf32> to vector<2x128xf32>
    %cst_325 = arith.constant 5.000000e-01 : f32
    %821 = vector.broadcast %cst_325 : f32 to vector<2x128xf32>
    %822 = arith.mulf %821, %820 : vector<2x128xf32>
    %823 = math.tanh %822 : vector<2x128xf32>
    %cst_326 = arith.constant 5.000000e-01 : f32
    %824 = vector.broadcast %cst_326 : f32 to vector<2x128xf32>
    %825 = arith.mulf %824, %823 : vector<2x128xf32>
    %cst_327 = arith.constant 5.000000e-01 : f32
    %826 = vector.broadcast %cst_327 : f32 to vector<2x128xf32>
    %827 = arith.addf %825, %826 : vector<2x128xf32>
    %828 = vector.extract_strided_slice %814 {offsets = [0, 128], sizes = [2, 128], strides = [1, 1]} : vector<2x512xf32> to vector<2x128xf32>
    %cst_328 = arith.constant 5.000000e-01 : f32
    %829 = vector.broadcast %cst_328 : f32 to vector<2x128xf32>
    %830 = arith.mulf %829, %828 : vector<2x128xf32>
    %831 = math.tanh %830 : vector<2x128xf32>
    %cst_329 = arith.constant 5.000000e-01 : f32
    %832 = vector.broadcast %cst_329 : f32 to vector<2x128xf32>
    %833 = arith.mulf %832, %831 : vector<2x128xf32>
    %cst_330 = arith.constant 5.000000e-01 : f32
    %834 = vector.broadcast %cst_330 : f32 to vector<2x128xf32>
    %835 = arith.addf %833, %834 : vector<2x128xf32>
    %836 = vector.extract_strided_slice %814 {offsets = [0, 256], sizes = [2, 128], strides = [1, 1]} : vector<2x512xf32> to vector<2x128xf32>
    %837 = math.tanh %836 : vector<2x128xf32>
    %838 = vector.extract_strided_slice %814 {offsets = [0, 384], sizes = [2, 128], strides = [1, 1]} : vector<2x512xf32> to vector<2x128xf32>
    %cst_331 = arith.constant 5.000000e-01 : f32
    %839 = vector.broadcast %cst_331 : f32 to vector<2x128xf32>
    %840 = arith.mulf %839, %838 : vector<2x128xf32>
    %841 = math.tanh %840 : vector<2x128xf32>
    %cst_332 = arith.constant 5.000000e-01 : f32
    %842 = vector.broadcast %cst_332 : f32 to vector<2x128xf32>
    %843 = arith.mulf %842, %841 : vector<2x128xf32>
    %cst_333 = arith.constant 5.000000e-01 : f32
    %844 = vector.broadcast %cst_333 : f32 to vector<2x128xf32>
    %845 = arith.addf %843, %844 : vector<2x128xf32>
    %846 = arith.mulf %835, %776 : vector<2x128xf32>
    %847 = arith.mulf %827, %837 : vector<2x128xf32>
    %848 = arith.addf %846, %847 : vector<2x128xf32>
    %849 = math.tanh %848 : vector<2x128xf32>
    %850 = arith.mulf %845, %849 : vector<2x128xf32>
    %851 = vector.extract_strided_slice %819 {offsets = [0, 0], sizes = [2, 128], strides = [1, 1]} : vector<2x512xf32> to vector<2x128xf32>
    %cst_334 = arith.constant 5.000000e-01 : f32
    %852 = vector.broadcast %cst_334 : f32 to vector<2x128xf32>
    %853 = arith.mulf %852, %851 : vector<2x128xf32>
    %854 = math.tanh %853 : vector<2x128xf32>
    %cst_335 = arith.constant 5.000000e-01 : f32
    %855 = vector.broadcast %cst_335 : f32 to vector<2x128xf32>
    %856 = arith.mulf %855, %854 : vector<2x128xf32>
    %cst_336 = arith.constant 5.000000e-01 : f32
    %857 = vector.broadcast %cst_336 : f32 to vector<2x128xf32>
    %858 = arith.addf %856, %857 : vector<2x128xf32>
    %859 = vector.extract_strided_slice %819 {offsets = [0, 128], sizes = [2, 128], strides = [1, 1]} : vector<2x512xf32> to vector<2x128xf32>
    %cst_337 = arith.constant 5.000000e-01 : f32
    %860 = vector.broadcast %cst_337 : f32 to vector<2x128xf32>
    %861 = arith.mulf %860, %859 : vector<2x128xf32>
    %862 = math.tanh %861 : vector<2x128xf32>
    %cst_338 = arith.constant 5.000000e-01 : f32
    %863 = vector.broadcast %cst_338 : f32 to vector<2x128xf32>
    %864 = arith.mulf %863, %862 : vector<2x128xf32>
    %cst_339 = arith.constant 5.000000e-01 : f32
    %865 = vector.broadcast %cst_339 : f32 to vector<2x128xf32>
    %866 = arith.addf %864, %865 : vector<2x128xf32>
    %867 = vector.extract_strided_slice %819 {offsets = [0, 256], sizes = [2, 128], strides = [1, 1]} : vector<2x512xf32> to vector<2x128xf32>
    %868 = math.tanh %867 : vector<2x128xf32>
    %869 = vector.extract_strided_slice %819 {offsets = [0, 384], sizes = [2, 128], strides = [1, 1]} : vector<2x512xf32> to vector<2x128xf32>
    %cst_340 = arith.constant 5.000000e-01 : f32
    %870 = vector.broadcast %cst_340 : f32 to vector<2x128xf32>
    %871 = arith.mulf %870, %869 : vector<2x128xf32>
    %872 = math.tanh %871 : vector<2x128xf32>
    %cst_341 = arith.constant 5.000000e-01 : f32
    %873 = vector.broadcast %cst_341 : f32 to vector<2x128xf32>
    %874 = arith.mulf %873, %872 : vector<2x128xf32>
    %cst_342 = arith.constant 5.000000e-01 : f32
    %875 = vector.broadcast %cst_342 : f32 to vector<2x128xf32>
    %876 = arith.addf %874, %875 : vector<2x128xf32>
    %877 = arith.mulf %866, %807 : vector<2x128xf32>
    %878 = arith.mulf %858, %868 : vector<2x128xf32>
    %879 = arith.addf %877, %878 : vector<2x128xf32>
    %880 = math.tanh %879 : vector<2x128xf32>
    %881 = arith.mulf %876, %880 : vector<2x128xf32>
    %c8_343 = arith.constant 8 : index
    %c0_344 = arith.constant 0 : index
    %882 = vector.load %arg11[%c8_343, %c0_344] : memref<16x1024xf32, #tpu.memory_space<vmem>>, vector<2x512xf32>
    %883 = arith.truncf %850 : vector<2x128xf32> to vector<2x128xbf16>
    %c0_345 = arith.constant 0 : index
    %c0_346 = arith.constant 0 : index
    %884 = vector.load %arg7[%c0_345, %c0_346] : memref<128x512xbf16, #tpu.memory_space<vmem>>, vector<128x512xbf16>
    %cst_347 = arith.constant dense<0.000000e+00> : vector<2x512xf32>
    %885 = tpu.matmul %883, %884, %cst_347 {dimension_numbers = #tpu.dot_dimension_numbers<[1], [0], [0], [1], [0, 0, 1, 1], [], []>} : vector<2x128xbf16>, vector<128x512xbf16>, vector<2x512xf32> -> vector<2x512xf32>
    %886 = arith.addf %882, %885 : vector<2x512xf32>
    %c6_348 = arith.constant 6 : index
    %c512_349 = arith.constant 512 : index
    %887 = vector.load %arg11[%c6_348, %c512_349] : memref<16x1024xf32, #tpu.memory_space<vmem>>, vector<2x512xf32>
    %888 = arith.truncf %881 : vector<2x128xf32> to vector<2x128xbf16>
    %c0_350 = arith.constant 0 : index
    %c0_351 = arith.constant 0 : index
    %889 = vector.load %arg8[%c0_350, %c0_351] : memref<128x512xbf16, #tpu.memory_space<vmem>>, vector<128x512xbf16>
    %cst_352 = arith.constant dense<0.000000e+00> : vector<2x512xf32>
    %890 = tpu.matmul %888, %889, %cst_352 {dimension_numbers = #tpu.dot_dimension_numbers<[1], [0], [0], [1], [0, 0, 1, 1], [], []>} : vector<2x128xbf16>, vector<128x512xbf16>, vector<2x512xf32> -> vector<2x512xf32>
    %891 = arith.addf %887, %890 : vector<2x512xf32>
    %892 = vector.extract_strided_slice %886 {offsets = [0, 0], sizes = [2, 128], strides = [1, 1]} : vector<2x512xf32> to vector<2x128xf32>
    %cst_353 = arith.constant 5.000000e-01 : f32
    %893 = vector.broadcast %cst_353 : f32 to vector<2x128xf32>
    %894 = arith.mulf %893, %892 : vector<2x128xf32>
    %895 = math.tanh %894 : vector<2x128xf32>
    %cst_354 = arith.constant 5.000000e-01 : f32
    %896 = vector.broadcast %cst_354 : f32 to vector<2x128xf32>
    %897 = arith.mulf %896, %895 : vector<2x128xf32>
    %cst_355 = arith.constant 5.000000e-01 : f32
    %898 = vector.broadcast %cst_355 : f32 to vector<2x128xf32>
    %899 = arith.addf %897, %898 : vector<2x128xf32>
    %900 = vector.extract_strided_slice %886 {offsets = [0, 128], sizes = [2, 128], strides = [1, 1]} : vector<2x512xf32> to vector<2x128xf32>
    %cst_356 = arith.constant 5.000000e-01 : f32
    %901 = vector.broadcast %cst_356 : f32 to vector<2x128xf32>
    %902 = arith.mulf %901, %900 : vector<2x128xf32>
    %903 = math.tanh %902 : vector<2x128xf32>
    %cst_357 = arith.constant 5.000000e-01 : f32
    %904 = vector.broadcast %cst_357 : f32 to vector<2x128xf32>
    %905 = arith.mulf %904, %903 : vector<2x128xf32>
    %cst_358 = arith.constant 5.000000e-01 : f32
    %906 = vector.broadcast %cst_358 : f32 to vector<2x128xf32>
    %907 = arith.addf %905, %906 : vector<2x128xf32>
    %908 = vector.extract_strided_slice %886 {offsets = [0, 256], sizes = [2, 128], strides = [1, 1]} : vector<2x512xf32> to vector<2x128xf32>
    %909 = math.tanh %908 : vector<2x128xf32>
    %910 = vector.extract_strided_slice %886 {offsets = [0, 384], sizes = [2, 128], strides = [1, 1]} : vector<2x512xf32> to vector<2x128xf32>
    %cst_359 = arith.constant 5.000000e-01 : f32
    %911 = vector.broadcast %cst_359 : f32 to vector<2x128xf32>
    %912 = arith.mulf %911, %910 : vector<2x128xf32>
    %913 = math.tanh %912 : vector<2x128xf32>
    %cst_360 = arith.constant 5.000000e-01 : f32
    %914 = vector.broadcast %cst_360 : f32 to vector<2x128xf32>
    %915 = arith.mulf %914, %913 : vector<2x128xf32>
    %cst_361 = arith.constant 5.000000e-01 : f32
    %916 = vector.broadcast %cst_361 : f32 to vector<2x128xf32>
    %917 = arith.addf %915, %916 : vector<2x128xf32>
    %918 = arith.mulf %907, %848 : vector<2x128xf32>
    %919 = arith.mulf %899, %909 : vector<2x128xf32>
    %920 = arith.addf %918, %919 : vector<2x128xf32>
    %921 = math.tanh %920 : vector<2x128xf32>
    %922 = arith.mulf %917, %921 : vector<2x128xf32>
    %923 = vector.extract_strided_slice %891 {offsets = [0, 0], sizes = [2, 128], strides = [1, 1]} : vector<2x512xf32> to vector<2x128xf32>
    %cst_362 = arith.constant 5.000000e-01 : f32
    %924 = vector.broadcast %cst_362 : f32 to vector<2x128xf32>
    %925 = arith.mulf %924, %923 : vector<2x128xf32>
    %926 = math.tanh %925 : vector<2x128xf32>
    %cst_363 = arith.constant 5.000000e-01 : f32
    %927 = vector.broadcast %cst_363 : f32 to vector<2x128xf32>
    %928 = arith.mulf %927, %926 : vector<2x128xf32>
    %cst_364 = arith.constant 5.000000e-01 : f32
    %929 = vector.broadcast %cst_364 : f32 to vector<2x128xf32>
    %930 = arith.addf %928, %929 : vector<2x128xf32>
    %931 = vector.extract_strided_slice %891 {offsets = [0, 128], sizes = [2, 128], strides = [1, 1]} : vector<2x512xf32> to vector<2x128xf32>
    %cst_365 = arith.constant 5.000000e-01 : f32
    %932 = vector.broadcast %cst_365 : f32 to vector<2x128xf32>
    %933 = arith.mulf %932, %931 : vector<2x128xf32>
    %934 = math.tanh %933 : vector<2x128xf32>
    %cst_366 = arith.constant 5.000000e-01 : f32
    %935 = vector.broadcast %cst_366 : f32 to vector<2x128xf32>
    %936 = arith.mulf %935, %934 : vector<2x128xf32>
    %cst_367 = arith.constant 5.000000e-01 : f32
    %937 = vector.broadcast %cst_367 : f32 to vector<2x128xf32>
    %938 = arith.addf %936, %937 : vector<2x128xf32>
    %939 = vector.extract_strided_slice %891 {offsets = [0, 256], sizes = [2, 128], strides = [1, 1]} : vector<2x512xf32> to vector<2x128xf32>
    %940 = math.tanh %939 : vector<2x128xf32>
    %941 = vector.extract_strided_slice %891 {offsets = [0, 384], sizes = [2, 128], strides = [1, 1]} : vector<2x512xf32> to vector<2x128xf32>
    %cst_368 = arith.constant 5.000000e-01 : f32
    %942 = vector.broadcast %cst_368 : f32 to vector<2x128xf32>
    %943 = arith.mulf %942, %941 : vector<2x128xf32>
    %944 = math.tanh %943 : vector<2x128xf32>
    %cst_369 = arith.constant 5.000000e-01 : f32
    %945 = vector.broadcast %cst_369 : f32 to vector<2x128xf32>
    %946 = arith.mulf %945, %944 : vector<2x128xf32>
    %cst_370 = arith.constant 5.000000e-01 : f32
    %947 = vector.broadcast %cst_370 : f32 to vector<2x128xf32>
    %948 = arith.addf %946, %947 : vector<2x128xf32>
    %949 = arith.mulf %938, %879 : vector<2x128xf32>
    %950 = arith.mulf %930, %940 : vector<2x128xf32>
    %951 = arith.addf %949, %950 : vector<2x128xf32>
    %952 = math.tanh %951 : vector<2x128xf32>
    %953 = arith.mulf %948, %952 : vector<2x128xf32>
    %c10_371 = arith.constant 10 : index
    %c0_372 = arith.constant 0 : index
    %954 = vector.load %arg11[%c10_371, %c0_372] : memref<16x1024xf32, #tpu.memory_space<vmem>>, vector<2x512xf32>
    %955 = arith.truncf %922 : vector<2x128xf32> to vector<2x128xbf16>
    %c0_373 = arith.constant 0 : index
    %c0_374 = arith.constant 0 : index
    %956 = vector.load %arg7[%c0_373, %c0_374] : memref<128x512xbf16, #tpu.memory_space<vmem>>, vector<128x512xbf16>
    %cst_375 = arith.constant dense<0.000000e+00> : vector<2x512xf32>
    %957 = tpu.matmul %955, %956, %cst_375 {dimension_numbers = #tpu.dot_dimension_numbers<[1], [0], [0], [1], [0, 0, 1, 1], [], []>} : vector<2x128xbf16>, vector<128x512xbf16>, vector<2x512xf32> -> vector<2x512xf32>
    %958 = arith.addf %954, %957 : vector<2x512xf32>
    %c4_376 = arith.constant 4 : index
    %c512_377 = arith.constant 512 : index
    %959 = vector.load %arg11[%c4_376, %c512_377] : memref<16x1024xf32, #tpu.memory_space<vmem>>, vector<2x512xf32>
    %960 = arith.truncf %953 : vector<2x128xf32> to vector<2x128xbf16>
    %c0_378 = arith.constant 0 : index
    %c0_379 = arith.constant 0 : index
    %961 = vector.load %arg8[%c0_378, %c0_379] : memref<128x512xbf16, #tpu.memory_space<vmem>>, vector<128x512xbf16>
    %cst_380 = arith.constant dense<0.000000e+00> : vector<2x512xf32>
    %962 = tpu.matmul %960, %961, %cst_380 {dimension_numbers = #tpu.dot_dimension_numbers<[1], [0], [0], [1], [0, 0, 1, 1], [], []>} : vector<2x128xbf16>, vector<128x512xbf16>, vector<2x512xf32> -> vector<2x512xf32>
    %963 = arith.addf %959, %962 : vector<2x512xf32>
    %964 = vector.extract_strided_slice %958 {offsets = [0, 0], sizes = [2, 128], strides = [1, 1]} : vector<2x512xf32> to vector<2x128xf32>
    %cst_381 = arith.constant 5.000000e-01 : f32
    %965 = vector.broadcast %cst_381 : f32 to vector<2x128xf32>
    %966 = arith.mulf %965, %964 : vector<2x128xf32>
    %967 = math.tanh %966 : vector<2x128xf32>
    %cst_382 = arith.constant 5.000000e-01 : f32
    %968 = vector.broadcast %cst_382 : f32 to vector<2x128xf32>
    %969 = arith.mulf %968, %967 : vector<2x128xf32>
    %cst_383 = arith.constant 5.000000e-01 : f32
    %970 = vector.broadcast %cst_383 : f32 to vector<2x128xf32>
    %971 = arith.addf %969, %970 : vector<2x128xf32>
    %972 = vector.extract_strided_slice %958 {offsets = [0, 128], sizes = [2, 128], strides = [1, 1]} : vector<2x512xf32> to vector<2x128xf32>
    %cst_384 = arith.constant 5.000000e-01 : f32
    %973 = vector.broadcast %cst_384 : f32 to vector<2x128xf32>
    %974 = arith.mulf %973, %972 : vector<2x128xf32>
    %975 = math.tanh %974 : vector<2x128xf32>
    %cst_385 = arith.constant 5.000000e-01 : f32
    %976 = vector.broadcast %cst_385 : f32 to vector<2x128xf32>
    %977 = arith.mulf %976, %975 : vector<2x128xf32>
    %cst_386 = arith.constant 5.000000e-01 : f32
    %978 = vector.broadcast %cst_386 : f32 to vector<2x128xf32>
    %979 = arith.addf %977, %978 : vector<2x128xf32>
    %980 = vector.extract_strided_slice %958 {offsets = [0, 256], sizes = [2, 128], strides = [1, 1]} : vector<2x512xf32> to vector<2x128xf32>
    %981 = math.tanh %980 : vector<2x128xf32>
    %982 = vector.extract_strided_slice %958 {offsets = [0, 384], sizes = [2, 128], strides = [1, 1]} : vector<2x512xf32> to vector<2x128xf32>
    %cst_387 = arith.constant 5.000000e-01 : f32
    %983 = vector.broadcast %cst_387 : f32 to vector<2x128xf32>
    %984 = arith.mulf %983, %982 : vector<2x128xf32>
    %985 = math.tanh %984 : vector<2x128xf32>
    %cst_388 = arith.constant 5.000000e-01 : f32
    %986 = vector.broadcast %cst_388 : f32 to vector<2x128xf32>
    %987 = arith.mulf %986, %985 : vector<2x128xf32>
    %cst_389 = arith.constant 5.000000e-01 : f32
    %988 = vector.broadcast %cst_389 : f32 to vector<2x128xf32>
    %989 = arith.addf %987, %988 : vector<2x128xf32>
    %990 = arith.mulf %979, %920 : vector<2x128xf32>
    %991 = arith.mulf %971, %981 : vector<2x128xf32>
    %992 = arith.addf %990, %991 : vector<2x128xf32>
    %993 = math.tanh %992 : vector<2x128xf32>
    %994 = arith.mulf %989, %993 : vector<2x128xf32>
    %995 = vector.extract_strided_slice %963 {offsets = [0, 0], sizes = [2, 128], strides = [1, 1]} : vector<2x512xf32> to vector<2x128xf32>
    %cst_390 = arith.constant 5.000000e-01 : f32
    %996 = vector.broadcast %cst_390 : f32 to vector<2x128xf32>
    %997 = arith.mulf %996, %995 : vector<2x128xf32>
    %998 = math.tanh %997 : vector<2x128xf32>
    %cst_391 = arith.constant 5.000000e-01 : f32
    %999 = vector.broadcast %cst_391 : f32 to vector<2x128xf32>
    %1000 = arith.mulf %999, %998 : vector<2x128xf32>
    %cst_392 = arith.constant 5.000000e-01 : f32
    %1001 = vector.broadcast %cst_392 : f32 to vector<2x128xf32>
    %1002 = arith.addf %1000, %1001 : vector<2x128xf32>
    %1003 = vector.extract_strided_slice %963 {offsets = [0, 128], sizes = [2, 128], strides = [1, 1]} : vector<2x512xf32> to vector<2x128xf32>
    %cst_393 = arith.constant 5.000000e-01 : f32
    %1004 = vector.broadcast %cst_393 : f32 to vector<2x128xf32>
    %1005 = arith.mulf %1004, %1003 : vector<2x128xf32>
    %1006 = math.tanh %1005 : vector<2x128xf32>
    %cst_394 = arith.constant 5.000000e-01 : f32
    %1007 = vector.broadcast %cst_394 : f32 to vector<2x128xf32>
    %1008 = arith.mulf %1007, %1006 : vector<2x128xf32>
    %cst_395 = arith.constant 5.000000e-01 : f32
    %1009 = vector.broadcast %cst_395 : f32 to vector<2x128xf32>
    %1010 = arith.addf %1008, %1009 : vector<2x128xf32>
    %1011 = vector.extract_strided_slice %963 {offsets = [0, 256], sizes = [2, 128], strides = [1, 1]} : vector<2x512xf32> to vector<2x128xf32>
    %1012 = math.tanh %1011 : vector<2x128xf32>
    %1013 = vector.extract_strided_slice %963 {offsets = [0, 384], sizes = [2, 128], strides = [1, 1]} : vector<2x512xf32> to vector<2x128xf32>
    %cst_396 = arith.constant 5.000000e-01 : f32
    %1014 = vector.broadcast %cst_396 : f32 to vector<2x128xf32>
    %1015 = arith.mulf %1014, %1013 : vector<2x128xf32>
    %1016 = math.tanh %1015 : vector<2x128xf32>
    %cst_397 = arith.constant 5.000000e-01 : f32
    %1017 = vector.broadcast %cst_397 : f32 to vector<2x128xf32>
    %1018 = arith.mulf %1017, %1016 : vector<2x128xf32>
    %cst_398 = arith.constant 5.000000e-01 : f32
    %1019 = vector.broadcast %cst_398 : f32 to vector<2x128xf32>
    %1020 = arith.addf %1018, %1019 : vector<2x128xf32>
    %1021 = arith.mulf %1010, %951 : vector<2x128xf32>
    %1022 = arith.mulf %1002, %1012 : vector<2x128xf32>
    %1023 = arith.addf %1021, %1022 : vector<2x128xf32>
    %1024 = math.tanh %1023 : vector<2x128xf32>
    %1025 = arith.mulf %1020, %1024 : vector<2x128xf32>
    %c12_399 = arith.constant 12 : index
    %c0_400 = arith.constant 0 : index
    %1026 = vector.load %arg11[%c12_399, %c0_400] : memref<16x1024xf32, #tpu.memory_space<vmem>>, vector<2x512xf32>
    %1027 = arith.truncf %994 : vector<2x128xf32> to vector<2x128xbf16>
    %c0_401 = arith.constant 0 : index
    %c0_402 = arith.constant 0 : index
    %1028 = vector.load %arg7[%c0_401, %c0_402] : memref<128x512xbf16, #tpu.memory_space<vmem>>, vector<128x512xbf16>
    %cst_403 = arith.constant dense<0.000000e+00> : vector<2x512xf32>
    %1029 = tpu.matmul %1027, %1028, %cst_403 {dimension_numbers = #tpu.dot_dimension_numbers<[1], [0], [0], [1], [0, 0, 1, 1], [], []>} : vector<2x128xbf16>, vector<128x512xbf16>, vector<2x512xf32> -> vector<2x512xf32>
    %1030 = arith.addf %1026, %1029 : vector<2x512xf32>
    %c2_404 = arith.constant 2 : index
    %c512_405 = arith.constant 512 : index
    %1031 = vector.load %arg11[%c2_404, %c512_405] : memref<16x1024xf32, #tpu.memory_space<vmem>>, vector<2x512xf32>
    %1032 = arith.truncf %1025 : vector<2x128xf32> to vector<2x128xbf16>
    %c0_406 = arith.constant 0 : index
    %c0_407 = arith.constant 0 : index
    %1033 = vector.load %arg8[%c0_406, %c0_407] : memref<128x512xbf16, #tpu.memory_space<vmem>>, vector<128x512xbf16>
    %cst_408 = arith.constant dense<0.000000e+00> : vector<2x512xf32>
    %1034 = tpu.matmul %1032, %1033, %cst_408 {dimension_numbers = #tpu.dot_dimension_numbers<[1], [0], [0], [1], [0, 0, 1, 1], [], []>} : vector<2x128xbf16>, vector<128x512xbf16>, vector<2x512xf32> -> vector<2x512xf32>
    %1035 = arith.addf %1031, %1034 : vector<2x512xf32>
    %1036 = vector.extract_strided_slice %1030 {offsets = [0, 0], sizes = [2, 128], strides = [1, 1]} : vector<2x512xf32> to vector<2x128xf32>
    %cst_409 = arith.constant 5.000000e-01 : f32
    %1037 = vector.broadcast %cst_409 : f32 to vector<2x128xf32>
    %1038 = arith.mulf %1037, %1036 : vector<2x128xf32>
    %1039 = math.tanh %1038 : vector<2x128xf32>
    %cst_410 = arith.constant 5.000000e-01 : f32
    %1040 = vector.broadcast %cst_410 : f32 to vector<2x128xf32>
    %1041 = arith.mulf %1040, %1039 : vector<2x128xf32>
    %cst_411 = arith.constant 5.000000e-01 : f32
    %1042 = vector.broadcast %cst_411 : f32 to vector<2x128xf32>
    %1043 = arith.addf %1041, %1042 : vector<2x128xf32>
    %1044 = vector.extract_strided_slice %1030 {offsets = [0, 128], sizes = [2, 128], strides = [1, 1]} : vector<2x512xf32> to vector<2x128xf32>
    %cst_412 = arith.constant 5.000000e-01 : f32
    %1045 = vector.broadcast %cst_412 : f32 to vector<2x128xf32>
    %1046 = arith.mulf %1045, %1044 : vector<2x128xf32>
    %1047 = math.tanh %1046 : vector<2x128xf32>
    %cst_413 = arith.constant 5.000000e-01 : f32
    %1048 = vector.broadcast %cst_413 : f32 to vector<2x128xf32>
    %1049 = arith.mulf %1048, %1047 : vector<2x128xf32>
    %cst_414 = arith.constant 5.000000e-01 : f32
    %1050 = vector.broadcast %cst_414 : f32 to vector<2x128xf32>
    %1051 = arith.addf %1049, %1050 : vector<2x128xf32>
    %1052 = vector.extract_strided_slice %1030 {offsets = [0, 256], sizes = [2, 128], strides = [1, 1]} : vector<2x512xf32> to vector<2x128xf32>
    %1053 = math.tanh %1052 : vector<2x128xf32>
    %1054 = vector.extract_strided_slice %1030 {offsets = [0, 384], sizes = [2, 128], strides = [1, 1]} : vector<2x512xf32> to vector<2x128xf32>
    %cst_415 = arith.constant 5.000000e-01 : f32
    %1055 = vector.broadcast %cst_415 : f32 to vector<2x128xf32>
    %1056 = arith.mulf %1055, %1054 : vector<2x128xf32>
    %1057 = math.tanh %1056 : vector<2x128xf32>
    %cst_416 = arith.constant 5.000000e-01 : f32
    %1058 = vector.broadcast %cst_416 : f32 to vector<2x128xf32>
    %1059 = arith.mulf %1058, %1057 : vector<2x128xf32>
    %cst_417 = arith.constant 5.000000e-01 : f32
    %1060 = vector.broadcast %cst_417 : f32 to vector<2x128xf32>
    %1061 = arith.addf %1059, %1060 : vector<2x128xf32>
    %1062 = arith.mulf %1051, %992 : vector<2x128xf32>
    %1063 = arith.mulf %1043, %1053 : vector<2x128xf32>
    %1064 = arith.addf %1062, %1063 : vector<2x128xf32>
    %1065 = math.tanh %1064 : vector<2x128xf32>
    %1066 = arith.mulf %1061, %1065 : vector<2x128xf32>
    %1067 = vector.extract_strided_slice %1035 {offsets = [0, 0], sizes = [2, 128], strides = [1, 1]} : vector<2x512xf32> to vector<2x128xf32>
    %cst_418 = arith.constant 5.000000e-01 : f32
    %1068 = vector.broadcast %cst_418 : f32 to vector<2x128xf32>
    %1069 = arith.mulf %1068, %1067 : vector<2x128xf32>
    %1070 = math.tanh %1069 : vector<2x128xf32>
    %cst_419 = arith.constant 5.000000e-01 : f32
    %1071 = vector.broadcast %cst_419 : f32 to vector<2x128xf32>
    %1072 = arith.mulf %1071, %1070 : vector<2x128xf32>
    %cst_420 = arith.constant 5.000000e-01 : f32
    %1073 = vector.broadcast %cst_420 : f32 to vector<2x128xf32>
    %1074 = arith.addf %1072, %1073 : vector<2x128xf32>
    %1075 = vector.extract_strided_slice %1035 {offsets = [0, 128], sizes = [2, 128], strides = [1, 1]} : vector<2x512xf32> to vector<2x128xf32>
    %cst_421 = arith.constant 5.000000e-01 : f32
    %1076 = vector.broadcast %cst_421 : f32 to vector<2x128xf32>
    %1077 = arith.mulf %1076, %1075 : vector<2x128xf32>
    %1078 = math.tanh %1077 : vector<2x128xf32>
    %cst_422 = arith.constant 5.000000e-01 : f32
    %1079 = vector.broadcast %cst_422 : f32 to vector<2x128xf32>
    %1080 = arith.mulf %1079, %1078 : vector<2x128xf32>
    %cst_423 = arith.constant 5.000000e-01 : f32
    %1081 = vector.broadcast %cst_423 : f32 to vector<2x128xf32>
    %1082 = arith.addf %1080, %1081 : vector<2x128xf32>
    %1083 = vector.extract_strided_slice %1035 {offsets = [0, 256], sizes = [2, 128], strides = [1, 1]} : vector<2x512xf32> to vector<2x128xf32>
    %1084 = math.tanh %1083 : vector<2x128xf32>
    %1085 = vector.extract_strided_slice %1035 {offsets = [0, 384], sizes = [2, 128], strides = [1, 1]} : vector<2x512xf32> to vector<2x128xf32>
    %cst_424 = arith.constant 5.000000e-01 : f32
    %1086 = vector.broadcast %cst_424 : f32 to vector<2x128xf32>
    %1087 = arith.mulf %1086, %1085 : vector<2x128xf32>
    %1088 = math.tanh %1087 : vector<2x128xf32>
    %cst_425 = arith.constant 5.000000e-01 : f32
    %1089 = vector.broadcast %cst_425 : f32 to vector<2x128xf32>
    %1090 = arith.mulf %1089, %1088 : vector<2x128xf32>
    %cst_426 = arith.constant 5.000000e-01 : f32
    %1091 = vector.broadcast %cst_426 : f32 to vector<2x128xf32>
    %1092 = arith.addf %1090, %1091 : vector<2x128xf32>
    %1093 = arith.mulf %1082, %1023 : vector<2x128xf32>
    %1094 = arith.mulf %1074, %1084 : vector<2x128xf32>
    %1095 = arith.addf %1093, %1094 : vector<2x128xf32>
    %1096 = math.tanh %1095 : vector<2x128xf32>
    %1097 = arith.mulf %1092, %1096 : vector<2x128xf32>
    %c14_427 = arith.constant 14 : index
    %c0_428 = arith.constant 0 : index
    %1098 = vector.load %arg11[%c14_427, %c0_428] : memref<16x1024xf32, #tpu.memory_space<vmem>>, vector<2x512xf32>
    %1099 = arith.truncf %1066 : vector<2x128xf32> to vector<2x128xbf16>
    %c0_429 = arith.constant 0 : index
    %c0_430 = arith.constant 0 : index
    %1100 = vector.load %arg7[%c0_429, %c0_430] : memref<128x512xbf16, #tpu.memory_space<vmem>>, vector<128x512xbf16>
    %cst_431 = arith.constant dense<0.000000e+00> : vector<2x512xf32>
    %1101 = tpu.matmul %1099, %1100, %cst_431 {dimension_numbers = #tpu.dot_dimension_numbers<[1], [0], [0], [1], [0, 0, 1, 1], [], []>} : vector<2x128xbf16>, vector<128x512xbf16>, vector<2x512xf32> -> vector<2x512xf32>
    %1102 = arith.addf %1098, %1101 : vector<2x512xf32>
    %c0_432 = arith.constant 0 : index
    %c512_433 = arith.constant 512 : index
    %1103 = vector.load %arg11[%c0_432, %c512_433] : memref<16x1024xf32, #tpu.memory_space<vmem>>, vector<2x512xf32>
    %1104 = arith.truncf %1097 : vector<2x128xf32> to vector<2x128xbf16>
    %c0_434 = arith.constant 0 : index
    %c0_435 = arith.constant 0 : index
    %1105 = vector.load %arg8[%c0_434, %c0_435] : memref<128x512xbf16, #tpu.memory_space<vmem>>, vector<128x512xbf16>
    %cst_436 = arith.constant dense<0.000000e+00> : vector<2x512xf32>
    %1106 = tpu.matmul %1104, %1105, %cst_436 {dimension_numbers = #tpu.dot_dimension_numbers<[1], [0], [0], [1], [0, 0, 1, 1], [], []>} : vector<2x128xbf16>, vector<128x512xbf16>, vector<2x512xf32> -> vector<2x512xf32>
    %1107 = arith.addf %1103, %1106 : vector<2x512xf32>
    %1108 = vector.extract_strided_slice %1102 {offsets = [0, 0], sizes = [2, 128], strides = [1, 1]} : vector<2x512xf32> to vector<2x128xf32>
    %cst_437 = arith.constant 5.000000e-01 : f32
    %1109 = vector.broadcast %cst_437 : f32 to vector<2x128xf32>
    %1110 = arith.mulf %1109, %1108 : vector<2x128xf32>
    %1111 = math.tanh %1110 : vector<2x128xf32>
    %cst_438 = arith.constant 5.000000e-01 : f32
    %1112 = vector.broadcast %cst_438 : f32 to vector<2x128xf32>
    %1113 = arith.mulf %1112, %1111 : vector<2x128xf32>
    %cst_439 = arith.constant 5.000000e-01 : f32
    %1114 = vector.broadcast %cst_439 : f32 to vector<2x128xf32>
    %1115 = arith.addf %1113, %1114 : vector<2x128xf32>
    %1116 = vector.extract_strided_slice %1102 {offsets = [0, 128], sizes = [2, 128], strides = [1, 1]} : vector<2x512xf32> to vector<2x128xf32>
    %cst_440 = arith.constant 5.000000e-01 : f32
    %1117 = vector.broadcast %cst_440 : f32 to vector<2x128xf32>
    %1118 = arith.mulf %1117, %1116 : vector<2x128xf32>
    %1119 = math.tanh %1118 : vector<2x128xf32>
    %cst_441 = arith.constant 5.000000e-01 : f32
    %1120 = vector.broadcast %cst_441 : f32 to vector<2x128xf32>
    %1121 = arith.mulf %1120, %1119 : vector<2x128xf32>
    %cst_442 = arith.constant 5.000000e-01 : f32
    %1122 = vector.broadcast %cst_442 : f32 to vector<2x128xf32>
    %1123 = arith.addf %1121, %1122 : vector<2x128xf32>
    %1124 = vector.extract_strided_slice %1102 {offsets = [0, 256], sizes = [2, 128], strides = [1, 1]} : vector<2x512xf32> to vector<2x128xf32>
    %1125 = math.tanh %1124 : vector<2x128xf32>
    %1126 = vector.extract_strided_slice %1102 {offsets = [0, 384], sizes = [2, 128], strides = [1, 1]} : vector<2x512xf32> to vector<2x128xf32>
    %cst_443 = arith.constant 5.000000e-01 : f32
    %1127 = vector.broadcast %cst_443 : f32 to vector<2x128xf32>
    %1128 = arith.mulf %1127, %1126 : vector<2x128xf32>
    %1129 = math.tanh %1128 : vector<2x128xf32>
    %cst_444 = arith.constant 5.000000e-01 : f32
    %1130 = vector.broadcast %cst_444 : f32 to vector<2x128xf32>
    %1131 = arith.mulf %1130, %1129 : vector<2x128xf32>
    %cst_445 = arith.constant 5.000000e-01 : f32
    %1132 = vector.broadcast %cst_445 : f32 to vector<2x128xf32>
    %1133 = arith.addf %1131, %1132 : vector<2x128xf32>
    %1134 = arith.mulf %1123, %1064 : vector<2x128xf32>
    %1135 = arith.mulf %1115, %1125 : vector<2x128xf32>
    %1136 = arith.addf %1134, %1135 : vector<2x128xf32>
    %1137 = math.tanh %1136 : vector<2x128xf32>
    %1138 = arith.mulf %1133, %1137 : vector<2x128xf32>
    %1139 = vector.extract_strided_slice %1107 {offsets = [0, 0], sizes = [2, 128], strides = [1, 1]} : vector<2x512xf32> to vector<2x128xf32>
    %cst_446 = arith.constant 5.000000e-01 : f32
    %1140 = vector.broadcast %cst_446 : f32 to vector<2x128xf32>
    %1141 = arith.mulf %1140, %1139 : vector<2x128xf32>
    %1142 = math.tanh %1141 : vector<2x128xf32>
    %cst_447 = arith.constant 5.000000e-01 : f32
    %1143 = vector.broadcast %cst_447 : f32 to vector<2x128xf32>
    %1144 = arith.mulf %1143, %1142 : vector<2x128xf32>
    %cst_448 = arith.constant 5.000000e-01 : f32
    %1145 = vector.broadcast %cst_448 : f32 to vector<2x128xf32>
    %1146 = arith.addf %1144, %1145 : vector<2x128xf32>
    %1147 = vector.extract_strided_slice %1107 {offsets = [0, 128], sizes = [2, 128], strides = [1, 1]} : vector<2x512xf32> to vector<2x128xf32>
    %cst_449 = arith.constant 5.000000e-01 : f32
    %1148 = vector.broadcast %cst_449 : f32 to vector<2x128xf32>
    %1149 = arith.mulf %1148, %1147 : vector<2x128xf32>
    %1150 = math.tanh %1149 : vector<2x128xf32>
    %cst_450 = arith.constant 5.000000e-01 : f32
    %1151 = vector.broadcast %cst_450 : f32 to vector<2x128xf32>
    %1152 = arith.mulf %1151, %1150 : vector<2x128xf32>
    %cst_451 = arith.constant 5.000000e-01 : f32
    %1153 = vector.broadcast %cst_451 : f32 to vector<2x128xf32>
    %1154 = arith.addf %1152, %1153 : vector<2x128xf32>
    %1155 = vector.extract_strided_slice %1107 {offsets = [0, 256], sizes = [2, 128], strides = [1, 1]} : vector<2x512xf32> to vector<2x128xf32>
    %1156 = math.tanh %1155 : vector<2x128xf32>
    %1157 = vector.extract_strided_slice %1107 {offsets = [0, 384], sizes = [2, 128], strides = [1, 1]} : vector<2x512xf32> to vector<2x128xf32>
    %cst_452 = arith.constant 5.000000e-01 : f32
    %1158 = vector.broadcast %cst_452 : f32 to vector<2x128xf32>
    %1159 = arith.mulf %1158, %1157 : vector<2x128xf32>
    %1160 = math.tanh %1159 : vector<2x128xf32>
    %cst_453 = arith.constant 5.000000e-01 : f32
    %1161 = vector.broadcast %cst_453 : f32 to vector<2x128xf32>
    %1162 = arith.mulf %1161, %1160 : vector<2x128xf32>
    %cst_454 = arith.constant 5.000000e-01 : f32
    %1163 = vector.broadcast %cst_454 : f32 to vector<2x128xf32>
    %1164 = arith.addf %1162, %1163 : vector<2x128xf32>
    %1165 = arith.mulf %1154, %1095 : vector<2x128xf32>
    %1166 = arith.mulf %1146, %1156 : vector<2x128xf32>
    %1167 = arith.addf %1165, %1166 : vector<2x128xf32>
    %1168 = math.tanh %1167 : vector<2x128xf32>
    %1169 = arith.mulf %1164, %1168 : vector<2x128xf32>
    %c0_455 = arith.constant 0 : index
    %c0_456 = arith.constant 0 : index
    %1170 = vector.load %arg9[%c0_455, %c0_456] : memref<2x256xf32, #tpu.memory_space<vmem>>, vector<2x128xf32>
    tpu.vector_store %arg9[%c0_455, %c0_456], %1138 {strides = array<i32>} : memref<2x256xf32, #tpu.memory_space<vmem>>, vector<2x128xf32>,
    %c0_457 = arith.constant 0 : index
    %c128 = arith.constant 128 : index
    %1171 = vector.load %arg9[%c0_457, %c128] : memref<2x256xf32, #tpu.memory_space<vmem>>, vector<2x128xf32>
    tpu.vector_store %arg9[%c0_457, %c128], %1169 {strides = array<i32>} : memref<2x256xf32, #tpu.memory_space<vmem>>, vector<2x128xf32>,
    return
  }
}

</mosaic_0001>

<bundles_post_ra>
// kernel: tpu_custom_call.1
= control target key start
LH: loop header
LB: loop body
LE: loop exit
PB: predicated region body
PF: predicated region fallthrough
CT: control target
= control target key end

     0   :  { %14 = vsyncpa [#allocation5], 0  ;;  %s9452_s0 = inlined_call_operand.hbm [shape: bf16[16,32], index: 0, kind: input, shape index: {}]   ;;  %s9453_s1 = inlined_call_operand.hbm [shape: bf16[32,1024], index: 1, kind: input, shape index: {}]   ;;  %s9454_s2 = inlined_call_operand.hbm [shape: f32[1,1024], index: 2, kind: input, shape index: {}]   ;;  %s9455_s3 = inlined_call_operand.hbm [shape: bf16[128,512], index: 3, kind: input, shape index: {}]   ;;  %s9456_s4 = inlined_call_operand.hbm [shape: bf16[128,512], index: 4, kind: input, shape index: {}]   ;;  %s9457_s5 = inlined_call_operand.hbm [shape: bf16[256,1024], index: 5, kind: input, shape index: {}]   ;;  %s9458_s6 = inlined_call_operand.vmem [shape: f32[1,1024], index: 6, kind: input, shape index: {}]   ;;  %s9459_s7 = inlined_call_operand.hbm [shape: bf16[128,512], index: 7, kind: input, shape index: {}]   ;;  %s9460_s8 = inlined_call_operand.hbm [shape: bf16[128,512], index: 8, kind: input, shape index: {}]   ;;  %s9461_s9 = inlined_call_operand.hbm [shape: f32[2,256], index: 9, kind: output, shape index: {}]  }
   0x1   :  { %15 = vsyncpa [#allocation8], 0 }
   0x2   :  { %16 = vsyncpa [#allocation11], 0 }
   0x3   :  { %17 = vsyncpa [#allocation14], 0 }
   0x4   :  { %18 = vsyncpa [#allocation17], 0 }
   0x5   :  { %19 = vsyncpa [#allocation6], 0  ;;  %s7462_s30 = smov [#allocation7]   ;;  %s7252_s13 = scalar_lea.hbm %s9453_s1, 2048 }
   0x6   :  { %s37_s10 = sshll.u32 %s7462_s30, 4  ;;  %p7253_p0 = scmp.ne.s32.totalorder %s9453_s1, %s7252_s13  ;;  %s38_s10 = int_to_ptr.vmem [resolvable:$true] %s37_s10 }
   0x7   :  { %p7256_p1 = scmp.lt.u32.totalorder %s7252_s13, %s9453_s1 }
   0x9   :  { %p7258_p2 = pnand %p7256_p1, %p7253_p0 }
   0xb   :  { %7261 = shalt.err (!%p7258_p2)
}
   0xc   :  { %s7262_s18 = scalar_lea.vmem %s38_s10, 2048  ;;  %p7267_p4 = scmp.lt.s32.totalorder %s38_s10, %s38_s10 }
   0xd   :  { %p7263_p3 = scmp.ne.s32.totalorder %s38_s10, %s7262_s18  ;;  %p7268_p5 = scmp.lt.s32.totalorder %s7262_s18, %s7262_s18 }
   0xf   :  { %p7269_p6 = por %p7268_p5, %p7267_p4 }
  0x11   :  { %p7270_p7 = pnand %p7269_p6, %p7263_p3 }
  0x13   :  { %7273 = shalt.err (!%p7270_p7)
}
  0x14   :  { %s7463_s19 = smov 512   ;;  %s7464_s20 = smov 32  }
  0x15   :  { %43 = dma.hbm_to_vmem [thread:$0]  %s9453_s1, 2048, %s38_s10, [#allocation8], %s7463_s19, %s7463_s19, %s7464_s20  }
  0x16   :  { %s7465_s23 = smov [#allocation10]   ;;  %s7274_s27 = scalar_lea.hbm %s9455_s3, 4096 }
  0x17   :  { %s59_s24 = sshll.u32 %s7465_s23, 4  ;;  %p7275_p8 = scmp.ne.s32.totalorder %s9455_s3, %s7274_s27  ;;  %s60_s24 = int_to_ptr.vmem [resolvable:$true] %s59_s24 }
  0x18   :  { %p7278_p9 = scmp.lt.u32.totalorder %s7274_s27, %s9455_s3 }
  0x1a   :  { %p7280_p10 = pnand %p7278_p9, %p7275_p8 }
  0x1c   :  { %7283 = shalt.err (!%p7280_p10)
}
  0x1d   :  { %s7284_s12 = scalar_lea.vmem %s60_s24, 4096  ;;  %p7289_p12 = scmp.lt.s32.totalorder %s60_s24, %s60_s24 }
  0x1e   :  { %p7285_p11 = scmp.ne.s32.totalorder %s60_s24, %s7284_s12  ;;  %p7290_p13 = scmp.lt.s32.totalorder %s7284_s12, %s7284_s12 }
  0x20   :  { %p7291_p0 = por %p7290_p13, %p7289_p12 }
  0x22   :  { %p7292_p1 = pnand %p7291_p0, %p7285_p11 }
  0x24   :  { %7295 = shalt.err (!%p7292_p1)
}
  0x25   :  { %s7466_s1 = smov 256   ;;  %s7467_s10 = smov 16  }
  0x26   :  { %65 = dma.hbm_to_vmem [thread:$0]  %s9455_s3, 4096, %s60_s24, [#allocation11], %s7466_s1, %s7466_s1, %s7467_s10  }
  0x27   :  { %s7468_s15 = smov [#allocation13]   ;;  %s7469_s17 = smov [#allocation4]  }
  0x28   :  { %s83_s16 = sshll.u32 %s7468_s15, 4  ;;  %s25_s18 = sshll.u32 %s7469_s17, 4  ;;  %s84_s16 = int_to_ptr.vmem [resolvable:$true] %s83_s16  ;;  %s7559_s18 = int_to_ptr.vmem [resolvable:$true] %s25_s18 }
  0x29   :  { %s7296_s23 = scalar_lea.hbm %s9457_s5, 16384 }
  0x2a   :  { %p7297_p2 = scmp.ne.s32.totalorder %s9457_s5, %s7296_s23  ;;  %p7300_p3 = scmp.lt.u32.totalorder %s7296_s23, %s9457_s5 }
  0x2c   :  { %p7302_p4 = pnand %p7300_p3, %p7297_p2 }
  0x2e   :  { %7305 = shalt.err (!%p7302_p4)
}
  0x2f   :  { %s7306_s3 = scalar_lea.vmem %s84_s16, 16384  ;;  %p7311_p6 = scmp.lt.s32.totalorder %s84_s16, %s84_s16 }
  0x30   :  { %p7307_p5 = scmp.ne.s32.totalorder %s84_s16, %s7306_s3  ;;  %p7312_p7 = scmp.lt.s32.totalorder %s7306_s3, %s7306_s3 }
  0x32   :  { %p7313_p8 = por %p7312_p7, %p7311_p6 }
  0x34   :  { %p7314_p9 = pnand %p7313_p8, %p7307_p5 }
  0x36   :  { %7317 = shalt.err (!%p7314_p9)
}
  0x37   :  { %89 = dma.hbm_to_vmem [thread:$0]  %s9457_s5, 16384, %s84_s16, [#allocation14], %s7463_s19, %s7463_s19, %s7464_s20  }
  0x38   :  { %s7318_s12 = scalar_lea.hbm %s9452_s0, 128 }
  0x39   :  { %p7319_p10 = scmp.ne.s32.totalorder %s9452_s0, %s7318_s12  ;;  %p7322_p11 = scmp.lt.u32.totalorder %s7318_s12, %s9452_s0 }
  0x3b   :  { %p7324_p12 = pnand %p7322_p11, %p7319_p10 }
  0x3d   :  { %7327 = shalt.err (!%p7324_p12)
}
  0x3e   :  { %s7328_s21 = scalar_lea.vmem %s7559_s18, 128  ;;  %p7333_p0 = scmp.lt.s32.totalorder %s7559_s18, %s7559_s18 }
  0x3f   :  { %p7329_p13 = scmp.ne.s32.totalorder %s7559_s18, %s7328_s21  ;;  %p7334_p1 = scmp.lt.s32.totalorder %s7328_s21, %s7328_s21 }
  0x41   :  { %p7335_p2 = por %p7334_p1, %p7333_p0 }
  0x43   :  { %p7336_p3 = pnand %p7335_p2, %p7329_p13 }
  0x45   :  { %7339 = shalt.err (!%p7336_p3)
}
  0x46   :  { %s7470_s5 = smov 64   ;;  %s7471_s19 = smov 4  }
  0x47   :  { %31 = dma.hbm_to_vmem [thread:$0]  %s9452_s0, 128, %s7559_s18, [#allocation5], %s7470_s5, %s7470_s5, %s7471_s19  }
  0x48   :  { %s7472_s22 = smov [#allocation9]   ;;  %s7473_s25 = smov [#allocation12]  }
  0x49   :  { %s50_s23 = sshll.u32 %s7472_s22, 4  ;;  %s71_s26 = sshll.u32 %s7473_s25, 4  ;;  %s51_s23 = int_to_ptr.vmem [resolvable:$true] %s50_s23  ;;  %s7593_s26 = int_to_ptr.vmem [resolvable:$true] %s71_s26 }
  0x4a   :  { %s7340_s3 = scalar_lea.hbm %s9454_s2, 128 }
  0x4b   :  { %p7341_p4 = scmp.ne.s32.totalorder %s9454_s2, %s7340_s3  ;;  %p7344_p5 = scmp.lt.u32.totalorder %s7340_s3, %s9454_s2 }
  0x4d   :  { %p7346_p6 = pnand %p7344_p5, %p7341_p4 }
  0x4f   :  { %7349 = shalt.err (!%p7346_p6)
}
  0x50   :  { %s7350_s0 = scalar_lea.vmem %s51_s23, 128  ;;  %p7355_p8 = scmp.lt.s32.totalorder %s51_s23, %s51_s23 }
  0x51   :  { %p7351_p7 = scmp.ne.s32.totalorder %s51_s23, %s7350_s0  ;;  %p7356_p9 = scmp.lt.s32.totalorder %s7350_s0, %s7350_s0 }
  0x53   :  { %p7357_p10 = por %p7356_p9, %p7355_p8 }
  0x55   :  { %p7358_p11 = pnand %p7357_p10, %p7351_p7 }
  0x57   :  { %7361 = shalt.err (!%p7358_p11)
}
  0x58   :  { %53 = dma.hbm_to_vmem [thread:$0]  %s9454_s2, 128, %s51_s23, [#allocation8]  }
  0x59   :  { %s7362_s15 = scalar_lea.hbm %s9456_s4, 4096 }
  0x5a   :  { %p7363_p12 = scmp.ne.s32.totalorder %s9456_s4, %s7362_s15  ;;  %p7366_p13 = scmp.lt.u32.totalorder %s7362_s15, %s9456_s4 }
  0x5c   :  { %p7368_p0 = pnand %p7366_p13, %p7363_p12 }
  0x5e   :  { %7371 = shalt.err (!%p7368_p0)
}
  0x5f   :  { %s7372_s20 = scalar_lea.vmem %s7593_s26, 4096  ;;  %p7377_p2 = scmp.lt.s32.totalorder %s7593_s26, %s7593_s26 }
  0x60   :  { %p7373_p1 = scmp.ne.s32.totalorder %s7593_s26, %s7372_s20  ;;  %p7378_p3 = scmp.lt.s32.totalorder %s7372_s20, %s7372_s20 }
  0x62   :  { %p7379_p4 = por %p7378_p3, %p7377_p2 }
  0x64   :  { %p7380_p5 = pnand %p7379_p4, %p7373_p1 }
  0x66   :  { %7383 = shalt.err (!%p7380_p5)
}
  0x67   :  { %77 = dma.hbm_to_vmem [thread:$0]  %s9456_s4, 4096, %s7593_s26, [#allocation11], %s7466_s1, %s7466_s1, %s7467_s10  }
  0x68   :  { %s7474_s22 = smov [#allocation15]   ;;  %s7475_s25 = smov [#allocation16]  }
  0x69   :  { %s97_s23 = sshll.u32 %s7474_s22, 4  ;;  %s109_s27 = sshll.u32 %s7475_s25, 4  ;;  %s98_s23 = int_to_ptr.vmem [resolvable:$true] %s97_s23  ;;  %s7627_s27 = int_to_ptr.vmem [resolvable:$true] %s109_s27 }
  0x6a   :  { %s7384_s24 = scalar_lea.hbm %s9459_s7, 4096 }
  0x6b   :  { %p7385_p6 = scmp.ne.s32.totalorder %s9459_s7, %s7384_s24  ;;  %p7388_p7 = scmp.lt.u32.totalorder %s7384_s24, %s9459_s7 }
  0x6d   :  { %p7390_p8 = pnand %p7388_p7, %p7385_p6 }
  0x6f   :  { %7393 = shalt.err (!%p7390_p8)
}
  0x70   :  { %s7394_s4 = scalar_lea.vmem %s98_s23, 4096  ;;  %p7399_p10 = scmp.lt.s32.totalorder %s98_s23, %s98_s23 }
  0x71   :  { %p7395_p9 = scmp.ne.s32.totalorder %s98_s23, %s7394_s4  ;;  %p7400_p11 = scmp.lt.s32.totalorder %s7394_s4, %s7394_s4 }
  0x73   :  { %p7401_p12 = por %p7400_p11, %p7399_p10 }
  0x75   :  { %p7402_p13 = pnand %p7401_p12, %p7395_p9 }
  0x77   :  { %7405 = shalt.err (!%p7402_p13)
}
  0x78   :  { %103 = dma.hbm_to_vmem [thread:$0]  %s9459_s7, 4096, %s98_s23, [#allocation14], %s7466_s1, %s7466_s1, %s7467_s10  }
  0x79   :  { %s7406_s14 = scalar_lea.hbm %s9460_s8, 4096 }
  0x7a   :  { %p7407_p0 = scmp.ne.s32.totalorder %s9460_s8, %s7406_s14  ;;  %p7410_p1 = scmp.lt.u32.totalorder %s7406_s14, %s9460_s8 }
  0x7c   :  { %p7412_p2 = pnand %p7410_p1, %p7407_p0 }
  0x7e   :  { %7415 = shalt.err (!%p7412_p2)
}
  0x7f   :  { %s7416_s19 = scalar_lea.vmem %s7627_s27, 4096  ;;  %p7421_p4 = scmp.lt.s32.totalorder %s7627_s27, %s7627_s27 }
  0x80   :  { %p7417_p3 = scmp.ne.s32.totalorder %s7627_s27, %s7416_s19  ;;  %p7422_p5 = scmp.lt.s32.totalorder %s7416_s19, %s7416_s19 }
  0x82   :  { %p7423_p6 = por %p7422_p5, %p7421_p4 }
  0x84   :  { %p7424_p7 = pnand %p7423_p6, %p7417_p3 }
  0x86   :  { %7427 = shalt.err (!%p7424_p7)
}
  0x87   :  { %115 = dma.hbm_to_vmem [thread:$0]  %s9460_s8, 4096, %s7627_s27, [#allocation17], %s7466_s1, %s7466_s1, %s7467_s10  }
  0x88   :  { %7450 = dma.done.wait [#allocation5], 128  }
  0x89   :  { %7451 = vsyncadd [#allocation5], 4294967168 }
  0x8a   :  { %7452 = dma.done.wait [#allocation8], 2176  }
  0x8b   :  { %7453 = vsyncadd [#allocation8], 4294965120 }
  0x8c   :  { %7454 = dma.done.wait [#allocation11], 8192  }
  0x8d   :  { %7455 = vsyncadd [#allocation11], 4294959104 }
  0x8e   :  { %7456 = dma.done.wait [#allocation14], 20480  }
  0x8f   :  { %7457 = vsyncadd [#allocation14], 4294946816 }
  0x90   :  { %7458 = dma.done.wait [#allocation17], 4096  }
  0x91   :  { %7459 = vsyncadd [#allocation17], 4294963200  ;;  %v9462_v0 = vmov 0   ;;  %v143_v1 = vld [vmem:[#allocation7] sm:$0xff]  ;;  %v144_v3 = vld [vmem:[#allocation7 + $0x8] sm:$0xff]  ;;  %vm286_vm0 = vcmask 261120  }
  0x92   :  { %322 = vmatprep.mubr.bf16.mxu0 %v9462_v0  ;;  %365 = vmatprep.mubr.bf16.mxu1 %v9462_v0  ;;  %v147_v2 = vld [vmem:[#allocation7 + $0x20] sm:$0xff]  ;;  %v148_v5 = vld [vmem:[#allocation7 + $0x28] sm:$0xff]  ;;  %v145_v15 = vld [vmem:[#allocation7 + $0x10] sm:$0xff]  ;;  %vm2823_vm1 = vcmask 1041408   ;;  %vm2825_vm2 = vcmask 1043456   ;;  %vm2827_vm3 = vcmask 1045504  }
  0x93   :  { %v6217_v4 = vcombine.high %v143_v1, %v147_v2  ;;  %v6216_v6 = vcombine.low %v143_v1, %v147_v2  ;;  %v151_v7 = vld [vmem:[#allocation7 + $0x40] sm:$0xff]  ;;  %v6219_v9 = vcombine.high %v144_v3, %v148_v5  ;;  %v6218_v10 = vcombine.low %v144_v3, %v148_v5  ;;  %v152_v12 = vld [vmem:[#allocation7 + $0x48] sm:$0xff]  ;;  %v149_v17 = vld [vmem:[#allocation7 + $0x30] sm:$0xff] }
  0x94   :  { %v155_v8 = vld [vmem:[#allocation7 + $0x60] sm:$0xff]  ;;  %v156_v13 = vld [vmem:[#allocation7 + $0x68] sm:$0xff]  ;;  %v146_v18 = vld [vmem:[#allocation7 + $0x18] sm:$0xff]  ;;  %v6221_v22 = vcombine.high %v145_v15, %v149_v17  ;;  %v6220_v28 = vcombine.low %v145_v15, %v149_v17 }
  0x95   :  { %v6225_v11 = vcombine.high %v151_v7, %v155_v8  ;;  %290 = vmatprep.subr.bf16.mxu0 %v6217_v4  ;;  %v6227_v14 = vcombine.high %v152_v12, %v156_v13  ;;  %333 = vmatprep.subr.bf16.mxu1 %v6219_v9  ;;  %v6224_v16 = vcombine.low %v151_v7, %v155_v8  ;;  %v150_v19 = vld [vmem:[#allocation7 + $0x38] sm:$0xff]  ;;  %v153_v23 = vld [vmem:[#allocation7 + $0x50] sm:$0xff] }
  0x96   :  { %291 = vmatpush1.bf16.msra.mxu0 %v6216_v6  ;;  %334 = vmatpush1.bf16.msra.mxu1 %v6218_v10  ;;  %v6226_v20 = vcombine.low %v152_v12, %v156_v13  ;;  %v6509_v21 = vld [vmem:[#allocation4] sm:$0xff]   ;;  %v157_v24 = vld [vmem:[#allocation7 + $0x70] sm:$0xff]  ;;  %v6223_v25 = vcombine.high %v146_v18, %v150_v19  ;;  %v6222_v29 = vcombine.low %v146_v18, %v150_v19 }
  0x97   :  { %292 = vmatprep.subr.bf16.mxu0 %v6225_v11  ;;  %335 = vmatprep.subr.bf16.mxu1 %v6227_v14  ;;  %v154_v26 = vld [vmem:[#allocation7 + $0x58] sm:$0xff]  ;;  %v6229_v30 = vcombine.high %v153_v23, %v157_v24  ;;  %v6228_v32 = vcombine.low %v153_v23, %v157_v24  ;;  %v7671_v35 = vld [vmem:[#allocation10 + $0xc] ss:$16 sps:$4 sm:$0xff]   ;;  %v7676_v37 = vld [vmem:[#allocation10 + $0x8] ss:$16 sps:$4 sm:$0xff]  }
  0x98   :  { %v158_v27 = vld [vmem:[#allocation7 + $0x78] sm:$0xff]  ;;  %v7682_v39 = vld [vmem:[#allocation10 + $0x2c] ss:$16 sps:$4 sm:$0xff]   ;;  %v7691_v41 = vld [vmem:[#allocation10 + $0x28] ss:$16 sps:$4 sm:$0xff]  }
  0x99   :  { %v6231_v31 = vcombine.high %v154_v26, %v158_v27  ;;  %v6230_v33 = vcombine.low %v154_v26, %v158_v27  ;;  %v7668_v34 = vld [vmem:[#allocation10 + $0x4] ss:$16 sps:$4 sm:$0xff]   ;;  %v7674_v36 = vld [vmem:[#allocation10] ss:$16 sps:$4 sm:$0xff]   ;;  %v7696_v43 = vld [vmem:[#allocation10 + $0x4c] ss:$16 sps:$4 sm:$0xff]  }
  0x9a   :  { %293 = vmatpush1.bf16.msra.mxu0 %v6224_v16  ;;  %336 = vmatpush1.bf16.msra.mxu1 %v6226_v20  ;;  %v7679_v38 = vld [vmem:[#allocation10 + $0x24] ss:$16 sps:$4 sm:$0xff]   ;;  %v7687_v40 = vld [vmem:[#allocation10 + $0x20] ss:$16 sps:$4 sm:$0xff]   ;;  %v7703_v45 = vld [vmem:[#allocation10 + $0x48] ss:$16 sps:$4 sm:$0xff]  }
  0x9b   :  { %376 = vmatprep.subr.bf16.mxu0 %v6221_v22  ;;  %419 = vmatprep.subr.bf16.mxu1 %v6223_v25  ;;  %v7693_v42 = vld [vmem:[#allocation10 + $0x44] ss:$16 sps:$4 sm:$0xff]   ;;  %v7701_v44 = vld [vmem:[#allocation10 + $0x40] ss:$16 sps:$4 sm:$0xff]   ;;  %9669 = vst [vmem:[#allocation25_spill] sm:$0xff] %v7703_v45 }
  0x9c   :  { %v7707_v46 = vld [vmem:[#allocation10 + $0x64] ss:$16 sps:$4 sm:$0xff]   ;;  %v7710_v47 = vld [vmem:[#allocation10 + $0x6c] ss:$16 sps:$4 sm:$0xff]   ;;  %v7713_v48 = vld [vmem:[#allocation10 + $0x60] ss:$16 sps:$4 sm:$0xff]  }
  0x9d   :  { %6232 = vmatmul.mubr.msk.bf16.vlgmr.msra.gmra.mrb[0].mxu0 %vm286_vm0, %v6509_v21  ;;  %6233 = vmatmul.mubr.msk.bf16.vlgmr.msra.gmra.mrb[0].mxu1 %vm286_vm0, %v6509_v21  ;;  %9670 = vst [vmem:[#allocation26_spill] sm:$0xff] %v7707_v46  ;;  %9671 = vst [vmem:[#allocation27_spill] sm:$0xff] %v7710_v47  ;;  %v7717_v49 = vld [vmem:[#allocation10 + $0x68] ss:$16 sps:$4 sm:$0xff]   ;;  %v7719_v50 = vld [vmem:[#allocation10 + $0x84] ss:$16 sps:$4 sm:$0xff]  }
  0x9e   :  { %377 = vmatpush1.bf16.msra.mxu0 %v6220_v28  ;;  %420 = vmatpush1.bf16.msra.mxu1 %v6222_v29  ;;  %9672 = vst [vmem:[#allocation28_spill] sm:$0xff] %v7713_v48  ;;  %9673 = vst [vmem:[#allocation29_spill] sm:$0xff] %v7717_v49  ;;  %v7722_v51 = vld [vmem:[#allocation10 + $0x8c] ss:$16 sps:$4 sm:$0xff]   ;;  %v7725_v52 = vld [vmem:[#allocation10 + $0x80] ss:$16 sps:$4 sm:$0xff]  }
  0x9f   :  { %378 = vmatprep.subr.bf16.mxu0 %v6229_v30  ;;  %421 = vmatprep.subr.bf16.mxu1 %v6231_v31  ;;  %9674 = vst [vmem:[#allocation30_spill] sm:$0xff] %v7719_v50  ;;  %9675 = vst [vmem:[#allocation31_spill] sm:$0xff] %v7722_v51  ;;  %v7727_v53 = vld [vmem:[#allocation10 + $0x88] ss:$16 sps:$4 sm:$0xff]   ;;  %v7731_v54 = vld [vmem:[#allocation10 + $0xa4] ss:$16 sps:$4 sm:$0xff]  }
  0xa0   :  { %408 = vmatprep.mubr.bf16.mxu0 %v9462_v0  ;;  %451 = vmatprep.mubr.bf16.mxu1 %v9462_v0  ;;  %9676 = vst [vmem:[#allocation32_spill] sm:$0xff] %v7725_v52  ;;  %9677 = vst [vmem:[#allocation33_spill] sm:$0xff] %v7727_v53  ;;  %v7734_v55 = vld [vmem:[#allocation10 + $0xac] ss:$16 sps:$4 sm:$0xff]   ;;  %v7737_v56 = vld [vmem:[#allocation10 + $0xa0] ss:$16 sps:$4 sm:$0xff]  }
  0xa1   :  { %9678 = vst [vmem:[#allocation34_spill] sm:$0xff] %v7731_v54  ;;  %9679 = vst [vmem:[#allocation35_spill] sm:$0xff] %v7734_v55  ;;  %v7741_v57 = vld [vmem:[#allocation10 + $0xa8] ss:$16 sps:$4 sm:$0xff]   ;;  %v7743_v58 = vld [vmem:[#allocation10 + $0xc4] ss:$16 sps:$4 sm:$0xff]  }
  0xa2   :  { %379 = vmatpush1.bf16.msra.mxu0 %v6228_v32  ;;  %422 = vmatpush1.bf16.msra.mxu1 %v6230_v33  ;;  %9680 = vst [vmem:[#allocation36_spill] sm:$0xff] %v7737_v56  ;;  %9681 = vst [vmem:[#allocation37_spill] sm:$0xff] %v7741_v57  ;;  %v7746_v59 = vld [vmem:[#allocation10 + $0xcc] ss:$16 sps:$4 sm:$0xff]   ;;  %v7749_v60 = vld [vmem:[#allocation10 + $0xc0] ss:$16 sps:$4 sm:$0xff]  }
  0xa3   :  { %674 = vmatprep.subr.bf16.mxu0 %v7668_v34  ;;  %715 = vmatprep.subr.bf16.mxu1 %v7671_v35  ;;  %9682 = vst [vmem:[#allocation38_spill] sm:$0xff] %v7743_v58  ;;  %9683 = vst [vmem:[#allocation39_spill] sm:$0xff] %v7746_v59  ;;  %v7751_v61 = vld [vmem:[#allocation10 + $0xc8] ss:$16 sps:$4 sm:$0xff]   ;;  %v7755_v62 = vld [vmem:[#allocation10 + $0xe4] ss:$16 sps:$4 sm:$0xff]  }
  0xa4   :  { %9684 = vst [vmem:[#allocation40_spill] sm:$0xff] %v7749_v60  ;;  %9685 = vst [vmem:[#allocation41_spill] sm:$0xff] %v7751_v61  ;;  %v7758_v63 = vld [vmem:[#allocation10 + $0xec] ss:$16 sps:$4 sm:$0xff]   ;;  %v7761_v1 = vld [vmem:[#allocation10 + $0xe0] ss:$16 sps:$4 sm:$0xff]  }
  0xa5   :  { %6234 = vmatmul.mubr.msk.bf16.vlgmr.msra.gmra.mrb[4].mxu0 %vm286_vm0, %v6509_v21  ;;  %6235 = vmatmul.mubr.msk.bf16.vlgmr.msra.gmra.mrb[4].mxu1 %vm286_vm0, %v6509_v21  ;;  %9686 = vst [vmem:[#allocation42_spill] sm:$0xff] %v7755_v62  ;;  %9687 = vst [vmem:[#allocation43_spill] sm:$0xff] %v7758_v63  ;;  %v7765_v2 = vld [vmem:[#allocation10 + $0xe8] ss:$16 sps:$4 sm:$0xff]   ;;  %v7767_v3 = vld [vmem:[#allocation12 + $0x4] ss:$16 sps:$4 sm:$0xff]  }
  0xa6   :  { %675 = vmatpush1.bf16.msra.mxu0 %v7674_v36  ;;  %716 = vmatpush1.bf16.msra.mxu1 %v7676_v37  ;;  %9688 = vst [vmem:[#allocation44_spill] sm:$0xff] %v7761_v1  ;;  %9689 = vst [vmem:[#allocation45_spill] sm:$0xff] %v7765_v2  ;;  %v7770_v4 = vld [vmem:[#allocation12 + $0xc] ss:$16 sps:$4 sm:$0xff]   ;;  %v7773_v5 = vld [vmem:[#allocation12] ss:$16 sps:$4 sm:$0xff]  }
  0xa7   :  { %676 = vmatprep.subr.bf16.mxu0 %v7679_v38  ;;  %717 = vmatprep.subr.bf16.mxu1 %v7682_v39  ;;  %9690 = vst [vmem:[#allocation46_spill] sm:$0xff] %v7767_v3  ;;  %9691 = vst [vmem:[#allocation47_spill] sm:$0xff] %v7770_v4  ;;  %v7775_v6 = vld [vmem:[#allocation12 + $0x8] ss:$16 sps:$4 sm:$0xff]   ;;  %v7777_v7 = vld [vmem:[#allocation12 + $0x24] ss:$16 sps:$4 sm:$0xff]  }
  0xa8   :  { %706 = vmatprep.mubr.bf16.mxu0 %v9462_v0  ;;  %747 = vmatprep.mubr.bf16.mxu1 %v9462_v0  ;;  %v7781_v8 = vld [vmem:[#allocation12 + $0x2c] ss:$16 sps:$4 sm:$0xff]   ;;  %v7784_v9 = vld [vmem:[#allocation12 + $0x20] ss:$16 sps:$4 sm:$0xff]   ;;  %v7787_v10 = vld [vmem:[#allocation12 + $0x28] ss:$16 sps:$4 sm:$0xff]  }
  0xa9   :  { %v7789_v11 = vld [vmem:[#allocation12 + $0x44] ss:$16 sps:$4 sm:$0xff]   ;;  %v7793_v12 = vld [vmem:[#allocation12 + $0x4c] ss:$16 sps:$4 sm:$0xff]   ;;  %v7798_v13 = vld [vmem:[#allocation12 + $0x40] ss:$16 sps:$4 sm:$0xff]  }
  0xaa   :  { %677 = vmatpush1.bf16.msra.mxu0 %v7687_v40  ;;  %718 = vmatpush1.bf16.msra.mxu1 %v7691_v41  ;;  %v7801_v14 = vld [vmem:[#allocation12 + $0x48] ss:$16 sps:$4 sm:$0xff]   ;;  %v7803_v15 = vld [vmem:[#allocation12 + $0x64] ss:$16 sps:$4 sm:$0xff]   ;;  %v7807_v16 = vld [vmem:[#allocation12 + $0x6c] ss:$16 sps:$4 sm:$0xff]  }
  0xab   :  { %678 = vmatprep.subr.bf16.mxu0 %v7693_v42  ;;  %719 = vmatprep.subr.bf16.mxu1 %v7696_v43  ;;  %v7812_v17 = vld [vmem:[#allocation12 + $0x60] ss:$16 sps:$4 sm:$0xff]   ;;  %v7814_v18 = vld [vmem:[#allocation12 + $0x68] ss:$16 sps:$4 sm:$0xff]   ;;  %v7816_v19 = vld [vmem:[#allocation12 + $0x84] ss:$16 sps:$4 sm:$0xff]  }
  0xac   :  { %v7819_v20 = vld [vmem:[#allocation12 + $0x8c] ss:$16 sps:$4 sm:$0xff]   ;;  %v7824_v21 = vld [vmem:[#allocation12 + $0x80] ss:$16 sps:$4 sm:$0xff]   ;;  %v7826_v22 = vld [vmem:[#allocation12 + $0x88] ss:$16 sps:$4 sm:$0xff]  }
  0xad   :  { %v7828_v23 = vld [vmem:[#allocation12 + $0xa4] ss:$16 sps:$4 sm:$0xff]   ;;  %v7831_v24 = vld [vmem:[#allocation12 + $0xac] ss:$16 sps:$4 sm:$0xff]   ;;  %v7836_v25 = vld [vmem:[#allocation12 + $0xa0] ss:$16 sps:$4 sm:$0xff]  }
  0xae   :  { %679 = vmatpush1.bf16.msra.mxu0 %v7701_v44  ;;  %720 = vmatpush1.bf16.msra.mxu1 %v7703_v45  ;;  %v7838_v26 = vld [vmem:[#allocation12 + $0xa8] ss:$16 sps:$4 sm:$0xff]   ;;  %v7840_v27 = vld [vmem:[#allocation12 + $0xc4] ss:$16 sps:$4 sm:$0xff]   ;;  %v7846_v28 = vld [vmem:[#allocation12 + $0xcc] ss:$16 sps:$4 sm:$0xff]  }
  0xaf   :  { %680 = vmatprep.subr.bf16.mxu0 %v7707_v46  ;;  %721 = vmatprep.subr.bf16.mxu1 %v7710_v47  ;;  %9692 = vst [vmem:[#allocation48_spill] sm:$0xff] %v7846_v28  ;;  %v7849_v29 = vld [vmem:[#allocation12 + $0xc0] ss:$16 sps:$4 sm:$0xff]   ;;  %v7853_v30 = vld [vmem:[#allocation12 + $0xc8] ss:$16 sps:$4 sm:$0xff]  }
  0xb0   :  { %v7855_v31 = vld [vmem:[#allocation12 + $0xe4] ss:$16 sps:$4 sm:$0xff]   ;;  %v7858_v32 = vld [vmem:[#allocation12 + $0xec] ss:$16 sps:$4 sm:$0xff]   ;;  %v7861_v33 = vld [vmem:[#allocation12 + $0xe0] ss:$16 sps:$4 sm:$0xff]  }
  0xb2   :  { %681 = vmatpush1.bf16.msra.mxu0 %v7713_v48  ;;  %722 = vmatpush1.bf16.msra.mxu1 %v7717_v49 }
  0xb3   :  { %682 = vmatprep.subr.bf16.mxu0 %v7719_v50  ;;  %723 = vmatprep.subr.bf16.mxu1 %v7722_v51 }
  0xb6   :  { %683 = vmatpush1.bf16.msra.mxu0 %v7725_v52  ;;  %724 = vmatpush1.bf16.msra.mxu1 %v7727_v53 }
  0xb7   :  { %684 = vmatprep.subr.bf16.mxu0 %v7731_v54  ;;  %725 = vmatprep.subr.bf16.mxu1 %v7734_v55 }
  0xba   :  { %685 = vmatpush1.bf16.msra.mxu0 %v7737_v56  ;;  %726 = vmatpush1.bf16.msra.mxu1 %v7741_v57 }
  0xbb   :  { %686 = vmatprep.subr.bf16.mxu0 %v7743_v58  ;;  %727 = vmatprep.subr.bf16.mxu1 %v7746_v59 }
  0xbe   :  { %687 = vmatpush1.bf16.msra.mxu0 %v7749_v60  ;;  %728 = vmatpush1.bf16.msra.mxu1 %v7751_v61 }
  0xbf   :  { %688 = vmatprep.subr.bf16.mxu0 %v7755_v62  ;;  %729 = vmatprep.subr.bf16.mxu1 %v7758_v63 }
  0xc2   :  { %689 = vmatpush1.bf16.msra.mxu0 %v7761_v1  ;;  %730 = vmatpush1.bf16.msra.mxu1 %v7765_v2 }
  0xc3   :  { %956 = vmatprep.subr.bf16.mxu0 %v7767_v3  ;;  %997 = vmatprep.subr.bf16.mxu1 %v7770_v4 }
  0xc5   :  { %707 = vmatmul.mubr.bf16.vlgmr.msra.gmra.mrb[8].mxu0 %v9462_v0  ;;  %748 = vmatmul.mubr.bf16.vlgmr.msra.gmra.mrb[8].mxu1 %v9462_v0 }
  0xc6   :  { %957 = vmatpush1.bf16.msra.mxu0 %v7773_v5  ;;  %998 = vmatpush1.bf16.msra.mxu1 %v7775_v6 }
  0xc7   :  { %958 = vmatprep.subr.bf16.mxu0 %v7777_v7  ;;  %999 = vmatprep.subr.bf16.mxu1 %v7781_v8 }
  0xc8   :  { %988 = vmatprep.mubr.bf16.mxu0 %v9462_v0  ;;  %1029 = vmatprep.mubr.bf16.mxu1 %v9462_v0  ;;  %v7865_v0 = vld [vmem:[#allocation12 + $0xe8] ss:$16 sps:$4 sm:$0xff]  }
  0xca   :  { %959 = vmatpush1.bf16.msra.mxu0 %v7784_v9  ;;  %1000 = vmatpush1.bf16.msra.mxu1 %v7787_v10 }
  0xcb   :  { %960 = vmatprep.subr.bf16.mxu0 %v7789_v11  ;;  %1001 = vmatprep.subr.bf16.mxu1 %v7793_v12 }
  0xce   :  { %961 = vmatpush1.bf16.msra.mxu0 %v7798_v13  ;;  %1002 = vmatpush1.bf16.msra.mxu1 %v7801_v14 }
  0xcf   :  { %962 = vmatprep.subr.bf16.mxu0 %v7803_v15  ;;  %1003 = vmatprep.subr.bf16.mxu1 %v7807_v16 }
  0xd2   :  { %963 = vmatpush1.bf16.msra.mxu0 %v7812_v17  ;;  %1004 = vmatpush1.bf16.msra.mxu1 %v7814_v18 }
  0xd3   :  { %964 = vmatprep.subr.bf16.mxu0 %v7816_v19  ;;  %1005 = vmatprep.subr.bf16.mxu1 %v7819_v20 }
  0xd6   :  { %965 = vmatpush1.bf16.msra.mxu0 %v7824_v21  ;;  %1006 = vmatpush1.bf16.msra.mxu1 %v7826_v22 }
  0xd7   :  { %966 = vmatprep.subr.bf16.mxu0 %v7828_v23  ;;  %1007 = vmatprep.subr.bf16.mxu1 %v7831_v24 }
  0xda   :  { %967 = vmatpush1.bf16.msra.mxu0 %v7836_v25  ;;  %1008 = vmatpush1.bf16.msra.mxu1 %v7838_v26 }
  0xdb   :  { %968 = vmatprep.subr.bf16.mxu0 %v7840_v27  ;;  %1009 = vmatprep.subr.bf16.mxu1 %v7846_v28  ;;  %v9693_v28 = vmov 0  }
  0xde   :  { %969 = vmatpush1.bf16.msra.mxu0 %v7849_v29  ;;  %1010 = vmatpush1.bf16.msra.mxu1 %v7853_v30 }
  0xdf   :  { %970 = vmatprep.subr.bf16.mxu0 %v7855_v31  ;;  %1011 = vmatprep.subr.bf16.mxu1 %v7858_v32 }
  0xe2   :  { %971 = vmatpush1.bf16.msra.mxu0 %v7861_v33  ;;  %1012 = vmatpush1.bf16.msra.mxu1 %v7865_v0 }
  0xe3   :  { %1095 = vmatprep.subr.bf16.mxu0 %v7668_v34  ;;  %1136 = vmatprep.subr.bf16.mxu1 %v7671_v35 }
  0xe5   :  { %989 = vmatmul.mubr.bf16.vlgmr.msra.gmra.mrb[12].mxu0 %v9693_v28  ;;  %1030 = vmatmul.mubr.bf16.vlgmr.msra.gmra.mrb[12].mxu1 %v9693_v28 }
  0xe6   :  { %1096 = vmatpush1.bf16.msra.mxu0 %v7674_v36  ;;  %1137 = vmatpush1.bf16.msra.mxu1 %v7676_v37 }
  0xe7   :  { %1097 = vmatprep.subr.bf16.mxu0 %v7679_v38  ;;  %1138 = vmatprep.subr.bf16.mxu1 %v7682_v39 }
  0xe8   :  { %1127 = vmatprep.mubr.bf16.mxu0 %v9693_v28  ;;  %1168 = vmatprep.mubr.bf16.mxu1 %v9693_v28 }
  0xea   :  { %1098 = vmatpush1.bf16.msra.mxu0 %v7687_v40  ;;  %1139 = vmatpush1.bf16.msra.mxu1 %v7691_v41 }
  0xeb   :  { %1099 = vmatprep.subr.bf16.mxu0 %v7693_v42  ;;  %1140 = vmatprep.subr.bf16.mxu1 %v7696_v43 }
  0xee   :  { %1100 = vmatpush1.bf16.msra.mxu0 %v7701_v44  ;;  %1141 = vmatpush1.bf16.msra.mxu1 %v7703_v45 }
  0xef   :  { %1101 = vmatprep.subr.bf16.mxu0 %v7707_v46  ;;  %1142 = vmatprep.subr.bf16.mxu1 %v7710_v47 }
  0xf2   :  { %1102 = vmatpush1.bf16.msra.mxu0 %v7713_v48  ;;  %1143 = vmatpush1.bf16.msra.mxu1 %v7717_v49 }
  0xf3   :  { %1103 = vmatprep.subr.bf16.mxu0 %v7719_v50  ;;  %1144 = vmatprep.subr.bf16.mxu1 %v7722_v51 }
  0xf6   :  { %1104 = vmatpush1.bf16.msra.mxu0 %v7725_v52  ;;  %1145 = vmatpush1.bf16.msra.mxu1 %v7727_v53 }
  0xf7   :  { %1105 = vmatprep.subr.bf16.mxu0 %v7731_v54  ;;  %1146 = vmatprep.subr.bf16.mxu1 %v7734_v55 }
  0xfa   :  { %1106 = vmatpush1.bf16.msra.mxu0 %v7737_v56  ;;  %1147 = vmatpush1.bf16.msra.mxu1 %v7741_v57  ;;  %v161_v57 = vlaneseq }
  0xfb   :  { %1107 = vmatprep.subr.bf16.mxu0 %v7743_v58  ;;  %1148 = vmatprep.subr.bf16.mxu1 %v7746_v59 }
  0xfc   :  { %v7908_v58 = vshrl.u32 %v161_v57, 7 }
  0xfe   :  { %1108 = vmatpush1.bf16.msra.mxu0 %v7749_v60  ;;  %1149 = vmatpush1.bf16.msra.mxu1 %v7751_v61  ;;  %9694 = vst [vmem:[#allocation49_spill] sm:$0xff] %v7908_v58  ;;  %v9485_v59 = vsub.s32 0, %v7908_v58  ;;  %v159_v60 = vld [vmem:[#allocation9] sm:$0xff]  ;;  %v9486_v61 = vsub.s32 1, %v7908_v58 }
  0xff   :  { %1109 = vmatprep.subr.bf16.mxu0 %v7755_v62  ;;  %1150 = vmatprep.subr.bf16.mxu1 %v7758_v63  ;;  %v9488_v62 = vsub.s32 2, %v7908_v58  ;;  %v9491_v63 = vsub.s32 3, %v7908_v58 }
 0x101   :  { %v176_v57 = vrot.slane %v159_v60, %v9491_v63  ;;  %v9493_v63 = vsub.s32 7, %v7908_v58 }
 0x102   :  { %1110 = vmatpush1.bf16.msra.mxu0 %v7761_v1  ;;  %1151 = vmatpush1.bf16.msra.mxu1 %v7765_v2  ;;  %v164_v1 = vrot.slane %v159_v60, %v9485_v59 }
 0x103   :  { %1201 = vmatprep.subr.bf16.mxu0 %v7767_v3  ;;  %1242 = vmatprep.subr.bf16.mxu1 %v7770_v4  ;;  %v168_v3 = vrot.slane %v159_v60, %v9486_v61  ;;  %v172_v4 = vrot.slane %v159_v60, %v9488_v62  ;;  %v9494_v61 = vsub.s32 6, %v7908_v58 }
 0x170   :  { %v324_v2 = vpop.f32.mrb[0].mxu0  ;;  %v367_v54 = vpop.f32.mrb[0].mxu1 }
 0x171   :  { %v325_v56 = vadd.f32 %v324_v2, %v164_v1  ;;  %v326_v55 = vpop.f32.mrb[1].mxu0  ;;  %v368_v50 = vadd.f32 %v367_v54, %v172_v4  ;;  %v369_v49 = vpop.f32.mrb[1].mxu1 }
 0x172   :  { %v327_v52 = vadd.f32 %v326_v55, %v168_v3  ;;  %v328_v51 = vpop.f32.mrb[2].mxu0  ;;  %v370_v47 = vadd.f32 %v369_v49, %v176_v57  ;;  %v371_v46 = vpop.f32.mrb[2].mxu1  ;;  %v9695_v55 = vsub.s32 4, %v7908_v58  ;;  %v188_v49 = vrot.slane %v159_v60, %v9494_v61 }
 0x173   :  { %462 = vst [vmem:[#allocation2] sm:$0xff] %v325_v56  ;;  %v329_v48 = vadd.f32 %v328_v51, %v164_v1  ;;  %v330_v62 = vpop.f32.mrb[3].mxu0  ;;  %464 = vst [vmem:[#allocation2 + $0x10] sm:$0xff] %v368_v50  ;;  %v372_v45 = vadd.f32 %v371_v46, %v172_v4  ;;  %v373_v53 = vpop.f32.mrb[3].mxu1  ;;  %v9696_v51 = vsub.s32 5, %v7908_v58  ;;  %v192_v50 = vrot.slane %v159_v60, %v9493_v63 }
 0x174   :  { %463 = vst [vmem:[#allocation2 + $0x8] sm:$0xff] %v327_v52  ;;  %v331_v2 = vadd.f32 %v330_v62, %v168_v3  ;;  %465 = vst [vmem:[#allocation2 + $0x18] sm:$0xff] %v370_v47  ;;  %v374_v54 = vadd.f32 %v373_v53, %v176_v57  ;;  %v180_v59 = vrot.slane %v159_v60, %v9695_v55 }
 0x175   :  { %470 = vst [vmem:[#allocation2 + $0x40] sm:$0xff] %v329_v48  ;;  %472 = vst [vmem:[#allocation2 + $0x50] sm:$0xff] %v372_v45  ;;  %v184_v56 = vrot.slane %v159_v60, %v9696_v51 }
 0x176   :  { %471 = vst [vmem:[#allocation2 + $0x48] sm:$0xff] %v331_v2  ;;  %473 = vst [vmem:[#allocation2 + $0x58] sm:$0xff] %v374_v54 }
 0x178   :  { %v410_v46 = vpop.f32.mrb[4].mxu0  ;;  %v453_v47 = vpop.f32.mrb[4].mxu1 }
 0x179   :  { %v411_v52 = vadd.f32 %v410_v46, %v180_v59  ;;  %v412_v48 = vpop.f32.mrb[5].mxu0  ;;  %v454_v1 = vadd.f32 %v453_v47, %v188_v49  ;;  %v455_v3 = vpop.f32.mrb[5].mxu1 }
 0x17a   :  { %v413_v53 = vadd.f32 %v412_v48, %v184_v56  ;;  %v414_v62 = vpop.f32.mrb[6].mxu0  ;;  %v456_v57 = vadd.f32 %v455_v3, %v192_v50  ;;  %v457_v2 = vpop.f32.mrb[6].mxu1  ;;  %v478_v46 = vld [vmem:[#allocation2] sm:$0x3] }
 0x17b   :  { %466 = vst [vmem:[#allocation2 + $0x20] sm:$0xff] %v411_v52  ;;  %v415_v45 = vadd.f32 %v414_v62, %v180_v59  ;;  %v416_v4 = vpop.f32.mrb[7].mxu0  ;;  %468 = vst [vmem:[#allocation2 + $0x30] sm:$0xff] %v454_v1  ;;  %v458_v54 = vadd.f32 %v457_v2, %v188_v49  ;;  %v459_v51 = vpop.f32.mrb[7].mxu1  ;;  %v479_v52 = vld [vmem:[#allocation2 + $0x8] sm:$0x3] }
 0x17c   :  { %467 = vst [vmem:[#allocation2 + $0x28] sm:$0xff] %v413_v53  ;;  %v417_v55 = vadd.f32 %v416_v4, %v184_v56  ;;  %469 = vst [vmem:[#allocation2 + $0x38] sm:$0xff] %v456_v57  ;;  %v460_v60 = vadd.f32 %v459_v51, %v192_v50  ;;  %v480_v49 = vld [vmem:[#allocation2 + $0x10] sm:$0x3]  ;;  %v481_v57 = vld [vmem:[#allocation2 + $0x18] sm:$0x3] }
 0x17d   :  { %474 = vst [vmem:[#allocation2 + $0x60] sm:$0xff] %v415_v45  ;;  %476 = vst [vmem:[#allocation2 + $0x70] sm:$0xff] %v458_v54 }
 0x17e   :  { %475 = vst [vmem:[#allocation2 + $0x68] sm:$0xff] %v417_v55  ;;  %477 = vst [vmem:[#allocation2 + $0x78] sm:$0xff] %v460_v60 }
 0x198   :  { %v708_v48 = vpop.f32.mrb[8].mxu0  ;;  %v749_v63 = vpop.f32.mrb[8].mxu1 }
 0x199   :  { %v756_v47 = vadd.f32 %v708_v48, %v478_v46  ;;  %v710_v59 = vpop.f32.mrb[9].mxu0  ;;  %v751_v3 = vpop.f32.mrb[9].mxu1  ;;  %v758_v50 = vadd.f32 %v749_v63, %v480_v49 }
 0x19a   :  { %v757_v62 = vadd.f32 %v710_v59, %v479_v52  ;;  %v712_v61 = vpop.f32.mrb[10].mxu0  ;;  %v753_v1 = vpop.f32.mrb[10].mxu1  ;;  %v759_v2 = vadd.f32 %v751_v3, %v481_v57 }
 0x19b   :  { %v1054_v53 = vmul.f32 0.5, %v756_v47  ;;  %v713_v56 = vpop.f32.mrb[11].mxu0  ;;  %v754_v45 = vpop.f32.mrb[11].mxu1 }
 0x19c   :  { %v1058_v4 = vmul.f32 0.5, %v757_v62  ;;  %v1063_v55 = vmul.f32 0.5, %v759_v2  ;;  %v760_v45 = vld [vmem:[#allocation2 + $0x60] sm:$0xc0] }
 0x19d   :  { %6702 = vtanh.f32 %v1054_v53 }
 0x19e   :  { %6704 = vtanh.f32 %v1058_v4 }
 0x19f   :  { %6706 = vtanh.f32 %v758_v50 }
 0x1a0   :  { %6708 = vtanh.f32 %v1063_v55 }
 0x1a7   :  { %v6703_v54 = vpop.eup %6702 }
 0x1a8   :  { %v6705_v51 = vpop.eup %6704  ;;  %v1056_v60 = vmul.f32 0.5, %v6703_v54 }
 0x1a9   :  { %v1060_v46 = vmul.f32 0.5, %v6705_v51  ;;  %v6707_v61 = vpop.eup %6706 }
 0x1aa   :  { %v1057_v48 = vadd.f32 0.5, %v1056_v60  ;;  %v6709_v63 = vpop.eup %6708  ;;  %v761_v60 = vld [vmem:[#allocation2 + $0x68] sm:$0xc0] }
 0x1ab   :  { %v1061_v47 = vadd.f32 0.5, %v1060_v46  ;;  %v1065_v62 = vmul.f32 0.5, %v6709_v63  ;;  %v762_v63 = vld [vmem:[#allocation2 + $0x70] sm:$0xc0] }
 0x1ac   :  { %v1068_v52 = vmul.f32 %v6707_v61, %v1057_v48 }
 0x1ad   :  { %v1067_v59 = vmul.f32 0.0, %v1061_v47  ;;  %v1066_v4 = vadd.f32 0.5, %v1065_v62 }
 0x1af   :  { %v7934_v56 = vadd.f32 %v1068_v52, %v1067_v59 }
 0x1b1   :  { %6710 = vtanh.f32 %v7934_v56 }
 0x1b8   :  { %v990_v53 = vpop.f32.mrb[12].mxu0  ;;  %v1031_v3 = vpop.f32.mrb[12].mxu1 }
 0x1b9   :  { %v1042_v1 = vrot.slane %v990_v53, 2  ;;  %v992_v49 = vpop.f32.mrb[13].mxu0  ;;  %v1033_v57 = vpop.f32.mrb[13].mxu1  ;;  %v1044_v51 = vrot.slane %v1031_v3, 2 }
 0x1ba   :  { %v1043_v50 = vrot.slane %v992_v49, 2  ;;  %v994_v2 = vpop.f32.mrb[14].mxu0  ;;  %v1035_v48 = vpop.f32.mrb[14].mxu1  ;;  %v1045_v58 = vrot.slane %v1033_v57, 2 }
 0x1bb   :  { %v6711_v55 = vpop.eup %6710  ;;  %v1050_v54 = vadd.f32 %v1042_v1, %v760_v45  ;;  %v995_v46 = vpop.f32.mrb[15].mxu0  ;;  %v1052_v49 = vadd.f32 %v1044_v51, %v762_v63  ;;  %v763_v1 = vld [vmem:[#allocation2 + $0x78] sm:$0xc0] }
 0x1bc   :  { %v7937_v61 = vmul.f32 %v6711_v55, %v1066_v4  ;;  %v1051_v47 = vadd.f32 %v1043_v50, %v761_v60  ;;  %v1036_v52 = vpop.f32.mrb[15].mxu1  ;;  %v1053_v3 = vadd.f32 %v1045_v58, %v763_v1  ;;  %v9710_v1 = vld [vmem:[#allocation36_spill] sm:$0xff] }
 0x1bd   :  { %v1072_v59 = vmul.f32 0.5, %v1050_v54 }
 0x1be   :  { %v1076_v53 = vmul.f32 0.5, %v1051_v47  ;;  %v1094_v62 = vpack.c.bf16 %v7937_v61, %v7937_v61  ;;  %v1081_v4 = vmul.f32 0.5, %v1053_v3  ;;  %v9697_v47 = vld [vmem:[#allocation48_spill] sm:$0xff]  ;;  %v9711_v3 = vld [vmem:[#allocation37_spill] sm:$0xff] }
 0x1bf   :  { %6712 = vtanh.f32 %v1072_v59 }
 0x1c0   :  { %6714 = vtanh.f32 %v1076_v53  ;;  %1128 = vmatmul.mubr.bf16.vlgmr.msra.gmra.mrb[16].mxu0 %v1094_v62  ;;  %1169 = vmatmul.mubr.bf16.vlgmr.msra.gmra.mrb[16].mxu1 %v1094_v62 }
 0x1c1   :  { %1202 = vmatpush1.bf16.msra.mxu0 %v7773_v5  ;;  %1243 = vmatpush1.bf16.msra.mxu1 %v7775_v6  ;;  %6716 = vtanh.f32 %v1052_v49 }
 0x1c2   :  { %1203 = vmatprep.subr.bf16.mxu0 %v7777_v7  ;;  %1244 = vmatprep.subr.bf16.mxu1 %v7781_v8  ;;  %6718 = vtanh.f32 %v1081_v4  ;;  %v9712_v4 = vld [vmem:[#allocation38_spill] sm:$0xff] }
 0x1c3   :  { %1233 = vmatprep.mubr.bf16.mxu0 %v9693_v28  ;;  %1274 = vmatprep.mubr.bf16.mxu1 %v9693_v28 }
 0x1c5   :  { %1204 = vmatpush1.bf16.msra.mxu0 %v7784_v9  ;;  %1245 = vmatpush1.bf16.msra.mxu1 %v7787_v10 }
 0x1c6   :  { %1205 = vmatprep.subr.bf16.mxu0 %v7789_v11  ;;  %1246 = vmatprep.subr.bf16.mxu1 %v7793_v12 }
 0x1c9   :  { %v6713_v45 = vpop.eup %6712  ;;  %1206 = vmatpush1.bf16.msra.mxu0 %v7798_v13  ;;  %1247 = vmatpush1.bf16.msra.mxu1 %v7801_v14 }
 0x1ca   :  { %v6715_v50 = vpop.eup %6714  ;;  %v1074_v58 = vmul.f32 0.5, %v6713_v45  ;;  %1207 = vmatprep.subr.bf16.mxu0 %v7803_v15  ;;  %1248 = vmatprep.subr.bf16.mxu1 %v7807_v16  ;;  %v9713_v45 = vld [vmem:[#allocation39_spill] sm:$0xff] }
 0x1cb   :  { %v1078_v57 = vmul.f32 0.5, %v6715_v50  ;;  %v6717_v55 = vpop.eup %6716  ;;  %v9714_v50 = vld [vmem:[#allocation40_spill] sm:$0xff] }
 0x1cc   :  { %v1075_v2 = vadd.f32 0.5, %v1074_v58  ;;  %v6719_v48 = vpop.eup %6718  ;;  %v9715_v58 = vld [vmem:[#allocation41_spill] sm:$0xff] }
 0x1cd   :  { %v1079_v54 = vadd.f32 0.5, %v1078_v57  ;;  %1208 = vmatpush1.bf16.msra.mxu0 %v7812_v17  ;;  %1249 = vmatpush1.bf16.msra.mxu1 %v7814_v18  ;;  %v1083_v52 = vmul.f32 0.5, %v6719_v48  ;;  %v9716_v57 = vld [vmem:[#allocation42_spill] sm:$0xff] }
 0x1ce   :  { %v1086_v51 = vmul.f32 %v6717_v55, %v1075_v2  ;;  %1209 = vmatprep.subr.bf16.mxu0 %v7816_v19  ;;  %1250 = vmatprep.subr.bf16.mxu1 %v7819_v20  ;;  %v9717_v2 = vld [vmem:[#allocation43_spill] sm:$0xff]  ;;  %v9718_v55 = vld [vmem:[#allocation44_spill] sm:$0xff] }
 0x1cf   :  { %v1085_v60 = vmul.f32 0.0, %v1079_v54  ;;  %v1084_v59 = vadd.f32 0.5, %v1083_v52  ;;  %v9719_v54 = vld [vmem:[#allocation45_spill] sm:$0xff] }
 0x1d1   :  { %v7959_v46 = vadd.f32 %v1086_v51, %v1085_v60  ;;  %1210 = vmatpush1.bf16.msra.mxu0 %v7824_v21  ;;  %1251 = vmatpush1.bf16.msra.mxu1 %v7826_v22  ;;  %v9720_v51 = vld [vmem:[#allocation46_spill] sm:$0xff]  ;;  %v9721_v60 = vld [vmem:[#allocation47_spill] sm:$0xff] }
 0x1d2   :  { %1211 = vmatprep.subr.bf16.mxu0 %v7828_v23  ;;  %1252 = vmatprep.subr.bf16.mxu1 %v7831_v24 }
 0x1d3   :  { %6720 = vtanh.f32 %v7959_v46 }
 0x1d5   :  { %1212 = vmatpush1.bf16.msra.mxu0 %v7836_v25  ;;  %1253 = vmatpush1.bf16.msra.mxu1 %v7838_v26 }
 0x1d6   :  { %1213 = vmatprep.subr.bf16.mxu0 %v7840_v27  ;;  %1254 = vmatprep.subr.bf16.mxu1 %v9697_v47 }
 0x1d9   :  { %1214 = vmatpush1.bf16.msra.mxu0 %v7849_v29  ;;  %1255 = vmatpush1.bf16.msra.mxu1 %v7853_v30 }
 0x1da   :  { %1215 = vmatprep.subr.bf16.mxu0 %v7855_v31  ;;  %1256 = vmatprep.subr.bf16.mxu1 %v7858_v32 }
 0x1dd   :  { %v6721_v63 = vpop.eup %6720  ;;  %1216 = vmatpush1.bf16.msra.mxu0 %v7861_v33  ;;  %1257 = vmatpush1.bf16.msra.mxu1 %v7865_v0 }
 0x1de   :  { %v7976_v53 = vmul.f32 %v6721_v63, %v1084_v59  ;;  %1349 = vmatprep.subr.bf16.mxu0 %v7668_v34  ;;  %1390 = vmatprep.subr.bf16.mxu1 %v7671_v35  ;;  %v9699_v34 = vld [vmem:[#allocation25_spill] sm:$0xff]  ;;  %v9700_v35 = vld [vmem:[#allocation26_spill] sm:$0xff] }
 0x1e0   :  { %9698 = vst [vmem:[#allocation48_spill] sm:$0xff] %v7976_v53  ;;  %v1197_v62 = vpack.c.bf16 %v7976_v53, %v7976_v53  ;;  %v8253_v53 = vld [vmem:[#allocation12 + $0xcc] ss:$16 sps:$4 sm:$0xff]  }
 0x1e1   :  { %9753 = vst [vmem:[#allocation58_spill] sm:$0xff] %v8253_v53 }
 0x1e2   :  { %v1199_v49 = vrot.slane %v1197_v62, 3 }
 0x1e4   :  { %1234 = vmatmul.mubr.bf16.vlgmr.msra.gmra.mrb[20].mxu0 %v1199_v49  ;;  %1275 = vmatmul.mubr.bf16.vlgmr.msra.gmra.mrb[20].mxu1 %v1199_v49  ;;  %v1090_v49 = vld [vmem:[#allocation2] sm:$0xc] }
 0x1e5   :  { %1350 = vmatpush1.bf16.msra.mxu0 %v7674_v36  ;;  %1391 = vmatpush1.bf16.msra.mxu1 %v7676_v37  ;;  %v9701_v36 = vld [vmem:[#allocation27_spill] sm:$0xff]  ;;  %v9702_v37 = vld [vmem:[#allocation28_spill] sm:$0xff] }
 0x1e6   :  { %1351 = vmatprep.subr.bf16.mxu0 %v7679_v38  ;;  %1392 = vmatprep.subr.bf16.mxu1 %v7682_v39  ;;  %v9703_v38 = vld [vmem:[#allocation29_spill] sm:$0xff]  ;;  %v9704_v39 = vld [vmem:[#allocation30_spill] sm:$0xff] }
 0x1e7   :  { %1381 = vmatprep.mubr.bf16.mxu0 %v9693_v28  ;;  %1422 = vmatprep.mubr.bf16.mxu1 %v9693_v28 }
 0x1e9   :  { %1352 = vmatpush1.bf16.msra.mxu0 %v7687_v40  ;;  %1393 = vmatpush1.bf16.msra.mxu1 %v7691_v41  ;;  %v9705_v40 = vld [vmem:[#allocation31_spill] sm:$0xff]  ;;  %v9706_v41 = vld [vmem:[#allocation32_spill] sm:$0xff] }
 0x1ea   :  { %1353 = vmatprep.subr.bf16.mxu0 %v7693_v42  ;;  %1394 = vmatprep.subr.bf16.mxu1 %v7696_v43  ;;  %v9707_v42 = vld [vmem:[#allocation33_spill] sm:$0xff]  ;;  %v9708_v43 = vld [vmem:[#allocation34_spill] sm:$0xff] }
 0x1ed   :  { %1354 = vmatpush1.bf16.msra.mxu0 %v7701_v44  ;;  %1395 = vmatpush1.bf16.msra.mxu1 %v9699_v34  ;;  %v9709_v44 = vld [vmem:[#allocation35_spill] sm:$0xff] }
 0x1ee   :  { %1355 = vmatprep.subr.bf16.mxu0 %v9700_v35  ;;  %1396 = vmatprep.subr.bf16.mxu1 %v9701_v36 }
 0x1f1   :  { %1356 = vmatpush1.bf16.msra.mxu0 %v9702_v37  ;;  %1397 = vmatpush1.bf16.msra.mxu1 %v9703_v38 }
 0x1f2   :  { %1357 = vmatprep.subr.bf16.mxu0 %v9704_v39  ;;  %1398 = vmatprep.subr.bf16.mxu1 %v9705_v40  ;;  %v1091_v39 = vld [vmem:[#allocation2 + $0x8] sm:$0xc] }
 0x1f5   :  { %1358 = vmatpush1.bf16.msra.mxu0 %v9706_v41  ;;  %1399 = vmatpush1.bf16.msra.mxu1 %v9707_v42 }
 0x1f6   :  { %1359 = vmatprep.subr.bf16.mxu0 %v9708_v43  ;;  %1400 = vmatprep.subr.bf16.mxu1 %v9709_v44  ;;  %v1092_v44 = vld [vmem:[#allocation2 + $0x10] sm:$0xc] }
 0x1f9   :  { %1360 = vmatpush1.bf16.msra.mxu0 %v9710_v1  ;;  %1401 = vmatpush1.bf16.msra.mxu1 %v9711_v3 }
 0x1fa   :  { %1361 = vmatprep.subr.bf16.mxu0 %v9712_v4  ;;  %1402 = vmatprep.subr.bf16.mxu1 %v9713_v45  ;;  %v1093_v45 = vld [vmem:[#allocation2 + $0x18] sm:$0xc] }
 0x1fd   :  { %1362 = vmatpush1.bf16.msra.mxu0 %v9714_v50  ;;  %1403 = vmatpush1.bf16.msra.mxu1 %v9715_v58 }
 0x1fe   :  { %1363 = vmatprep.subr.bf16.mxu0 %v9716_v57  ;;  %1404 = vmatprep.subr.bf16.mxu1 %v9717_v2 }
 0x201   :  { %1364 = vmatpush1.bf16.msra.mxu0 %v9718_v55  ;;  %1405 = vmatpush1.bf16.msra.mxu1 %v9719_v54 }
 0x202   :  { %1455 = vmatprep.subr.bf16.mxu0 %v9720_v51  ;;  %1496 = vmatprep.subr.bf16.mxu1 %v9721_v60 }
 0x293   :  { %v1129_v48 = vpop.f32.mrb[16].mxu0  ;;  %v1170_v52 = vpop.f32.mrb[16].mxu1 }
 0x294   :  { %v1181_v59 = vrot.slane %v1129_v48, 6  ;;  %v1131_v63 = vpop.f32.mrb[17].mxu0  ;;  %v1172_v62 = vpop.f32.mrb[17].mxu1  ;;  %v1183_v38 = vrot.slane %v1170_v52, 6  ;;  %v1313_v48 = vrot.slane %v7934_v56, 6 }
 0x295   :  { %v1182_v34 = vrot.slane %v1131_v63, 6  ;;  %v1133_v35 = vpop.f32.mrb[18].mxu0  ;;  %v1174_v36 = vpop.f32.mrb[18].mxu1  ;;  %v1184_v4 = vrot.slane %v1172_v62, 6 }
 0x296   :  { %v1189_v37 = vadd.f32 %v1181_v59, %v1090_v49  ;;  %v1134_v40 = vpop.f32.mrb[19].mxu0  ;;  %v1175_v41 = vpop.f32.mrb[19].mxu1  ;;  %v1191_v3 = vadd.f32 %v1183_v38, %v1092_v44 }
 0x297   :  { %v1190_v42 = vadd.f32 %v1182_v34, %v1091_v39  ;;  %v1192_v50 = vadd.f32 %v1184_v4, %v1093_v45  ;;  %v1194_v45 = vld [vmem:[#allocation2 + $0x68] sm:$0x30] }
 0x298   :  { %v1299_v43 = vmul.f32 0.5, %v1189_v37 }
 0x299   :  { %v1303_v1 = vmul.f32 0.5, %v1190_v42  ;;  %v1308_v58 = vmul.f32 0.5, %v1192_v50 }
 0x29a   :  { %6722 = vtanh.f32 %v1299_v43  ;;  %v1193_v43 = vld [vmem:[#allocation2 + $0x60] sm:$0x30] }
 0x29b   :  { %6724 = vtanh.f32 %v1303_v1 }
 0x29c   :  { %6726 = vtanh.f32 %v1191_v3 }
 0x29d   :  { %6728 = vtanh.f32 %v1308_v58 }
 0x2a4   :  { %v6723_v57 = vpop.eup %6722 }
 0x2a5   :  { %v6725_v2 = vpop.eup %6724  ;;  %v1301_v55 = vmul.f32 0.5, %v6723_v57 }
 0x2a6   :  { %v1305_v54 = vmul.f32 0.5, %v6725_v2  ;;  %v6727_v60 = vpop.eup %6726 }
 0x2a7   :  { %v1302_v51 = vadd.f32 0.5, %v1301_v55  ;;  %v6729_v62 = vpop.eup %6728 }
 0x2a8   :  { %v1306_v52 = vadd.f32 0.5, %v1305_v54  ;;  %v1310_v34 = vmul.f32 0.5, %v6729_v62  ;;  %v1195_v54 = vld [vmem:[#allocation2 + $0x70] sm:$0x30] }
 0x2a9   :  { %v1316_v59 = vmul.f32 %v6727_v60, %v1302_v51 }
 0x2aa   :  { %v1315_v63 = vmul.f32 %v1313_v48, %v1306_v52  ;;  %v1311_v35 = vadd.f32 0.5, %v1310_v34 }
 0x2ac   :  { %v8017_v49 = vadd.f32 %v1316_v59, %v1315_v63  ;;  %v1196_v59 = vld [vmem:[#allocation2 + $0x78] sm:$0x30] }
 0x2ae   :  { %6730 = vtanh.f32 %v8017_v49 }
 0x2b7   :  { %v1235_v36 = vpop.f32.mrb[20].mxu0  ;;  %v1276_v37 = vpop.f32.mrb[20].mxu1 }
 0x2b8   :  { %v6731_v38 = vpop.eup %6730  ;;  %v1287_v39 = vrot.slane %v1235_v36, 4  ;;  %v1237_v40 = vpop.f32.mrb[21].mxu0  ;;  %v1289_v4 = vrot.slane %v1276_v37, 4  ;;  %v8111_v36 = vld [vmem:[#allocation10 + $0x68] ss:$16 sps:$4 sm:$0xff]  }
 0x2b9   :  { %v1278_v41 = vpop.f32.mrb[21].mxu1  ;;  %v8020_v42 = vmul.f32 %v6731_v38, %v1311_v35  ;;  %v1288_v56 = vrot.slane %v1237_v40, 4  ;;  %v1239_v44 = vpop.f32.mrb[22].mxu0  ;;  %v8108_v35 = vld [vmem:[#allocation10 + $0x60] ss:$16 sps:$4 sm:$0xff]   ;;  %9728 = vst [vmem:[#allocation31_spill] sm:$0xff] %v8111_v36 }
 0x2ba   :  { %v1280_v1 = vpop.f32.mrb[22].mxu1  ;;  %v1295_v3 = vadd.f32 %v1287_v39, %v1193_v43  ;;  %v1240_v50 = vpop.f32.mrb[23].mxu0  ;;  %v1297_v48 = vadd.f32 %v1289_v4, %v1195_v54  ;;  %v1290_v52 = vrot.slane %v1278_v41, 4  ;;  %9727 = vst [vmem:[#allocation30_spill] sm:$0xff] %v8108_v35  ;;  %v8114_v37 = vld [vmem:[#allocation10 + $0x84] ss:$16 sps:$4 sm:$0xff]  }
 0x2bb   :  { %v1281_v58 = vpop.f32.mrb[23].mxu1  ;;  %v1296_v57 = vadd.f32 %v1288_v56, %v1194_v45  ;;  %v1345_v2 = vpack.c.bf16 %v8020_v42, %v8020_v42  ;;  %9729 = vst [vmem:[#allocation32_spill] sm:$0xff] %v8114_v37  ;;  %v8117_v38 = vld [vmem:[#allocation10 + $0x8c] ss:$16 sps:$4 sm:$0xff]   ;;  %v8120_v39 = vld [vmem:[#allocation10 + $0x80] ss:$16 sps:$4 sm:$0xff]  }
 0x2bc   :  { %v1320_v55 = vmul.f32 0.5, %v1295_v3  ;;  %v1298_v63 = vadd.f32 %v1290_v52, %v1196_v59  ;;  %9730 = vst [vmem:[#allocation33_spill] sm:$0xff] %v8117_v38  ;;  %9731 = vst [vmem:[#allocation34_spill] sm:$0xff] %v8120_v39  ;;  %v8123_v40 = vld [vmem:[#allocation10 + $0x88] ss:$16 sps:$4 sm:$0xff]  }
 0x2bd   :  { %v1324_v51 = vmul.f32 0.5, %v1296_v57  ;;  %v1347_v60 = vrot.slane %v1345_v2, 1  ;;  %9732 = vst [vmem:[#allocation35_spill] sm:$0xff] %v8123_v40  ;;  %v8126_v41 = vld [vmem:[#allocation10 + $0xa4] ss:$16 sps:$4 sm:$0xff]  }
 0x2be   :  { %6732 = vtanh.f32 %v1320_v55  ;;  %9733 = vst [vmem:[#allocation36_spill] sm:$0xff] %v8126_v41  ;;  %v8129_v43 = vld [vmem:[#allocation10 + $0xac] ss:$16 sps:$4 sm:$0xff]   ;;  %v8132_v56 = vld [vmem:[#allocation10 + $0xa0] ss:$16 sps:$4 sm:$0xff]  }
 0x2bf   :  { %6734 = vtanh.f32 %v1324_v51  ;;  %1382 = vmatmul.mubr.bf16.vlgmr.msra.gmra.mrb[24].mxu0 %v1347_v60  ;;  %1423 = vmatmul.mubr.bf16.vlgmr.msra.gmra.mrb[24].mxu1 %v1347_v60  ;;  %9734 = vst [vmem:[#allocation37_spill] sm:$0xff] %v8129_v43  ;;  %9735 = vst [vmem:[#allocation38_spill] sm:$0xff] %v8132_v56  ;;  %v8135_v44 = vld [vmem:[#allocation10 + $0xa8] ss:$16 sps:$4 sm:$0xff]   ;;  %v8138_v1 = vld [vmem:[#allocation10 + $0xc4] ss:$16 sps:$4 sm:$0xff]  }
 0x2c0   :  { %1456 = vmatpush1.bf16.msra.mxu0 %v7773_v5  ;;  %1497 = vmatpush1.bf16.msra.mxu1 %v7775_v6  ;;  %6736 = vtanh.f32 %v1297_v48  ;;  %v1329_v5 = vmul.f32 0.5, %v1298_v63  ;;  %9736 = vst [vmem:[#allocation39_spill] sm:$0xff] %v8135_v44  ;;  %9737 = vst [vmem:[#allocation40_spill] sm:$0xff] %v8138_v1  ;;  %v8141_v3 = vld [vmem:[#allocation10 + $0xcc] ss:$16 sps:$4 sm:$0xff]  }
 0x2c1   :  { %1457 = vmatprep.subr.bf16.mxu0 %v7777_v7  ;;  %1498 = vmatprep.subr.bf16.mxu1 %v7781_v8  ;;  %9738 = vst [vmem:[#allocation41_spill] sm:$0xff] %v8141_v3  ;;  %v8144_v4 = vld [vmem:[#allocation10 + $0xc0] ss:$16 sps:$4 sm:$0xff]   ;;  %v8147_v45 = vld [vmem:[#allocation10 + $0xc8] ss:$16 sps:$4 sm:$0xff]  }
 0x2c2   :  { %1487 = vmatprep.mubr.bf16.mxu0 %v9693_v28  ;;  %1528 = vmatprep.mubr.bf16.mxu1 %v9693_v28  ;;  %6738 = vtanh.f32 %v1329_v5  ;;  %9739 = vst [vmem:[#allocation42_spill] sm:$0xff] %v8144_v4  ;;  %9740 = vst [vmem:[#allocation43_spill] sm:$0xff] %v8147_v45  ;;  %v8150_v50 = vld [vmem:[#allocation10 + $0xe4] ss:$16 sps:$4 sm:$0xff]   ;;  %v8153_v58 = vld [vmem:[#allocation10 + $0xec] ss:$16 sps:$4 sm:$0xff]  }
 0x2c3   :  { %9741 = vst [vmem:[#allocation44_spill] sm:$0xff] %v8150_v50  ;;  %9742 = vst [vmem:[#allocation45_spill] sm:$0xff] %v8153_v58  ;;  %v8156_v57 = vld [vmem:[#allocation10 + $0xe0] ss:$16 sps:$4 sm:$0xff]   ;;  %v8159_v2 = vld [vmem:[#allocation10 + $0xe8] ss:$16 sps:$4 sm:$0xff]  }
 0x2c4   :  { %1458 = vmatpush1.bf16.msra.mxu0 %v7784_v9  ;;  %1499 = vmatpush1.bf16.msra.mxu1 %v7787_v10  ;;  %9743 = vst [vmem:[#allocation46_spill] sm:$0xff] %v8156_v57  ;;  %9744 = vst [vmem:[#allocation47_spill] sm:$0xff] %v8159_v2  ;;  %v8162_v55 = vld [vmem:[#allocation12 + $0x4] ss:$16 sps:$4 sm:$0xff]   ;;  %v8165_v54 = vld [vmem:[#allocation12 + $0xc] ss:$16 sps:$4 sm:$0xff]  }
 0x2c5   :  { %1459 = vmatprep.subr.bf16.mxu0 %v7789_v11  ;;  %1500 = vmatprep.subr.bf16.mxu1 %v7793_v12  ;;  %v1334_v11 = vrot.slane %v7959_v46, 2  ;;  %v8102_v46 = vld [vmem:[#allocation10 + $0x64] ss:$16 sps:$4 sm:$0xff]   ;;  %9745 = vst [vmem:[#allocation50_spill] sm:$0xff] %v8162_v55  ;;  %9746 = vst [vmem:[#allocation51_spill] sm:$0xff] %v8165_v54 }
 0x2c6   :  { %9725 = vst [vmem:[#allocation28_spill] sm:$0xff] %v8102_v46  ;;  %v1341_v63 = vld [vmem:[#allocation2] sm:$0x30] }
 0x2c8   :  { %v6733_v6 = vpop.eup %6732  ;;  %1460 = vmatpush1.bf16.msra.mxu0 %v7798_v13  ;;  %1501 = vmatpush1.bf16.msra.mxu1 %v7801_v14 }
 0x2c9   :  { %v6735_v7 = vpop.eup %6734  ;;  %v1322_v8 = vmul.f32 0.5, %v6733_v6  ;;  %1461 = vmatprep.subr.bf16.mxu0 %v7803_v15  ;;  %1502 = vmatprep.subr.bf16.mxu1 %v7807_v16 }
 0x2ca   :  { %v1326_v62 = vmul.f32 0.5, %v6735_v7  ;;  %v6737_v10 = vpop.eup %6736 }
 0x2cb   :  { %v1323_v9 = vadd.f32 0.5, %v1322_v8 }
 0x2cc   :  { %v1327_v34 = vadd.f32 0.5, %v1326_v62  ;;  %1462 = vmatpush1.bf16.msra.mxu0 %v7812_v17  ;;  %1503 = vmatpush1.bf16.msra.mxu1 %v7814_v18  ;;  %v6739_v15 = vpop.eup %6738 }
 0x2cd   :  { %v1337_v12 = vmul.f32 %v6737_v10, %v1323_v9  ;;  %1463 = vmatprep.subr.bf16.mxu0 %v7816_v19  ;;  %1504 = vmatprep.subr.bf16.mxu1 %v7819_v20  ;;  %v1331_v16 = vmul.f32 0.5, %v6739_v15  ;;  %v8062_v20 = vld [vmem:[#allocation10 + $0x4] ss:$16 sps:$4 sm:$0xff]   ;;  %v1342_v9 = vld [vmem:[#allocation2 + $0x8] sm:$0x30] }
 0x2ce   :  { %v1336_v13 = vmul.f32 %v1334_v11, %v1327_v34 }
 0x2cf   :  { %v1332_v17 = vadd.f32 0.5, %v1331_v16 }
 0x2d0   :  { %v8043_v14 = vadd.f32 %v1337_v12, %v1336_v13  ;;  %1464 = vmatpush1.bf16.msra.mxu0 %v7824_v21  ;;  %1505 = vmatpush1.bf16.msra.mxu1 %v7826_v22  ;;  %v8065_v21 = vld [vmem:[#allocation10 + $0xc] ss:$16 sps:$4 sm:$0xff]   ;;  %v1343_v13 = vld [vmem:[#allocation2 + $0x10] sm:$0x30] }
 0x2d1   :  { %1465 = vmatprep.subr.bf16.mxu0 %v7828_v23  ;;  %1506 = vmatprep.subr.bf16.mxu1 %v7831_v24  ;;  %v8070_v24 = vld [vmem:[#allocation10] ss:$16 sps:$4 sm:$0xff]  }
 0x2d2   :  { %6740 = vtanh.f32 %v8043_v14 }
 0x2d4   :  { %1466 = vmatpush1.bf16.msra.mxu0 %v7836_v25  ;;  %1507 = vmatpush1.bf16.msra.mxu1 %v7838_v26  ;;  %v8076_v25 = vld [vmem:[#allocation10 + $0x24] ss:$16 sps:$4 sm:$0xff]   ;;  %v8079_v26 = vld [vmem:[#allocation10 + $0x2c] ss:$16 sps:$4 sm:$0xff]  }
 0x2d5   :  { %1467 = vmatprep.subr.bf16.mxu0 %v7840_v27  ;;  %1508 = vmatprep.subr.bf16.mxu1 %v9697_v47  ;;  %v8084_v27 = vld [vmem:[#allocation10 + $0x20] ss:$16 sps:$4 sm:$0xff]   ;;  %v8105_v47 = vld [vmem:[#allocation10 + $0x6c] ss:$16 sps:$4 sm:$0xff]  }
 0x2d6   :  { %9726 = vst [vmem:[#allocation29_spill] sm:$0xff] %v8105_v47 }
 0x2d8   :  { %1468 = vmatpush1.bf16.msra.mxu0 %v7849_v29  ;;  %1509 = vmatpush1.bf16.msra.mxu1 %v7853_v30  ;;  %v8087_v29 = vld [vmem:[#allocation10 + $0x28] ss:$16 sps:$4 sm:$0xff]   ;;  %v8090_v30 = vld [vmem:[#allocation10 + $0x44] ss:$16 sps:$4 sm:$0xff]  }
 0x2d9   :  { %1469 = vmatprep.subr.bf16.mxu0 %v7855_v31  ;;  %1510 = vmatprep.subr.bf16.mxu1 %v7858_v32  ;;  %v8093_v31 = vld [vmem:[#allocation10 + $0x4c] ss:$16 sps:$4 sm:$0xff]   ;;  %v8096_v32 = vld [vmem:[#allocation10 + $0x40] ss:$16 sps:$4 sm:$0xff]  }
 0x2da   :  { %9723 = vst [vmem:[#allocation26_spill] sm:$0xff] %v8096_v32 }
 0x2dc   :  { %v6741_v18 = vpop.eup %6740  ;;  %1470 = vmatpush1.bf16.msra.mxu0 %v7861_v33  ;;  %1511 = vmatpush1.bf16.msra.mxu1 %v7865_v0  ;;  %v8073_v0 = vld [vmem:[#allocation10 + $0x8] ss:$16 sps:$4 sm:$0xff]  }
 0x2dd   :  { %v8060_v19 = vmul.f32 %v6741_v18, %v1332_v17  ;;  %1603 = vmatprep.subr.bf16.mxu0 %v8062_v20  ;;  %1644 = vmatprep.subr.bf16.mxu1 %v8065_v21  ;;  %v8099_v33 = vld [vmem:[#allocation10 + $0x48] ss:$16 sps:$4 sm:$0xff]   ;;  %v1344_v18 = vld [vmem:[#allocation2 + $0x18] sm:$0x30] }
 0x2de   :  { %9724 = vst [vmem:[#allocation27_spill] sm:$0xff] %v8099_v33 }
 0x2df   :  { %9722 = vst [vmem:[#allocation25_spill] sm:$0xff] %v8060_v19  ;;  %v1451_v22 = vpack.c.bf16 %v8060_v19, %v8060_v19 }
 0x2e1   :  { %v1453_v23 = vrot.slane %v1451_v22, 2 }
 0x2e3   :  { %1488 = vmatmul.mubr.bf16.vlgmr.msra.gmra.mrb[28].mxu0 %v1453_v23  ;;  %1529 = vmatmul.mubr.bf16.vlgmr.msra.gmra.mrb[28].mxu1 %v1453_v23 }
 0x2e4   :  { %1604 = vmatpush1.bf16.msra.mxu0 %v8070_v24  ;;  %1645 = vmatpush1.bf16.msra.mxu1 %v8073_v0 }
 0x2e5   :  { %1605 = vmatprep.subr.bf16.mxu0 %v8076_v25  ;;  %1646 = vmatprep.subr.bf16.mxu1 %v8079_v26 }
 0x2e6   :  { %1635 = vmatprep.mubr.bf16.mxu0 %v9693_v28  ;;  %1676 = vmatprep.mubr.bf16.mxu1 %v9693_v28 }
 0x2e8   :  { %1606 = vmatpush1.bf16.msra.mxu0 %v8084_v27  ;;  %1647 = vmatpush1.bf16.msra.mxu1 %v8087_v29 }
 0x2e9   :  { %1607 = vmatprep.subr.bf16.mxu0 %v8090_v30  ;;  %1648 = vmatprep.subr.bf16.mxu1 %v8093_v31 }
 0x2ec   :  { %1608 = vmatpush1.bf16.msra.mxu0 %v8096_v32  ;;  %1649 = vmatpush1.bf16.msra.mxu1 %v8099_v33 }
 0x2ed   :  { %1609 = vmatprep.subr.bf16.mxu0 %v8102_v46  ;;  %1650 = vmatprep.subr.bf16.mxu1 %v8105_v47 }
 0x2f0   :  { %1610 = vmatpush1.bf16.msra.mxu0 %v8108_v35  ;;  %1651 = vmatpush1.bf16.msra.mxu1 %v8111_v36 }
 0x2f1   :  { %1611 = vmatprep.subr.bf16.mxu0 %v8114_v37  ;;  %1652 = vmatprep.subr.bf16.mxu1 %v8117_v38 }
 0x2f4   :  { %1612 = vmatpush1.bf16.msra.mxu0 %v8120_v39  ;;  %1653 = vmatpush1.bf16.msra.mxu1 %v8123_v40 }
 0x2f5   :  { %1613 = vmatprep.subr.bf16.mxu0 %v8126_v41  ;;  %1654 = vmatprep.subr.bf16.mxu1 %v8129_v43 }
 0x2f8   :  { %1614 = vmatpush1.bf16.msra.mxu0 %v8132_v56  ;;  %1655 = vmatpush1.bf16.msra.mxu1 %v8135_v44 }
 0x2f9   :  { %1615 = vmatprep.subr.bf16.mxu0 %v8138_v1  ;;  %1656 = vmatprep.subr.bf16.mxu1 %v8141_v3 }
 0x2fc   :  { %1616 = vmatpush1.bf16.msra.mxu0 %v8144_v4  ;;  %1657 = vmatpush1.bf16.msra.mxu1 %v8147_v45 }
 0x2fd   :  { %1617 = vmatprep.subr.bf16.mxu0 %v8150_v50  ;;  %1658 = vmatprep.subr.bf16.mxu1 %v8153_v58 }
 0x300   :  { %1618 = vmatpush1.bf16.msra.mxu0 %v8156_v57  ;;  %1659 = vmatpush1.bf16.msra.mxu1 %v8159_v2 }
 0x301   :  { %1709 = vmatprep.subr.bf16.mxu0 %v8162_v55  ;;  %1750 = vmatprep.subr.bf16.mxu1 %v8165_v54 }
 0x392   :  { %v1383_v51 = vpop.f32.mrb[24].mxu0  ;;  %v1424_v60 = vpop.f32.mrb[24].mxu1 }
 0x393   :  { %v1435_v48 = vrot.slane %v1383_v51, 4  ;;  %v1385_v52 = vpop.f32.mrb[25].mxu0  ;;  %v1426_v59 = vpop.f32.mrb[25].mxu1  ;;  %v1437_v62 = vrot.slane %v1424_v60, 4 }
 0x394   :  { %v1436_v5 = vrot.slane %v1385_v52, 4  ;;  %v1387_v6 = vpop.f32.mrb[26].mxu0  ;;  %v1428_v7 = vpop.f32.mrb[26].mxu1  ;;  %v1438_v17 = vrot.slane %v1426_v59, 4 }
 0x395   :  { %v1443_v8 = vadd.f32 %v1435_v48, %v1341_v63  ;;  %v1388_v10 = vpop.f32.mrb[27].mxu0  ;;  %v1429_v34 = vpop.f32.mrb[27].mxu1  ;;  %v1445_v16 = vadd.f32 %v1437_v62, %v1343_v13 }
 0x396   :  { %v1444_v11 = vadd.f32 %v1436_v5, %v1342_v9  ;;  %v1446_v22 = vadd.f32 %v1438_v17, %v1344_v18  ;;  %v1567_v5 = vrot.slane %v8017_v49, 6 }
 0x397   :  { %v1553_v12 = vmul.f32 0.5, %v1443_v8 }
 0x398   :  { %v1557_v15 = vmul.f32 0.5, %v1444_v11  ;;  %v1562_v23 = vmul.f32 0.5, %v1446_v22  ;;  %v1447_v22 = vld [vmem:[#allocation2 + $0x60] sm:$0xc] }
 0x399   :  { %6742 = vtanh.f32 %v1553_v12 }
 0x39a   :  { %6744 = vtanh.f32 %v1557_v15 }
 0x39b   :  { %6746 = vtanh.f32 %v1445_v16 }
 0x39c   :  { %6748 = vtanh.f32 %v1562_v23 }
 0x3a3   :  { %v6743_v51 = vpop.eup %6742 }
 0x3a4   :  { %v6745_v52 = vpop.eup %6744  ;;  %v1555_v6 = vmul.f32 0.5, %v6743_v51 }
 0x3a5   :  { %v1559_v48 = vmul.f32 0.5, %v6745_v52  ;;  %v6747_v63 = vpop.eup %6746 }
 0x3a6   :  { %v1556_v60 = vadd.f32 0.5, %v1555_v6  ;;  %v6749_v59 = vpop.eup %6748 }
 0x3a7   :  { %v1560_v7 = vadd.f32 0.5, %v1559_v48  ;;  %v1564_v62 = vmul.f32 0.5, %v6749_v59  ;;  %v1448_v48 = vld [vmem:[#allocation2 + $0x68] sm:$0xc] }
 0x3a8   :  { %v1570_v8 = vmul.f32 %v6747_v63, %v1556_v60 }
 0x3a9   :  { %v1569_v9 = vmul.f32 %v1567_v5, %v1560_v7  ;;  %v1565_v34 = vadd.f32 0.5, %v1564_v62  ;;  %v2824_v7 = vsel %vm2823_vm1, %v7937_v61, %v8020_v42  ;;  %v1449_v62 = vld [vmem:[#allocation2 + $0x70] sm:$0xc]  ;;  %v8181_v61 = vld [vmem:[#allocation12 + $0x8] ss:$16 sps:$4 sm:$0xff]  }
 0x3aa   :  { %v1450_v42 = vld [vmem:[#allocation2 + $0x78] sm:$0xc] }
 0x3ab   :  { %v8169_v10 = vadd.f32 %v1570_v8, %v1569_v9 }
 0x3ad   :  { %6750 = vtanh.f32 %v8169_v10 }
 0x3b6   :  { %v1489_v11 = vpop.f32.mrb[28].mxu0  ;;  %v1530_v12 = vpop.f32.mrb[28].mxu1 }
 0x3b7   :  { %v6751_v13 = vpop.eup %6750  ;;  %v1541_v15 = vrot.slane %v1489_v11, 6  ;;  %v1491_v16 = vpop.f32.mrb[29].mxu0  ;;  %v1543_v6 = vrot.slane %v1530_v12, 6  ;;  %v8178_v12 = vld [vmem:[#allocation12] ss:$16 sps:$4 sm:$0xff]  }
 0x3b8   :  { %v1532_v17 = vpop.f32.mrb[29].mxu1  ;;  %v1573_v18 = vmul.f32 %v6751_v13, %v1565_v34  ;;  %v1542_v49 = vrot.slane %v1491_v16, 6  ;;  %v1493_v23 = vpop.f32.mrb[30].mxu0  ;;  %v8184_v16 = vld [vmem:[#allocation12 + $0x24] ss:$16 sps:$4 sm:$0xff]  }
 0x3b9   :  { %v1534_v51 = vpop.f32.mrb[30].mxu1  ;;  %v1549_v52 = vadd.f32 %v1541_v15, %v1447_v22  ;;  %v1494_v60 = vpop.f32.mrb[31].mxu0  ;;  %v1551_v13 = vadd.f32 %v1543_v6, %v1449_v62  ;;  %v1544_v15 = vrot.slane %v1532_v17, 6  ;;  %v8192_v22 = vld [vmem:[#allocation12 + $0x20] ss:$16 sps:$4 sm:$0xff]  }
 0x3ba   :  { %v1535_v63 = vpop.f32.mrb[31].mxu1  ;;  %v1550_v5 = vadd.f32 %v1542_v49, %v1448_v48  ;;  %v1599_v8 = vpack.c.bf16 %v1573_v18, %v1573_v18  ;;  %v8176_v9 = vsel %vm2825_vm2, %v2824_v7, %v1573_v18  ;;  %v8187_v18 = vld [vmem:[#allocation12 + $0x2c] ss:$16 sps:$4 sm:$0xff]   ;;  %v8195_v49 = vld [vmem:[#allocation12 + $0x28] ss:$16 sps:$4 sm:$0xff]  }
 0x3bb   :  { %v1574_v59 = vmul.f32 0.5, %v1549_v52  ;;  %v1552_v17 = vadd.f32 %v1544_v15, %v1450_v42  ;;  %v8198_v23 = vld [vmem:[#allocation12 + $0x44] ss:$16 sps:$4 sm:$0xff]   ;;  %v8201_v51 = vld [vmem:[#allocation12 + $0x4c] ss:$16 sps:$4 sm:$0xff]  }
 0x3bc   :  { %v1578_v34 = vmul.f32 0.5, %v1550_v5  ;;  %v1601_v11 = vrot.slane %v1599_v8, 2  ;;  %v8204_v48 = vld [vmem:[#allocation12 + $0x40] ss:$16 sps:$4 sm:$0xff]   ;;  %v8207_v60 = vld [vmem:[#allocation12 + $0x48] ss:$16 sps:$4 sm:$0xff]  }
 0x3bd   :  { %6752 = vtanh.f32 %v1574_v59  ;;  %v1583_v52 = vmul.f32 0.5, %v1552_v17  ;;  %v8210_v5 = vld [vmem:[#allocation12 + $0x64] ss:$16 sps:$4 sm:$0xff]   ;;  %v8213_v8 = vld [vmem:[#allocation12 + $0x6c] ss:$16 sps:$4 sm:$0xff]  }
 0x3be   :  { %6754 = vtanh.f32 %v1578_v34  ;;  %1636 = vmatmul.mubr.bf16.vlgmr.msra.gmra.mrb[32].mxu0 %v1601_v11  ;;  %1677 = vmatmul.mubr.bf16.vlgmr.msra.gmra.mrb[32].mxu1 %v1601_v11  ;;  %v8217_v15 = vld [vmem:[#allocation12 + $0x60] ss:$16 sps:$4 sm:$0xff]   ;;  %v8220_v42 = vld [vmem:[#allocation12 + $0x68] ss:$16 sps:$4 sm:$0xff]  }
 0x3bf   :  { %1710 = vmatpush1.bf16.msra.mxu0 %v8178_v12  ;;  %1751 = vmatpush1.bf16.msra.mxu1 %v8181_v61  ;;  %6756 = vtanh.f32 %v1551_v13  ;;  %v1588_v13 = vrot.slane %v8043_v14, 2  ;;  %v8231_v14 = vld [vmem:[#allocation12 + $0x80] ss:$16 sps:$4 sm:$0xff]  }
 0x3c0   :  { %1711 = vmatprep.subr.bf16.mxu0 %v8184_v16  ;;  %1752 = vmatprep.subr.bf16.mxu1 %v8187_v18  ;;  %6758 = vtanh.f32 %v1583_v52 }
 0x3c1   :  { %1741 = vmatprep.mubr.bf16.mxu0 %v9693_v28  ;;  %1782 = vmatprep.mubr.bf16.mxu1 %v9693_v28 }
 0x3c3   :  { %1712 = vmatpush1.bf16.msra.mxu0 %v8192_v22  ;;  %1753 = vmatpush1.bf16.msra.mxu1 %v8195_v49 }
 0x3c4   :  { %1713 = vmatprep.subr.bf16.mxu0 %v8198_v23  ;;  %1754 = vmatprep.subr.bf16.mxu1 %v8201_v51 }
 0x3c7   :  { %v6753_v6 = vpop.eup %6752  ;;  %1714 = vmatpush1.bf16.msra.mxu0 %v8204_v48  ;;  %1755 = vmatpush1.bf16.msra.mxu1 %v8207_v60 }
 0x3c8   :  { %v6755_v63 = vpop.eup %6754  ;;  %v1576_v7 = vmul.f32 0.5, %v6753_v6  ;;  %1715 = vmatprep.subr.bf16.mxu0 %v8210_v5  ;;  %1756 = vmatprep.subr.bf16.mxu1 %v8213_v8  ;;  %v8223_v6 = vld [vmem:[#allocation12 + $0x84] ss:$16 sps:$4 sm:$0xff]  }
 0x3c9   :  { %v1580_v59 = vmul.f32 0.5, %v6755_v63  ;;  %v6757_v34 = vpop.eup %6756  ;;  %v8226_v63 = vld [vmem:[#allocation12 + $0x8c] ss:$16 sps:$4 sm:$0xff]  }
 0x3ca   :  { %v1577_v62 = vadd.f32 0.5, %v1576_v7 }
 0x3cb   :  { %v1581_v11 = vadd.f32 0.5, %v1580_v59  ;;  %1716 = vmatpush1.bf16.msra.mxu0 %v8217_v15  ;;  %1757 = vmatpush1.bf16.msra.mxu1 %v8220_v42  ;;  %v8234_v59 = vld [vmem:[#allocation12 + $0x88] ss:$16 sps:$4 sm:$0xff]  }
 0x3cc   :  { %v1591_v17 = vmul.f32 %v6757_v34, %v1577_v62  ;;  %1717 = vmatprep.subr.bf16.mxu0 %v8223_v6  ;;  %1758 = vmatprep.subr.bf16.mxu1 %v8226_v63  ;;  %9747 = vst [vmem:[#allocation52_spill] sm:$0xff] %v8234_v59  ;;  %v8237_v62 = vld [vmem:[#allocation12 + $0xa4] ss:$16 sps:$4 sm:$0xff]   ;;  %v8240_v34 = vld [vmem:[#allocation12 + $0xac] ss:$16 sps:$4 sm:$0xff]  }
 0x3cd   :  { %v1590_v52 = vmul.f32 %v1588_v13, %v1581_v11  ;;  %9748 = vst [vmem:[#allocation53_spill] sm:$0xff] %v8237_v62  ;;  %9749 = vst [vmem:[#allocation54_spill] sm:$0xff] %v8240_v34  ;;  %v6759_v11 = vpop.eup %6758  ;;  %v8244_v13 = vld [vmem:[#allocation12 + $0xa0] ss:$16 sps:$4 sm:$0xff]  }
 0x3ce   :  { %9750 = vst [vmem:[#allocation55_spill] sm:$0xff] %v8244_v13  ;;  %v1585_v19 = vmul.f32 0.5, %v6759_v11  ;;  %v8271_v11 = vld [vmem:[#allocation12 + $0xe8] ss:$16 sps:$4 sm:$0xff]  }
 0x3cf   :  { %v8229_v7 = vadd.f32 %v1591_v17, %v1590_v52  ;;  %1718 = vmatpush1.bf16.msra.mxu0 %v8231_v14  ;;  %1759 = vmatpush1.bf16.msra.mxu1 %v8234_v59  ;;  %v8247_v17 = vld [vmem:[#allocation12 + $0xa8] ss:$16 sps:$4 sm:$0xff]   ;;  %v8250_v52 = vld [vmem:[#allocation12 + $0xc4] ss:$16 sps:$4 sm:$0xff]  }
 0x3d0   :  { %1719 = vmatprep.subr.bf16.mxu0 %v8237_v62  ;;  %1760 = vmatprep.subr.bf16.mxu1 %v8240_v34  ;;  %9751 = vst [vmem:[#allocation56_spill] sm:$0xff] %v8247_v17  ;;  %9752 = vst [vmem:[#allocation57_spill] sm:$0xff] %v8250_v52  ;;  %v8256_v34 = vld [vmem:[#allocation12 + $0xc0] ss:$16 sps:$4 sm:$0xff]   ;;  %v8259_v62 = vld [vmem:[#allocation12 + $0xc8] ss:$16 sps:$4 sm:$0xff]  }
 0x3d1   :  { %6760 = vtanh.f32 %v8229_v7  ;;  %9754 = vst [vmem:[#allocation59_spill] sm:$0xff] %v8256_v34 }
 0x3d3   :  { %1720 = vmatpush1.bf16.msra.mxu0 %v8244_v13  ;;  %1761 = vmatpush1.bf16.msra.mxu1 %v8247_v17  ;;  %v8262_v13 = vld [vmem:[#allocation12 + $0xe4] ss:$16 sps:$4 sm:$0xff]   ;;  %v8265_v17 = vld [vmem:[#allocation12 + $0xec] ss:$16 sps:$4 sm:$0xff]  }
 0x3d4   :  { %1721 = vmatprep.subr.bf16.mxu0 %v8250_v52  ;;  %1762 = vmatprep.subr.bf16.mxu1 %v8253_v53  ;;  %9755 = vst [vmem:[#allocation60_spill] sm:$0xff] %v8262_v13  ;;  %9756 = vst [vmem:[#allocation61_spill] sm:$0xff] %v8265_v17  ;;  %v1586_v52 = vadd.f32 0.5, %v1585_v19  ;;  %v8268_v53 = vld [vmem:[#allocation12 + $0xe0] ss:$16 sps:$4 sm:$0xff]  }
 0x3d7   :  { %1722 = vmatpush1.bf16.msra.mxu0 %v8256_v34  ;;  %1763 = vmatpush1.bf16.msra.mxu1 %v8259_v62 }
 0x3d8   :  { %1723 = vmatprep.subr.bf16.mxu0 %v8262_v13  ;;  %1764 = vmatprep.subr.bf16.mxu1 %v8265_v17 }
 0x3db   :  { %v6761_v59 = vpop.eup %6760  ;;  %1724 = vmatpush1.bf16.msra.mxu0 %v8268_v53  ;;  %1765 = vmatpush1.bf16.msra.mxu1 %v8271_v11 }
 0x3dc   :  { %v8274_v34 = vmul.f32 %v6761_v59, %v1586_v52  ;;  %1845 = vmatprep.subr.bf16.mxu0 %v8062_v20  ;;  %1886 = vmatprep.subr.bf16.mxu1 %v8065_v21 }
 0x3de   :  { %9757 = vst [vmem:[#allocation62_spill] sm:$0xff] %v8274_v34  ;;  %v1705_v13 = vpack.c.bf16 %v8274_v34, %v8274_v34  ;;  %v1595_v34 = vld [vmem:[#allocation2] sm:$0xc0] }
 0x3e0   :  { %v1707_v17 = vrot.slane %v1705_v13, 1 }
 0x3e2   :  { %1742 = vmatmul.mubr.bf16.vlgmr.msra.gmra.mrb[36].mxu0 %v1707_v17  ;;  %1783 = vmatmul.mubr.bf16.vlgmr.msra.gmra.mrb[36].mxu1 %v1707_v17 }
 0x3e3   :  { %1846 = vmatpush1.bf16.msra.mxu0 %v8070_v24  ;;  %1887 = vmatpush1.bf16.msra.mxu1 %v8073_v0 }
 0x3e4   :  { %1847 = vmatprep.subr.bf16.mxu0 %v8076_v25  ;;  %1888 = vmatprep.subr.bf16.mxu1 %v8079_v26 }
 0x3e5   :  { %1877 = vmatprep.mubr.bf16.mxu0 %v9693_v28  ;;  %1918 = vmatprep.mubr.bf16.mxu1 %v9693_v28 }
 0x3e7   :  { %1848 = vmatpush1.bf16.msra.mxu0 %v8084_v27  ;;  %1889 = vmatpush1.bf16.msra.mxu1 %v8087_v29 }
 0x3e8   :  { %1849 = vmatprep.subr.bf16.mxu0 %v8090_v30  ;;  %1890 = vmatprep.subr.bf16.mxu1 %v8093_v31 }
 0x3eb   :  { %1850 = vmatpush1.bf16.msra.mxu0 %v8096_v32  ;;  %1891 = vmatpush1.bf16.msra.mxu1 %v8099_v33 }
 0x3ec   :  { %1851 = vmatprep.subr.bf16.mxu0 %v8102_v46  ;;  %1892 = vmatprep.subr.bf16.mxu1 %v8105_v47 }
 0x3ef   :  { %1852 = vmatpush1.bf16.msra.mxu0 %v8108_v35  ;;  %1893 = vmatpush1.bf16.msra.mxu1 %v8111_v36 }
 0x3f0   :  { %1853 = vmatprep.subr.bf16.mxu0 %v8114_v37  ;;  %1894 = vmatprep.subr.bf16.mxu1 %v8117_v38 }
 0x3f3   :  { %1854 = vmatpush1.bf16.msra.mxu0 %v8120_v39  ;;  %1895 = vmatpush1.bf16.msra.mxu1 %v8123_v40 }
 0x3f4   :  { %1855 = vmatprep.subr.bf16.mxu0 %v8126_v41  ;;  %1896 = vmatprep.subr.bf16.mxu1 %v8129_v43  ;;  %v1597_v43 = vld [vmem:[#allocation2 + $0x10] sm:$0xc0] }
 0x3f7   :  { %1856 = vmatpush1.bf16.msra.mxu0 %v8132_v56  ;;  %1897 = vmatpush1.bf16.msra.mxu1 %v8135_v44 }
 0x3f8   :  { %1857 = vmatprep.subr.bf16.mxu0 %v8138_v1  ;;  %1898 = vmatprep.subr.bf16.mxu1 %v8141_v3 }
 0x3fb   :  { %1858 = vmatpush1.bf16.msra.mxu0 %v8144_v4  ;;  %1899 = vmatpush1.bf16.msra.mxu1 %v8147_v45 }
 0x3fc   :  { %1859 = vmatprep.subr.bf16.mxu0 %v8150_v50  ;;  %1900 = vmatprep.subr.bf16.mxu1 %v8153_v58  ;;  %v1596_v58 = vld [vmem:[#allocation2 + $0x8] sm:$0xc0] }
 0x3ff   :  { %1860 = vmatpush1.bf16.msra.mxu0 %v8156_v57  ;;  %1901 = vmatpush1.bf16.msra.mxu1 %v8159_v2 }
 0x400   :  { %1936 = vmatprep.subr.bf16.mxu0 %v8162_v55  ;;  %1977 = vmatprep.subr.bf16.mxu1 %v8165_v54 }
 0x491   :  { %v1637_v19 = vpop.f32.mrb[32].mxu0  ;;  %v1678_v59 = vpop.f32.mrb[32].mxu1 }
 0x492   :  { %v1689_v13 = vrot.slane %v1637_v19, 2  ;;  %v1639_v17 = vpop.f32.mrb[33].mxu0  ;;  %v1680_v52 = vpop.f32.mrb[33].mxu1  ;;  %v1691_v1 = vrot.slane %v1678_v59, 2  ;;  %v1598_v19 = vld [vmem:[#allocation2 + $0x18] sm:$0xc0] }
 0x493   :  { %v1690_v4 = vrot.slane %v1639_v17, 2  ;;  %v1641_v45 = vpop.f32.mrb[34].mxu0  ;;  %v1682_v3 = vpop.f32.mrb[34].mxu1  ;;  %v1692_v41 = vrot.slane %v1680_v52, 2 }
 0x494   :  { %v1697_v50 = vadd.f32 %v1689_v13, %v1595_v34  ;;  %v1642_v44 = vpop.f32.mrb[35].mxu0  ;;  %v1683_v57 = vpop.f32.mrb[35].mxu1  ;;  %v1699_v54 = vadd.f32 %v1691_v1, %v1597_v43 }
 0x495   :  { %v1698_v56 = vadd.f32 %v1690_v4, %v1596_v58  ;;  %v1700_v40 = vadd.f32 %v1692_v41, %v1598_v19  ;;  %v1809_v4 = vrot.slane %v8169_v10, 6 }
 0x496   :  { %v1795_v2 = vmul.f32 0.5, %v1697_v50 }
 0x497   :  { %v1799_v55 = vmul.f32 0.5, %v1698_v56  ;;  %v1804_v39 = vmul.f32 0.5, %v1700_v40  ;;  %v1701_v40 = vld [vmem:[#allocation2 + $0x60] sm:$0x3] }
 0x498   :  { %6762 = vtanh.f32 %v1795_v2 }
 0x499   :  { %6764 = vtanh.f32 %v1799_v55 }
 0x49a   :  { %6766 = vtanh.f32 %v1699_v54 }
 0x49b   :  { %6768 = vtanh.f32 %v1804_v39  ;;  %v1702_v39 = vld [vmem:[#allocation2 + $0x68] sm:$0x3] }
 0x4a2   :  { %v6763_v17 = vpop.eup %6762 }
 0x4a3   :  { %v6765_v45 = vpop.eup %6764  ;;  %v1797_v3 = vmul.f32 0.5, %v6763_v17 }
 0x4a4   :  { %v1801_v34 = vmul.f32 0.5, %v6765_v45  ;;  %v6767_v44 = vpop.eup %6766 }
 0x4a5   :  { %v1798_v59 = vadd.f32 0.5, %v1797_v3  ;;  %v6769_v43 = vpop.eup %6768 }
 0x4a6   :  { %v1802_v57 = vadd.f32 0.5, %v1801_v34  ;;  %v1806_v1 = vmul.f32 0.5, %v6769_v43 }
 0x4a7   :  { %v1812_v50 = vmul.f32 %v6767_v44, %v1798_v59 }
 0x4a8   :  { %v1811_v56 = vmul.f32 %v1809_v4, %v1802_v57  ;;  %v1807_v41 = vadd.f32 0.5, %v1806_v1  ;;  %v1703_v57 = vld [vmem:[#allocation2 + $0x70] sm:$0x3] }
 0x4aa   :  { %v8315_v58 = vadd.f32 %v1812_v50, %v1811_v56 }
 0x4ac   :  { %6770 = vtanh.f32 %v8315_v58 }
 0x4b5   :  { %v1743_v2 = vpop.f32.mrb[36].mxu0  ;;  %v1784_v55 = vpop.f32.mrb[36].mxu1 }
 0x4b6   :  { %v6771_v54 = vpop.eup %6770  ;;  %v1791_v13 = vadd.f32 %v1743_v2, %v1701_v40  ;;  %v1745_v52 = vpop.f32.mrb[37].mxu0  ;;  %v1793_v43 = vadd.f32 %v1784_v55, %v1703_v57  ;;  %v1704_v40 = vld [vmem:[#allocation2 + $0x78] sm:$0x3]  ;;  %v9762_v57 = vld [vmem:[#allocation55_spill] sm:$0xff] }
 0x4b7   :  { %v1786_v19 = vpop.f32.mrb[37].mxu1  ;;  %v1815_v17 = vmul.f32 %v6771_v54, %v1807_v41  ;;  %v1792_v10 = vadd.f32 %v1745_v52, %v1702_v39  ;;  %v1747_v45 = vpop.f32.mrb[38].mxu0 }
 0x4b8   :  { %v1788_v3 = vpop.f32.mrb[38].mxu1  ;;  %v1816_v34 = vmul.f32 0.5, %v1791_v13  ;;  %v1748_v59 = vpop.f32.mrb[39].mxu0  ;;  %v1794_v41 = vadd.f32 %v1786_v19, %v1704_v40  ;;  %v9766_v40 = vld [vmem:[#allocation59_spill] sm:$0xff] }
 0x4b9   :  { %v1789_v44 = vpop.f32.mrb[39].mxu1  ;;  %v1820_v4 = vmul.f32 0.5, %v1792_v10  ;;  %v1841_v50 = vpack.c.bf16 %v1815_v17, %v1815_v17  ;;  %v8320_v56 = vsel %vm2827_vm3, %v8176_v9, %v1815_v17  ;;  %v1830_v17 = vrot.slane %v8229_v7, 2  ;;  %v9760_v59 = vld [vmem:[#allocation53_spill] sm:$0xff]  ;;  %v9761_v7 = vld [vmem:[#allocation54_spill] sm:$0xff] }
 0x4ba   :  { %9758 = vst [vmem:[#allocation63_spill] sm:$0xff] %v8320_v56  ;;  %6772 = vtanh.f32 %v1816_v34  ;;  %v1825_v9 = vmul.f32 0.5, %v1794_v41  ;;  %v9759_v34 = vld [vmem:[#allocation52_spill] sm:$0xff]  ;;  %v9782_v56 = vld [vmem:[#allocation46_spill] sm:$0xff] }
 0x4bb   :  { %6774 = vtanh.f32 %v1820_v4  ;;  %v1843_v1 = vrot.slane %v1841_v50, 3  ;;  %v9763_v4 = vld [vmem:[#allocation56_spill] sm:$0xff] }
 0x4bc   :  { %6776 = vtanh.f32 %v1793_v43  ;;  %v9764_v43 = vld [vmem:[#allocation57_spill] sm:$0xff] }
 0x4bd   :  { %1878 = vmatmul.mubr.bf16.vlgmr.msra.gmra.mrb[40].mxu0 %v1843_v1  ;;  %1919 = vmatmul.mubr.bf16.vlgmr.msra.gmra.mrb[40].mxu1 %v1843_v1  ;;  %6778 = vtanh.f32 %v1825_v9  ;;  %v9765_v1 = vld [vmem:[#allocation58_spill] sm:$0xff]  ;;  %v9767_v9 = vld [vmem:[#allocation60_spill] sm:$0xff] }
 0x4be   :  { %1937 = vmatpush1.bf16.msra.mxu0 %v8178_v12  ;;  %1978 = vmatpush1.bf16.msra.mxu1 %v8181_v61 }
 0x4bf   :  { %1938 = vmatprep.subr.bf16.mxu0 %v8184_v16  ;;  %1979 = vmatprep.subr.bf16.mxu1 %v8187_v18 }
 0x4c0   :  { %1968 = vmatprep.mubr.bf16.mxu0 %v9693_v28  ;;  %2009 = vmatprep.mubr.bf16.mxu1 %v9693_v28 }
 0x4c2   :  { %1939 = vmatpush1.bf16.msra.mxu0 %v8192_v22  ;;  %1980 = vmatpush1.bf16.msra.mxu1 %v8195_v49 }
 0x4c3   :  { %1940 = vmatprep.subr.bf16.mxu0 %v8198_v23  ;;  %1981 = vmatprep.subr.bf16.mxu1 %v8201_v51 }
 0x4c4   :  { %v6773_v2 = vpop.eup %6772 }
 0x4c5   :  { %v6775_v55 = vpop.eup %6774  ;;  %v1818_v54 = vmul.f32 0.5, %v6773_v2  ;;  %v9768_v2 = vld [vmem:[#allocation61_spill] sm:$0xff] }
 0x4c6   :  { %v1822_v13 = vmul.f32 0.5, %v6775_v55  ;;  %1941 = vmatpush1.bf16.msra.mxu0 %v8204_v48  ;;  %1982 = vmatpush1.bf16.msra.mxu1 %v8207_v60  ;;  %v6777_v52 = vpop.eup %6776 }
 0x4c7   :  { %v1819_v39 = vadd.f32 0.5, %v1818_v54  ;;  %1942 = vmatprep.subr.bf16.mxu0 %v8210_v5  ;;  %1983 = vmatprep.subr.bf16.mxu1 %v8213_v8  ;;  %v6779_v44 = vpop.eup %6778 }
 0x4c8   :  { %v1823_v19 = vadd.f32 0.5, %v1822_v13  ;;  %v1827_v50 = vmul.f32 0.5, %v6779_v44  ;;  %v9776_v44 = vld [vmem:[#allocation40_spill] sm:$0xff] }
 0x4c9   :  { %v1833_v10 = vmul.f32 %v6777_v52, %v1819_v39  ;;  %v9770_v39 = vld [vmem:[#allocation34_spill] sm:$0xff]  ;;  %v9771_v52 = vld [vmem:[#allocation35_spill] sm:$0xff] }
 0x4ca   :  { %v1832_v45 = vmul.f32 %v1830_v17, %v1823_v19  ;;  %1943 = vmatpush1.bf16.msra.mxu0 %v8217_v15  ;;  %1984 = vmatpush1.bf16.msra.mxu1 %v8220_v42  ;;  %v1828_v41 = vadd.f32 0.5, %v1827_v50  ;;  %v9772_v19 = vld [vmem:[#allocation36_spill] sm:$0xff]  ;;  %v9773_v17 = vld [vmem:[#allocation37_spill] sm:$0xff] }
 0x4cb   :  { %1944 = vmatprep.subr.bf16.mxu0 %v8223_v6  ;;  %1985 = vmatprep.subr.bf16.mxu1 %v8226_v63  ;;  %v9777_v50 = vld [vmem:[#allocation41_spill] sm:$0xff] }
 0x4cc   :  { %v8341_v3 = vadd.f32 %v1833_v10, %v1832_v45  ;;  %v9774_v10 = vld [vmem:[#allocation38_spill] sm:$0xff]  ;;  %v9775_v45 = vld [vmem:[#allocation39_spill] sm:$0xff] }
 0x4ce   :  { %6780 = vtanh.f32 %v8341_v3  ;;  %1945 = vmatpush1.bf16.msra.mxu0 %v8231_v14  ;;  %1986 = vmatpush1.bf16.msra.mxu1 %v9759_v34 }
 0x4cf   :  { %1946 = vmatprep.subr.bf16.mxu0 %v9760_v59  ;;  %1987 = vmatprep.subr.bf16.mxu1 %v9761_v7 }
 0x4d2   :  { %1947 = vmatpush1.bf16.msra.mxu0 %v9762_v57  ;;  %1988 = vmatpush1.bf16.msra.mxu1 %v9763_v4 }
 0x4d3   :  { %1948 = vmatprep.subr.bf16.mxu0 %v9764_v43  ;;  %1989 = vmatprep.subr.bf16.mxu1 %v9765_v1 }
 0x4d6   :  { %1949 = vmatpush1.bf16.msra.mxu0 %v9766_v40  ;;  %1990 = vmatpush1.bf16.msra.mxu1 %v8259_v62 }
 0x4d7   :  { %1950 = vmatprep.subr.bf16.mxu0 %v9767_v9  ;;  %1991 = vmatprep.subr.bf16.mxu1 %v9768_v2 }
 0x4d8   :  { %v6781_v55 = vpop.eup %6780 }
 0x4d9   :  { %v8356_v54 = vmul.f32 %v6781_v55, %v1828_v41  ;;  %v9778_v41 = vld [vmem:[#allocation42_spill] sm:$0xff]  ;;  %v9779_v55 = vld [vmem:[#allocation43_spill] sm:$0xff] }
 0x4da   :  { %1951 = vmatpush1.bf16.msra.mxu0 %v8268_v53  ;;  %1992 = vmatpush1.bf16.msra.mxu1 %v8271_v11 }
 0x4db   :  { %9769 = vst [vmem:[#allocation52_spill] sm:$0xff] %v8356_v54  ;;  %v1935_v13 = vpack.c.bf16 %v8356_v54, %v8356_v54  ;;  %2081 = vmatprep.subr.bf16.mxu0 %v8062_v20  ;;  %2122 = vmatprep.subr.bf16.mxu1 %v8065_v21  ;;  %v9781_v54 = vld [vmem:[#allocation45_spill] sm:$0xff] }
 0x4dd   :  { %1969 = vmatmul.mubr.bf16.vlgmr.msra.gmra.mrb[44].mxu0 %v1935_v13  ;;  %2010 = vmatmul.mubr.bf16.vlgmr.msra.gmra.mrb[44].mxu1 %v1935_v13  ;;  %v9780_v13 = vld [vmem:[#allocation44_spill] sm:$0xff] }
 0x4de   :  { %2082 = vmatpush1.bf16.msra.mxu0 %v8070_v24  ;;  %2123 = vmatpush1.bf16.msra.mxu1 %v8073_v0 }
 0x4df   :  { %2083 = vmatprep.subr.bf16.mxu0 %v8076_v25  ;;  %2124 = vmatprep.subr.bf16.mxu1 %v8079_v26 }
 0x4e0   :  { %2113 = vmatprep.mubr.bf16.mxu0 %v9693_v28  ;;  %2154 = vmatprep.mubr.bf16.mxu1 %v9693_v28 }
 0x4e2   :  { %2084 = vmatpush1.bf16.msra.mxu0 %v8084_v27  ;;  %2125 = vmatpush1.bf16.msra.mxu1 %v8087_v29 }
 0x4e3   :  { %2085 = vmatprep.subr.bf16.mxu0 %v8090_v30  ;;  %2126 = vmatprep.subr.bf16.mxu1 %v8093_v31 }
 0x4e6   :  { %2086 = vmatpush1.bf16.msra.mxu0 %v8096_v32  ;;  %2127 = vmatpush1.bf16.msra.mxu1 %v8099_v33 }
 0x4e7   :  { %2087 = vmatprep.subr.bf16.mxu0 %v8102_v46  ;;  %2128 = vmatprep.subr.bf16.mxu1 %v8105_v47 }
 0x4ea   :  { %2088 = vmatpush1.bf16.msra.mxu0 %v8108_v35  ;;  %2129 = vmatpush1.bf16.msra.mxu1 %v8111_v36 }
 0x4eb   :  { %2089 = vmatprep.subr.bf16.mxu0 %v8114_v37  ;;  %2130 = vmatprep.subr.bf16.mxu1 %v8117_v38 }
 0x4ee   :  { %2090 = vmatpush1.bf16.msra.mxu0 %v9770_v39  ;;  %2131 = vmatpush1.bf16.msra.mxu1 %v9771_v52  ;;  %v1838_v39 = vld [vmem:[#allocation2 + $0x48] sm:$0x3] }
 0x4ef   :  { %2091 = vmatprep.subr.bf16.mxu0 %v9772_v19  ;;  %2132 = vmatprep.subr.bf16.mxu1 %v9773_v17  ;;  %v9783_v19 = vld [vmem:[#allocation47_spill] sm:$0xff]  ;;  %v9784_v17 = vld [vmem:[#allocation50_spill] sm:$0xff] }
 0x4f2   :  { %2092 = vmatpush1.bf16.msra.mxu0 %v9774_v10  ;;  %2133 = vmatpush1.bf16.msra.mxu1 %v9775_v45  ;;  %v9785_v10 = vld [vmem:[#allocation51_spill] sm:$0xff]  ;;  %v1837_v45 = vld [vmem:[#allocation2 + $0x40] sm:$0x3] }
 0x4f3   :  { %2093 = vmatprep.subr.bf16.mxu0 %v9776_v44  ;;  %2134 = vmatprep.subr.bf16.mxu1 %v9777_v50 }
 0x4f6   :  { %2094 = vmatpush1.bf16.msra.mxu0 %v9778_v41  ;;  %2135 = vmatpush1.bf16.msra.mxu1 %v9779_v55 }
 0x4f7   :  { %2095 = vmatprep.subr.bf16.mxu0 %v9780_v13  ;;  %2136 = vmatprep.subr.bf16.mxu1 %v9781_v54 }
 0x4fa   :  { %2096 = vmatpush1.bf16.msra.mxu0 %v9782_v56  ;;  %2137 = vmatpush1.bf16.msra.mxu1 %v9783_v19  ;;  %v1839_v56 = vld [vmem:[#allocation2 + $0x50] sm:$0x3] }
 0x4fb   :  { %2187 = vmatprep.subr.bf16.mxu0 %v9784_v17  ;;  %2228 = vmatprep.subr.bf16.mxu1 %v9785_v10  ;;  %v1840_v17 = vld [vmem:[#allocation2 + $0x58] sm:$0x3] }
 0x590   :  { %v1879_v44 = vpop.f32.mrb[40].mxu0  ;;  %v1920_v52 = vpop.f32.mrb[40].mxu1 }
 0x591   :  { %v1927_v50 = vadd.f32 %v1879_v44, %v1837_v45  ;;  %v1881_v41 = vpop.f32.mrb[41].mxu0  ;;  %v1922_v38 = vpop.f32.mrb[41].mxu1  ;;  %v1929_v19 = vadd.f32 %v1920_v52, %v1839_v56 }
 0x592   :  { %v1928_v55 = vadd.f32 %v1881_v41, %v1838_v39  ;;  %v1883_v37 = vpop.f32.mrb[42].mxu0  ;;  %v1924_v13 = vpop.f32.mrb[42].mxu1  ;;  %v1930_v10 = vadd.f32 %v1922_v38, %v1840_v17 }
 0x593   :  { %v2034_v36 = vmul.f32 0.5, %v1927_v50  ;;  %v1884_v54 = vpop.f32.mrb[43].mxu0  ;;  %v1925_v35 = vpop.f32.mrb[43].mxu1 }
 0x594   :  { %v2038_v47 = vmul.f32 0.5, %v1928_v55  ;;  %v2043_v46 = vmul.f32 0.5, %v1930_v10  ;;  %v2048_v54 = vrot.slane %v8315_v58, 6 }
 0x595   :  { %6782 = vtanh.f32 %v2034_v36 }
 0x596   :  { %6784 = vtanh.f32 %v2038_v47 }
 0x597   :  { %6786 = vtanh.f32 %v1929_v19 }
 0x598   :  { %6788 = vtanh.f32 %v2043_v46  ;;  %v1931_v46 = vld [vmem:[#allocation2 + $0x20] sm:$0xc0] }
 0x59f   :  { %v6783_v33 = vpop.eup %6782 }
 0x5a0   :  { %v6785_v45 = vpop.eup %6784  ;;  %v2036_v44 = vmul.f32 0.5, %v6783_v33 }
 0x5a1   :  { %v2040_v32 = vmul.f32 0.5, %v6785_v45  ;;  %v6787_v37 = vpop.eup %6786 }
 0x5a2   :  { %v2037_v39 = vadd.f32 0.5, %v2036_v44  ;;  %v6789_v47 = vpop.eup %6788 }
 0x5a3   :  { %v2041_v41 = vadd.f32 0.5, %v2040_v32  ;;  %v2045_v36 = vmul.f32 0.5, %v6789_v47  ;;  %v1933_v47 = vld [vmem:[#allocation2 + $0x30] sm:$0xc0] }
 0x5a4   :  { %v2051_v35 = vmul.f32 %v6787_v37, %v2037_v39  ;;  %v1932_v39 = vld [vmem:[#allocation2 + $0x28] sm:$0xc0] }
 0x5a5   :  { %v2050_v50 = vmul.f32 %v2048_v54, %v2041_v41  ;;  %v2046_v17 = vadd.f32 0.5, %v2045_v36 }
 0x5a7   :  { %v8399_v55 = vadd.f32 %v2051_v35, %v2050_v50 }
 0x5a9   :  { %9786 = vst [vmem:[#allocation53_spill] sm:$0xff] %v8399_v55  ;;  %6790 = vtanh.f32 %v8399_v55 }
 0x5b0   :  { %v1970_v38 = vpop.f32.mrb[44].mxu0  ;;  %v2011_v56 = vpop.f32.mrb[44].mxu1 }
 0x5b1   :  { %v2022_v52 = vrot.slane %v1970_v38, 2  ;;  %v1972_v19 = vpop.f32.mrb[45].mxu0  ;;  %v2013_v33 = vpop.f32.mrb[45].mxu1  ;;  %v2024_v44 = vrot.slane %v2011_v56, 2  ;;  %v1934_v56 = vld [vmem:[#allocation2 + $0x38] sm:$0xc0] }
 0x5b2   :  { %v2023_v10 = vrot.slane %v1972_v19, 2  ;;  %v1974_v13 = vpop.f32.mrb[46].mxu0  ;;  %v2015_v32 = vpop.f32.mrb[46].mxu1  ;;  %v2025_v19 = vrot.slane %v2013_v33, 2 }
 0x5b3   :  { %v6791_v45 = vpop.eup %6790  ;;  %v2030_v58 = vadd.f32 %v2022_v52, %v1931_v46  ;;  %v1975_v37 = vpop.f32.mrb[47].mxu0  ;;  %v2032_v36 = vadd.f32 %v2024_v44, %v1933_v47 }
 0x5b4   :  { %v2016_v41 = vpop.f32.mrb[47].mxu1  ;;  %v8402_v54 = vmul.f32 %v6791_v45, %v2046_v17  ;;  %v2031_v35 = vadd.f32 %v2023_v10, %v1932_v39  ;;  %v2033_v52 = vadd.f32 %v2025_v19, %v1934_v56  ;;  %v9793_v19 = vld [vmem:[#allocation32_spill] sm:$0xff]  ;;  %v9798_v56 = vld [vmem:[#allocation37_spill] sm:$0xff] }
 0x5b5   :  { %v2055_v50 = vmul.f32 0.5, %v2030_v58  ;;  %v2069_v58 = vrot.slane %v8341_v3, 2 }
 0x5b6   :  { %v2059_v55 = vmul.f32 0.5, %v2031_v35  ;;  %v2080_v38 = vpack.c.bf16 %v8402_v54, %v8402_v54 }
 0x5b7   :  { %6792 = vtanh.f32 %v2055_v50 }
 0x5b8   :  { %6794 = vtanh.f32 %v2059_v55  ;;  %2114 = vmatmul.mubr.bf16.vlgmr.msra.gmra.mrb[48].mxu0 %v2080_v38  ;;  %2155 = vmatmul.mubr.bf16.vlgmr.msra.gmra.mrb[48].mxu1 %v2080_v38  ;;  %v2064_v55 = vmul.f32 0.5, %v2033_v52  ;;  %v9799_v52 = vld [vmem:[#allocation38_spill] sm:$0xff] }
 0x5b9   :  { %2188 = vmatpush1.bf16.msra.mxu0 %v8178_v12  ;;  %2229 = vmatpush1.bf16.msra.mxu1 %v8181_v61  ;;  %6796 = vtanh.f32 %v2032_v36 }
 0x5ba   :  { %2189 = vmatprep.subr.bf16.mxu0 %v8184_v16  ;;  %2230 = vmatprep.subr.bf16.mxu1 %v8187_v18  ;;  %6798 = vtanh.f32 %v2064_v55  ;;  %v9800_v55 = vld [vmem:[#allocation39_spill] sm:$0xff] }
 0x5bb   :  { %2219 = vmatprep.mubr.bf16.mxu0 %v9693_v28  ;;  %2260 = vmatprep.mubr.bf16.mxu1 %v9693_v28 }
 0x5bd   :  { %2190 = vmatpush1.bf16.msra.mxu0 %v8192_v22  ;;  %2231 = vmatpush1.bf16.msra.mxu1 %v8195_v49 }
 0x5be   :  { %2191 = vmatprep.subr.bf16.mxu0 %v8198_v23  ;;  %2232 = vmatprep.subr.bf16.mxu1 %v8201_v51 }
 0x5c1   :  { %v6793_v33 = vpop.eup %6792  ;;  %2192 = vmatpush1.bf16.msra.mxu0 %v8204_v48  ;;  %2233 = vmatpush1.bf16.msra.mxu1 %v8207_v60 }
 0x5c2   :  { %v6795_v17 = vpop.eup %6794  ;;  %v2057_v46 = vmul.f32 0.5, %v6793_v33  ;;  %2193 = vmatprep.subr.bf16.mxu0 %v8210_v5  ;;  %2234 = vmatprep.subr.bf16.mxu1 %v8213_v8  ;;  %v9801_v33 = vld [vmem:[#allocation40_spill] sm:$0xff] }
 0x5c3   :  { %v2061_v10 = vmul.f32 0.5, %v6795_v17  ;;  %v6797_v32 = vpop.eup %6796  ;;  %v9802_v17 = vld [vmem:[#allocation41_spill] sm:$0xff] }
 0x5c4   :  { %v2058_v13 = vadd.f32 0.5, %v2057_v46  ;;  %v6799_v3 = vpop.eup %6798  ;;  %v9803_v46 = vld [vmem:[#allocation42_spill] sm:$0xff] }
 0x5c5   :  { %v2062_v45 = vadd.f32 0.5, %v2061_v10  ;;  %2194 = vmatpush1.bf16.msra.mxu0 %v8217_v15  ;;  %2235 = vmatpush1.bf16.msra.mxu1 %v8220_v42  ;;  %v2066_v41 = vmul.f32 0.5, %v6799_v3  ;;  %v9804_v10 = vld [vmem:[#allocation43_spill] sm:$0xff] }
 0x5c6   :  { %v2072_v44 = vmul.f32 %v6797_v32, %v2058_v13  ;;  %2195 = vmatprep.subr.bf16.mxu0 %v8223_v6  ;;  %2236 = vmatprep.subr.bf16.mxu1 %v8226_v63  ;;  %v9805_v13 = vld [vmem:[#allocation44_spill] sm:$0xff]  ;;  %v9806_v32 = vld [vmem:[#allocation45_spill] sm:$0xff] }
 0x5c7   :  { %v2071_v39 = vmul.f32 %v2069_v58, %v2062_v45  ;;  %v2067_v35 = vadd.f32 0.5, %v2066_v41  ;;  %v9807_v45 = vld [vmem:[#allocation46_spill] sm:$0xff]  ;;  %v9808_v58 = vld [vmem:[#allocation47_spill] sm:$0xff] }
 0x5c9   :  { %v8425_v37 = vadd.f32 %v2072_v44, %v2071_v39  ;;  %2196 = vmatpush1.bf16.msra.mxu0 %v8231_v14  ;;  %2237 = vmatpush1.bf16.msra.mxu1 %v9759_v34  ;;  %v9809_v44 = vld [vmem:[#allocation50_spill] sm:$0xff]  ;;  %v9810_v39 = vld [vmem:[#allocation51_spill] sm:$0xff] }
 0x5ca   :  { %2197 = vmatprep.subr.bf16.mxu0 %v9760_v59  ;;  %2238 = vmatprep.subr.bf16.mxu1 %v9761_v7 }
 0x5cb   :  { %6800 = vtanh.f32 %v8425_v37 }
 0x5cd   :  { %2198 = vmatpush1.bf16.msra.mxu0 %v9762_v57  ;;  %2239 = vmatpush1.bf16.msra.mxu1 %v9763_v4 }
 0x5ce   :  { %2199 = vmatprep.subr.bf16.mxu0 %v9764_v43  ;;  %2240 = vmatprep.subr.bf16.mxu1 %v9765_v1 }
 0x5d1   :  { %2200 = vmatpush1.bf16.msra.mxu0 %v9766_v40  ;;  %2241 = vmatpush1.bf16.msra.mxu1 %v8259_v62 }
 0x5d2   :  { %2201 = vmatprep.subr.bf16.mxu0 %v9767_v9  ;;  %2242 = vmatprep.subr.bf16.mxu1 %v9768_v2 }
 0x5d5   :  { %v6801_v50 = vpop.eup %6800  ;;  %2202 = vmatpush1.bf16.msra.mxu0 %v8268_v53  ;;  %2243 = vmatpush1.bf16.msra.mxu1 %v8271_v11 }
 0x5d6   :  { %v8442_v47 = vmul.f32 %v6801_v50, %v2067_v35  ;;  %2335 = vmatprep.subr.bf16.mxu0 %v8062_v20  ;;  %2376 = vmatprep.subr.bf16.mxu1 %v8065_v21  ;;  %v9787_v20 = vld [vmem:[#allocation26_spill] sm:$0xff]  ;;  %v9788_v21 = vld [vmem:[#allocation27_spill] sm:$0xff] }
 0x5d8   :  { %v2183_v38 = vpack.c.bf16 %v8442_v47, %v8442_v47 }
 0x5da   :  { %v2185_v36 = vrot.slane %v2183_v38, 3 }
 0x5dc   :  { %2220 = vmatmul.mubr.bf16.vlgmr.msra.gmra.mrb[52].mxu0 %v2185_v36  ;;  %2261 = vmatmul.mubr.bf16.vlgmr.msra.gmra.mrb[52].mxu1 %v2185_v36  ;;  %v2076_v36 = vld [vmem:[#allocation2 + $0x40] sm:$0xc] }
 0x5dd   :  { %2336 = vmatpush1.bf16.msra.mxu0 %v8070_v24  ;;  %2377 = vmatpush1.bf16.msra.mxu1 %v8073_v0  ;;  %v9789_v24 = vld [vmem:[#allocation28_spill] sm:$0xff]  ;;  %v9790_v0 = vld [vmem:[#allocation29_spill] sm:$0xff] }
 0x5de   :  { %2337 = vmatprep.subr.bf16.mxu0 %v8076_v25  ;;  %2378 = vmatprep.subr.bf16.mxu1 %v8079_v26  ;;  %v9791_v25 = vld [vmem:[#allocation30_spill] sm:$0xff]  ;;  %v9792_v26 = vld [vmem:[#allocation31_spill] sm:$0xff] }
 0x5df   :  { %2367 = vmatprep.mubr.bf16.mxu0 %v9693_v28  ;;  %2408 = vmatprep.mubr.bf16.mxu1 %v9693_v28 }
 0x5e1   :  { %2338 = vmatpush1.bf16.msra.mxu0 %v8084_v27  ;;  %2379 = vmatpush1.bf16.msra.mxu1 %v8087_v29  ;;  %v9794_v27 = vld [vmem:[#allocation33_spill] sm:$0xff]  ;;  %v9795_v29 = vld [vmem:[#allocation34_spill] sm:$0xff] }
 0x5e2   :  { %2339 = vmatprep.subr.bf16.mxu0 %v8090_v30  ;;  %2380 = vmatprep.subr.bf16.mxu1 %v8093_v31  ;;  %v9796_v30 = vld [vmem:[#allocation35_spill] sm:$0xff]  ;;  %v9797_v31 = vld [vmem:[#allocation36_spill] sm:$0xff] }
 0x5e5   :  { %2340 = vmatpush1.bf16.msra.mxu0 %v9787_v20  ;;  %2381 = vmatpush1.bf16.msra.mxu1 %v9788_v21 }
 0x5e6   :  { %2341 = vmatprep.subr.bf16.mxu0 %v9789_v24  ;;  %2382 = vmatprep.subr.bf16.mxu1 %v9790_v0 }
 0x5e9   :  { %2342 = vmatpush1.bf16.msra.mxu0 %v9791_v25  ;;  %2383 = vmatpush1.bf16.msra.mxu1 %v9792_v26  ;;  %v2077_v26 = vld [vmem:[#allocation2 + $0x48] sm:$0xc] }
 0x5ea   :  { %2343 = vmatprep.subr.bf16.mxu0 %v9793_v19  ;;  %2384 = vmatprep.subr.bf16.mxu1 %v9794_v27 }
 0x5ed   :  { %2344 = vmatpush1.bf16.msra.mxu0 %v9795_v29  ;;  %2385 = vmatpush1.bf16.msra.mxu1 %v9796_v30 }
 0x5ee   :  { %2345 = vmatprep.subr.bf16.mxu0 %v9797_v31  ;;  %2386 = vmatprep.subr.bf16.mxu1 %v9798_v56  ;;  %v2078_v31 = vld [vmem:[#allocation2 + $0x50] sm:$0xc] }
 0x5f1   :  { %2346 = vmatpush1.bf16.msra.mxu0 %v9799_v52  ;;  %2387 = vmatpush1.bf16.msra.mxu1 %v9800_v55 }
 0x5f2   :  { %2347 = vmatprep.subr.bf16.mxu0 %v9801_v33  ;;  %2388 = vmatprep.subr.bf16.mxu1 %v9802_v17  ;;  %v2079_v33 = vld [vmem:[#allocation2 + $0x58] sm:$0xc] }
 0x5f5   :  { %2348 = vmatpush1.bf16.msra.mxu0 %v9803_v46  ;;  %2389 = vmatpush1.bf16.msra.mxu1 %v9804_v10 }
 0x5f6   :  { %2349 = vmatprep.subr.bf16.mxu0 %v9805_v13  ;;  %2390 = vmatprep.subr.bf16.mxu1 %v9806_v32 }
 0x5f9   :  { %2350 = vmatpush1.bf16.msra.mxu0 %v9807_v45  ;;  %2391 = vmatpush1.bf16.msra.mxu1 %v9808_v58 }
 0x5fa   :  { %2441 = vmatprep.subr.bf16.mxu0 %v9809_v44  ;;  %2482 = vmatprep.subr.bf16.mxu1 %v9810_v39 }
 0x68b   :  { %v2115_v3 = vpop.f32.mrb[48].mxu0  ;;  %v2156_v41 = vpop.f32.mrb[48].mxu1 }
 0x68c   :  { %v2167_v35 = vrot.slane %v2115_v3, 6  ;;  %v2117_v50 = vpop.f32.mrb[49].mxu0  ;;  %v2158_v38 = vpop.f32.mrb[49].mxu1  ;;  %v2169_v25 = vrot.slane %v2156_v41, 6  ;;  %v9811_v3 = vld [vmem:[#allocation53_spill] sm:$0xff] }
 0x68d   :  { %v2168_v20 = vrot.slane %v2117_v50, 6  ;;  %v2119_v21 = vpop.f32.mrb[50].mxu0  ;;  %v2160_v24 = vpop.f32.mrb[50].mxu1  ;;  %v2170_v55 = vrot.slane %v2158_v38, 6  ;;  %v2299_v41 = vrot.slane %v9811_v3, 6 }
 0x68e   :  { %v2175_v0 = vadd.f32 %v2167_v35, %v2076_v36  ;;  %v2120_v19 = vpop.f32.mrb[51].mxu0  ;;  %v2161_v27 = vpop.f32.mrb[51].mxu1  ;;  %v2177_v52 = vadd.f32 %v2169_v25, %v2078_v31 }
 0x68f   :  { %v2176_v29 = vadd.f32 %v2168_v20, %v2077_v26  ;;  %v2178_v17 = vadd.f32 %v2170_v55, %v2079_v33 }
 0x690   :  { %v2285_v30 = vmul.f32 0.5, %v2175_v0 }
 0x691   :  { %v2289_v56 = vmul.f32 0.5, %v2176_v29  ;;  %v2294_v46 = vmul.f32 0.5, %v2178_v17  ;;  %v2180_v17 = vld [vmem:[#allocation2 + $0x28] sm:$0x30] }
 0x692   :  { %6802 = vtanh.f32 %v2285_v30  ;;  %v2179_v30 = vld [vmem:[#allocation2 + $0x20] sm:$0x30] }
 0x693   :  { %6804 = vtanh.f32 %v2289_v56 }
 0x694   :  { %6806 = vtanh.f32 %v2177_v52 }
 0x695   :  { %6808 = vtanh.f32 %v2294_v46 }
 0x69c   :  { %v6803_v10 = vpop.eup %6802 }
 0x69d   :  { %v6805_v13 = vpop.eup %6804  ;;  %v2287_v32 = vmul.f32 0.5, %v6803_v10 }
 0x69e   :  { %v2291_v45 = vmul.f32 0.5, %v6805_v13  ;;  %v6807_v44 = vpop.eup %6806 }
 0x69f   :  { %v2288_v58 = vadd.f32 0.5, %v2287_v32  ;;  %v6809_v38 = vpop.eup %6808 }
 0x6a0   :  { %v2292_v39 = vadd.f32 0.5, %v2291_v45  ;;  %v2296_v20 = vmul.f32 0.5, %v6809_v38 }
 0x6a1   :  { %v2302_v35 = vmul.f32 %v6807_v44, %v2288_v58  ;;  %v2181_v58 = vld [vmem:[#allocation2 + $0x30] sm:$0x30] }
 0x6a2   :  { %v2301_v50 = vmul.f32 %v2299_v41, %v2292_v39  ;;  %v2297_v21 = vadd.f32 0.5, %v2296_v20 }
 0x6a4   :  { %v8483_v36 = vadd.f32 %v2302_v35, %v2301_v50  ;;  %v2182_v35 = vld [vmem:[#allocation2 + $0x38] sm:$0x30] }
 0x6a6   :  { %6810 = vtanh.f32 %v8483_v36 }
 0x6af   :  { %v2221_v24 = vpop.f32.mrb[52].mxu0  ;;  %v2262_v0 = vpop.f32.mrb[52].mxu1 }
 0x6b0   :  { %v6811_v25 = vpop.eup %6810  ;;  %v2273_v26 = vrot.slane %v2221_v24, 4  ;;  %v2223_v19 = vpop.f32.mrb[53].mxu0  ;;  %v2275_v33 = vrot.slane %v2262_v0, 4  ;;  %v7101_v24 = vld [vmem:[#allocation10 + $0x68] ss:$16 sps:$4 sm:$0xff]  }
 0x6b1   :  { %v2264_v27 = vpop.f32.mrb[53].mxu1  ;;  %v8486_v29 = vmul.f32 %v6811_v25, %v2297_v21  ;;  %v2274_v31 = vrot.slane %v2223_v19, 4  ;;  %v2225_v56 = vpop.f32.mrb[54].mxu0  ;;  %v7100_v21 = vld [vmem:[#allocation10 + $0x60] ss:$16 sps:$4 sm:$0xff]  }
 0x6b2   :  { %v2266_v52 = vpop.f32.mrb[54].mxu1  ;;  %v2281_v55 = vadd.f32 %v2273_v26, %v2179_v30  ;;  %v2226_v46 = vpop.f32.mrb[55].mxu0  ;;  %v2283_v3 = vadd.f32 %v2275_v33, %v2181_v58  ;;  %v2276_v41 = vrot.slane %v2264_v27, 4  ;;  %v7102_v0 = vld [vmem:[#allocation10 + $0x84] ss:$16 sps:$4 sm:$0xff]  }
 0x6b3   :  { %v2267_v10 = vpop.f32.mrb[55].mxu1  ;;  %v2282_v13 = vadd.f32 %v2274_v31, %v2180_v17  ;;  %v2331_v32 = vpack.c.bf16 %v8486_v29, %v8486_v29  ;;  %v7103_v25 = vld [vmem:[#allocation10 + $0x8c] ss:$16 sps:$4 sm:$0xff]   ;;  %v7104_v26 = vld [vmem:[#allocation10 + $0x80] ss:$16 sps:$4 sm:$0xff]  }
 0x6b4   :  { %v2306_v45 = vmul.f32 0.5, %v2281_v55  ;;  %v2284_v50 = vadd.f32 %v2276_v41, %v2182_v35  ;;  %v7105_v19 = vld [vmem:[#allocation10 + $0x88] ss:$16 sps:$4 sm:$0xff]   ;;  %v7106_v27 = vld [vmem:[#allocation10 + $0xa4] ss:$16 sps:$4 sm:$0xff]  }
 0x6b5   :  { %v2310_v44 = vmul.f32 0.5, %v2282_v13  ;;  %v2333_v39 = vrot.slane %v2331_v32, 1  ;;  %v7107_v30 = vld [vmem:[#allocation10 + $0xac] ss:$16 sps:$4 sm:$0xff]   ;;  %v7108_v31 = vld [vmem:[#allocation10 + $0xa0] ss:$16 sps:$4 sm:$0xff]  }
 0x6b6   :  { %6812 = vtanh.f32 %v2306_v45  ;;  %v7109_v56 = vld [vmem:[#allocation10 + $0xa8] ss:$16 sps:$4 sm:$0xff]   ;;  %v7110_v52 = vld [vmem:[#allocation10 + $0xc4] ss:$16 sps:$4 sm:$0xff]   ;;  %v7111_v55 = vld [vmem:[#allocation10 + $0xcc] ss:$16 sps:$4 sm:$0xff]  }
 0x6b7   :  { %6814 = vtanh.f32 %v2310_v44  ;;  %2368 = vmatmul.mubr.bf16.vlgmr.msra.gmra.mrb[56].mxu0 %v2333_v39  ;;  %2409 = vmatmul.mubr.bf16.vlgmr.msra.gmra.mrb[56].mxu1 %v2333_v39  ;;  %v7112_v33 = vld [vmem:[#allocation10 + $0xc0] ss:$16 sps:$4 sm:$0xff]   ;;  %v7113_v17 = vld [vmem:[#allocation10 + $0xc8] ss:$16 sps:$4 sm:$0xff]   ;;  %v7114_v46 = vld [vmem:[#allocation10 + $0xe4] ss:$16 sps:$4 sm:$0xff]  }
 0x6b8   :  { %2442 = vmatpush1.bf16.msra.mxu0 %v8178_v12  ;;  %2483 = vmatpush1.bf16.msra.mxu1 %v8181_v61  ;;  %6816 = vtanh.f32 %v2283_v3  ;;  %v2315_v12 = vmul.f32 0.5, %v2284_v50  ;;  %v7115_v10 = vld [vmem:[#allocation10 + $0xec] ss:$16 sps:$4 sm:$0xff]   ;;  %v7116_v13 = vld [vmem:[#allocation10 + $0xe0] ss:$16 sps:$4 sm:$0xff]  }
 0x6b9   :  { %2443 = vmatprep.subr.bf16.mxu0 %v8184_v16  ;;  %2484 = vmatprep.subr.bf16.mxu1 %v8187_v18  ;;  %v7117_v32 = vld [vmem:[#allocation10 + $0xe8] ss:$16 sps:$4 sm:$0xff]   ;;  %v7118_v45 = vld [vmem:[#allocation12 + $0x4] ss:$16 sps:$4 sm:$0xff]   ;;  %v7119_v58 = vld [vmem:[#allocation12 + $0xc] ss:$16 sps:$4 sm:$0xff]  }
 0x6ba   :  { %2473 = vmatprep.mubr.bf16.mxu0 %v9693_v28  ;;  %2514 = vmatprep.mubr.bf16.mxu1 %v9693_v28  ;;  %6818 = vtanh.f32 %v2315_v12  ;;  %v2327_v50 = vld [vmem:[#allocation2 + $0x40] sm:$0x30] }
 0x6bc   :  { %2444 = vmatpush1.bf16.msra.mxu0 %v8192_v22  ;;  %2485 = vmatpush1.bf16.msra.mxu1 %v8195_v49 }
 0x6bd   :  { %2445 = vmatprep.subr.bf16.mxu0 %v8198_v23  ;;  %2486 = vmatprep.subr.bf16.mxu1 %v8201_v51  ;;  %v2320_v23 = vrot.slane %v8425_v37, 2  ;;  %v7099_v37 = vld [vmem:[#allocation10 + $0x6c] ss:$16 sps:$4 sm:$0xff]  }
 0x6c0   :  { %v6813_v61 = vpop.eup %6812  ;;  %2446 = vmatpush1.bf16.msra.mxu0 %v8204_v48  ;;  %2487 = vmatpush1.bf16.msra.mxu1 %v8207_v60 }
 0x6c1   :  { %v6815_v16 = vpop.eup %6814  ;;  %v2308_v18 = vmul.f32 0.5, %v6813_v61  ;;  %2447 = vmatprep.subr.bf16.mxu0 %v8210_v5  ;;  %2488 = vmatprep.subr.bf16.mxu1 %v8213_v8 }
 0x6c2   :  { %v2312_v38 = vmul.f32 0.5, %v6815_v16  ;;  %v6817_v49 = vpop.eup %6816 }
 0x6c3   :  { %v2309_v22 = vadd.f32 0.5, %v2308_v18 }
 0x6c4   :  { %v2313_v20 = vadd.f32 0.5, %v2312_v38  ;;  %2448 = vmatpush1.bf16.msra.mxu0 %v8217_v15  ;;  %2489 = vmatpush1.bf16.msra.mxu1 %v8220_v42  ;;  %v6819_v5 = vpop.eup %6818 }
 0x6c5   :  { %v2323_v51 = vmul.f32 %v6817_v49, %v2309_v22  ;;  %2449 = vmatprep.subr.bf16.mxu0 %v8223_v6  ;;  %2490 = vmatprep.subr.bf16.mxu1 %v8226_v63  ;;  %v2317_v8 = vmul.f32 0.5, %v6819_v5  ;;  %v7086_v63 = vld [vmem:[#allocation10 + $0x4] ss:$16 sps:$4 sm:$0xff]   ;;  %v2328_v22 = vld [vmem:[#allocation2 + $0x48] sm:$0x30] }
 0x6c6   :  { %v2322_v48 = vmul.f32 %v2320_v23, %v2313_v20 }
 0x6c7   :  { %v2318_v15 = vadd.f32 0.5, %v2317_v8 }
 0x6c8   :  { %v8509_v60 = vadd.f32 %v2323_v51, %v2322_v48  ;;  %2450 = vmatpush1.bf16.msra.mxu0 %v8231_v14  ;;  %2491 = vmatpush1.bf16.msra.mxu1 %v9759_v34  ;;  %v7087_v14 = vld [vmem:[#allocation10 + $0xc] ss:$16 sps:$4 sm:$0xff]   ;;  %v2329_v48 = vld [vmem:[#allocation2 + $0x50] sm:$0x30] }
 0x6c9   :  { %2451 = vmatprep.subr.bf16.mxu0 %v9760_v59  ;;  %2492 = vmatprep.subr.bf16.mxu1 %v9761_v7  ;;  %v7088_v59 = vld [vmem:[#allocation10] ss:$16 sps:$4 sm:$0xff]   ;;  %v7089_v7 = vld [vmem:[#allocation10 + $0x8] ss:$16 sps:$4 sm:$0xff]  }
 0x6ca   :  { %6820 = vtanh.f32 %v8509_v60 }
 0x6cc   :  { %2452 = vmatpush1.bf16.msra.mxu0 %v9762_v57  ;;  %2493 = vmatpush1.bf16.msra.mxu1 %v9763_v4  ;;  %v7090_v57 = vld [vmem:[#allocation10 + $0x24] ss:$16 sps:$4 sm:$0xff]   ;;  %v7093_v4 = vld [vmem:[#allocation10 + $0x28] ss:$16 sps:$4 sm:$0xff]  }
 0x6cd   :  { %2453 = vmatprep.subr.bf16.mxu0 %v9764_v43  ;;  %2494 = vmatprep.subr.bf16.mxu1 %v9765_v1  ;;  %v7094_v43 = vld [vmem:[#allocation10 + $0x44] ss:$16 sps:$4 sm:$0xff]   ;;  %v7095_v1 = vld [vmem:[#allocation10 + $0x4c] ss:$16 sps:$4 sm:$0xff]  }
 0x6d0   :  { %2454 = vmatpush1.bf16.msra.mxu0 %v9766_v40  ;;  %2495 = vmatpush1.bf16.msra.mxu1 %v8259_v62  ;;  %v7096_v40 = vld [vmem:[#allocation10 + $0x40] ss:$16 sps:$4 sm:$0xff]  }
 0x6d1   :  { %2455 = vmatprep.subr.bf16.mxu0 %v9767_v9  ;;  %2496 = vmatprep.subr.bf16.mxu1 %v9768_v2  ;;  %v7097_v9 = vld [vmem:[#allocation10 + $0x48] ss:$16 sps:$4 sm:$0xff]   ;;  %v7098_v2 = vld [vmem:[#allocation10 + $0x64] ss:$16 sps:$4 sm:$0xff]  }
 0x6d4   :  { %v6821_v42 = vpop.eup %6820  ;;  %2456 = vmatpush1.bf16.msra.mxu0 %v8268_v53  ;;  %2497 = vmatpush1.bf16.msra.mxu1 %v8271_v11  ;;  %v7091_v53 = vld [vmem:[#allocation10 + $0x2c] ss:$16 sps:$4 sm:$0xff]   ;;  %v7092_v11 = vld [vmem:[#allocation10 + $0x20] ss:$16 sps:$4 sm:$0xff]  }
 0x6d5   :  { %v8526_v6 = vmul.f32 %v6821_v42, %v2318_v15  ;;  %2589 = vmatprep.subr.bf16.mxu0 %v7086_v63  ;;  %2630 = vmatprep.subr.bf16.mxu1 %v7087_v14  ;;  %v2330_v42 = vld [vmem:[#allocation2 + $0x58] sm:$0x30] }
 0x6d7   :  { %v2437_v34 = vpack.c.bf16 %v8526_v6, %v8526_v6 }
 0x6d9   :  { %v2439_v62 = vrot.slane %v2437_v34, 2 }
 0x6db   :  { %2474 = vmatmul.mubr.bf16.vlgmr.msra.gmra.mrb[60].mxu0 %v2439_v62  ;;  %2515 = vmatmul.mubr.bf16.vlgmr.msra.gmra.mrb[60].mxu1 %v2439_v62 }
 0x6dc   :  { %2590 = vmatpush1.bf16.msra.mxu0 %v7088_v59  ;;  %2631 = vmatpush1.bf16.msra.mxu1 %v7089_v7 }
 0x6dd   :  { %2591 = vmatprep.subr.bf16.mxu0 %v7090_v57  ;;  %2632 = vmatprep.subr.bf16.mxu1 %v7091_v53 }
 0x6de   :  { %2621 = vmatprep.mubr.bf16.mxu0 %v9693_v28  ;;  %2662 = vmatprep.mubr.bf16.mxu1 %v9693_v28 }
 0x6e0   :  { %2592 = vmatpush1.bf16.msra.mxu0 %v7092_v11  ;;  %2633 = vmatpush1.bf16.msra.mxu1 %v7093_v4  ;;  %v2553_v4 = vrot.slane %v8483_v36, 6 }
 0x6e1   :  { %2593 = vmatprep.subr.bf16.mxu0 %v7094_v43  ;;  %2634 = vmatprep.subr.bf16.mxu1 %v7095_v1 }
 0x6e4   :  { %2594 = vmatpush1.bf16.msra.mxu0 %v7096_v40  ;;  %2635 = vmatpush1.bf16.msra.mxu1 %v7097_v9 }
 0x6e5   :  { %2595 = vmatprep.subr.bf16.mxu0 %v7098_v2  ;;  %2636 = vmatprep.subr.bf16.mxu1 %v7099_v37 }
 0x6e8   :  { %2596 = vmatpush1.bf16.msra.mxu0 %v7100_v21  ;;  %2637 = vmatpush1.bf16.msra.mxu1 %v7101_v24 }
 0x6e9   :  { %2597 = vmatprep.subr.bf16.mxu0 %v7102_v0  ;;  %2638 = vmatprep.subr.bf16.mxu1 %v7103_v25 }
 0x6ec   :  { %2598 = vmatpush1.bf16.msra.mxu0 %v7104_v26  ;;  %2639 = vmatpush1.bf16.msra.mxu1 %v7105_v19 }
 0x6ed   :  { %2599 = vmatprep.subr.bf16.mxu0 %v7106_v27  ;;  %2640 = vmatprep.subr.bf16.mxu1 %v7107_v30  ;;  %v2433_v30 = vld [vmem:[#allocation2 + $0x20] sm:$0xc] }
 0x6f0   :  { %2600 = vmatpush1.bf16.msra.mxu0 %v7108_v31  ;;  %2641 = vmatpush1.bf16.msra.mxu1 %v7109_v56 }
 0x6f1   :  { %2601 = vmatprep.subr.bf16.mxu0 %v7110_v52  ;;  %2642 = vmatprep.subr.bf16.mxu1 %v7111_v55 }
 0x6f4   :  { %2602 = vmatpush1.bf16.msra.mxu0 %v7112_v33  ;;  %2643 = vmatpush1.bf16.msra.mxu1 %v7113_v17  ;;  %v2434_v33 = vld [vmem:[#allocation2 + $0x28] sm:$0xc] }
 0x6f5   :  { %2603 = vmatprep.subr.bf16.mxu0 %v7114_v46  ;;  %2644 = vmatprep.subr.bf16.mxu1 %v7115_v10  ;;  %v2829_v10 = vsel %vm2823_vm1, %v8402_v54, %v8486_v29  ;;  %v2436_v54 = vld [vmem:[#allocation2 + $0x38] sm:$0xc]  ;;  %v7122_v29 = vld [vmem:[#allocation12 + $0x24] ss:$16 sps:$4 sm:$0xff]  }
 0x6f8   :  { %2604 = vmatpush1.bf16.msra.mxu0 %v7116_v13  ;;  %2645 = vmatpush1.bf16.msra.mxu1 %v7117_v32 }
 0x6f9   :  { %2695 = vmatprep.subr.bf16.mxu0 %v7118_v45  ;;  %2736 = vmatprep.subr.bf16.mxu1 %v7119_v58 }
 0x78a   :  { %v2369_v44 = vpop.f32.mrb[56].mxu0  ;;  %v2410_v39 = vpop.f32.mrb[56].mxu1 }
 0x78b   :  { %v2421_v3 = vrot.slane %v2369_v44, 4  ;;  %v2371_v41 = vpop.f32.mrb[57].mxu0  ;;  %v2412_v35 = vpop.f32.mrb[57].mxu1  ;;  %v2423_v38 = vrot.slane %v2410_v39, 4  ;;  %v2435_v44 = vld [vmem:[#allocation2 + $0x30] sm:$0xc] }
 0x78c   :  { %v2422_v12 = vrot.slane %v2371_v41, 4  ;;  %v2373_v61 = vpop.f32.mrb[58].mxu0  ;;  %v2414_v16 = vpop.f32.mrb[58].mxu1  ;;  %v2424_v15 = vrot.slane %v2412_v35, 4 }
 0x78d   :  { %v2429_v18 = vadd.f32 %v2421_v3, %v2327_v50  ;;  %v2374_v49 = vpop.f32.mrb[59].mxu0  ;;  %v2415_v20 = vpop.f32.mrb[59].mxu1  ;;  %v2431_v8 = vadd.f32 %v2423_v38, %v2329_v48  ;;  %v7120_v50 = vld [vmem:[#allocation12] ss:$16 sps:$4 sm:$0xff]   ;;  %v7123_v61 = vld [vmem:[#allocation12 + $0x2c] ss:$16 sps:$4 sm:$0xff]  }
 0x78e   :  { %v2430_v23 = vadd.f32 %v2422_v12, %v2328_v22  ;;  %v2432_v63 = vadd.f32 %v2424_v15, %v2330_v42  ;;  %v7121_v12 = vld [vmem:[#allocation12 + $0x8] ss:$16 sps:$4 sm:$0xff]   ;;  %v7126_v22 = vld [vmem:[#allocation12 + $0x44] ss:$16 sps:$4 sm:$0xff]   ;;  %v7127_v49 = vld [vmem:[#allocation12 + $0x4c] ss:$16 sps:$4 sm:$0xff]  }
 0x78f   :  { %v2539_v51 = vmul.f32 0.5, %v2429_v18  ;;  %v7124_v18 = vld [vmem:[#allocation12 + $0x20] ss:$16 sps:$4 sm:$0xff]   ;;  %v7125_v38 = vld [vmem:[#allocation12 + $0x28] ss:$16 sps:$4 sm:$0xff]  }
 0x790   :  { %v2543_v5 = vmul.f32 0.5, %v2430_v23  ;;  %v2548_v14 = vmul.f32 0.5, %v2432_v63  ;;  %v7129_v48 = vld [vmem:[#allocation12 + $0x48] ss:$16 sps:$4 sm:$0xff]   ;;  %v7130_v15 = vld [vmem:[#allocation12 + $0x64] ss:$16 sps:$4 sm:$0xff]  }
 0x791   :  { %6822 = vtanh.f32 %v2539_v51  ;;  %v7128_v51 = vld [vmem:[#allocation12 + $0x40] ss:$16 sps:$4 sm:$0xff]   ;;  %v7131_v42 = vld [vmem:[#allocation12 + $0x6c] ss:$16 sps:$4 sm:$0xff]  }
 0x792   :  { %6824 = vtanh.f32 %v2543_v5 }
 0x793   :  { %6826 = vtanh.f32 %v2431_v8 }
 0x794   :  { %6828 = vtanh.f32 %v2548_v14 }
 0x79b   :  { %v6823_v34 = vpop.eup %6822 }
 0x79c   :  { %v6825_v62 = vpop.eup %6824  ;;  %v2541_v59 = vmul.f32 0.5, %v6823_v34 }
 0x79d   :  { %v2545_v7 = vmul.f32 0.5, %v6825_v62  ;;  %v6827_v53 = vpop.eup %6826 }
 0x79e   :  { %v2542_v57 = vadd.f32 0.5, %v2541_v59  ;;  %v6829_v9 = vpop.eup %6828  ;;  %v2574_v59 = vrot.slane %v8509_v60, 2 }
 0x79f   :  { %v2546_v11 = vadd.f32 0.5, %v2545_v7  ;;  %v2550_v2 = vmul.f32 0.5, %v6829_v9  ;;  %v7132_v7 = vld [vmem:[#allocation12 + $0x60] ss:$16 sps:$4 sm:$0xff]  }
 0x7a0   :  { %v2556_v43 = vmul.f32 %v6827_v53, %v2542_v57  ;;  %v7133_v57 = vld [vmem:[#allocation12 + $0x68] ss:$16 sps:$4 sm:$0xff]   ;;  %v7136_v9 = vld [vmem:[#allocation12 + $0x80] ss:$16 sps:$4 sm:$0xff]  }
 0x7a1   :  { %v2555_v1 = vmul.f32 %v2553_v4, %v2546_v11  ;;  %v2551_v37 = vadd.f32 0.5, %v2550_v2  ;;  %v7134_v11 = vld [vmem:[#allocation12 + $0x84] ss:$16 sps:$4 sm:$0xff]   ;;  %v7135_v4 = vld [vmem:[#allocation12 + $0x8c] ss:$16 sps:$4 sm:$0xff]  }
 0x7a2   :  { %v7137_v2 = vld [vmem:[#allocation12 + $0x88] ss:$16 sps:$4 sm:$0xff]  }
 0x7a3   :  { %v8533_v40 = vadd.f32 %v2556_v43, %v2555_v1 }
 0x7a5   :  { %6830 = vtanh.f32 %v8533_v40 }
 0x7ae   :  { %v2475_v21 = vpop.f32.mrb[60].mxu0  ;;  %v2516_v24 = vpop.f32.mrb[60].mxu1 }
 0x7af   :  { %v6831_v0 = vpop.eup %6830  ;;  %v2527_v25 = vrot.slane %v2475_v21, 6  ;;  %v2477_v26 = vpop.f32.mrb[61].mxu0  ;;  %v2529_v55 = vrot.slane %v2516_v24, 6  ;;  %v7139_v21 = vld [vmem:[#allocation12 + $0xac] ss:$16 sps:$4 sm:$0xff]  }
 0x7b0   :  { %v2518_v19 = vpop.f32.mrb[61].mxu1  ;;  %v2559_v27 = vmul.f32 %v6831_v0, %v2551_v37  ;;  %v2528_v31 = vrot.slane %v2477_v26, 6  ;;  %v2479_v56 = vpop.f32.mrb[62].mxu0  ;;  %v7138_v37 = vld [vmem:[#allocation12 + $0xa4] ss:$16 sps:$4 sm:$0xff]  }
 0x7b1   :  { %v2520_v36 = vpop.f32.mrb[62].mxu1  ;;  %v2535_v52 = vadd.f32 %v2527_v25, %v2433_v30  ;;  %v2480_v17 = vpop.f32.mrb[63].mxu0  ;;  %v2537_v41 = vadd.f32 %v2529_v55, %v2435_v44  ;;  %v2530_v35 = vrot.slane %v2518_v19, 6  ;;  %v7140_v24 = vld [vmem:[#allocation12 + $0xa0] ss:$16 sps:$4 sm:$0xff]  }
 0x7b2   :  { %v2521_v46 = vpop.f32.mrb[63].mxu1  ;;  %v2536_v13 = vadd.f32 %v2528_v31, %v2434_v33  ;;  %v2585_v32 = vpack.c.bf16 %v2559_v27, %v2559_v27  ;;  %v8540_v45 = vsel %vm2825_vm2, %v2829_v10, %v2559_v27  ;;  %v7141_v0 = vld [vmem:[#allocation12 + $0xa8] ss:$16 sps:$4 sm:$0xff]   ;;  %v7142_v25 = vld [vmem:[#allocation12 + $0xc4] ss:$16 sps:$4 sm:$0xff]  }
 0x7b3   :  { %v2560_v58 = vmul.f32 0.5, %v2535_v52  ;;  %v2538_v16 = vadd.f32 %v2530_v35, %v2436_v54  ;;  %v7143_v26 = vld [vmem:[#allocation12 + $0xcc] ss:$16 sps:$4 sm:$0xff]   ;;  %v7144_v27 = vld [vmem:[#allocation12 + $0xc0] ss:$16 sps:$4 sm:$0xff]  }
 0x7b4   :  { %v2564_v39 = vmul.f32 0.5, %v2536_v13  ;;  %v2587_v3 = vrot.slane %v2585_v32, 2  ;;  %v7145_v30 = vld [vmem:[#allocation12 + $0xc8] ss:$16 sps:$4 sm:$0xff]   ;;  %v7146_v31 = vld [vmem:[#allocation12 + $0xe4] ss:$16 sps:$4 sm:$0xff]  }
 0x7b5   :  { %6832 = vtanh.f32 %v2560_v58  ;;  %v2569_v20 = vmul.f32 0.5, %v2538_v16  ;;  %v7147_v56 = vld [vmem:[#allocation12 + $0xec] ss:$16 sps:$4 sm:$0xff]   ;;  %v7148_v55 = vld [vmem:[#allocation12 + $0xe0] ss:$16 sps:$4 sm:$0xff]  }
 0x7b6   :  { %6834 = vtanh.f32 %v2564_v39  ;;  %2622 = vmatmul.mubr.bf16.vlgmr.msra.gmra.mrb[64].mxu0 %v2587_v3  ;;  %2663 = vmatmul.mubr.bf16.vlgmr.msra.gmra.mrb[64].mxu1 %v2587_v3  ;;  %v7149_v33 = vld [vmem:[#allocation12 + $0xe8] ss:$16 sps:$4 sm:$0xff]   ;;  %v2840_v13 = vld [vmem:[#allocation13] sm:$0xff] }
 0x7b7   :  { %2696 = vmatpush1.bf16.msra.mxu0 %v7120_v50  ;;  %2737 = vmatpush1.bf16.msra.mxu1 %v7121_v12  ;;  %6836 = vtanh.f32 %v2537_v41  ;;  %v2844_v32 = vld [vmem:[#allocation13 + $0x20] sm:$0xff]  ;;  %v2841_v58 = vld [vmem:[#allocation13 + $0x8] sm:$0xff] }
 0x7b8   :  { %2697 = vmatprep.subr.bf16.mxu0 %v7122_v29  ;;  %2738 = vmatprep.subr.bf16.mxu1 %v7123_v61  ;;  %6838 = vtanh.f32 %v2569_v20  ;;  %v6301_v44 = vcombine.high %v2840_v13, %v2844_v32  ;;  %v2845_v39 = vld [vmem:[#allocation13 + $0x28] sm:$0xff]  ;;  %v6300_v3 = vcombine.low %v2840_v13, %v2844_v32  ;;  %v2848_v50 = vld [vmem:[#allocation13 + $0x40] sm:$0xff] }
 0x7b9   :  { %2727 = vmatprep.mubr.bf16.mxu0 %v9693_v28  ;;  %2768 = vmatprep.mubr.bf16.mxu1 %v9693_v28  ;;  %v6302_v41 = vcombine.low %v2841_v58, %v2845_v39  ;;  %v6303_v35 = vcombine.high %v2841_v58, %v2845_v39  ;;  %v2852_v12 = vld [vmem:[#allocation13 + $0x60] sm:$0xff]  ;;  %v2849_v54 = vld [vmem:[#allocation13 + $0x48] sm:$0xff] }
 0x7ba   :  { %v6309_v29 = vcombine.high %v2848_v50, %v2852_v12  ;;  %v2853_v61 = vld [vmem:[#allocation13 + $0x68] sm:$0xff]  ;;  %v6308_v16 = vcombine.low %v2848_v50, %v2852_v12  ;;  %v2900_v13 = vld [vmem:[#allocation13 + $0x1e0] sm:$0xff] }
 0x7bb   :  { %2698 = vmatpush1.bf16.msra.mxu0 %v7124_v18  ;;  %2739 = vmatpush1.bf16.msra.mxu1 %v7125_v38  ;;  %v6310_v18 = vcombine.low %v2849_v54, %v2853_v61  ;;  %v6311_v38 = vcombine.high %v2849_v54, %v2853_v61  ;;  %v2857_v20 = vld [vmem:[#allocation13 + $0x88] sm:$0xff]  ;;  %v2908_v50 = vld [vmem:[#allocation13 + $0x220] sm:$0xff] }
 0x7bc   :  { %2699 = vmatprep.subr.bf16.mxu0 %v7126_v22  ;;  %2740 = vmatprep.subr.bf16.mxu1 %v7127_v49  ;;  %v2856_v22 = vld [vmem:[#allocation13 + $0x80] sm:$0xff]  ;;  %v2897_v32 = vld [vmem:[#allocation13 + $0x1c8] sm:$0xff] }
 0x7bd   :  { %v2860_v49 = vld [vmem:[#allocation13 + $0xa0] sm:$0xff]  ;;  %v2905_v12 = vld [vmem:[#allocation13 + $0x208] sm:$0xff] }
 0x7bf   :  { %v6833_v23 = vpop.eup %6832  ;;  %2700 = vmatpush1.bf16.msra.mxu0 %v7128_v51  ;;  %2741 = vmatpush1.bf16.msra.mxu1 %v7129_v48  ;;  %v6317_v51 = vcombine.high %v2856_v22, %v2860_v49  ;;  %v2861_v48 = vld [vmem:[#allocation13 + $0xa8] sm:$0xff] }
 0x7c0   :  { %v6835_v5 = vpop.eup %6834  ;;  %v2562_v8 = vmul.f32 0.5, %v6833_v23  ;;  %2701 = vmatprep.subr.bf16.mxu0 %v7130_v15  ;;  %2742 = vmatprep.subr.bf16.mxu1 %v7131_v42  ;;  %v6316_v23 = vcombine.low %v2856_v22, %v2860_v49  ;;  %v6318_v15 = vcombine.low %v2857_v20, %v2861_v48  ;;  %v6319_v42 = vcombine.high %v2857_v20, %v2861_v48  ;;  %v2916_v22 = vld [vmem:[#allocation13 + $0x260] sm:$0xff]  ;;  %v2913_v49 = vld [vmem:[#allocation13 + $0x248] sm:$0xff] }
 0x7c1   :  { %v2566_v63 = vmul.f32 0.5, %v6835_v5  ;;  %v6837_v34 = vpop.eup %6836  ;;  %v2864_v5 = vld [vmem:[#allocation13 + $0xc0] sm:$0xff] }
 0x7c2   :  { %v2563_v14 = vadd.f32 0.5, %v2562_v8  ;;  %v6839_v60 = vpop.eup %6838  ;;  %v2868_v8 = vld [vmem:[#allocation13 + $0xe0] sm:$0xff] }
 0x7c3   :  { %v2567_v62 = vadd.f32 0.5, %v2566_v63  ;;  %2702 = vmatpush1.bf16.msra.mxu0 %v7132_v7  ;;  %2743 = vmatpush1.bf16.msra.mxu1 %v7133_v57  ;;  %v2571_v19 = vmul.f32 0.5, %v6839_v60  ;;  %v6325_v63 = vcombine.high %v2864_v5, %v2868_v8  ;;  %v2876_v7 = vld [vmem:[#allocation13 + $0x120] sm:$0xff]  ;;  %v2873_v57 = vld [vmem:[#allocation13 + $0x108] sm:$0xff] }
 0x7c4   :  { %v2577_v53 = vmul.f32 %v6837_v34, %v2563_v14  ;;  %2703 = vmatprep.subr.bf16.mxu0 %v7134_v11  ;;  %2744 = vmatprep.subr.bf16.mxu1 %v7135_v4  ;;  %v2865_v14 = vld [vmem:[#allocation13 + $0xc8] sm:$0xff]  ;;  %v6324_v11 = vcombine.low %v2864_v5, %v2868_v8  ;;  %v2920_v8 = vld [vmem:[#allocation13 + $0x280] sm:$0xff] }
 0x7c5   :  { %v2576_v43 = vmul.f32 %v2574_v59, %v2567_v62  ;;  %v2572_v36 = vadd.f32 0.5, %v2571_v19  ;;  %v2869_v34 = vld [vmem:[#allocation13 + $0xe8] sm:$0xff]  ;;  %v2872_v62 = vld [vmem:[#allocation13 + $0x100] sm:$0xff] }
 0x7c6   :  { %v6327_v59 = vcombine.high %v2865_v14, %v2869_v34  ;;  %v6326_v4 = vcombine.low %v2865_v14, %v2869_v34  ;;  %v2885_v60 = vld [vmem:[#allocation13 + $0x168] sm:$0xff] }
 0x7c7   :  { %v8545_v1 = vadd.f32 %v2577_v53, %v2576_v43  ;;  %2704 = vmatpush1.bf16.msra.mxu0 %v7136_v9  ;;  %2745 = vmatpush1.bf16.msra.mxu1 %v7137_v2  ;;  %v2877_v53 = vld [vmem:[#allocation13 + $0x128] sm:$0xff]  ;;  %v6333_v43 = vcombine.high %v2872_v62, %v2876_v7  ;;  %v2880_v2 = vld [vmem:[#allocation13 + $0x140] sm:$0xff] }
 0x7c8   :  { %2705 = vmatprep.subr.bf16.mxu0 %v7138_v37  ;;  %2746 = vmatprep.subr.bf16.mxu1 %v7139_v21  ;;  %v6335_v9 = vcombine.high %v2873_v57, %v2877_v53  ;;  %v2884_v37 = vld [vmem:[#allocation13 + $0x160] sm:$0xff]  ;;  %v2881_v21 = vld [vmem:[#allocation13 + $0x148] sm:$0xff] }
 0x7c9   :  { %6840 = vtanh.f32 %v8545_v1  ;;  %v6340_v19 = vcombine.low %v2880_v2, %v2884_v37  ;;  %v2925_v14 = vld [vmem:[#allocation13 + $0x2a8] sm:$0xff] }
 0x7cb   :  { %2706 = vmatpush1.bf16.msra.mxu0 %v7140_v24  ;;  %2747 = vmatpush1.bf16.msra.mxu1 %v7141_v0  ;;  %v6332_v24 = vcombine.low %v2872_v62, %v2876_v7  ;;  %v6334_v0 = vcombine.low %v2873_v57, %v2877_v53  ;;  %v2928_v7 = vld [vmem:[#allocation13 + $0x2c0] sm:$0xff]  ;;  %v2929_v53 = vld [vmem:[#allocation13 + $0x2c8] sm:$0xff] }
 0x7cc   :  { %2707 = vmatprep.subr.bf16.mxu0 %v7142_v25  ;;  %2748 = vmatprep.subr.bf16.mxu1 %v7143_v26  ;;  %v6341_v25 = vcombine.high %v2880_v2, %v2884_v37  ;;  %v6343_v26 = vcombine.high %v2881_v21, %v2885_v60  ;;  %v2932_v57 = vld [vmem:[#allocation13 + $0x2e0] sm:$0xff] }
 0x7cd   :  { %v2940_v2 = vld [vmem:[#allocation13 + $0x320] sm:$0xff] }
 0x7cf   :  { %2708 = vmatpush1.bf16.msra.mxu0 %v7144_v27  ;;  %2749 = vmatpush1.bf16.msra.mxu1 %v7145_v30  ;;  %v6342_v27 = vcombine.low %v2881_v21, %v2885_v60  ;;  %v2888_v30 = vld [vmem:[#allocation13 + $0x180] sm:$0xff] }
 0x7d0   :  { %2709 = vmatprep.subr.bf16.mxu0 %v7146_v31  ;;  %2750 = vmatprep.subr.bf16.mxu1 %v7147_v56  ;;  %v2892_v31 = vld [vmem:[#allocation13 + $0x1a0] sm:$0xff]  ;;  %v2889_v56 = vld [vmem:[#allocation13 + $0x188] sm:$0xff] }
 0x7d3   :  { %v6841_v52 = vpop.eup %6840  ;;  %2710 = vmatpush1.bf16.msra.mxu0 %v7148_v55  ;;  %2751 = vmatpush1.bf16.msra.mxu1 %v7149_v33  ;;  %v6348_v55 = vcombine.low %v2888_v30, %v2892_v31 }
 0x7d4   :  { %v8548_v17 = vmul.f32 %v6841_v52, %v2572_v36  ;;  %3650 = vmatprep.subr.bf16.mxu0 %v6301_v44  ;;  %3693 = vmatprep.subr.bf16.mxu1 %v6303_v35  ;;  %v6349_v36 = vcombine.high %v2888_v30, %v2892_v31  ;;  %v2893_v52 = vld [vmem:[#allocation13 + $0x1a8] sm:$0xff]  ;;  %v2904_v35 = vld [vmem:[#allocation13 + $0x200] sm:$0xff] }
 0x7d5   :  { %v6350_v33 = vcombine.low %v2889_v56, %v2893_v52  ;;  %v2901_v44 = vld [vmem:[#allocation13 + $0x1e8] sm:$0xff]  ;;  %v6365_v54 = vcombine.high %v2904_v35, %v2908_v50  ;;  %v6364_v61 = vcombine.low %v2904_v35, %v2908_v50 }
 0x7d6   :  { %v2691_v46 = vpack.c.bf16 %v8548_v17, %v8548_v17  ;;  %v2949_v30 = vld [vmem:[#allocation13 + $0x368] sm:$0xff] }
 0x7d8   :  { %v2693_v10 = vrot.slane %v2691_v46, 1  ;;  %v6351_v46 = vcombine.high %v2889_v56, %v2893_v52  ;;  %v2952_v52 = vld [vmem:[#allocation13 + $0x380] sm:$0xff] }
 0x7da   :  { %2728 = vmatmul.mubr.bf16.vlgmr.msra.gmra.mrb[68].mxu0 %v2693_v10  ;;  %2769 = vmatmul.mubr.bf16.vlgmr.msra.gmra.mrb[68].mxu1 %v2693_v10  ;;  %v2896_v10 = vld [vmem:[#allocation13 + $0x1c0] sm:$0xff] }
 0x7db   :  { %3651 = vmatpush1.bf16.msra.mxu0 %v6300_v3  ;;  %3694 = vmatpush1.bf16.msra.mxu1 %v6302_v41  ;;  %v6357_v58 = vcombine.high %v2896_v10, %v2900_v13  ;;  %v6356_v39 = vcombine.low %v2896_v10, %v2900_v13  ;;  %v6358_v3 = vcombine.low %v2897_v32, %v2901_v44  ;;  %v2957_v10 = vld [vmem:[#allocation13 + $0x3a8] sm:$0xff]  ;;  %v8552_v13 = vld [vmem:[#allocation13 + $0x10] sm:$0xff] }
 0x7dc   :  { %3652 = vmatprep.subr.bf16.mxu0 %v6309_v29  ;;  %3695 = vmatprep.subr.bf16.mxu1 %v6311_v38  ;;  %v6359_v41 = vcombine.high %v2897_v32, %v2901_v44  ;;  %v2909_v29 = vld [vmem:[#allocation13 + $0x228] sm:$0xff]  ;;  %v2912_v38 = vld [vmem:[#allocation13 + $0x240] sm:$0xff]  ;;  %v8554_v32 = vld [vmem:[#allocation13 + $0x30] sm:$0xff] }
 0x7dd   :  { %v6373_v20 = vcombine.high %v2912_v38, %v2916_v22  ;;  %v8558_v44 = vld [vmem:[#allocation13 + $0x38] sm:$0xff] }
 0x7df   :  { %3653 = vmatpush1.bf16.msra.mxu0 %v6308_v16  ;;  %3696 = vmatpush1.bf16.msra.mxu1 %v6310_v18  ;;  %v6366_v16 = vcombine.low %v2905_v12, %v2909_v29  ;;  %v6367_v18 = vcombine.high %v2905_v12, %v2909_v29  ;;  %v2964_v29 = vld [vmem:[#allocation13 + $0x3e0] sm:$0xff] }
 0x7e0   :  { %3654 = vmatprep.subr.bf16.mxu0 %v6317_v51  ;;  %3697 = vmatprep.subr.bf16.mxu1 %v6319_v42  ;;  %v6372_v51 = vcombine.low %v2912_v38, %v2916_v22  ;;  %v2921_v42 = vld [vmem:[#allocation13 + $0x288] sm:$0xff] }
 0x7e1   :  { %v6382_v62 = vcombine.low %v2921_v42, %v2925_v14 }
 0x7e3   :  { %3655 = vmatpush1.bf16.msra.mxu0 %v6316_v23  ;;  %3698 = vmatpush1.bf16.msra.mxu1 %v6318_v15  ;;  %v2917_v23 = vld [vmem:[#allocation13 + $0x268] sm:$0xff]  ;;  %v2924_v15 = vld [vmem:[#allocation13 + $0x2a0] sm:$0xff] }
 0x7e4   :  { %3656 = vmatprep.subr.bf16.mxu0 %v6325_v63  ;;  %3699 = vmatprep.subr.bf16.mxu1 %v6327_v59  ;;  %v6374_v48 = vcombine.low %v2913_v49, %v2917_v23  ;;  %v6375_v5 = vcombine.high %v2913_v49, %v2917_v23  ;;  %v6381_v63 = vcombine.high %v2920_v8, %v2924_v15 }
 0x7e5   :  { %v6380_v34 = vcombine.low %v2920_v8, %v2924_v15  ;;  %v6383_v59 = vcombine.high %v2921_v42, %v2925_v14  ;;  %v2581_v14 = vld [vmem:[#allocation2 + $0x40] sm:$0xc0] }
 0x7e7   :  { %3657 = vmatpush1.bf16.msra.mxu0 %v6324_v11  ;;  %3700 = vmatpush1.bf16.msra.mxu1 %v6326_v4  ;;  %v6388_v11 = vcombine.low %v2928_v7, %v2932_v57  ;;  %v6389_v4 = vcombine.high %v2928_v7, %v2932_v57 }
 0x7e8   :  { %3658 = vmatprep.subr.bf16.mxu0 %v6333_v43  ;;  %3701 = vmatprep.subr.bf16.mxu1 %v6335_v9  ;;  %v2933_v43 = vld [vmem:[#allocation13 + $0x2e8] sm:$0xff]  ;;  %v2936_v9 = vld [vmem:[#allocation13 + $0x300] sm:$0xff] }
 0x7e9   :  { %v6390_v37 = vcombine.low %v2929_v53, %v2933_v43  ;;  %v6391_v21 = vcombine.high %v2929_v53, %v2933_v43  ;;  %v6397_v60 = vcombine.high %v2936_v9, %v2940_v2  ;;  %v6396_v31 = vcombine.low %v2936_v9, %v2940_v2  ;;  %v2582_v53 = vld [vmem:[#allocation2 + $0x48] sm:$0xc0]  ;;  %v2583_v2 = vld [vmem:[#allocation2 + $0x50] sm:$0xc0] }
 0x7eb   :  { %3659 = vmatpush1.bf16.msra.mxu0 %v6332_v24  ;;  %3702 = vmatpush1.bf16.msra.mxu1 %v6334_v0  ;;  %v2937_v24 = vld [vmem:[#allocation13 + $0x308] sm:$0xff] }
 0x7ec   :  { %3660 = vmatprep.subr.bf16.mxu0 %v6341_v25  ;;  %3703 = vmatprep.subr.bf16.mxu1 %v6343_v26  ;;  %v2941_v0 = vld [vmem:[#allocation13 + $0x328] sm:$0xff]  ;;  %v2944_v25 = vld [vmem:[#allocation13 + $0x340] sm:$0xff] }
 0x7ed   :  { %v6399_v26 = vcombine.high %v2937_v24, %v2941_v0  ;;  %v6398_v56 = vcombine.low %v2937_v24, %v2941_v0  ;;  %v2584_v24 = vld [vmem:[#allocation2 + $0x58] sm:$0xc0] }
 0x7ef   :  { %3661 = vmatpush1.bf16.msra.mxu0 %v6340_v19  ;;  %3704 = vmatpush1.bf16.msra.mxu1 %v6342_v27  ;;  %v2948_v19 = vld [vmem:[#allocation13 + $0x360] sm:$0xff]  ;;  %v2945_v27 = vld [vmem:[#allocation13 + $0x348] sm:$0xff] }
 0x7f0   :  { %3662 = vmatprep.subr.bf16.mxu0 %v6349_v36  ;;  %3705 = vmatprep.subr.bf16.mxu1 %v6351_v46  ;;  %v6405_v36 = vcombine.high %v2944_v25, %v2948_v19  ;;  %v2953_v46 = vld [vmem:[#allocation13 + $0x388] sm:$0xff]  ;;  %v6406_v35 = vcombine.low %v2945_v27, %v2949_v30 }
 0x7f1   :  { %v6415_v12 = vcombine.high %v2953_v46, %v2957_v10  ;;  %v6414_v38 = vcombine.low %v2953_v46, %v2957_v10 }
 0x7f3   :  { %3663 = vmatpush1.bf16.msra.mxu0 %v6348_v55  ;;  %3706 = vmatpush1.bf16.msra.mxu1 %v6350_v33  ;;  %v2956_v55 = vld [vmem:[#allocation13 + $0x3a0] sm:$0xff]  ;;  %v6407_v33 = vcombine.high %v2945_v27, %v2949_v30 }
 0x7f4   :  { %3664 = vmatprep.subr.bf16.mxu0 %v6357_v58  ;;  %3707 = vmatprep.subr.bf16.mxu1 %v6359_v41  ;;  %v8556_v58 = vld [vmem:[#allocation13 + $0x18] sm:$0xff]  ;;  %v6413_v50 = vcombine.high %v2952_v52, %v2956_v55 }
 0x7f5   :  { %v6306_v41 = vcombine.low %v8556_v58, %v8558_v44 }
 0x7f7   :  { %3665 = vmatpush1.bf16.msra.mxu0 %v6356_v39  ;;  %3708 = vmatpush1.bf16.msra.mxu1 %v6358_v3  ;;  %v6404_v39 = vcombine.low %v2944_v25, %v2948_v19  ;;  %v6304_v3 = vcombine.low %v8552_v13, %v8554_v32 }
 0x7f8   :  { %3666 = vmatprep.subr.bf16.mxu0 %v6365_v54  ;;  %3709 = vmatprep.subr.bf16.mxu1 %v6367_v18  ;;  %v2960_v54 = vld [vmem:[#allocation13 + $0x3c0] sm:$0xff]  ;;  %v6412_v18 = vcombine.low %v2952_v52, %v2956_v55  ;;  %v2795_v52 = vrot.slane %v8533_v40, 6 }
 0x7f9   :  { %v6421_v22 = vcombine.high %v2960_v54, %v2964_v29 }
 0x7fb   :  { %3667 = vmatpush1.bf16.msra.mxu0 %v6364_v61  ;;  %3710 = vmatpush1.bf16.msra.mxu1 %v6366_v16  ;;  %v2961_v61 = vld [vmem:[#allocation13 + $0x3c8] sm:$0xff] }
 0x7fc   :  { %3668 = vmatprep.subr.bf16.mxu0 %v6373_v20  ;;  %3711 = vmatprep.subr.bf16.mxu1 %v6375_v5  ;;  %v2965_v16 = vld [vmem:[#allocation13 + $0x3e8] sm:$0xff]  ;;  %v6420_v20 = vcombine.low %v2960_v54, %v2964_v29 }
 0x7fd   :  { %v6423_v49 = vcombine.high %v2961_v61, %v2965_v16  ;;  %v6422_v23 = vcombine.low %v2961_v61, %v2965_v16  ;;  %v2688_v16 = vld [vmem:[#allocation2 + $0x28] sm:$0x3] }
 0x7ff   :  { %3669 = vmatpush1.bf16.msra.mxu0 %v6372_v51  ;;  %3712 = vmatpush1.bf16.msra.mxu1 %v6374_v48  ;;  %v6305_v51 = vcombine.high %v8552_v13, %v8554_v32  ;;  %v6307_v48 = vcombine.high %v8556_v58, %v8558_v44 }
 0x800   :  { %3670 = vmatprep.subr.bf16.mxu0 %v6381_v63  ;;  %3713 = vmatprep.subr.bf16.mxu1 %v6383_v59 }
 0x803   :  { %3671 = vmatpush1.bf16.msra.mxu0 %v6380_v34  ;;  %3714 = vmatpush1.bf16.msra.mxu1 %v6382_v62 }
 0x804   :  { %3672 = vmatprep.subr.bf16.mxu0 %v6389_v4  ;;  %3715 = vmatprep.subr.bf16.mxu1 %v6391_v21 }
 0x807   :  { %3673 = vmatpush1.bf16.msra.mxu0 %v6388_v11  ;;  %3716 = vmatpush1.bf16.msra.mxu1 %v6390_v37 }
 0x808   :  { %3674 = vmatprep.subr.bf16.mxu0 %v6397_v60  ;;  %3717 = vmatprep.subr.bf16.mxu1 %v6399_v26 }
 0x80b   :  { %3675 = vmatpush1.bf16.msra.mxu0 %v6396_v31  ;;  %3718 = vmatpush1.bf16.msra.mxu1 %v6398_v56 }
 0x80c   :  { %3676 = vmatprep.subr.bf16.mxu0 %v6405_v36  ;;  %3719 = vmatprep.subr.bf16.mxu1 %v6407_v33 }
 0x80f   :  { %3677 = vmatpush1.bf16.msra.mxu0 %v6404_v39  ;;  %3720 = vmatpush1.bf16.msra.mxu1 %v6406_v35 }
 0x810   :  { %3678 = vmatprep.subr.bf16.mxu0 %v6413_v50  ;;  %3721 = vmatprep.subr.bf16.mxu1 %v6415_v12  ;;  %v2687_v50 = vld [vmem:[#allocation2 + $0x20] sm:$0x3] }
 0x813   :  { %3679 = vmatpush1.bf16.msra.mxu0 %v6412_v18  ;;  %3722 = vmatpush1.bf16.msra.mxu1 %v6414_v38 }
 0x814   :  { %3680 = vmatprep.subr.bf16.mxu0 %v6421_v22  ;;  %3723 = vmatprep.subr.bf16.mxu1 %v6423_v49 }
 0x817   :  { %3681 = vmatpush1.bf16.msra.mxu0 %v6420_v20  ;;  %3724 = vmatpush1.bf16.msra.mxu1 %v6422_v23 }
 0x818   :  { %3736 = vmatprep.subr.bf16.mxu0 %v6305_v51  ;;  %3779 = vmatprep.subr.bf16.mxu1 %v6307_v48 }
 0x889   :  { %v2623_v5 = vpop.f32.mrb[64].mxu0  ;;  %v2664_v8 = vpop.f32.mrb[64].mxu1 }
 0x88a   :  { %v2675_v15 = vrot.slane %v2623_v5, 2  ;;  %v2625_v42 = vpop.f32.mrb[65].mxu0  ;;  %v2666_v63 = vpop.f32.mrb[65].mxu1  ;;  %v2677_v57 = vrot.slane %v2664_v8, 2  ;;  %v2689_v5 = vld [vmem:[#allocation2 + $0x30] sm:$0x3] }
 0x88b   :  { %v2676_v34 = vrot.slane %v2625_v42, 2  ;;  %v2627_v62 = vpop.f32.mrb[66].mxu0  ;;  %v2668_v59 = vpop.f32.mrb[66].mxu1  ;;  %v2678_v60 = vrot.slane %v2666_v63, 2  ;;  %v9812_v63 = vld [vmem:[#allocation63_spill] sm:$0xff] }
 0x88c   :  { %v2683_v7 = vadd.f32 %v2675_v15, %v2581_v14  ;;  %v2628_v11 = vpop.f32.mrb[67].mxu0  ;;  %v2669_v4 = vpop.f32.mrb[67].mxu1  ;;  %v2685_v21 = vadd.f32 %v2677_v57, %v2583_v2 }
 0x88d   :  { %v2684_v43 = vadd.f32 %v2676_v34, %v2582_v53  ;;  %v2686_v0 = vadd.f32 %v2678_v60, %v2584_v24  ;;  %v2690_v34 = vld [vmem:[#allocation2 + $0x38] sm:$0x3] }
 0x88e   :  { %v2781_v9 = vmul.f32 0.5, %v2683_v7 }
 0x88f   :  { %v2785_v37 = vmul.f32 0.5, %v2684_v43  ;;  %v2790_v25 = vmul.f32 0.5, %v2686_v0  ;;  %v9813_v0 = vld [vmem:[#allocation62_spill] sm:$0xff] }
 0x890   :  { %6842 = vtanh.f32 %v2781_v9 }
 0x891   :  { %6844 = vtanh.f32 %v2785_v37 }
 0x892   :  { %6846 = vtanh.f32 %v2685_v21 }
 0x893   :  { %6848 = vtanh.f32 %v2790_v25  ;;  %v9814_v25 = vld [vmem:[#allocation52_spill] sm:$0xff] }
 0x89a   :  { %v6843_v26 = vpop.eup %6842 }
 0x89b   :  { %v6845_v19 = vpop.eup %6844  ;;  %v2783_v27 = vmul.f32 0.5, %v6843_v26  ;;  %v2835_v26 = vsel %vm2823_vm1, %v9814_v25, %v9813_v0  ;;  %v2899_v0 = vld [vmem:[#allocation13 + $0x1d8] sm:$0xff] }
 0x89c   :  { %v2787_v30 = vmul.f32 0.5, %v6845_v19  ;;  %v6847_v56 = vpop.eup %6846  ;;  %v2903_v25 = vld [vmem:[#allocation13 + $0x1f8] sm:$0xff] }
 0x89d   :  { %v2784_v31 = vadd.f32 0.5, %v2783_v27  ;;  %v6849_v10 = vpop.eup %6848 }
 0x89e   :  { %v2788_v36 = vadd.f32 0.5, %v2787_v30  ;;  %v2792_v39 = vmul.f32 0.5, %v6849_v10  ;;  %v2854_v10 = vld [vmem:[#allocation13 + $0x70] sm:$0xff] }
 0x89f   :  { %v2798_v55 = vmul.f32 %v6847_v56, %v2784_v31  ;;  %v9815_v31 = vld [vmem:[#allocation25_spill] sm:$0xff] }
 0x8a0   :  { %v2797_v33 = vmul.f32 %v2795_v52, %v2788_v36  ;;  %v2793_v35 = vadd.f32 0.5, %v2792_v39  ;;  %v2836_v56 = vsel %vm2825_vm2, %v2835_v26, %v9815_v31  ;;  %v2850_v52 = vld [vmem:[#allocation13 + $0x50] sm:$0xff]  ;;  %v2851_v39 = vld [vmem:[#allocation13 + $0x58] sm:$0xff] }
 0x8a1   :  { %v2906_v31 = vld [vmem:[#allocation13 + $0x210] sm:$0xff] }
 0x8a2   :  { %v2799_v46 = vadd.f32 %v2798_v55, %v2797_v33  ;;  %v9816_v33 = vld [vmem:[#allocation48_spill] sm:$0xff] }
 0x8a4   :  { %6850 = vtanh.f32 %v2799_v46  ;;  %v2837_v46 = vsel %vm2827_vm3, %v2836_v56, %v9816_v33  ;;  %v2910_v56 = vld [vmem:[#allocation13 + $0x230] sm:$0xff] }
 0x8a5   :  { %v6369_v33 = vcombine.high %v2906_v31, %v2910_v56 }
 0x8ad   :  { %v2729_v12 = vpop.f32.mrb[68].mxu0  ;;  %v2770_v54 = vpop.f32.mrb[68].mxu1 }
 0x8ae   :  { %v6851_v29 = vpop.eup %6850  ;;  %v2777_v61 = vadd.f32 %v2729_v12, %v2687_v50  ;;  %v2731_v18 = vpop.f32.mrb[69].mxu0  ;;  %v2779_v42 = vadd.f32 %v2770_v54, %v2689_v5  ;;  %v2858_v12 = vld [vmem:[#allocation13 + $0x90] sm:$0xff]  ;;  %v6313_v54 = vcombine.high %v2850_v52, %v2854_v10 }
 0x8af   :  { %v2772_v38 = vpop.f32.mrb[69].mxu1  ;;  %v2801_v22 = vmul.f32 %v6851_v29, %v2793_v35  ;;  %v2778_v49 = vadd.f32 %v2731_v18, %v2688_v16  ;;  %v2733_v20 = vpop.f32.mrb[70].mxu0  ;;  %v2855_v35 = vld [vmem:[#allocation13 + $0x78] sm:$0xff] }
 0x8b0   :  { %v2774_v23 = vpop.f32.mrb[70].mxu1  ;;  %v2802_v40 = vmul.f32 0.5, %v2777_v61  ;;  %v2734_v51 = vpop.f32.mrb[71].mxu0  ;;  %v2780_v62 = vadd.f32 %v2772_v38, %v2690_v34  ;;  %v6315_v29 = vcombine.high %v2851_v39, %v2855_v35  ;;  %v2859_v61 = vld [vmem:[#allocation13 + $0x98] sm:$0xff] }
 0x8b1   :  { %v2775_v48 = vpop.f32.mrb[71].mxu1  ;;  %v2806_v8 = vmul.f32 0.5, %v2778_v49  ;;  %v2831_v15 = vsel %vm2827_vm3, %v8540_v45, %v2801_v22  ;;  %v2816_v45 = vrot.slane %v8545_v1, 2  ;;  %v2863_v16 = vld [vmem:[#allocation13 + $0xb8] sm:$0xff]  ;;  %v2866_v22 = vld [vmem:[#allocation13 + $0xd0] sm:$0xff] }
 0x8b2   :  { %6852 = vtanh.f32 %v2802_v40  ;;  %v8572_v14 = vpack.c.bf16 %v2831_v15, %v9812_v63  ;;  %v2811_v59 = vmul.f32 0.5, %v2780_v62  ;;  %v6323_v38 = vcombine.high %v2859_v61, %v2863_v16  ;;  %v2870_v49 = vld [vmem:[#allocation13 + $0xf0] sm:$0xff]  ;;  %v2867_v20 = vld [vmem:[#allocation13 + $0xd8] sm:$0xff] }
 0x8b3   :  { %6854 = vtanh.f32 %v2806_v8  ;;  %v2871_v23 = vld [vmem:[#allocation13 + $0xf8] sm:$0xff]  ;;  %v6322_v32 = vcombine.low %v2859_v61, %v2863_v16  ;;  %v6329_v58 = vcombine.high %v2866_v22, %v2870_v49  ;;  %v6328_v48 = vcombine.low %v2866_v22, %v2870_v49  ;;  %v2886_v63 = vld [vmem:[#allocation13 + $0x170] sm:$0xff] }
 0x8b4   :  { %6856 = vtanh.f32 %v2779_v42  ;;  %v6331_v44 = vcombine.high %v2867_v20, %v2871_v23  ;;  %v2875_v40 = vld [vmem:[#allocation13 + $0x118] sm:$0xff]  ;;  %v6330_v5 = vcombine.low %v2867_v20, %v2871_v23  ;;  %v2882_v42 = vld [vmem:[#allocation13 + $0x150] sm:$0xff] }
 0x8b5   :  { %6858 = vtanh.f32 %v2811_v59  ;;  %v2879_v51 = vld [vmem:[#allocation13 + $0x138] sm:$0xff]  ;;  %v2922_v61 = vld [vmem:[#allocation13 + $0x290] sm:$0xff] }
 0x8b6   :  { %v6339_v15 = vcombine.high %v2875_v40, %v2879_v51  ;;  %v2883_v34 = vld [vmem:[#allocation13 + $0x158] sm:$0xff]  ;;  %v2926_v16 = vld [vmem:[#allocation13 + $0x2b0] sm:$0xff] }
 0x8b7   :  { %v2887_v62 = vld [vmem:[#allocation13 + $0x178] sm:$0xff]  ;;  %v6385_v22 = vcombine.high %v2922_v61, %v2926_v16  ;;  %v2930_v20 = vld [vmem:[#allocation13 + $0x2d0] sm:$0xff] }
 0x8b8   :  { %v2934_v23 = vld [vmem:[#allocation13 + $0x2f0] sm:$0xff] }
 0x8bc   :  { %v6853_v7 = vpop.eup %6852 }
 0x8bd   :  { %v6855_v57 = vpop.eup %6854  ;;  %v2804_v53 = vmul.f32 0.5, %v6853_v7  ;;  %v6338_v7 = vcombine.low %v2875_v40, %v2879_v51  ;;  %v2938_v40 = vld [vmem:[#allocation13 + $0x310] sm:$0xff] }
 0x8be   :  { %v2808_v11 = vmul.f32 0.5, %v6855_v57  ;;  %v6857_v43 = vpop.eup %6856  ;;  %v6345_v57 = vcombine.high %v2882_v42, %v2886_v63  ;;  %v2942_v51 = vld [vmem:[#allocation13 + $0x330] sm:$0xff] }
 0x8bf   :  { %v2805_v4 = vadd.f32 0.5, %v2804_v53  ;;  %v6859_v60 = vpop.eup %6858  ;;  %v6347_v53 = vcombine.high %v2883_v34, %v2887_v62 }
 0x8c0   :  { %v2809_v9 = vadd.f32 0.5, %v2808_v11  ;;  %v2813_v24 = vmul.f32 0.5, %v6859_v60  ;;  %v2890_v11 = vld [vmem:[#allocation13 + $0x190] sm:$0xff] }
 0x8c1   :  { %v2819_v2 = vmul.f32 %v6857_v43, %v2805_v4  ;;  %v2894_v4 = vld [vmem:[#allocation13 + $0x1b0] sm:$0xff]  ;;  %v2891_v43 = vld [vmem:[#allocation13 + $0x198] sm:$0xff] }
 0x8c2   :  { %v2818_v37 = vmul.f32 %v2816_v45, %v2809_v9  ;;  %v2814_v19 = vadd.f32 0.5, %v2813_v24  ;;  %v2895_v9 = vld [vmem:[#allocation13 + $0x1b8] sm:$0xff]  ;;  %v6344_v45 = vcombine.low %v2882_v42, %v2886_v63  ;;  %v2898_v60 = vld [vmem:[#allocation13 + $0x1d0] sm:$0xff]  ;;  %v6352_v26 = vcombine.low %v2890_v11, %v2894_v4 }
 0x8c3   :  { %v2902_v24 = vld [vmem:[#allocation13 + $0x1f0] sm:$0xff]  ;;  %v6401_v42 = vcombine.high %v2938_v40, %v2942_v51 }
 0x8c4   :  { %v2820_v21 = vadd.f32 %v2819_v2, %v2818_v37  ;;  %v6346_v2 = vcombine.low %v2883_v34, %v2887_v62  ;;  %v6353_v37 = vcombine.high %v2890_v11, %v2894_v4  ;;  %v2946_v34 = vld [vmem:[#allocation13 + $0x350] sm:$0xff] }
 0x8c5   :  { %v2950_v62 = vld [vmem:[#allocation13 + $0x370] sm:$0xff] }
 0x8c6   :  { %6860 = vtanh.f32 %v2820_v21  ;;  %v6355_v21 = vcombine.high %v2891_v43, %v2895_v9  ;;  %v6409_v11 = vcombine.high %v2946_v34, %v2950_v62 }
 0x8d0   :  { %v6861_v27 = vpop.eup %6860 }
 0x8d1   :  { %v2822_v30 = vmul.f32 %v6861_v27, %v2814_v19  ;;  %v6354_v19 = vcombine.low %v2891_v43, %v2895_v9  ;;  %v6361_v27 = vcombine.high %v2898_v60, %v2902_v24  ;;  %v2954_v43 = vld [vmem:[#allocation13 + $0x390] sm:$0xff] }
 0x8d2   :  { %v2958_v9 = vld [vmem:[#allocation13 + $0x3b0] sm:$0xff] }
 0x8d3   :  { %v2832_v36 = vsel %vm2823_vm1, %v2822_v30, %v8548_v17  ;;  %v2862_v17 = vld [vmem:[#allocation13 + $0xb0] sm:$0xff]  ;;  %v6363_v30 = vcombine.high %v2899_v0, %v2903_v25 }
 0x8d4   :  { %v2833_v1 = vsel %vm2825_vm2, %v2832_v36, %v8526_v6  ;;  %v6314_v6 = vcombine.low %v2851_v39, %v2855_v35  ;;  %v6321_v18 = vcombine.high %v2858_v12, %v2862_v17  ;;  %v6320_v13 = vcombine.low %v2858_v12, %v2862_v17  ;;  %v2907_v36 = vld [vmem:[#allocation13 + $0x218] sm:$0xff]  ;;  %v2918_v39 = vld [vmem:[#allocation13 + $0x270] sm:$0xff] }
 0x8d5   :  { %v2834_v55 = vsel %vm2827_vm3, %v2833_v1, %v8442_v47  ;;  %v6312_v47 = vcombine.low %v2850_v52, %v2854_v10  ;;  %v2911_v1 = vld [vmem:[#allocation13 + $0x238] sm:$0xff]  ;;  %v6360_v52 = vcombine.low %v2898_v60, %v2902_v24  ;;  %v2914_v10 = vld [vmem:[#allocation13 + $0x250] sm:$0xff]  ;;  %v6368_v12 = vcombine.low %v2906_v31, %v2910_v56 }
 0x8d6   :  { %v2839_v50 = vpack.c.bf16 %v2837_v46, %v2834_v55  ;;  %v6362_v55 = vcombine.low %v2899_v0, %v2903_v25  ;;  %v6371_v46 = vcombine.high %v2907_v36, %v2911_v1  ;;  %v2915_v35 = vld [vmem:[#allocation13 + $0x258] sm:$0xff]  ;;  %v6417_v60 = vcombine.high %v2954_v43, %v2958_v9  ;;  %v2962_v0 = vld [vmem:[#allocation13 + $0x3d0] sm:$0xff] }
 0x8d7   :  { %v2966_v25 = vld [vmem:[#allocation13 + $0x3f0] sm:$0xff] }
 0x8d8   :  { %3682 = vmatprep.mubr.bf16.mxu0 %v2839_v50  ;;  %3725 = vmatprep.mubr.bf16.mxu1 %v2839_v50  ;;  %v6425_v31 = vcombine.high %v2962_v0, %v2966_v25 }
 0x8d9   :  { %3683 = vmatmul.mubr.bf16.vlgmr.msra.gmra.mrb[72].mxu0 %v8572_v14  ;;  %3726 = vmatmul.mubr.bf16.vlgmr.msra.gmra.mrb[72].mxu1 %v8572_v14 }
 0x8da   :  { %3737 = vmatpush1.bf16.msra.mxu0 %v6304_v3  ;;  %3780 = vmatpush1.bf16.msra.mxu1 %v6306_v41  ;;  %v2874_v3 = vld [vmem:[#allocation13 + $0x110] sm:$0xff] }
 0x8db   :  { %3768 = vmatprep.mubr.bf16.mxu0 %v2839_v50  ;;  %3811 = vmatprep.mubr.bf16.mxu1 %v2839_v50  ;;  %v2878_v41 = vld [vmem:[#allocation13 + $0x130] sm:$0xff]  ;;  %v2919_v50 = vld [vmem:[#allocation13 + $0x278] sm:$0xff] }
 0x8dc   :  { %3738 = vmatprep.subr.bf16.mxu0 %v6313_v54  ;;  %3781 = vmatprep.subr.bf16.mxu1 %v6315_v29  ;;  %v6337_v8 = vcombine.high %v2874_v3, %v2878_v41  ;;  %v6336_v59 = vcombine.low %v2874_v3, %v2878_v41  ;;  %v6370_v54 = vcombine.low %v2907_v36, %v2911_v1 }
 0x8dd   :  { %v6377_v29 = vcombine.high %v2914_v10, %v2918_v39  ;;  %v6379_v17 = vcombine.high %v2915_v35, %v2919_v50  ;;  %v6393_v3 = vcombine.high %v2930_v20, %v2934_v23  ;;  %v6424_v36 = vcombine.low %v2962_v0, %v2966_v25  ;;  %v8760_v0 = vld [vmem:[#allocation16 + $0xac] ss:$16 sps:$4 sm:$0xff]   ;;  %v8764_v25 = vld [vmem:[#allocation16 + $0xa0] ss:$16 sps:$4 sm:$0xff]  }
 0x8de   :  { %3739 = vmatpush1.bf16.msra.mxu0 %v6312_v47  ;;  %3782 = vmatpush1.bf16.msra.mxu1 %v6314_v6  ;;  %v2923_v47 = vld [vmem:[#allocation13 + $0x298] sm:$0xff]  ;;  %9841 = vst [vmem:[#allocation42_spill] sm:$0xff] %v8764_v25 }
 0x8df   :  { %3740 = vmatprep.subr.bf16.mxu0 %v6321_v18  ;;  %3783 = vmatprep.subr.bf16.mxu1 %v6323_v38  ;;  %v2927_v6 = vld [vmem:[#allocation13 + $0x2b8] sm:$0xff]  ;;  %v6376_v18 = vcombine.low %v2914_v10, %v2918_v39  ;;  %v6378_v38 = vcombine.low %v2915_v35, %v2919_v50  ;;  %v8606_v10 = vld [vmem:[#allocation15 + $0x24] ss:$16 sps:$4 sm:$0xff]   ;;  %v8614_v35 = vld [vmem:[#allocation15 + $0x20] ss:$16 sps:$4 sm:$0xff]  }
 0x8e0   :  { %v6387_v49 = vcombine.high %v2923_v47, %v2927_v6  ;;  %v8608_v39 = vld [vmem:[#allocation15 + $0x2c] ss:$16 sps:$4 sm:$0xff]   ;;  %v8616_v50 = vld [vmem:[#allocation15 + $0x28] ss:$16 sps:$4 sm:$0xff]  }
 0x8e2   :  { %3741 = vmatpush1.bf16.msra.mxu0 %v6320_v13  ;;  %3784 = vmatpush1.bf16.msra.mxu1 %v6322_v32  ;;  %v2931_v13 = vld [vmem:[#allocation13 + $0x2d8] sm:$0xff] }
 0x8e3   :  { %3742 = vmatprep.subr.bf16.mxu0 %v6329_v58  ;;  %3785 = vmatprep.subr.bf16.mxu1 %v6331_v44  ;;  %v2935_v32 = vld [vmem:[#allocation13 + $0x2f8] sm:$0xff]  ;;  %v6384_v58 = vcombine.low %v2922_v61, %v2926_v16  ;;  %v6386_v44 = vcombine.low %v2923_v47, %v2927_v6  ;;  %v8640_v16 = vld [vmem:[#allocation15 + $0x60] ss:$16 sps:$4 sm:$0xff]   ;;  %v8646_v6 = vld [vmem:[#allocation15 + $0x84] ss:$16 sps:$4 sm:$0xff]  }
 0x8e4   :  { %v6395_v41 = vcombine.high %v2931_v13, %v2935_v32  ;;  %v8636_v61 = vld [vmem:[#allocation15 + $0x6c] ss:$16 sps:$4 sm:$0xff]   ;;  %9821 = vst [vmem:[#allocation58_spill] sm:$0xff] %v8640_v16  ;;  %v8642_v47 = vld [vmem:[#allocation15 + $0x68] ss:$16 sps:$4 sm:$0xff]   ;;  %9823 = vst [vmem:[#allocation60_spill] sm:$0xff] %v8646_v6 }
 0x8e5   :  { %9820 = vst [vmem:[#allocation57_spill] sm:$0xff] %v8636_v61  ;;  %9822 = vst [vmem:[#allocation59_spill] sm:$0xff] %v8642_v47 }
 0x8e6   :  { %3743 = vmatpush1.bf16.msra.mxu0 %v6328_v48  ;;  %3786 = vmatpush1.bf16.msra.mxu1 %v6330_v5  ;;  %v2939_v48 = vld [vmem:[#allocation13 + $0x318] sm:$0xff] }
 0x8e7   :  { %3744 = vmatprep.subr.bf16.mxu0 %v6337_v8  ;;  %3787 = vmatprep.subr.bf16.mxu1 %v6339_v15  ;;  %v2943_v5 = vld [vmem:[#allocation13 + $0x338] sm:$0xff]  ;;  %v6392_v8 = vcombine.low %v2930_v20, %v2934_v23  ;;  %v6394_v15 = vcombine.low %v2931_v13, %v2935_v32  ;;  %v8664_v23 = vld [vmem:[#allocation15 + $0xa0] ss:$16 sps:$4 sm:$0xff]   ;;  %v8670_v32 = vld [vmem:[#allocation15 + $0xc4] ss:$16 sps:$4 sm:$0xff]  }
 0x8e8   :  { %v6403_v63 = vcombine.high %v2939_v48, %v2943_v5  ;;  %v8660_v20 = vld [vmem:[#allocation15 + $0xac] ss:$16 sps:$4 sm:$0xff]   ;;  %9829 = vst [vmem:[#allocation30_spill] sm:$0xff] %v8664_v23  ;;  %v8666_v13 = vld [vmem:[#allocation15 + $0xa8] ss:$16 sps:$4 sm:$0xff]   ;;  %9831 = vst [vmem:[#allocation32_spill] sm:$0xff] %v8670_v32 }
 0x8e9   :  { %9828 = vst [vmem:[#allocation29_spill] sm:$0xff] %v8660_v20  ;;  %9830 = vst [vmem:[#allocation31_spill] sm:$0xff] %v8666_v13 }
 0x8ea   :  { %3745 = vmatpush1.bf16.msra.mxu0 %v6336_v59  ;;  %3788 = vmatpush1.bf16.msra.mxu1 %v6338_v7  ;;  %v2947_v59 = vld [vmem:[#allocation13 + $0x358] sm:$0xff] }
 0x8eb   :  { %3746 = vmatprep.subr.bf16.mxu0 %v6345_v57  ;;  %3789 = vmatprep.subr.bf16.mxu1 %v6347_v53  ;;  %v2951_v7 = vld [vmem:[#allocation13 + $0x378] sm:$0xff]  ;;  %v6400_v57 = vcombine.low %v2938_v40, %v2942_v51  ;;  %v6402_v53 = vcombine.low %v2939_v48, %v2943_v5  ;;  %v8688_v51 = vld [vmem:[#allocation15 + $0xe0] ss:$16 sps:$4 sm:$0xff]   ;;  %v8694_v5 = vld [vmem:[#allocation16 + $0x4] ss:$16 sps:$4 sm:$0xff]  }
 0x8ec   :  { %v6411_v4 = vcombine.high %v2947_v59, %v2951_v7  ;;  %v8684_v40 = vld [vmem:[#allocation15 + $0xec] ss:$16 sps:$4 sm:$0xff]   ;;  %9837 = vst [vmem:[#allocation38_spill] sm:$0xff] %v8688_v51  ;;  %v8690_v48 = vld [vmem:[#allocation15 + $0xe8] ss:$16 sps:$4 sm:$0xff]   ;;  %9839 = vst [vmem:[#allocation40_spill] sm:$0xff] %v8694_v5 }
 0x8ed   :  { %9836 = vst [vmem:[#allocation37_spill] sm:$0xff] %v8684_v40  ;;  %9838 = vst [vmem:[#allocation39_spill] sm:$0xff] %v8690_v48 }
 0x8ee   :  { %3747 = vmatpush1.bf16.msra.mxu0 %v6344_v45  ;;  %3790 = vmatpush1.bf16.msra.mxu1 %v6346_v2  ;;  %v2955_v45 = vld [vmem:[#allocation13 + $0x398] sm:$0xff] }
 0x8ef   :  { %3748 = vmatprep.subr.bf16.mxu0 %v6353_v37  ;;  %3791 = vmatprep.subr.bf16.mxu1 %v6355_v21  ;;  %v2959_v2 = vld [vmem:[#allocation13 + $0x3b8] sm:$0xff]  ;;  %v6408_v37 = vcombine.low %v2946_v34, %v2950_v62  ;;  %v6410_v21 = vcombine.low %v2947_v59, %v2951_v7  ;;  %v8714_v62 = vld [vmem:[#allocation16 + $0x20] ss:$16 sps:$4 sm:$0xff]   ;;  %v8720_v7 = vld [vmem:[#allocation16 + $0x44] ss:$16 sps:$4 sm:$0xff]  }
 0x8f0   :  { %v6419_v24 = vcombine.high %v2955_v45, %v2959_v2  ;;  %v8708_v34 = vld [vmem:[#allocation16 + $0x2c] ss:$16 sps:$4 sm:$0xff]   ;;  %v8716_v59 = vld [vmem:[#allocation16 + $0x28] ss:$16 sps:$4 sm:$0xff]  }
 0x8f2   :  { %3749 = vmatpush1.bf16.msra.mxu0 %v6352_v26  ;;  %3792 = vmatpush1.bf16.msra.mxu1 %v6354_v19  ;;  %v2963_v26 = vld [vmem:[#allocation13 + $0x3d8] sm:$0xff] }
 0x8f3   :  { %3750 = vmatprep.subr.bf16.mxu0 %v6361_v27  ;;  %3793 = vmatprep.subr.bf16.mxu1 %v6363_v30  ;;  %v2967_v19 = vld [vmem:[#allocation13 + $0x3f8] sm:$0xff]  ;;  %v6416_v27 = vcombine.low %v2954_v43, %v2958_v9  ;;  %v6418_v30 = vcombine.low %v2955_v45, %v2959_v2  ;;  %v8740_v9 = vld [vmem:[#allocation16 + $0x60] ss:$16 sps:$4 sm:$0xff]   ;;  %v8746_v2 = vld [vmem:[#allocation16 + $0x84] ss:$16 sps:$4 sm:$0xff]  }
 0x8f4   :  { %v6427_v56 = vcombine.high %v2963_v26, %v2967_v19  ;;  %v6426_v1 = vcombine.low %v2963_v26, %v2967_v19  ;;  %v8736_v43 = vld [vmem:[#allocation16 + $0x6c] ss:$16 sps:$4 sm:$0xff]   ;;  %v8742_v45 = vld [vmem:[#allocation16 + $0x68] ss:$16 sps:$4 sm:$0xff]   ;;  %v8770_v19 = vld [vmem:[#allocation16 + $0xc4] ss:$16 sps:$4 sm:$0xff]  }
 0x8f5   :  { %v8766_v26 = vld [vmem:[#allocation16 + $0xa8] ss:$16 sps:$4 sm:$0xff]  }
 0x8f6   :  { %3751 = vmatpush1.bf16.msra.mxu0 %v6360_v52  ;;  %3794 = vmatpush1.bf16.msra.mxu1 %v6362_v55  ;;  %v8596_v52 = vld [vmem:[#allocation15 + $0x4] ss:$16 sps:$4 sm:$0xff]   ;;  %v8598_v55 = vld [vmem:[#allocation15 + $0xc] ss:$16 sps:$4 sm:$0xff]  }
 0x8f7   :  { %3752 = vmatprep.subr.bf16.mxu0 %v6369_v33  ;;  %3795 = vmatprep.subr.bf16.mxu1 %v6371_v46  ;;  %v8600_v33 = vld [vmem:[#allocation15] ss:$16 sps:$4 sm:$0xff]   ;;  %v8602_v46 = vld [vmem:[#allocation15 + $0x8] ss:$16 sps:$4 sm:$0xff]  }
 0x8fa   :  { %3753 = vmatpush1.bf16.msra.mxu0 %v6368_v12  ;;  %3796 = vmatpush1.bf16.msra.mxu1 %v6370_v54  ;;  %v8620_v12 = vld [vmem:[#allocation15 + $0x44] ss:$16 sps:$4 sm:$0xff]   ;;  %v8622_v54 = vld [vmem:[#allocation15 + $0x4c] ss:$16 sps:$4 sm:$0xff]  }
 0x8fb   :  { %3754 = vmatprep.subr.bf16.mxu0 %v6377_v29  ;;  %3797 = vmatprep.subr.bf16.mxu1 %v6379_v17  ;;  %v8630_v29 = vld [vmem:[#allocation15 + $0x48] ss:$16 sps:$4 sm:$0xff]   ;;  %v8634_v17 = vld [vmem:[#allocation15 + $0x64] ss:$16 sps:$4 sm:$0xff]  }
 0x8fc   :  { %9818 = vst [vmem:[#allocation55_spill] sm:$0xff] %v8630_v29  ;;  %9819 = vst [vmem:[#allocation56_spill] sm:$0xff] %v8634_v17 }
 0x8fe   :  { %3755 = vmatpush1.bf16.msra.mxu0 %v6376_v18  ;;  %3798 = vmatpush1.bf16.msra.mxu1 %v6378_v38  ;;  %v8648_v18 = vld [vmem:[#allocation15 + $0x8c] ss:$16 sps:$4 sm:$0xff]   ;;  %v8652_v38 = vld [vmem:[#allocation15 + $0x80] ss:$16 sps:$4 sm:$0xff]  }
 0x8ff   :  { %3756 = vmatprep.subr.bf16.mxu0 %v6385_v22  ;;  %3799 = vmatprep.subr.bf16.mxu1 %v6387_v49  ;;  %9824 = vst [vmem:[#allocation61_spill] sm:$0xff] %v8648_v18  ;;  %9825 = vst [vmem:[#allocation26_spill] sm:$0xff] %v8652_v38  ;;  %v8654_v22 = vld [vmem:[#allocation15 + $0x88] ss:$16 sps:$4 sm:$0xff]   ;;  %v8658_v49 = vld [vmem:[#allocation15 + $0xa4] ss:$16 sps:$4 sm:$0xff]  }
 0x900   :  { %9826 = vst [vmem:[#allocation27_spill] sm:$0xff] %v8654_v22  ;;  %9827 = vst [vmem:[#allocation28_spill] sm:$0xff] %v8658_v49 }
 0x902   :  { %3757 = vmatpush1.bf16.msra.mxu0 %v6384_v58  ;;  %3800 = vmatpush1.bf16.msra.mxu1 %v6386_v44  ;;  %v8672_v58 = vld [vmem:[#allocation15 + $0xcc] ss:$16 sps:$4 sm:$0xff]   ;;  %v8676_v44 = vld [vmem:[#allocation15 + $0xc0] ss:$16 sps:$4 sm:$0xff]  }
 0x903   :  { %3758 = vmatprep.subr.bf16.mxu0 %v6393_v3  ;;  %3801 = vmatprep.subr.bf16.mxu1 %v6395_v41  ;;  %9832 = vst [vmem:[#allocation33_spill] sm:$0xff] %v8672_v58  ;;  %9833 = vst [vmem:[#allocation34_spill] sm:$0xff] %v8676_v44  ;;  %v8678_v3 = vld [vmem:[#allocation15 + $0xc8] ss:$16 sps:$4 sm:$0xff]   ;;  %v8682_v41 = vld [vmem:[#allocation15 + $0xe4] ss:$16 sps:$4 sm:$0xff]  }
 0x904   :  { %9834 = vst [vmem:[#allocation35_spill] sm:$0xff] %v8678_v3  ;;  %9835 = vst [vmem:[#allocation36_spill] sm:$0xff] %v8682_v41 }
 0x906   :  { %3759 = vmatpush1.bf16.msra.mxu0 %v6392_v8  ;;  %3802 = vmatpush1.bf16.msra.mxu1 %v6394_v15  ;;  %v8696_v8 = vld [vmem:[#allocation16 + $0xc] ss:$16 sps:$4 sm:$0xff]   ;;  %v8700_v15 = vld [vmem:[#allocation16] ss:$16 sps:$4 sm:$0xff]  }
 0x907   :  { %3760 = vmatprep.subr.bf16.mxu0 %v6401_v42  ;;  %3803 = vmatprep.subr.bf16.mxu1 %v6403_v63  ;;  %9840 = vst [vmem:[#allocation41_spill] sm:$0xff] %v8696_v8  ;;  %v8702_v42 = vld [vmem:[#allocation16 + $0x8] ss:$16 sps:$4 sm:$0xff]   ;;  %v8706_v63 = vld [vmem:[#allocation16 + $0x24] ss:$16 sps:$4 sm:$0xff]  }
 0x90a   :  { %3761 = vmatpush1.bf16.msra.mxu0 %v6400_v57  ;;  %3804 = vmatpush1.bf16.msra.mxu1 %v6402_v53  ;;  %v8722_v57 = vld [vmem:[#allocation16 + $0x4c] ss:$16 sps:$4 sm:$0xff]   ;;  %v8728_v53 = vld [vmem:[#allocation16 + $0x40] ss:$16 sps:$4 sm:$0xff]  }
 0x90b   :  { %3762 = vmatprep.subr.bf16.mxu0 %v6409_v11  ;;  %3805 = vmatprep.subr.bf16.mxu1 %v6411_v4  ;;  %v8730_v11 = vld [vmem:[#allocation16 + $0x48] ss:$16 sps:$4 sm:$0xff]   ;;  %v8734_v4 = vld [vmem:[#allocation16 + $0x64] ss:$16 sps:$4 sm:$0xff]  }
 0x90e   :  { %3763 = vmatpush1.bf16.msra.mxu0 %v6408_v37  ;;  %3806 = vmatpush1.bf16.msra.mxu1 %v6410_v21  ;;  %v8748_v37 = vld [vmem:[#allocation16 + $0x8c] ss:$16 sps:$4 sm:$0xff]   ;;  %v8752_v21 = vld [vmem:[#allocation16 + $0x80] ss:$16 sps:$4 sm:$0xff]  }
 0x90f   :  { %3764 = vmatprep.subr.bf16.mxu0 %v6417_v60  ;;  %3807 = vmatprep.subr.bf16.mxu1 %v6419_v24  ;;  %v8754_v60 = vld [vmem:[#allocation16 + $0x88] ss:$16 sps:$4 sm:$0xff]   ;;  %v8758_v24 = vld [vmem:[#allocation16 + $0xa4] ss:$16 sps:$4 sm:$0xff]  }
 0x912   :  { %3765 = vmatpush1.bf16.msra.mxu0 %v6416_v27  ;;  %3808 = vmatpush1.bf16.msra.mxu1 %v6418_v30  ;;  %v8772_v27 = vld [vmem:[#allocation16 + $0xcc] ss:$16 sps:$4 sm:$0xff]   ;;  %v8776_v30 = vld [vmem:[#allocation16 + $0xc0] ss:$16 sps:$4 sm:$0xff]  }
 0x913   :  { %3766 = vmatprep.subr.bf16.mxu0 %v6425_v31  ;;  %3809 = vmatprep.subr.bf16.mxu1 %v6427_v56  ;;  %v8778_v31 = vld [vmem:[#allocation16 + $0xc8] ss:$16 sps:$4 sm:$0xff]   ;;  %v8782_v56 = vld [vmem:[#allocation16 + $0xe4] ss:$16 sps:$4 sm:$0xff]  }
 0x916   :  { %3767 = vmatpush1.bf16.msra.mxu0 %v6424_v36  ;;  %3810 = vmatpush1.bf16.msra.mxu1 %v6426_v1  ;;  %v8784_v36 = vld [vmem:[#allocation16 + $0xec] ss:$16 sps:$4 sm:$0xff]   ;;  %v8788_v1 = vld [vmem:[#allocation16 + $0xe0] ss:$16 sps:$4 sm:$0xff]  }
 0x917   :  { %4034 = vmatprep.subr.bf16.mxu0 %v8596_v52  ;;  %4075 = vmatprep.subr.bf16.mxu1 %v8598_v55 }
 0x919   :  { %3769 = vmatmul.mubr.bf16.vlgmr.msra.gmra.mrb[76].mxu0 %v8572_v14  ;;  %3812 = vmatmul.mubr.bf16.vlgmr.msra.gmra.mrb[76].mxu1 %v8572_v14  ;;  %v8628_v14 = vld [vmem:[#allocation15 + $0x40] ss:$16 sps:$4 sm:$0xff]  }
 0x91a   :  { %4035 = vmatpush1.bf16.msra.mxu0 %v8600_v33  ;;  %4076 = vmatpush1.bf16.msra.mxu1 %v8602_v46  ;;  %9817 = vst [vmem:[#allocation54_spill] sm:$0xff] %v8628_v14 }
 0x91b   :  { %4036 = vmatprep.subr.bf16.mxu0 %v8606_v10  ;;  %4077 = vmatprep.subr.bf16.mxu1 %v8608_v39 }
 0x91c   :  { %4066 = vmatprep.mubr.bf16.mxu0 %v9693_v28  ;;  %4107 = vmatprep.mubr.bf16.mxu1 %v9693_v28 }
 0x91e   :  { %4037 = vmatpush1.bf16.msra.mxu0 %v8614_v35  ;;  %4078 = vmatpush1.bf16.msra.mxu1 %v8616_v50 }
 0x91f   :  { %4038 = vmatprep.subr.bf16.mxu0 %v8620_v12  ;;  %4079 = vmatprep.subr.bf16.mxu1 %v8622_v54 }
 0x922   :  { %4039 = vmatpush1.bf16.msra.mxu0 %v8628_v14  ;;  %4080 = vmatpush1.bf16.msra.mxu1 %v8630_v29 }
 0x923   :  { %4040 = vmatprep.subr.bf16.mxu0 %v8634_v17  ;;  %4081 = vmatprep.subr.bf16.mxu1 %v8636_v61 }
 0x926   :  { %4041 = vmatpush1.bf16.msra.mxu0 %v8640_v16  ;;  %4082 = vmatpush1.bf16.msra.mxu1 %v8642_v47 }
 0x927   :  { %4042 = vmatprep.subr.bf16.mxu0 %v8646_v6  ;;  %4083 = vmatprep.subr.bf16.mxu1 %v8648_v18 }
 0x92a   :  { %4043 = vmatpush1.bf16.msra.mxu0 %v8652_v38  ;;  %4084 = vmatpush1.bf16.msra.mxu1 %v8654_v22 }
 0x92b   :  { %4044 = vmatprep.subr.bf16.mxu0 %v8658_v49  ;;  %4085 = vmatprep.subr.bf16.mxu1 %v8660_v20 }
 0x92e   :  { %4045 = vmatpush1.bf16.msra.mxu0 %v8664_v23  ;;  %4086 = vmatpush1.bf16.msra.mxu1 %v8666_v13 }
 0x92f   :  { %4046 = vmatprep.subr.bf16.mxu0 %v8670_v32  ;;  %4087 = vmatprep.subr.bf16.mxu1 %v8672_v58 }
 0x932   :  { %4047 = vmatpush1.bf16.msra.mxu0 %v8676_v44  ;;  %4088 = vmatpush1.bf16.msra.mxu1 %v8678_v3 }
 0x933   :  { %4048 = vmatprep.subr.bf16.mxu0 %v8682_v41  ;;  %4089 = vmatprep.subr.bf16.mxu1 %v8684_v40 }
 0x936   :  { %4049 = vmatpush1.bf16.msra.mxu0 %v8688_v51  ;;  %4090 = vmatpush1.bf16.msra.mxu1 %v8690_v48 }
 0x937   :  { %4316 = vmatprep.subr.bf16.mxu0 %v8694_v5  ;;  %4357 = vmatprep.subr.bf16.mxu1 %v8696_v8 }
 0x939   :  { %4067 = vmatmul.mubr.bf16.vlgmr.msra.gmra.mrb[80].mxu0 %v9693_v28  ;;  %4108 = vmatmul.mubr.bf16.vlgmr.msra.gmra.mrb[80].mxu1 %v9693_v28 }
 0x93a   :  { %4317 = vmatpush1.bf16.msra.mxu0 %v8700_v15  ;;  %4358 = vmatpush1.bf16.msra.mxu1 %v8702_v42 }
 0x93b   :  { %4318 = vmatprep.subr.bf16.mxu0 %v8706_v63  ;;  %4359 = vmatprep.subr.bf16.mxu1 %v8708_v34 }
 0x93c   :  { %4348 = vmatprep.mubr.bf16.mxu0 %v9693_v28  ;;  %4389 = vmatprep.mubr.bf16.mxu1 %v9693_v28 }
 0x93e   :  { %4319 = vmatpush1.bf16.msra.mxu0 %v8714_v62  ;;  %4360 = vmatpush1.bf16.msra.mxu1 %v8716_v59 }
 0x93f   :  { %4320 = vmatprep.subr.bf16.mxu0 %v8720_v7  ;;  %4361 = vmatprep.subr.bf16.mxu1 %v8722_v57 }
 0x942   :  { %4321 = vmatpush1.bf16.msra.mxu0 %v8728_v53  ;;  %4362 = vmatpush1.bf16.msra.mxu1 %v8730_v11 }
 0x943   :  { %4322 = vmatprep.subr.bf16.mxu0 %v8734_v4  ;;  %4363 = vmatprep.subr.bf16.mxu1 %v8736_v43 }
 0x946   :  { %4323 = vmatpush1.bf16.msra.mxu0 %v8740_v9  ;;  %4364 = vmatpush1.bf16.msra.mxu1 %v8742_v45 }
 0x947   :  { %4324 = vmatprep.subr.bf16.mxu0 %v8746_v2  ;;  %4365 = vmatprep.subr.bf16.mxu1 %v8748_v37 }
 0x94a   :  { %4325 = vmatpush1.bf16.msra.mxu0 %v8752_v21  ;;  %4366 = vmatpush1.bf16.msra.mxu1 %v8754_v60 }
 0x94b   :  { %4326 = vmatprep.subr.bf16.mxu0 %v8758_v24  ;;  %4367 = vmatprep.subr.bf16.mxu1 %v8760_v0 }
 0x94e   :  { %4327 = vmatpush1.bf16.msra.mxu0 %v8764_v25  ;;  %4368 = vmatpush1.bf16.msra.mxu1 %v8766_v26  ;;  %v8790_v25 = vld [vmem:[#allocation16 + $0xe8] ss:$16 sps:$4 sm:$0xff]  }
 0x94f   :  { %4328 = vmatprep.subr.bf16.mxu0 %v8770_v19  ;;  %4369 = vmatprep.subr.bf16.mxu1 %v8772_v27 }
 0x952   :  { %4329 = vmatpush1.bf16.msra.mxu0 %v8776_v30  ;;  %4370 = vmatpush1.bf16.msra.mxu1 %v8778_v31 }
 0x953   :  { %4330 = vmatprep.subr.bf16.mxu0 %v8782_v56  ;;  %4371 = vmatprep.subr.bf16.mxu1 %v8784_v36 }
 0x956   :  { %4331 = vmatpush1.bf16.msra.mxu0 %v8788_v1  ;;  %4372 = vmatpush1.bf16.msra.mxu1 %v8790_v25 }
 0x957   :  { %4455 = vmatprep.subr.bf16.mxu0 %v8596_v52  ;;  %4496 = vmatprep.subr.bf16.mxu1 %v8598_v55 }
 0x959   :  { %4349 = vmatmul.mubr.bf16.vlgmr.msra.gmra.mrb[84].mxu0 %v9693_v28  ;;  %4390 = vmatmul.mubr.bf16.vlgmr.msra.gmra.mrb[84].mxu1 %v9693_v28 }
 0x95a   :  { %4456 = vmatpush1.bf16.msra.mxu0 %v8600_v33  ;;  %4497 = vmatpush1.bf16.msra.mxu1 %v8602_v46 }
 0x95b   :  { %4457 = vmatprep.subr.bf16.mxu0 %v8606_v10  ;;  %4498 = vmatprep.subr.bf16.mxu1 %v8608_v39 }
 0x95c   :  { %4487 = vmatprep.mubr.bf16.mxu0 %v9693_v28  ;;  %4528 = vmatprep.mubr.bf16.mxu1 %v9693_v28 }
 0x95e   :  { %4458 = vmatpush1.bf16.msra.mxu0 %v8614_v35  ;;  %4499 = vmatpush1.bf16.msra.mxu1 %v8616_v50 }
 0x95f   :  { %4459 = vmatprep.subr.bf16.mxu0 %v8620_v12  ;;  %4500 = vmatprep.subr.bf16.mxu1 %v8622_v54 }
 0x962   :  { %4460 = vmatpush1.bf16.msra.mxu0 %v8628_v14  ;;  %4501 = vmatpush1.bf16.msra.mxu1 %v8630_v29 }
 0x963   :  { %4461 = vmatprep.subr.bf16.mxu0 %v8634_v17  ;;  %4502 = vmatprep.subr.bf16.mxu1 %v8636_v61 }
 0x966   :  { %4462 = vmatpush1.bf16.msra.mxu0 %v8640_v16  ;;  %4503 = vmatpush1.bf16.msra.mxu1 %v8642_v47 }
 0x967   :  { %4463 = vmatprep.subr.bf16.mxu0 %v8646_v6  ;;  %4504 = vmatprep.subr.bf16.mxu1 %v8648_v18 }
 0x96a   :  { %4464 = vmatpush1.bf16.msra.mxu0 %v8652_v38  ;;  %4505 = vmatpush1.bf16.msra.mxu1 %v8654_v22 }
 0x96b   :  { %4465 = vmatprep.subr.bf16.mxu0 %v8658_v49  ;;  %4506 = vmatprep.subr.bf16.mxu1 %v8660_v20 }
 0x96e   :  { %4466 = vmatpush1.bf16.msra.mxu0 %v8664_v23  ;;  %4507 = vmatpush1.bf16.msra.mxu1 %v8666_v13 }
 0x96f   :  { %4467 = vmatprep.subr.bf16.mxu0 %v8670_v32  ;;  %4508 = vmatprep.subr.bf16.mxu1 %v8672_v58  ;;  %v2968_v58 = vld [vmem:[%s9458_s6] sm:$0xff]  ;;  %v9842_v32 = vld [vmem:[#allocation49_spill] sm:$0xff]  ;;  %s7478_s6 = smov [#allocation18]  }
 0x970   :  { %s6202_s10 = sshll.u32 %s7478_s6, 4  ;;  %s6203_s10 = int_to_ptr.vmem [resolvable:$true] %s6202_s10 }
 0x971   :  { %s7428_s2 = scalar_lea.vmem %s6203_s10, 64  ;;  %p7433_p9 = scmp.lt.s32.totalorder %s6203_s10, %s6203_s10 }
 0x972   :  { %4468 = vmatpush1.bf16.msra.mxu0 %v8676_v44  ;;  %4509 = vmatpush1.bf16.msra.mxu1 %v8678_v3  ;;  %v9843_v44 = vsub.s32 0, %v9842_v32  ;;  %v9844_v3 = vsub.s32 2, %v9842_v32  ;;  %p7429_p8 = scmp.ne.s32.totalorder %s6203_s10, %s7428_s2  ;;  %p7434_p10 = scmp.lt.s32.totalorder %s7428_s2, %s7428_s2 }
 0x973   :  { %4469 = vmatprep.subr.bf16.mxu0 %v8682_v41  ;;  %4510 = vmatprep.subr.bf16.mxu1 %v8684_v40  ;;  %v9845_v40 = vsub.s32 1, %v9842_v32 }
 0x974   :  { %v2973_v13 = vrot.slane %v2968_v58, %v9843_v44  ;;  %v2981_v41 = vrot.slane %v2968_v58, %v9844_v3  ;;  %p7435_p11 = por %p7434_p10, %p7433_p9 }
 0x975   :  { %v2977_v23 = vrot.slane %v2968_v58, %v9845_v40 }
 0x976   :  { %4470 = vmatpush1.bf16.msra.mxu0 %v8688_v51  ;;  %4511 = vmatpush1.bf16.msra.mxu1 %v8690_v48  ;;  %v9846_v51 = vsub.s32 3, %v9842_v32  ;;  %p7436_p12 = pnand %p7435_p11, %p7429_p8 }
 0x977   :  { %4561 = vmatprep.subr.bf16.mxu0 %v8694_v5  ;;  %4602 = vmatprep.subr.bf16.mxu1 %v8696_v8 }
 0x978   :  { %v2985_v48 = vrot.slane %v2968_v58, %v9846_v51 }
 0x9ac   :  { %v3684_v20 = vpop.f32.mrb[72].mxu0  ;;  %v3727_v5 = vpop.f32.mrb[72].mxu1 }
 0x9ad   :  { %v3685_v49 = vadd.f32 %v3684_v20, %v2973_v13  ;;  %v3728_v8 = vadd.f32 %v3727_v5, %v2981_v41  ;;  %v3686_v22 = vpop.f32.mrb[73].mxu0  ;;  %v3729_v38 = vpop.f32.mrb[73].mxu1  ;;  %v9847_v20 = vsub.s32 4, %v9842_v32 }
 0x9ae   :  { %v3687_v18 = vadd.f32 %v3686_v22, %v2977_v23  ;;  %v3730_v6 = vadd.f32 %v3729_v38, %v2985_v48  ;;  %v3688_v47 = vpop.f32.mrb[74].mxu0  ;;  %v3731_v16 = vpop.f32.mrb[74].mxu1  ;;  %v9848_v38 = vsub.s32 6, %v9842_v32 }
 0x9af   :  { %3822 = vst [vmem:[#allocation3] sm:$0xff] %v3685_v49  ;;  %3824 = vst [vmem:[#allocation3 + $0x10] sm:$0xff] %v3728_v8  ;;  %v3689_v44 = vadd.f32 %v3688_v47, %v2973_v13  ;;  %v3732_v3 = vadd.f32 %v3731_v16, %v2981_v41  ;;  %v3690_v61 = vpop.f32.mrb[75].mxu0  ;;  %v3733_v17 = vpop.f32.mrb[75].mxu1  ;;  %v2989_v22 = vrot.slane %v2968_v58, %v9847_v20  ;;  %v9849_v49 = vsub.s32 5, %v9842_v32 }
 0x9b0   :  { %3823 = vst [vmem:[#allocation3 + $0x8] sm:$0xff] %v3687_v18  ;;  %3825 = vst [vmem:[#allocation3 + $0x18] sm:$0xff] %v3730_v6  ;;  %v3691_v40 = vadd.f32 %v3690_v61, %v2977_v23  ;;  %v3734_v51 = vadd.f32 %v3733_v17, %v2985_v48  ;;  %v2997_v5 = vrot.slane %v2968_v58, %v9848_v38  ;;  %v9850_v16 = vsub.s32 7, %v9842_v32 }
 0x9b1   :  { %3830 = vst [vmem:[#allocation3 + $0x40] sm:$0xff] %v3689_v44  ;;  %3832 = vst [vmem:[#allocation3 + $0x50] sm:$0xff] %v3732_v3  ;;  %v2993_v47 = vrot.slane %v2968_v58, %v9849_v49 }
 0x9b2   :  { %3831 = vst [vmem:[#allocation3 + $0x48] sm:$0xff] %v3691_v40  ;;  %3833 = vst [vmem:[#allocation3 + $0x58] sm:$0xff] %v3734_v51  ;;  %v3001_v13 = vrot.slane %v2968_v58, %v9850_v16 }
 0x9b6   :  { %v3838_v16 = vld [vmem:[#allocation3] sm:$0x3] }
 0x9ec   :  { %v3770_v18 = vpop.f32.mrb[76].mxu0  ;;  %v3813_v6 = vpop.f32.mrb[76].mxu1 }
 0x9ed   :  { %v3771_v61 = vadd.f32 %v3770_v18, %v2989_v22  ;;  %v3814_v17 = vadd.f32 %v3813_v6, %v2997_v5  ;;  %v3772_v23 = vpop.f32.mrb[77].mxu0  ;;  %v3815_v41 = vpop.f32.mrb[77].mxu1 }
 0x9ee   :  { %v3773_v48 = vadd.f32 %v3772_v23, %v2993_v47  ;;  %v3816_v8 = vadd.f32 %v3815_v41, %v3001_v13  ;;  %v3774_v44 = vpop.f32.mrb[78].mxu0  ;;  %v3817_v3 = vpop.f32.mrb[78].mxu1  ;;  %v3839_v41 = vld [vmem:[#allocation3 + $0x8] sm:$0x3] }
 0x9ef   :  { %3826 = vst [vmem:[#allocation3 + $0x20] sm:$0xff] %v3771_v61  ;;  %3828 = vst [vmem:[#allocation3 + $0x30] sm:$0xff] %v3814_v17  ;;  %v3775_v40 = vadd.f32 %v3774_v44, %v2989_v22  ;;  %v3818_v51 = vadd.f32 %v3817_v3, %v2997_v5  ;;  %v3776_v20 = vpop.f32.mrb[79].mxu0  ;;  %v3819_v38 = vpop.f32.mrb[79].mxu1 }
 0x9f0   :  { %3827 = vst [vmem:[#allocation3 + $0x28] sm:$0xff] %v3773_v48  ;;  %3829 = vst [vmem:[#allocation3 + $0x38] sm:$0xff] %v3816_v8  ;;  %v3777_v49 = vadd.f32 %v3776_v20, %v2993_v47  ;;  %v3820_v58 = vadd.f32 %v3819_v38, %v3001_v13  ;;  %v3840_v8 = vld [vmem:[#allocation3 + $0x10] sm:$0x3] }
 0x9f1   :  { %3834 = vst [vmem:[#allocation3 + $0x60] sm:$0xff] %v3775_v40  ;;  %3836 = vst [vmem:[#allocation3 + $0x70] sm:$0xff] %v3818_v51  ;;  %v3841_v40 = vld [vmem:[#allocation3 + $0x18] sm:$0x3] }
 0x9f2   :  { %3835 = vst [vmem:[#allocation3 + $0x68] sm:$0xff] %v3777_v49  ;;  %3837 = vst [vmem:[#allocation3 + $0x78] sm:$0xff] %v3820_v58 }
 0xa0c   :  { %v4068_v18 = vpop.f32.mrb[80].mxu0  ;;  %v4109_v6 = vpop.f32.mrb[80].mxu1 }
 0xa0d   :  { %v4116_v23 = vadd.f32 %v4068_v18, %v3838_v16  ;;  %v4070_v32 = vpop.f32.mrb[81].mxu0  ;;  %v4111_v61 = vpop.f32.mrb[81].mxu1  ;;  %v4118_v13 = vadd.f32 %v4109_v6, %v3840_v8 }
 0xa0e   :  { %v4117_v17 = vadd.f32 %v4070_v32, %v3839_v41  ;;  %v4072_v22 = vpop.f32.mrb[82].mxu0  ;;  %v4113_v5 = vpop.f32.mrb[82].mxu1  ;;  %v4119_v51 = vadd.f32 %v4111_v61, %v3841_v40 }
 0xa0f   :  { %v4414_v44 = vmul.f32 0.5, %v4116_v23  ;;  %v4073_v3 = vpop.f32.mrb[83].mxu0  ;;  %v4114_v48 = vpop.f32.mrb[83].mxu1 }
 0xa10   :  { %v4418_v47 = vmul.f32 0.5, %v4117_v17  ;;  %v4423_v20 = vmul.f32 0.5, %v4119_v51 }
 0xa11   :  { %6862 = vtanh.f32 %v4414_v44 }
 0xa12   :  { %6864 = vtanh.f32 %v4418_v47 }
 0xa13   :  { %6866 = vtanh.f32 %v4118_v13  ;;  %v4120_v13 = vld [vmem:[#allocation3 + $0x60] sm:$0xc0] }
 0xa14   :  { %6868 = vtanh.f32 %v4423_v20 }
 0xa1b   :  { %v6863_v38 = vpop.eup %6862 }
 0xa1c   :  { %v6865_v49 = vpop.eup %6864  ;;  %v4416_v58 = vmul.f32 0.5, %v6863_v38 }
 0xa1d   :  { %v4420_v16 = vmul.f32 0.5, %v6865_v49  ;;  %v6867_v18 = vpop.eup %6866 }
 0xa1e   :  { %v4417_v32 = vadd.f32 0.5, %v4416_v58  ;;  %v6869_v6 = vpop.eup %6868 }
 0xa1f   :  { %v4421_v41 = vadd.f32 0.5, %v4420_v16  ;;  %v4425_v17 = vmul.f32 0.5, %v6869_v6  ;;  %v4121_v16 = vld [vmem:[#allocation3 + $0x68] sm:$0xc0] }
 0xa20   :  { %v4428_v23 = vmul.f32 %v6867_v18, %v4417_v32 }
 0xa21   :  { %v4427_v22 = vmul.f32 0.0, %v4421_v41  ;;  %v4426_v47 = vadd.f32 0.5, %v4425_v17  ;;  %v4123_v17 = vld [vmem:[#allocation3 + $0x78] sm:$0xc0] }
 0xa23   :  { %v8853_v5 = vadd.f32 %v4428_v23, %v4427_v22 }
 0xa25   :  { %9851 = vst [vmem:[#allocation43_spill] sm:$0xff] %v8853_v5  ;;  %6870 = vtanh.f32 %v8853_v5  ;;  %v4122_v5 = vld [vmem:[#allocation3 + $0x70] sm:$0xc0] }
 0xa2c   :  { %v4350_v44 = vpop.f32.mrb[84].mxu0  ;;  %v4391_v3 = vpop.f32.mrb[84].mxu1 }
 0xa2d   :  { %v4402_v61 = vrot.slane %v4350_v44, 2  ;;  %v4352_v48 = vpop.f32.mrb[85].mxu0  ;;  %v4393_v8 = vpop.f32.mrb[85].mxu1  ;;  %v4404_v58 = vrot.slane %v4391_v3, 2 }
 0xa2e   :  { %v4403_v40 = vrot.slane %v4352_v48, 2  ;;  %v4354_v51 = vpop.f32.mrb[86].mxu0  ;;  %v4395_v20 = vpop.f32.mrb[86].mxu1  ;;  %v4405_v14 = vrot.slane %v4393_v8, 2 }
 0xa2f   :  { %v6871_v38 = vpop.eup %6870  ;;  %v4410_v49 = vadd.f32 %v4402_v61, %v4120_v13  ;;  %v4355_v32 = vpop.f32.mrb[87].mxu0  ;;  %v4412_v44 = vadd.f32 %v4404_v58, %v4122_v5 }
 0xa30   :  { %v4396_v18 = vpop.f32.mrb[87].mxu1  ;;  %v4431_v41 = vmul.f32 %v6871_v38, %v4426_v47  ;;  %v4411_v23 = vadd.f32 %v4403_v40, %v4121_v16  ;;  %v4413_v3 = vadd.f32 %v4405_v14, %v4123_v17  ;;  %v9864_v17 = vld [vmem:[#allocation29_spill] sm:$0xff] }
 0xa31   :  { %v4432_v22 = vmul.f32 0.5, %v4410_v49  ;;  %v9852_v49 = vld [vmem:[#allocation42_spill] sm:$0xff] }
 0xa32   :  { %v4454_v6 = vpack.c.bf16 %v4431_v41, %v4431_v41  ;;  %v4436_v29 = vmul.f32 0.5, %v4411_v23 }
 0xa33   :  { %6872 = vtanh.f32 %v4432_v22  ;;  %v9859_v22 = vld [vmem:[#allocation60_spill] sm:$0xff] }
 0xa34   :  { %6874 = vtanh.f32 %v4436_v29  ;;  %4488 = vmatmul.mubr.bf16.vlgmr.msra.gmra.mrb[88].mxu0 %v4454_v6  ;;  %4529 = vmatmul.mubr.bf16.vlgmr.msra.gmra.mrb[88].mxu1 %v4454_v6  ;;  %v4441_v29 = vmul.f32 0.5, %v4413_v3  ;;  %v9862_v6 = vld [vmem:[#allocation27_spill] sm:$0xff]  ;;  %v9865_v3 = vld [vmem:[#allocation30_spill] sm:$0xff] }
 0xa35   :  { %4562 = vmatpush1.bf16.msra.mxu0 %v8700_v15  ;;  %4603 = vmatpush1.bf16.msra.mxu1 %v8702_v42  ;;  %6876 = vtanh.f32 %v4412_v44  ;;  %v9863_v44 = vld [vmem:[#allocation28_spill] sm:$0xff] }
 0xa36   :  { %4563 = vmatprep.subr.bf16.mxu0 %v8706_v63  ;;  %4604 = vmatprep.subr.bf16.mxu1 %v8708_v34  ;;  %6878 = vtanh.f32 %v4441_v29  ;;  %v9866_v29 = vld [vmem:[#allocation31_spill] sm:$0xff] }
 0xa37   :  { %4593 = vmatprep.mubr.bf16.mxu0 %v9693_v28  ;;  %4634 = vmatprep.mubr.bf16.mxu1 %v9693_v28 }
 0xa39   :  { %4564 = vmatpush1.bf16.msra.mxu0 %v8714_v62  ;;  %4605 = vmatpush1.bf16.msra.mxu1 %v8716_v59 }
 0xa3a   :  { %4565 = vmatprep.subr.bf16.mxu0 %v8720_v7  ;;  %4606 = vmatprep.subr.bf16.mxu1 %v8722_v57 }
 0xa3d   :  { %v6873_v5 = vpop.eup %6872  ;;  %4566 = vmatpush1.bf16.msra.mxu0 %v8728_v53  ;;  %4607 = vmatpush1.bf16.msra.mxu1 %v8730_v11 }
 0xa3e   :  { %v6875_v61 = vpop.eup %6874  ;;  %v4434_v14 = vmul.f32 0.5, %v6873_v5  ;;  %4567 = vmatprep.subr.bf16.mxu0 %v8734_v4  ;;  %4608 = vmatprep.subr.bf16.mxu1 %v8736_v43  ;;  %v9867_v5 = vld [vmem:[#allocation32_spill] sm:$0xff] }
 0xa3f   :  { %v4438_v48 = vmul.f32 0.5, %v6875_v61  ;;  %v6877_v47 = vpop.eup %6876  ;;  %v9868_v61 = vld [vmem:[#allocation33_spill] sm:$0xff] }
 0xa40   :  { %v4435_v8 = vadd.f32 0.5, %v4434_v14  ;;  %v6879_v38 = vpop.eup %6878  ;;  %v9869_v14 = vld [vmem:[#allocation34_spill] sm:$0xff] }
 0xa41   :  { %v4439_v13 = vadd.f32 0.5, %v4438_v48  ;;  %4568 = vmatpush1.bf16.msra.mxu0 %v8740_v9  ;;  %4609 = vmatpush1.bf16.msra.mxu1 %v8742_v45  ;;  %v4443_v58 = vmul.f32 0.5, %v6879_v38  ;;  %v9870_v48 = vld [vmem:[#allocation35_spill] sm:$0xff]  ;;  %v9876_v38 = vld [vmem:[#allocation41_spill] sm:$0xff] }
 0xa42   :  { %v4446_v40 = vmul.f32 %v6877_v47, %v4435_v8  ;;  %4569 = vmatprep.subr.bf16.mxu0 %v8746_v2  ;;  %4610 = vmatprep.subr.bf16.mxu1 %v8748_v37  ;;  %v9871_v8 = vld [vmem:[#allocation36_spill] sm:$0xff]  ;;  %v9872_v47 = vld [vmem:[#allocation37_spill] sm:$0xff] }
 0xa43   :  { %v4445_v51 = vmul.f32 0.0, %v4439_v13  ;;  %v4444_v16 = vadd.f32 0.5, %v4443_v58  ;;  %v9873_v13 = vld [vmem:[#allocation38_spill] sm:$0xff] }
 0xa45   :  { %v8874_v20 = vadd.f32 %v4446_v40, %v4445_v51  ;;  %4570 = vmatpush1.bf16.msra.mxu0 %v8752_v21  ;;  %4611 = vmatpush1.bf16.msra.mxu1 %v8754_v60  ;;  %v9874_v40 = vld [vmem:[#allocation39_spill] sm:$0xff]  ;;  %v9875_v51 = vld [vmem:[#allocation40_spill] sm:$0xff] }
 0xa46   :  { %4571 = vmatprep.subr.bf16.mxu0 %v8758_v24  ;;  %4612 = vmatprep.subr.bf16.mxu1 %v8760_v0 }
 0xa47   :  { %6880 = vtanh.f32 %v8874_v20 }
 0xa49   :  { %4572 = vmatpush1.bf16.msra.mxu0 %v9852_v49  ;;  %4613 = vmatpush1.bf16.msra.mxu1 %v8766_v26 }
 0xa4a   :  { %4573 = vmatprep.subr.bf16.mxu0 %v8770_v19  ;;  %4614 = vmatprep.subr.bf16.mxu1 %v8772_v27 }
 0xa4d   :  { %4574 = vmatpush1.bf16.msra.mxu0 %v8776_v30  ;;  %4615 = vmatpush1.bf16.msra.mxu1 %v8778_v31 }
 0xa4e   :  { %4575 = vmatprep.subr.bf16.mxu0 %v8782_v56  ;;  %4616 = vmatprep.subr.bf16.mxu1 %v8784_v36 }
 0xa51   :  { %v6881_v32 = vpop.eup %6880  ;;  %4576 = vmatpush1.bf16.msra.mxu0 %v8788_v1  ;;  %4617 = vmatpush1.bf16.msra.mxu1 %v8790_v25 }
 0xa52   :  { %v4449_v18 = vmul.f32 %v6881_v32, %v4444_v16  ;;  %4709 = vmatprep.subr.bf16.mxu0 %v8596_v52  ;;  %4750 = vmatprep.subr.bf16.mxu1 %v8598_v55  ;;  %v9853_v52 = vld [vmem:[#allocation54_spill] sm:$0xff]  ;;  %v9854_v55 = vld [vmem:[#allocation55_spill] sm:$0xff] }
 0xa54   :  { %v4557_v41 = vpack.c.bf16 %v4449_v18, %v4449_v18 }
 0xa56   :  { %v4559_v23 = vrot.slane %v4557_v41, 3 }
 0xa58   :  { %4594 = vmatmul.mubr.bf16.vlgmr.msra.gmra.mrb[92].mxu0 %v4559_v23  ;;  %4635 = vmatmul.mubr.bf16.vlgmr.msra.gmra.mrb[92].mxu1 %v4559_v23  ;;  %v4450_v23 = vld [vmem:[#allocation3] sm:$0xc] }
 0xa59   :  { %4710 = vmatpush1.bf16.msra.mxu0 %v8600_v33  ;;  %4751 = vmatpush1.bf16.msra.mxu1 %v8602_v46  ;;  %v9855_v33 = vld [vmem:[#allocation56_spill] sm:$0xff]  ;;  %v9856_v46 = vld [vmem:[#allocation57_spill] sm:$0xff] }
 0xa5a   :  { %4711 = vmatprep.subr.bf16.mxu0 %v8606_v10  ;;  %4752 = vmatprep.subr.bf16.mxu1 %v8608_v39  ;;  %v9857_v10 = vld [vmem:[#allocation58_spill] sm:$0xff]  ;;  %v9858_v39 = vld [vmem:[#allocation59_spill] sm:$0xff] }
 0xa5b   :  { %4741 = vmatprep.mubr.bf16.mxu0 %v9693_v28  ;;  %4782 = vmatprep.mubr.bf16.mxu1 %v9693_v28 }
 0xa5d   :  { %4712 = vmatpush1.bf16.msra.mxu0 %v8614_v35  ;;  %4753 = vmatpush1.bf16.msra.mxu1 %v8616_v50  ;;  %v9860_v35 = vld [vmem:[#allocation61_spill] sm:$0xff]  ;;  %v9861_v50 = vld [vmem:[#allocation26_spill] sm:$0xff] }
 0xa5e   :  { %4713 = vmatprep.subr.bf16.mxu0 %v8620_v12  ;;  %4754 = vmatprep.subr.bf16.mxu1 %v8622_v54 }
 0xa61   :  { %4714 = vmatpush1.bf16.msra.mxu0 %v9853_v52  ;;  %4755 = vmatpush1.bf16.msra.mxu1 %v9854_v55 }
 0xa62   :  { %4715 = vmatprep.subr.bf16.mxu0 %v9855_v33  ;;  %4756 = vmatprep.subr.bf16.mxu1 %v9856_v46 }
 0xa65   :  { %4716 = vmatpush1.bf16.msra.mxu0 %v9857_v10  ;;  %4757 = vmatpush1.bf16.msra.mxu1 %v9858_v39 }
 0xa66   :  { %4717 = vmatprep.subr.bf16.mxu0 %v9859_v22  ;;  %4758 = vmatprep.subr.bf16.mxu1 %v9860_v35 }
 0xa69   :  { %4718 = vmatpush1.bf16.msra.mxu0 %v9861_v50  ;;  %4759 = vmatpush1.bf16.msra.mxu1 %v9862_v6 }
 0xa6a   :  { %4719 = vmatprep.subr.bf16.mxu0 %v9863_v44  ;;  %4760 = vmatprep.subr.bf16.mxu1 %v9864_v17  ;;  %v4452_v17 = vld [vmem:[#allocation3 + $0x10] sm:$0xc] }
 0xa6d   :  { %4720 = vmatpush1.bf16.msra.mxu0 %v9865_v3  ;;  %4761 = vmatpush1.bf16.msra.mxu1 %v9866_v29 }
 0xa6e   :  { %4721 = vmatprep.subr.bf16.mxu0 %v9867_v5  ;;  %4762 = vmatprep.subr.bf16.mxu1 %v9868_v61 }
 0xa71   :  { %4722 = vmatpush1.bf16.msra.mxu0 %v9869_v14  ;;  %4763 = vmatpush1.bf16.msra.mxu1 %v9870_v48 }
 0xa72   :  { %4723 = vmatprep.subr.bf16.mxu0 %v9871_v8  ;;  %4764 = vmatprep.subr.bf16.mxu1 %v9872_v47  ;;  %v4451_v47 = vld [vmem:[#allocation3 + $0x8] sm:$0xc] }
 0xa75   :  { %4724 = vmatpush1.bf16.msra.mxu0 %v9873_v13  ;;  %4765 = vmatpush1.bf16.msra.mxu1 %v9874_v40 }
 0xa76   :  { %4815 = vmatprep.subr.bf16.mxu0 %v9875_v51  ;;  %4856 = vmatprep.subr.bf16.mxu1 %v9876_v38 }
 0xb07   :  { %v4489_v58 = vpop.f32.mrb[88].mxu0  ;;  %v4530_v16 = vpop.f32.mrb[88].mxu1 }
 0xb08   :  { %v4541_v32 = vrot.slane %v4489_v58, 6  ;;  %v4491_v18 = vpop.f32.mrb[89].mxu0  ;;  %v4532_v41 = vpop.f32.mrb[89].mxu1  ;;  %v4543_v5 = vrot.slane %v4530_v16, 6  ;;  %v4453_v58 = vld [vmem:[#allocation3 + $0x18] sm:$0xc] }
 0xb09   :  { %v4542_v14 = vrot.slane %v4491_v18, 6  ;;  %v4493_v48 = vpop.f32.mrb[90].mxu0  ;;  %v4534_v61 = vpop.f32.mrb[90].mxu1  ;;  %v4544_v44 = vrot.slane %v4532_v41, 6 }
 0xb0a   :  { %v4549_v8 = vadd.f32 %v4541_v32, %v4450_v23  ;;  %v4494_v29 = vpop.f32.mrb[91].mxu0  ;;  %v4535_v13 = vpop.f32.mrb[91].mxu1  ;;  %v4551_v38 = vadd.f32 %v4543_v5, %v4452_v17 }
 0xb0b   :  { %v4550_v3 = vadd.f32 %v4542_v14, %v4451_v47  ;;  %v4552_v6 = vadd.f32 %v4544_v44, %v4453_v58  ;;  %v9877_v13 = vld [vmem:[#allocation43_spill] sm:$0xff] }
 0xb0c   :  { %v4659_v40 = vmul.f32 0.5, %v4549_v8  ;;  %v4673_v14 = vrot.slane %v9877_v13, 6  ;;  %v4553_v58 = vld [vmem:[#allocation3 + $0x60] sm:$0x30]  ;;  %v4554_v13 = vld [vmem:[#allocation3 + $0x68] sm:$0x30] }
 0xb0d   :  { %v4663_v51 = vmul.f32 0.5, %v4550_v3  ;;  %v4668_v50 = vmul.f32 0.5, %v4552_v6 }
 0xb0e   :  { %6882 = vtanh.f32 %v4659_v40 }
 0xb0f   :  { %6884 = vtanh.f32 %v4663_v51 }
 0xb10   :  { %6886 = vtanh.f32 %v4551_v38 }
 0xb11   :  { %6888 = vtanh.f32 %v4668_v50 }
 0xb18   :  { %v6883_v18 = vpop.eup %6882 }
 0xb19   :  { %v6885_v48 = vpop.eup %6884  ;;  %v4661_v61 = vmul.f32 0.5, %v6883_v18 }
 0xb1a   :  { %v4665_v32 = vmul.f32 0.5, %v6885_v48  ;;  %v6887_v29 = vpop.eup %6886 }
 0xb1b   :  { %v4662_v16 = vadd.f32 0.5, %v4661_v61  ;;  %v6889_v17 = vpop.eup %6888 }
 0xb1c   :  { %v4666_v8 = vadd.f32 0.5, %v4665_v32  ;;  %v4670_v5 = vmul.f32 0.5, %v6889_v17 }
 0xb1d   :  { %v4676_v47 = vmul.f32 %v6887_v29, %v4662_v16 }
 0xb1e   :  { %v4675_v3 = vmul.f32 %v4673_v14, %v4666_v8  ;;  %v4671_v44 = vadd.f32 0.5, %v4670_v5  ;;  %v4555_v5 = vld [vmem:[#allocation3 + $0x70] sm:$0x30] }
 0xb20   :  { %v8928_v40 = vadd.f32 %v4676_v47, %v4675_v3 }
 0xb22   :  { %9878 = vst [vmem:[#allocation44_spill] sm:$0xff] %v8928_v40  ;;  %6890 = vtanh.f32 %v8928_v40 }
 0xb2b   :  { %v4595_v6 = vpop.f32.mrb[92].mxu0  ;;  %v4636_v51 = vpop.f32.mrb[92].mxu1 }
 0xb2c   :  { %v6891_v38 = vpop.eup %6890  ;;  %v4647_v41 = vrot.slane %v4595_v6, 4  ;;  %v4597_v23 = vpop.f32.mrb[93].mxu0  ;;  %v4649_v29 = vrot.slane %v4636_v51, 4 }
 0xb2d   :  { %v4638_v50 = vpop.f32.mrb[93].mxu1  ;;  %v4648_v18 = vrot.slane %v4597_v23, 4  ;;  %v4599_v48 = vpop.f32.mrb[94].mxu0  ;;  %v4679_v32 = vmul.f32 %v6891_v38, %v4671_v44  ;;  %v4556_v44 = vld [vmem:[#allocation3 + $0x78] sm:$0x30]  ;;  %v9894_v38 = vld [vmem:[#allocation39_spill] sm:$0xff] }
 0xb2e   :  { %v4640_v61 = vpop.f32.mrb[94].mxu1  ;;  %v4655_v16 = vadd.f32 %v4647_v41, %v4553_v58  ;;  %v4600_v14 = vpop.f32.mrb[95].mxu0  ;;  %v4657_v6 = vadd.f32 %v4649_v29, %v4555_v5  ;;  %v4650_v22 = vrot.slane %v4638_v50, 4  ;;  %v9895_v41 = vld [vmem:[#allocation40_spill] sm:$0xff]  ;;  %v9896_v23 = vld [vmem:[#allocation41_spill] sm:$0xff] }
 0xb2f   :  { %v4641_v8 = vpop.f32.mrb[95].mxu1  ;;  %v4656_v47 = vadd.f32 %v4648_v18, %v4554_v13  ;;  %v4705_v3 = vpack.c.bf16 %v4679_v32, %v4679_v32  ;;  %v4701_v32 = vld [vmem:[#allocation3] sm:$0x30] }
 0xb30   :  { %v4680_v17 = vmul.f32 0.5, %v4655_v16  ;;  %v4658_v51 = vadd.f32 %v4650_v22, %v4556_v44  ;;  %v4703_v44 = vld [vmem:[#allocation3 + $0x10] sm:$0x30] }
 0xb31   :  { %v4684_v40 = vmul.f32 0.5, %v4656_v47  ;;  %v4707_v35 = vrot.slane %v4705_v3, 1  ;;  %v4702_v47 = vld [vmem:[#allocation3 + $0x8] sm:$0x30] }
 0xb32   :  { %6892 = vtanh.f32 %v4680_v17 }
 0xb33   :  { %6894 = vtanh.f32 %v4684_v40  ;;  %4742 = vmatmul.mubr.bf16.vlgmr.msra.gmra.mrb[96].mxu0 %v4707_v35  ;;  %4783 = vmatmul.mubr.bf16.vlgmr.msra.gmra.mrb[96].mxu1 %v4707_v35  ;;  %v9893_v40 = vld [vmem:[#allocation38_spill] sm:$0xff] }
 0xb34   :  { %4816 = vmatpush1.bf16.msra.mxu0 %v8700_v15  ;;  %4857 = vmatpush1.bf16.msra.mxu1 %v8702_v42  ;;  %6896 = vtanh.f32 %v4657_v6  ;;  %v4689_v15 = vmul.f32 0.5, %v4658_v51 }
 0xb35   :  { %4817 = vmatprep.subr.bf16.mxu0 %v8706_v63  ;;  %4858 = vmatprep.subr.bf16.mxu1 %v8708_v34 }
 0xb36   :  { %4847 = vmatprep.mubr.bf16.mxu0 %v9693_v28  ;;  %4888 = vmatprep.mubr.bf16.mxu1 %v9693_v28  ;;  %6898 = vtanh.f32 %v4689_v15 }
 0xb38   :  { %4818 = vmatpush1.bf16.msra.mxu0 %v8714_v62  ;;  %4859 = vmatpush1.bf16.msra.mxu1 %v8716_v59 }
 0xb39   :  { %4819 = vmatprep.subr.bf16.mxu0 %v8720_v7  ;;  %4860 = vmatprep.subr.bf16.mxu1 %v8722_v57  ;;  %v4694_v7 = vrot.slane %v8874_v20, 2  ;;  %v9885_v20 = vld [vmem:[#allocation30_spill] sm:$0xff] }
 0xb3c   :  { %v6893_v42 = vpop.eup %6892  ;;  %4820 = vmatpush1.bf16.msra.mxu0 %v8728_v53  ;;  %4861 = vmatpush1.bf16.msra.mxu1 %v8730_v11 }
 0xb3d   :  { %v6895_v63 = vpop.eup %6894  ;;  %v4682_v34 = vmul.f32 0.5, %v6893_v42  ;;  %4821 = vmatprep.subr.bf16.mxu0 %v8734_v4  ;;  %4862 = vmatprep.subr.bf16.mxu1 %v8736_v43 }
 0xb3e   :  { %v4686_v22 = vmul.f32 0.5, %v6895_v63  ;;  %v6897_v59 = vpop.eup %6896  ;;  %v4704_v63 = vld [vmem:[#allocation3 + $0x18] sm:$0x30] }
 0xb3f   :  { %v4683_v62 = vadd.f32 0.5, %v4682_v34 }
 0xb40   :  { %v4687_v35 = vadd.f32 0.5, %v4686_v22  ;;  %4822 = vmatpush1.bf16.msra.mxu0 %v8740_v9  ;;  %4863 = vmatpush1.bf16.msra.mxu1 %v8742_v45  ;;  %v6899_v4 = vpop.eup %6898 }
 0xb41   :  { %v4697_v57 = vmul.f32 %v6897_v59, %v4683_v62  ;;  %4823 = vmatprep.subr.bf16.mxu0 %v8746_v2  ;;  %4864 = vmatprep.subr.bf16.mxu1 %v8748_v37  ;;  %v4691_v43 = vmul.f32 0.5, %v6899_v4  ;;  %v8967_v37 = vld [vmem:[#allocation15 + $0x4] ss:$16 sps:$4 sm:$0xff]  }
 0xb42   :  { %v4696_v53 = vmul.f32 %v4694_v7, %v4687_v35 }
 0xb43   :  { %v4692_v9 = vadd.f32 0.5, %v4691_v43  ;;  %v9897_v43 = vld [vmem:[#allocation44_spill] sm:$0xff] }
 0xb44   :  { %v8950_v11 = vadd.f32 %v4697_v57, %v4696_v53  ;;  %4824 = vmatpush1.bf16.msra.mxu0 %v8752_v21  ;;  %4865 = vmatpush1.bf16.msra.mxu1 %v8754_v60  ;;  %v8970_v21 = vld [vmem:[#allocation15 + $0xc] ss:$16 sps:$4 sm:$0xff]  }
 0xb45   :  { %4825 = vmatprep.subr.bf16.mxu0 %v8758_v24  ;;  %4866 = vmatprep.subr.bf16.mxu1 %v8760_v0  ;;  %v8973_v0 = vld [vmem:[#allocation15] ss:$16 sps:$4 sm:$0xff]  }
 0xb46   :  { %6900 = vtanh.f32 %v8950_v11 }
 0xb48   :  { %4826 = vmatpush1.bf16.msra.mxu0 %v9852_v49  ;;  %4867 = vmatpush1.bf16.msra.mxu1 %v8766_v26  ;;  %v8976_v26 = vld [vmem:[#allocation15 + $0x8] ss:$16 sps:$4 sm:$0xff]  }
 0xb49   :  { %4827 = vmatprep.subr.bf16.mxu0 %v8770_v19  ;;  %4868 = vmatprep.subr.bf16.mxu1 %v8772_v27  ;;  %v8982_v19 = vld [vmem:[#allocation15 + $0x2c] ss:$16 sps:$4 sm:$0xff]   ;;  %v8987_v27 = vld [vmem:[#allocation15 + $0x20] ss:$16 sps:$4 sm:$0xff]   ;;  %v9886_v49 = vld [vmem:[#allocation31_spill] sm:$0xff] }
 0xb4c   :  { %4828 = vmatpush1.bf16.msra.mxu0 %v8776_v30  ;;  %4869 = vmatpush1.bf16.msra.mxu1 %v8778_v31  ;;  %v8990_v30 = vld [vmem:[#allocation15 + $0x28] ss:$16 sps:$4 sm:$0xff]   ;;  %v9879_v31 = vld [vmem:[#allocation60_spill] sm:$0xff] }
 0xb4d   :  { %4829 = vmatprep.subr.bf16.mxu0 %v8782_v56  ;;  %4870 = vmatprep.subr.bf16.mxu1 %v8784_v36  ;;  %v9880_v56 = vld [vmem:[#allocation61_spill] sm:$0xff]  ;;  %v9881_v36 = vld [vmem:[#allocation26_spill] sm:$0xff] }
 0xb50   :  { %v6901_v45 = vpop.eup %6900  ;;  %4830 = vmatpush1.bf16.msra.mxu0 %v8788_v1  ;;  %4871 = vmatpush1.bf16.msra.mxu1 %v8790_v25  ;;  %v8979_v25 = vld [vmem:[#allocation15 + $0x24] ss:$16 sps:$4 sm:$0xff]  }
 0xb51   :  { %v4700_v2 = vmul.f32 %v6901_v45, %v4692_v9  ;;  %4963 = vmatprep.subr.bf16.mxu0 %v8967_v37  ;;  %5004 = vmatprep.subr.bf16.mxu1 %v8970_v21  ;;  %v9884_v1 = vld [vmem:[#allocation29_spill] sm:$0xff]  ;;  %v4927_v9 = vrot.slane %v9897_v43, 6  ;;  %v4948_v43 = vrot.slane %v8950_v11, 2  ;;  %v9076_v11 = vld [vmem:[#allocation16 + $0x80] ss:$16 sps:$4 sm:$0xff]  }
 0xb53   :  { %v4811_v60 = vpack.c.bf16 %v4700_v2, %v4700_v2 }
 0xb55   :  { %v4813_v24 = vrot.slane %v4811_v60, 2 }
 0xb57   :  { %4848 = vmatmul.mubr.bf16.vlgmr.msra.gmra.mrb[100].mxu0 %v4813_v24  ;;  %4889 = vmatmul.mubr.bf16.vlgmr.msra.gmra.mrb[100].mxu1 %v4813_v24 }
 0xb58   :  { %4964 = vmatpush1.bf16.msra.mxu0 %v8973_v0  ;;  %5005 = vmatpush1.bf16.msra.mxu1 %v8976_v26 }
 0xb59   :  { %4965 = vmatprep.subr.bf16.mxu0 %v8979_v25  ;;  %5006 = vmatprep.subr.bf16.mxu1 %v8982_v19 }
 0xb5a   :  { %4995 = vmatprep.mubr.bf16.mxu0 %v9693_v28  ;;  %5036 = vmatprep.mubr.bf16.mxu1 %v9693_v28 }
 0xb5c   :  { %4966 = vmatpush1.bf16.msra.mxu0 %v8987_v27  ;;  %5007 = vmatpush1.bf16.msra.mxu1 %v8990_v30 }
 0xb5d   :  { %4967 = vmatprep.subr.bf16.mxu0 %v8620_v12  ;;  %5008 = vmatprep.subr.bf16.mxu1 %v8622_v54  ;;  %v9882_v12 = vld [vmem:[#allocation27_spill] sm:$0xff]  ;;  %v9883_v54 = vld [vmem:[#allocation28_spill] sm:$0xff] }
 0xb60   :  { %4968 = vmatpush1.bf16.msra.mxu0 %v9853_v52  ;;  %5009 = vmatpush1.bf16.msra.mxu1 %v9854_v55  ;;  %v9887_v52 = vld [vmem:[#allocation32_spill] sm:$0xff]  ;;  %v9888_v55 = vld [vmem:[#allocation33_spill] sm:$0xff] }
 0xb61   :  { %4969 = vmatprep.subr.bf16.mxu0 %v9855_v33  ;;  %5010 = vmatprep.subr.bf16.mxu1 %v9856_v46  ;;  %v9889_v33 = vld [vmem:[#allocation34_spill] sm:$0xff]  ;;  %v9890_v46 = vld [vmem:[#allocation35_spill] sm:$0xff] }
 0xb64   :  { %4970 = vmatpush1.bf16.msra.mxu0 %v9857_v10  ;;  %5011 = vmatpush1.bf16.msra.mxu1 %v9858_v39  ;;  %v9891_v10 = vld [vmem:[#allocation36_spill] sm:$0xff]  ;;  %v9892_v39 = vld [vmem:[#allocation37_spill] sm:$0xff] }
 0xb65   :  { %4971 = vmatprep.subr.bf16.mxu0 %v9879_v31  ;;  %5012 = vmatprep.subr.bf16.mxu1 %v9880_v56 }
 0xb68   :  { %4972 = vmatpush1.bf16.msra.mxu0 %v9881_v36  ;;  %5013 = vmatpush1.bf16.msra.mxu1 %v9882_v12 }
 0xb69   :  { %4973 = vmatprep.subr.bf16.mxu0 %v9883_v54  ;;  %5014 = vmatprep.subr.bf16.mxu1 %v9884_v1 }
 0xb6c   :  { %4974 = vmatpush1.bf16.msra.mxu0 %v9885_v20  ;;  %5015 = vmatpush1.bf16.msra.mxu1 %v9886_v49 }
 0xb6d   :  { %4975 = vmatprep.subr.bf16.mxu0 %v9887_v52  ;;  %5016 = vmatprep.subr.bf16.mxu1 %v9888_v55  ;;  %v4807_v52 = vld [vmem:[#allocation3 + $0x60] sm:$0xc] }
 0xb70   :  { %4976 = vmatpush1.bf16.msra.mxu0 %v9889_v33  ;;  %5017 = vmatpush1.bf16.msra.mxu1 %v9890_v46 }
 0xb71   :  { %4977 = vmatprep.subr.bf16.mxu0 %v9891_v10  ;;  %5018 = vmatprep.subr.bf16.mxu1 %v9892_v39 }
 0xb74   :  { %4978 = vmatpush1.bf16.msra.mxu0 %v9893_v40  ;;  %5019 = vmatpush1.bf16.msra.mxu1 %v9894_v38  ;;  %v4808_v38 = vld [vmem:[#allocation3 + $0x68] sm:$0xc] }
 0xb75   :  { %5069 = vmatprep.subr.bf16.mxu0 %v9895_v41  ;;  %5110 = vmatprep.subr.bf16.mxu1 %v9896_v23 }
 0xc06   :  { %v4743_v50 = vpop.f32.mrb[96].mxu0  ;;  %v4784_v58 = vpop.f32.mrb[96].mxu1 }
 0xc07   :  { %v4795_v18 = vrot.slane %v4743_v50, 4  ;;  %v4745_v48 = vpop.f32.mrb[97].mxu0  ;;  %v4786_v61 = vpop.f32.mrb[97].mxu1  ;;  %v4797_v8 = vrot.slane %v4784_v58, 4 }
 0xc08   :  { %v4796_v16 = vrot.slane %v4745_v48, 4  ;;  %v4747_v29 = vpop.f32.mrb[98].mxu0  ;;  %v4788_v13 = vpop.f32.mrb[98].mxu1  ;;  %v4798_v42 = vrot.slane %v4786_v61, 4  ;;  %v4809_v48 = vld [vmem:[#allocation3 + $0x70] sm:$0xc] }
 0xc09   :  { %v4803_v14 = vadd.f32 %v4795_v18, %v4701_v32  ;;  %v4748_v3 = vpop.f32.mrb[99].mxu0  ;;  %v4789_v17 = vpop.f32.mrb[99].mxu1  ;;  %v4805_v15 = vadd.f32 %v4797_v8, %v4703_v44  ;;  %v9023_v13 = vld [vmem:[#allocation16] ss:$16 sps:$4 sm:$0xff]   ;;  %v4810_v8 = vld [vmem:[#allocation3 + $0x78] sm:$0xc] }
 0xc0a   :  { %v4804_v5 = vadd.f32 %v4796_v16, %v4702_v47  ;;  %v4806_v34 = vadd.f32 %v4798_v42, %v4704_v63  ;;  %v9029_v47 = vld [vmem:[#allocation16 + $0x24] ss:$16 sps:$4 sm:$0xff]   ;;  %v9032_v3 = vld [vmem:[#allocation16 + $0x2c] ss:$16 sps:$4 sm:$0xff]   ;;  %v9049_v63 = vld [vmem:[#allocation16 + $0x40] ss:$16 sps:$4 sm:$0xff]  }
 0xc0b   :  { %v4913_v6 = vmul.f32 0.5, %v4803_v14  ;;  %v9026_v14 = vld [vmem:[#allocation16 + $0x8] ss:$16 sps:$4 sm:$0xff]   ;;  %v9043_v44 = vld [vmem:[#allocation16 + $0x44] ss:$16 sps:$4 sm:$0xff]  }
 0xc0c   :  { %v4917_v51 = vmul.f32 0.5, %v4804_v5  ;;  %v4922_v22 = vmul.f32 0.5, %v4806_v34  ;;  %v9037_v5 = vld [vmem:[#allocation16 + $0x20] ss:$16 sps:$4 sm:$0xff]   ;;  %v9052_v34 = vld [vmem:[#allocation16 + $0x48] ss:$16 sps:$4 sm:$0xff]  }
 0xc0d   :  { %6902 = vtanh.f32 %v4913_v6  ;;  %v9040_v6 = vld [vmem:[#allocation16 + $0x28] ss:$16 sps:$4 sm:$0xff]  }
 0xc0e   :  { %6904 = vtanh.f32 %v4917_v51  ;;  %v9046_v51 = vld [vmem:[#allocation16 + $0x4c] ss:$16 sps:$4 sm:$0xff]  }
 0xc0f   :  { %6906 = vtanh.f32 %v4805_v15 }
 0xc10   :  { %6908 = vtanh.f32 %v4922_v22 }
 0xc17   :  { %v6903_v62 = vpop.eup %6902 }
 0xc18   :  { %v6905_v59 = vpop.eup %6904  ;;  %v4915_v35 = vmul.f32 0.5, %v6903_v62 }
 0xc19   :  { %v4919_v7 = vmul.f32 0.5, %v6905_v59  ;;  %v6907_v53 = vpop.eup %6906  ;;  %v9055_v59 = vld [vmem:[#allocation16 + $0x64] ss:$16 sps:$4 sm:$0xff]  }
 0xc1a   :  { %v4916_v57 = vadd.f32 0.5, %v4915_v35  ;;  %v6909_v24 = vpop.eup %6908  ;;  %v9058_v35 = vld [vmem:[#allocation16 + $0x6c] ss:$16 sps:$4 sm:$0xff]  }
 0xc1b   :  { %v4920_v4 = vadd.f32 0.5, %v4919_v7  ;;  %v4924_v31 = vmul.f32 0.5, %v6909_v24  ;;  %v9068_v24 = vld [vmem:[#allocation16 + $0x84] ss:$16 sps:$4 sm:$0xff]  }
 0xc1c   :  { %v4930_v45 = vmul.f32 %v6907_v53, %v4916_v57 }
 0xc1d   :  { %v4929_v2 = vmul.f32 %v4927_v9, %v4920_v4  ;;  %v4925_v56 = vadd.f32 0.5, %v4924_v31  ;;  %v9062_v9 = vld [vmem:[#allocation16 + $0x60] ss:$16 sps:$4 sm:$0xff]   ;;  %v9071_v31 = vld [vmem:[#allocation16 + $0x8c] ss:$16 sps:$4 sm:$0xff]  }
 0xc1f   :  { %v9020_v60 = vadd.f32 %v4930_v45, %v4929_v2  ;;  %v9065_v45 = vld [vmem:[#allocation16 + $0x68] ss:$16 sps:$4 sm:$0xff]  }
 0xc21   :  { %6910 = vtanh.f32 %v9020_v60 }
 0xc2a   :  { %v4849_v36 = vpop.f32.mrb[100].mxu0  ;;  %v4890_v12 = vpop.f32.mrb[100].mxu1 }
 0xc2b   :  { %v6911_v54 = vpop.eup %6910  ;;  %v4901_v1 = vrot.slane %v4849_v36, 6  ;;  %v4851_v20 = vpop.f32.mrb[101].mxu0  ;;  %v4903_v40 = vrot.slane %v4890_v12, 6  ;;  %v9079_v12 = vld [vmem:[#allocation16 + $0x88] ss:$16 sps:$4 sm:$0xff]  }
 0xc2c   :  { %v4892_v49 = vpop.f32.mrb[101].mxu1  ;;  %v4902_v55 = vrot.slane %v4851_v20, 6  ;;  %v4853_v33 = vpop.f32.mrb[102].mxu0  ;;  %v4933_v10 = vmul.f32 %v6911_v54, %v4925_v56  ;;  %v9082_v54 = vld [vmem:[#allocation16 + $0xa4] ss:$16 sps:$4 sm:$0xff]  }
 0xc2d   :  { %v4894_v46 = vpop.f32.mrb[102].mxu1  ;;  %v4909_v39 = vadd.f32 %v4901_v1, %v4807_v52  ;;  %v4854_v41 = vpop.f32.mrb[103].mxu0  ;;  %v4911_v16 = vadd.f32 %v4903_v40, %v4809_v48  ;;  %v4904_v29 = vrot.slane %v4892_v49, 6  ;;  %v9085_v1 = vld [vmem:[#allocation16 + $0xac] ss:$16 sps:$4 sm:$0xff]  }
 0xc2e   :  { %v4895_v23 = vpop.f32.mrb[103].mxu1  ;;  %v4910_v50 = vadd.f32 %v4902_v55, %v4808_v38  ;;  %v4959_v58 = vpack.c.bf16 %v4933_v10, %v4933_v10  ;;  %v9089_v49 = vld [vmem:[#allocation16 + $0xa0] ss:$16 sps:$4 sm:$0xff]   ;;  %v9092_v52 = vld [vmem:[#allocation16 + $0xa8] ss:$16 sps:$4 sm:$0xff]  }
 0xc2f   :  { %v4934_v18 = vmul.f32 0.5, %v4909_v39  ;;  %v4912_v17 = vadd.f32 %v4904_v29, %v4810_v8  ;;  %v9095_v55 = vld [vmem:[#allocation16 + $0xc4] ss:$16 sps:$4 sm:$0xff]   ;;  %v9098_v33 = vld [vmem:[#allocation16 + $0xcc] ss:$16 sps:$4 sm:$0xff]  }
 0xc30   :  { %v4938_v61 = vmul.f32 0.5, %v4910_v50  ;;  %v4961_v32 = vrot.slane %v4959_v58, 2  ;;  %v9101_v10 = vld [vmem:[#allocation16 + $0xc0] ss:$16 sps:$4 sm:$0xff]   ;;  %v9104_v39 = vld [vmem:[#allocation16 + $0xc8] ss:$16 sps:$4 sm:$0xff]  }
 0xc31   :  { %6912 = vtanh.f32 %v4934_v18  ;;  %v4943_v15 = vmul.f32 0.5, %v4912_v17  ;;  %v9107_v40 = vld [vmem:[#allocation16 + $0xe4] ss:$16 sps:$4 sm:$0xff]   ;;  %v9110_v38 = vld [vmem:[#allocation16 + $0xec] ss:$16 sps:$4 sm:$0xff]  }
 0xc32   :  { %6914 = vtanh.f32 %v4938_v61  ;;  %4996 = vmatmul.mubr.bf16.vlgmr.msra.gmra.mrb[104].mxu0 %v4961_v32  ;;  %5037 = vmatmul.mubr.bf16.vlgmr.msra.gmra.mrb[104].mxu1 %v4961_v32  ;;  %v9113_v50 = vld [vmem:[#allocation16 + $0xe0] ss:$16 sps:$4 sm:$0xff]   ;;  %v9116_v58 = vld [vmem:[#allocation16 + $0xe8] ss:$16 sps:$4 sm:$0xff]   ;;  %v9129_v32 = vld [vmem:[#allocation15 + $0x44] ss:$16 sps:$4 sm:$0xff]  }
 0xc33   :  { %5070 = vmatpush1.bf16.msra.mxu0 %v9023_v13  ;;  %5111 = vmatpush1.bf16.msra.mxu1 %v9026_v14  ;;  %6916 = vtanh.f32 %v4911_v16  ;;  %9898 = vst [vmem:[#allocation45_spill] sm:$0xff] %v9129_v32  ;;  %v9132_v16 = vld [vmem:[#allocation15 + $0x4c] ss:$16 sps:$4 sm:$0xff]   ;;  %v9135_v29 = vld [vmem:[#allocation15 + $0x40] ss:$16 sps:$4 sm:$0xff]  }
 0xc34   :  { %5071 = vmatprep.subr.bf16.mxu0 %v9029_v47  ;;  %5112 = vmatprep.subr.bf16.mxu1 %v9032_v3  ;;  %6918 = vtanh.f32 %v4943_v15  ;;  %9899 = vst [vmem:[#allocation46_spill] sm:$0xff] %v9132_v16  ;;  %9900 = vst [vmem:[#allocation47_spill] sm:$0xff] %v9135_v29  ;;  %v9138_v8 = vld [vmem:[#allocation15 + $0x48] ss:$16 sps:$4 sm:$0xff]   ;;  %v9141_v17 = vld [vmem:[#allocation15 + $0x64] ss:$16 sps:$4 sm:$0xff]  }
 0xc35   :  { %5101 = vmatprep.mubr.bf16.mxu0 %v9693_v28  ;;  %5142 = vmatprep.mubr.bf16.mxu1 %v9693_v28  ;;  %9901 = vst [vmem:[#allocation50_spill] sm:$0xff] %v9138_v8  ;;  %9902 = vst [vmem:[#allocation51_spill] sm:$0xff] %v9141_v17  ;;  %v9144_v15 = vld [vmem:[#allocation15 + $0x6c] ss:$16 sps:$4 sm:$0xff]  }
 0xc36   :  { %9903 = vst [vmem:[#allocation53_spill] sm:$0xff] %v9144_v15 }
 0xc37   :  { %5072 = vmatpush1.bf16.msra.mxu0 %v9037_v5  ;;  %5113 = vmatpush1.bf16.msra.mxu1 %v9040_v6 }
 0xc38   :  { %5073 = vmatprep.subr.bf16.mxu0 %v9043_v44  ;;  %5114 = vmatprep.subr.bf16.mxu1 %v9046_v51 }
 0xc3b   :  { %v6913_v42 = vpop.eup %6912  ;;  %5074 = vmatpush1.bf16.msra.mxu0 %v9049_v63  ;;  %5115 = vmatpush1.bf16.msra.mxu1 %v9052_v34 }
 0xc3c   :  { %v6915_v22 = vpop.eup %6914  ;;  %v4936_v62 = vmul.f32 0.5, %v6913_v42  ;;  %5075 = vmatprep.subr.bf16.mxu0 %v9055_v59  ;;  %5116 = vmatprep.subr.bf16.mxu1 %v9058_v35  ;;  %v9147_v42 = vld [vmem:[#allocation15 + $0x60] ss:$16 sps:$4 sm:$0xff]  }
 0xc3d   :  { %v4940_v7 = vmul.f32 0.5, %v6915_v22  ;;  %v6917_v53 = vpop.eup %6916  ;;  %9904 = vst [vmem:[#allocation63_spill] sm:$0xff] %v9147_v42  ;;  %v9150_v22 = vld [vmem:[#allocation15 + $0x68] ss:$16 sps:$4 sm:$0xff]  }
 0xc3e   :  { %v4937_v57 = vadd.f32 0.5, %v4936_v62  ;;  %v6919_v20 = vpop.eup %6918  ;;  %9905 = vst [vmem:[#allocation62_spill] sm:$0xff] %v9150_v22  ;;  %v9153_v62 = vld [vmem:[#allocation15 + $0x84] ss:$16 sps:$4 sm:$0xff]  }
 0xc3f   :  { %v4941_v4 = vadd.f32 0.5, %v4940_v7  ;;  %5076 = vmatpush1.bf16.msra.mxu0 %v9062_v9  ;;  %5117 = vmatpush1.bf16.msra.mxu1 %v9065_v45  ;;  %v4945_v46 = vmul.f32 0.5, %v6919_v20  ;;  %9906 = vst [vmem:[#allocation52_spill] sm:$0xff] %v9153_v62  ;;  %v9156_v7 = vld [vmem:[#allocation15 + $0x8c] ss:$16 sps:$4 sm:$0xff]  }
 0xc40   :  { %v4951_v2 = vmul.f32 %v6917_v53, %v4937_v57  ;;  %5077 = vmatprep.subr.bf16.mxu0 %v9068_v24  ;;  %5118 = vmatprep.subr.bf16.mxu1 %v9071_v31  ;;  %9907 = vst [vmem:[#allocation25_spill] sm:$0xff] %v9156_v7  ;;  %v9159_v57 = vld [vmem:[#allocation15 + $0x80] ss:$16 sps:$4 sm:$0xff]   ;;  %v9162_v53 = vld [vmem:[#allocation15 + $0x88] ss:$16 sps:$4 sm:$0xff]  }
 0xc41   :  { %v4950_v56 = vmul.f32 %v4948_v43, %v4941_v4  ;;  %v4946_v41 = vadd.f32 0.5, %v4945_v46  ;;  %9908 = vst [vmem:[#allocation48_spill] sm:$0xff] %v9159_v57  ;;  %9909 = vst [vmem:[#allocation42_spill] sm:$0xff] %v9162_v53  ;;  %v9165_v4 = vld [vmem:[#allocation15 + $0xa4] ss:$16 sps:$4 sm:$0xff]  }
 0xc42   :  { %9910 = vst [vmem:[#allocation54_spill] sm:$0xff] %v9165_v4  ;;  %v9168_v43 = vld [vmem:[#allocation15 + $0xac] ss:$16 sps:$4 sm:$0xff]   ;;  %v9177_v20 = vld [vmem:[#allocation15 + $0xc4] ss:$16 sps:$4 sm:$0xff]  }
 0xc43   :  { %v9074_v36 = vadd.f32 %v4951_v2, %v4950_v56  ;;  %5078 = vmatpush1.bf16.msra.mxu0 %v9076_v11  ;;  %5119 = vmatpush1.bf16.msra.mxu1 %v9079_v12  ;;  %9911 = vst [vmem:[#allocation55_spill] sm:$0xff] %v9168_v43  ;;  %v9171_v2 = vld [vmem:[#allocation15 + $0xa0] ss:$16 sps:$4 sm:$0xff]   ;;  %v9174_v56 = vld [vmem:[#allocation15 + $0xa8] ss:$16 sps:$4 sm:$0xff]   ;;  %9914 = vst [vmem:[#allocation58_spill] sm:$0xff] %v9177_v20 }
 0xc44   :  { %5079 = vmatprep.subr.bf16.mxu0 %v9082_v54  ;;  %5120 = vmatprep.subr.bf16.mxu1 %v9085_v1  ;;  %9912 = vst [vmem:[#allocation56_spill] sm:$0xff] %v9171_v2  ;;  %9913 = vst [vmem:[#allocation57_spill] sm:$0xff] %v9174_v56  ;;  %v9180_v46 = vld [vmem:[#allocation15 + $0xcc] ss:$16 sps:$4 sm:$0xff]  }
 0xc45   :  { %6920 = vtanh.f32 %v9074_v36  ;;  %9915 = vst [vmem:[#allocation59_spill] sm:$0xff] %v9180_v46 }
 0xc47   :  { %5080 = vmatpush1.bf16.msra.mxu0 %v9089_v49  ;;  %5121 = vmatpush1.bf16.msra.mxu1 %v9092_v52 }
 0xc48   :  { %5081 = vmatprep.subr.bf16.mxu0 %v9095_v55  ;;  %5122 = vmatprep.subr.bf16.mxu1 %v9098_v33 }
 0xc4b   :  { %5082 = vmatpush1.bf16.msra.mxu0 %v9101_v10  ;;  %5123 = vmatpush1.bf16.msra.mxu1 %v9104_v39 }
 0xc4c   :  { %5083 = vmatprep.subr.bf16.mxu0 %v9107_v40  ;;  %5124 = vmatprep.subr.bf16.mxu1 %v9110_v38 }
 0xc4f   :  { %v6921_v23 = vpop.eup %6920  ;;  %5084 = vmatpush1.bf16.msra.mxu0 %v9113_v50  ;;  %5125 = vmatpush1.bf16.msra.mxu1 %v9116_v58 }
 0xc50   :  { %v4954_v18 = vmul.f32 %v6921_v23, %v4946_v41  ;;  %5205 = vmatprep.subr.bf16.mxu0 %v8967_v37  ;;  %5246 = vmatprep.subr.bf16.mxu1 %v8970_v21  ;;  %v9183_v41 = vld [vmem:[#allocation15 + $0xc0] ss:$16 sps:$4 sm:$0xff]   ;;  %v9186_v23 = vld [vmem:[#allocation15 + $0xc8] ss:$16 sps:$4 sm:$0xff]  }
 0xc51   :  { %9916 = vst [vmem:[#allocation43_spill] sm:$0xff] %v9183_v41  ;;  %9917 = vst [vmem:[#allocation60_spill] sm:$0xff] %v9186_v23 }
 0xc52   :  { %v5065_v48 = vpack.c.bf16 %v4954_v18, %v4954_v18  ;;  %v9189_v18 = vld [vmem:[#allocation15 + $0xe4] ss:$16 sps:$4 sm:$0xff]  }
 0xc53   :  { %9918 = vst [vmem:[#allocation61_spill] sm:$0xff] %v9189_v18 }
 0xc54   :  { %v5067_v61 = vrot.slane %v5065_v48, 1  ;;  %v9192_v48 = vld [vmem:[#allocation15 + $0xec] ss:$16 sps:$4 sm:$0xff]  }
 0xc55   :  { %9919 = vst [vmem:[#allocation26_spill] sm:$0xff] %v9192_v48 }
 0xc56   :  { %5102 = vmatmul.mubr.bf16.vlgmr.msra.gmra.mrb[108].mxu0 %v5067_v61  ;;  %5143 = vmatmul.mubr.bf16.vlgmr.msra.gmra.mrb[108].mxu1 %v5067_v61  ;;  %v9195_v61 = vld [vmem:[#allocation15 + $0xe0] ss:$16 sps:$4 sm:$0xff]  }
 0xc57   :  { %5206 = vmatpush1.bf16.msra.mxu0 %v8973_v0  ;;  %5247 = vmatpush1.bf16.msra.mxu1 %v8976_v26  ;;  %9920 = vst [vmem:[#allocation27_spill] sm:$0xff] %v9195_v61 }
 0xc58   :  { %5207 = vmatprep.subr.bf16.mxu0 %v8979_v25  ;;  %5248 = vmatprep.subr.bf16.mxu1 %v8982_v19 }
 0xc59   :  { %5237 = vmatprep.mubr.bf16.mxu0 %v9693_v28  ;;  %5278 = vmatprep.mubr.bf16.mxu1 %v9693_v28 }
 0xc5b   :  { %5208 = vmatpush1.bf16.msra.mxu0 %v8987_v27  ;;  %5249 = vmatpush1.bf16.msra.mxu1 %v8990_v30 }
 0xc5c   :  { %5209 = vmatprep.subr.bf16.mxu0 %v9129_v32  ;;  %5250 = vmatprep.subr.bf16.mxu1 %v9132_v16 }
 0xc5f   :  { %5210 = vmatpush1.bf16.msra.mxu0 %v9135_v29  ;;  %5251 = vmatpush1.bf16.msra.mxu1 %v9138_v8 }
 0xc60   :  { %5211 = vmatprep.subr.bf16.mxu0 %v9141_v17  ;;  %5252 = vmatprep.subr.bf16.mxu1 %v9144_v15  ;;  %v4957_v15 = vld [vmem:[#allocation3 + $0x10] sm:$0xc0] }
 0xc63   :  { %5212 = vmatpush1.bf16.msra.mxu0 %v9147_v42  ;;  %5253 = vmatpush1.bf16.msra.mxu1 %v9150_v22 }
 0xc64   :  { %5213 = vmatprep.subr.bf16.mxu0 %v9153_v62  ;;  %5254 = vmatprep.subr.bf16.mxu1 %v9156_v7 }
 0xc67   :  { %5214 = vmatpush1.bf16.msra.mxu0 %v9159_v57  ;;  %5255 = vmatpush1.bf16.msra.mxu1 %v9162_v53 }
 0xc68   :  { %5215 = vmatprep.subr.bf16.mxu0 %v9165_v4  ;;  %5256 = vmatprep.subr.bf16.mxu1 %v9168_v43  ;;  %v4955_v43 = vld [vmem:[#allocation3] sm:$0xc0] }
 0xc6b   :  { %5216 = vmatpush1.bf16.msra.mxu0 %v9171_v2  ;;  %5257 = vmatpush1.bf16.msra.mxu1 %v9174_v56 }
 0xc6c   :  { %5217 = vmatprep.subr.bf16.mxu0 %v9177_v20  ;;  %5258 = vmatprep.subr.bf16.mxu1 %v9180_v46  ;;  %v9198_v46 = vld [vmem:[#allocation15 + $0xe8] ss:$16 sps:$4 sm:$0xff]  }
 0xc6d   :  { %9921 = vst [vmem:[#allocation28_spill] sm:$0xff] %v9198_v46 }
 0xc6f   :  { %5218 = vmatpush1.bf16.msra.mxu0 %v9183_v41  ;;  %5259 = vmatpush1.bf16.msra.mxu1 %v9186_v23  ;;  %v9201_v41 = vld [vmem:[#allocation16 + $0x4] ss:$16 sps:$4 sm:$0xff]   ;;  %v9204_v23 = vld [vmem:[#allocation16 + $0xc] ss:$16 sps:$4 sm:$0xff]  }
 0xc70   :  { %5219 = vmatprep.subr.bf16.mxu0 %v9189_v18  ;;  %5260 = vmatprep.subr.bf16.mxu1 %v9192_v48  ;;  %9922 = vst [vmem:[#allocation29_spill] sm:$0xff] %v9201_v41  ;;  %9923 = vst [vmem:[#allocation30_spill] sm:$0xff] %v9204_v23 }
 0xc73   :  { %5220 = vmatpush1.bf16.msra.mxu0 %v9195_v61  ;;  %5261 = vmatpush1.bf16.msra.mxu1 %v9198_v46  ;;  %v4956_v46 = vld [vmem:[#allocation3 + $0x8] sm:$0xc0] }
 0xc74   :  { %5296 = vmatprep.subr.bf16.mxu0 %v9201_v41  ;;  %5337 = vmatprep.subr.bf16.mxu1 %v9204_v23 }
 0xd05   :  { %v4997_v18 = vpop.f32.mrb[104].mxu0  ;;  %v5038_v20 = vpop.f32.mrb[104].mxu1 }
 0xd06   :  { %v5049_v56 = vrot.slane %v4997_v18, 2  ;;  %v4999_v48 = vpop.f32.mrb[105].mxu0  ;;  %v5040_v2 = vpop.f32.mrb[105].mxu1  ;;  %v5051_v7 = vrot.slane %v5038_v20, 2  ;;  %v4958_v18 = vld [vmem:[#allocation3 + $0x18] sm:$0xc0] }
 0xd07   :  { %v5050_v4 = vrot.slane %v4999_v48, 2  ;;  %v5001_v61 = vpop.f32.mrb[106].mxu0  ;;  %v5042_v53 = vpop.f32.mrb[106].mxu1  ;;  %v5052_v8 = vrot.slane %v5040_v2, 2 }
 0xd08   :  { %v5057_v57 = vadd.f32 %v5049_v56, %v4955_v43  ;;  %v5002_v62 = vpop.f32.mrb[107].mxu0  ;;  %v5043_v22 = vpop.f32.mrb[107].mxu1  ;;  %v5059_v23 = vadd.f32 %v5051_v7, %v4957_v15 }
 0xd09   :  { %v5058_v42 = vadd.f32 %v5050_v4, %v4956_v46  ;;  %v5060_v29 = vadd.f32 %v5052_v8, %v4958_v18 }
 0xd0a   :  { %v5155_v41 = vmul.f32 0.5, %v5057_v57  ;;  %v5169_v57 = vrot.slane %v9020_v60, 6 }
 0xd0b   :  { %v5159_v17 = vmul.f32 0.5, %v5058_v42  ;;  %v5164_v16 = vmul.f32 0.5, %v5060_v29  ;;  %v5061_v29 = vld [vmem:[#allocation3 + $0x60] sm:$0x3] }
 0xd0c   :  { %6922 = vtanh.f32 %v5155_v41 }
 0xd0d   :  { %6924 = vtanh.f32 %v5159_v17 }
 0xd0e   :  { %6926 = vtanh.f32 %v5059_v23 }
 0xd0f   :  { %6928 = vtanh.f32 %v5164_v16  ;;  %v5062_v16 = vld [vmem:[#allocation3 + $0x68] sm:$0x3] }
 0xd16   :  { %v6923_v48 = vpop.eup %6922 }
 0xd17   :  { %v6925_v61 = vpop.eup %6924  ;;  %v5157_v53 = vmul.f32 0.5, %v6923_v48 }
 0xd18   :  { %v5161_v43 = vmul.f32 0.5, %v6925_v61  ;;  %v6927_v62 = vpop.eup %6926 }
 0xd19   :  { %v5158_v56 = vadd.f32 0.5, %v5157_v53  ;;  %v6929_v17 = vpop.eup %6928 }
 0xd1a   :  { %v5162_v22 = vadd.f32 0.5, %v5161_v43  ;;  %v5166_v15 = vmul.f32 0.5, %v6929_v17 }
 0xd1b   :  { %v5172_v4 = vmul.f32 %v6927_v62, %v5158_v56 }
 0xd1c   :  { %v5171_v42 = vmul.f32 %v5169_v57, %v5162_v22  ;;  %v5167_v8 = vadd.f32 0.5, %v5166_v15  ;;  %v5063_v22 = vld [vmem:[#allocation3 + $0x70] sm:$0x3]  ;;  %v5064_v15 = vld [vmem:[#allocation3 + $0x78] sm:$0x3] }
 0xd1e   :  { %v9208_v20 = vadd.f32 %v5172_v4, %v5171_v42 }
 0xd20   :  { %6930 = vtanh.f32 %v9208_v20 }
 0xd29   :  { %v5103_v7 = vpop.f32.mrb[108].mxu0  ;;  %v5144_v2 = vpop.f32.mrb[108].mxu1 }
 0xd2a   :  { %v6931_v46 = vpop.eup %6930  ;;  %v5151_v41 = vadd.f32 %v5103_v7, %v5061_v29  ;;  %v5105_v23 = vpop.f32.mrb[109].mxu0  ;;  %v5153_v42 = vadd.f32 %v5144_v2, %v5063_v22 }
 0xd2b   :  { %v5146_v18 = vpop.f32.mrb[109].mxu1  ;;  %v5152_v48 = vadd.f32 %v5105_v23, %v5062_v16  ;;  %v5107_v61 = vpop.f32.mrb[110].mxu0  ;;  %v5175_v53 = vmul.f32 %v6931_v46, %v5167_v8 }
 0xd2c   :  { %v5148_v60 = vpop.f32.mrb[110].mxu1  ;;  %v5176_v43 = vmul.f32 0.5, %v5151_v41  ;;  %v5108_v56 = vpop.f32.mrb[111].mxu0  ;;  %v5154_v29 = vadd.f32 %v5146_v18, %v5064_v15  ;;  %v9927_v15 = vld [vmem:[#allocation51_spill] sm:$0xff] }
 0xd2d   :  { %v5149_v62 = vpop.f32.mrb[111].mxu1  ;;  %v5180_v57 = vmul.f32 0.5, %v5152_v48  ;;  %v5201_v4 = vpack.c.bf16 %v5175_v53, %v5175_v53  ;;  %v5190_v48 = vrot.slane %v9074_v36, 2 }
 0xd2e   :  { %6932 = vtanh.f32 %v5176_v43  ;;  %v5185_v8 = vmul.f32 0.5, %v5154_v29  ;;  %v9928_v29 = vld [vmem:[#allocation53_spill] sm:$0xff] }
 0xd2f   :  { %6934 = vtanh.f32 %v5180_v57  ;;  %v5203_v17 = vrot.slane %v5201_v4, 3  ;;  %v9924_v4 = vld [vmem:[#allocation46_spill] sm:$0xff] }
 0xd30   :  { %6936 = vtanh.f32 %v5153_v42  ;;  %v9925_v42 = vld [vmem:[#allocation47_spill] sm:$0xff] }
 0xd31   :  { %5238 = vmatmul.mubr.bf16.vlgmr.msra.gmra.mrb[112].mxu0 %v5203_v17  ;;  %5279 = vmatmul.mubr.bf16.vlgmr.msra.gmra.mrb[112].mxu1 %v5203_v17  ;;  %6938 = vtanh.f32 %v5185_v8  ;;  %v9926_v17 = vld [vmem:[#allocation50_spill] sm:$0xff]  ;;  %v9929_v8 = vld [vmem:[#allocation63_spill] sm:$0xff] }
 0xd32   :  { %5297 = vmatpush1.bf16.msra.mxu0 %v9023_v13  ;;  %5338 = vmatpush1.bf16.msra.mxu1 %v9026_v14 }
 0xd33   :  { %5298 = vmatprep.subr.bf16.mxu0 %v9029_v47  ;;  %5339 = vmatprep.subr.bf16.mxu1 %v9032_v3 }
 0xd34   :  { %5328 = vmatprep.mubr.bf16.mxu0 %v9693_v28  ;;  %5369 = vmatprep.mubr.bf16.mxu1 %v9693_v28 }
 0xd36   :  { %5299 = vmatpush1.bf16.msra.mxu0 %v9037_v5  ;;  %5340 = vmatpush1.bf16.msra.mxu1 %v9040_v6 }
 0xd37   :  { %5300 = vmatprep.subr.bf16.mxu0 %v9043_v44  ;;  %5341 = vmatprep.subr.bf16.mxu1 %v9046_v51 }
 0xd38   :  { %v6933_v7 = vpop.eup %6932 }
 0xd39   :  { %v6935_v2 = vpop.eup %6934  ;;  %v5178_v46 = vmul.f32 0.5, %v6933_v7  ;;  %v9930_v7 = vld [vmem:[#allocation62_spill] sm:$0xff] }
 0xd3a   :  { %v5182_v41 = vmul.f32 0.5, %v6935_v2  ;;  %5301 = vmatpush1.bf16.msra.mxu0 %v9049_v63  ;;  %5342 = vmatpush1.bf16.msra.mxu1 %v9052_v34  ;;  %v6937_v23 = vpop.eup %6936  ;;  %v9931_v2 = vld [vmem:[#allocation52_spill] sm:$0xff] }
 0xd3b   :  { %v5179_v16 = vadd.f32 0.5, %v5178_v46  ;;  %5302 = vmatprep.subr.bf16.mxu0 %v9055_v59  ;;  %5343 = vmatprep.subr.bf16.mxu1 %v9058_v35  ;;  %v6939_v36 = vpop.eup %6938  ;;  %v9932_v46 = vld [vmem:[#allocation25_spill] sm:$0xff] }
 0xd3c   :  { %v5183_v18 = vadd.f32 0.5, %v5182_v41  ;;  %v5187_v43 = vmul.f32 0.5, %v6939_v36  ;;  %v9933_v41 = vld [vmem:[#allocation48_spill] sm:$0xff]  ;;  %v9940_v36 = vld [vmem:[#allocation59_spill] sm:$0xff] }
 0xd3d   :  { %v5193_v61 = vmul.f32 %v6937_v23, %v5179_v16  ;;  %v9934_v16 = vld [vmem:[#allocation42_spill] sm:$0xff] }
 0xd3e   :  { %v5192_v60 = vmul.f32 %v5190_v48, %v5183_v18  ;;  %5303 = vmatpush1.bf16.msra.mxu0 %v9062_v9  ;;  %5344 = vmatpush1.bf16.msra.mxu1 %v9065_v45  ;;  %v5188_v56 = vadd.f32 0.5, %v5187_v43  ;;  %v9935_v23 = vld [vmem:[#allocation54_spill] sm:$0xff]  ;;  %v9936_v18 = vld [vmem:[#allocation55_spill] sm:$0xff]  ;;  %v9937_v48 = vld [vmem:[#allocation56_spill] sm:$0xff] }
 0xd3f   :  { %5304 = vmatprep.subr.bf16.mxu0 %v9068_v24  ;;  %5345 = vmatprep.subr.bf16.mxu1 %v9071_v31  ;;  %v9941_v43 = vld [vmem:[#allocation43_spill] sm:$0xff] }
 0xd40   :  { %v9230_v53 = vadd.f32 %v5193_v61, %v5192_v60  ;;  %v9938_v61 = vld [vmem:[#allocation57_spill] sm:$0xff]  ;;  %v9939_v60 = vld [vmem:[#allocation58_spill] sm:$0xff] }
 0xd42   :  { %6940 = vtanh.f32 %v9230_v53  ;;  %5305 = vmatpush1.bf16.msra.mxu0 %v9076_v11  ;;  %5346 = vmatpush1.bf16.msra.mxu1 %v9079_v12 }
 0xd43   :  { %5306 = vmatprep.subr.bf16.mxu0 %v9082_v54  ;;  %5347 = vmatprep.subr.bf16.mxu1 %v9085_v1 }
 0xd46   :  { %5307 = vmatpush1.bf16.msra.mxu0 %v9089_v49  ;;  %5348 = vmatpush1.bf16.msra.mxu1 %v9092_v52 }
 0xd47   :  { %5308 = vmatprep.subr.bf16.mxu0 %v9095_v55  ;;  %5349 = vmatprep.subr.bf16.mxu1 %v9098_v33 }
 0xd4a   :  { %5309 = vmatpush1.bf16.msra.mxu0 %v9101_v10  ;;  %5350 = vmatpush1.bf16.msra.mxu1 %v9104_v39 }
 0xd4b   :  { %5310 = vmatprep.subr.bf16.mxu0 %v9107_v40  ;;  %5351 = vmatprep.subr.bf16.mxu1 %v9110_v38 }
 0xd4c   :  { %v6941_v62 = vpop.eup %6940 }
 0xd4d   :  { %v5196_v22 = vmul.f32 %v6941_v62, %v5188_v56  ;;  %v9942_v56 = vld [vmem:[#allocation60_spill] sm:$0xff]  ;;  %v9943_v62 = vld [vmem:[#allocation61_spill] sm:$0xff] }
 0xd4e   :  { %5311 = vmatpush1.bf16.msra.mxu0 %v9113_v50  ;;  %5352 = vmatpush1.bf16.msra.mxu1 %v9116_v58 }
 0xd4f   :  { %v5295_v57 = vpack.c.bf16 %v5196_v22, %v5196_v22  ;;  %5441 = vmatprep.subr.bf16.mxu0 %v8967_v37  ;;  %5482 = vmatprep.subr.bf16.mxu1 %v8970_v21  ;;  %v9944_v22 = vld [vmem:[#allocation26_spill] sm:$0xff] }
 0xd51   :  { %5329 = vmatmul.mubr.bf16.vlgmr.msra.gmra.mrb[116].mxu0 %v5295_v57  ;;  %5370 = vmatmul.mubr.bf16.vlgmr.msra.gmra.mrb[116].mxu1 %v5295_v57  ;;  %v9945_v57 = vld [vmem:[#allocation27_spill] sm:$0xff] }
 0xd52   :  { %5442 = vmatpush1.bf16.msra.mxu0 %v8973_v0  ;;  %5483 = vmatpush1.bf16.msra.mxu1 %v8976_v26 }
 0xd53   :  { %5443 = vmatprep.subr.bf16.mxu0 %v8979_v25  ;;  %5484 = vmatprep.subr.bf16.mxu1 %v8982_v19 }
 0xd54   :  { %5473 = vmatprep.mubr.bf16.mxu0 %v9693_v28  ;;  %5514 = vmatprep.mubr.bf16.mxu1 %v9693_v28 }
 0xd56   :  { %5444 = vmatpush1.bf16.msra.mxu0 %v8987_v27  ;;  %5485 = vmatpush1.bf16.msra.mxu1 %v8990_v30 }
 0xd57   :  { %5445 = vmatprep.subr.bf16.mxu0 %v9129_v32  ;;  %5486 = vmatprep.subr.bf16.mxu1 %v9924_v4 }
 0xd5a   :  { %5446 = vmatpush1.bf16.msra.mxu0 %v9925_v42  ;;  %5487 = vmatpush1.bf16.msra.mxu1 %v9926_v17 }
 0xd5b   :  { %5447 = vmatprep.subr.bf16.mxu0 %v9927_v15  ;;  %5488 = vmatprep.subr.bf16.mxu1 %v9928_v29 }
 0xd5e   :  { %5448 = vmatpush1.bf16.msra.mxu0 %v9929_v8  ;;  %5489 = vmatpush1.bf16.msra.mxu1 %v9930_v7 }
 0xd5f   :  { %5449 = vmatprep.subr.bf16.mxu0 %v9931_v2  ;;  %5490 = vmatprep.subr.bf16.mxu1 %v9932_v46 }
 0xd62   :  { %5450 = vmatpush1.bf16.msra.mxu0 %v9933_v41  ;;  %5491 = vmatpush1.bf16.msra.mxu1 %v9934_v16  ;;  %v5198_v41 = vld [vmem:[#allocation3 + $0x48] sm:$0x3] }
 0xd63   :  { %5451 = vmatprep.subr.bf16.mxu0 %v9935_v23  ;;  %5492 = vmatprep.subr.bf16.mxu1 %v9936_v18  ;;  %v9946_v23 = vld [vmem:[#allocation28_spill] sm:$0xff]  ;;  %v9947_v18 = vld [vmem:[#allocation29_spill] sm:$0xff] }
 0xd66   :  { %5452 = vmatpush1.bf16.msra.mxu0 %v9937_v48  ;;  %5493 = vmatpush1.bf16.msra.mxu1 %v9938_v61  ;;  %v9948_v48 = vld [vmem:[#allocation30_spill] sm:$0xff] }
 0xd67   :  { %5453 = vmatprep.subr.bf16.mxu0 %v9939_v60  ;;  %5494 = vmatprep.subr.bf16.mxu1 %v9940_v36  ;;  %v5197_v61 = vld [vmem:[#allocation3 + $0x40] sm:$0x3] }
 0xd6a   :  { %5454 = vmatpush1.bf16.msra.mxu0 %v9941_v43  ;;  %5495 = vmatpush1.bf16.msra.mxu1 %v9942_v56 }
 0xd6b   :  { %5455 = vmatprep.subr.bf16.mxu0 %v9943_v62  ;;  %5496 = vmatprep.subr.bf16.mxu1 %v9944_v22 }
 0xd6e   :  { %5456 = vmatpush1.bf16.msra.mxu0 %v9945_v57  ;;  %5497 = vmatpush1.bf16.msra.mxu1 %v9946_v23  ;;  %v5199_v57 = vld [vmem:[#allocation3 + $0x50] sm:$0x3] }
 0xd6f   :  { %5547 = vmatprep.subr.bf16.mxu0 %v9947_v18  ;;  %5588 = vmatprep.subr.bf16.mxu1 %v9948_v48  ;;  %v5200_v18 = vld [vmem:[#allocation3 + $0x58] sm:$0x3] }
 0xe04   :  { %v5239_v60 = vpop.f32.mrb[112].mxu0  ;;  %v5280_v16 = vpop.f32.mrb[112].mxu1 }
 0xe05   :  { %v5287_v36 = vadd.f32 %v5239_v60, %v5197_v61  ;;  %v5241_v43 = vpop.f32.mrb[113].mxu0  ;;  %v5282_v46 = vpop.f32.mrb[113].mxu1  ;;  %v5289_v23 = vadd.f32 %v5280_v16, %v5199_v57 }
 0xe06   :  { %v5288_v56 = vadd.f32 %v5241_v43, %v5198_v41  ;;  %v5243_v2 = vpop.f32.mrb[114].mxu0  ;;  %v5284_v62 = vpop.f32.mrb[114].mxu1  ;;  %v5290_v48 = vadd.f32 %v5282_v46, %v5200_v18 }
 0xe07   :  { %v5394_v7 = vmul.f32 0.5, %v5287_v36  ;;  %v5244_v22 = vpop.f32.mrb[115].mxu0  ;;  %v5285_v8 = vpop.f32.mrb[115].mxu1  ;;  %v5408_v36 = vrot.slane %v9208_v20, 6 }
 0xe08   :  { %v5398_v29 = vmul.f32 0.5, %v5288_v56  ;;  %v5403_v15 = vmul.f32 0.5, %v5290_v48 }
 0xe09   :  { %6942 = vtanh.f32 %v5394_v7 }
 0xe0a   :  { %6944 = vtanh.f32 %v5398_v29 }
 0xe0b   :  { %6946 = vtanh.f32 %v5289_v23 }
 0xe0c   :  { %6948 = vtanh.f32 %v5403_v15  ;;  %v5291_v15 = vld [vmem:[#allocation3 + $0x20] sm:$0xc0] }
 0xe13   :  { %v6943_v17 = vpop.eup %6942 }
 0xe14   :  { %v6945_v61 = vpop.eup %6944  ;;  %v5396_v60 = vmul.f32 0.5, %v6943_v17 }
 0xe15   :  { %v5400_v42 = vmul.f32 0.5, %v6945_v61  ;;  %v6947_v2 = vpop.eup %6946 }
 0xe16   :  { %v5397_v41 = vadd.f32 0.5, %v5396_v60  ;;  %v6949_v29 = vpop.eup %6948 }
 0xe17   :  { %v5401_v43 = vadd.f32 0.5, %v5400_v42  ;;  %v5405_v7 = vmul.f32 0.5, %v6949_v29 }
 0xe18   :  { %v5411_v8 = vmul.f32 %v6947_v2, %v5397_v41  ;;  %v5292_v41 = vld [vmem:[#allocation3 + $0x28] sm:$0xc0] }
 0xe19   :  { %v5410_v62 = vmul.f32 %v5408_v36, %v5401_v43  ;;  %v5406_v48 = vadd.f32 0.5, %v5405_v7  ;;  %v5294_v7 = vld [vmem:[#allocation3 + $0x38] sm:$0xc0] }
 0xe1b   :  { %v9284_v56 = vadd.f32 %v5411_v8, %v5410_v62 }
 0xe1d   :  { %9949 = vst [vmem:[#allocation31_spill] sm:$0xff] %v9284_v56  ;;  %6950 = vtanh.f32 %v9284_v56  ;;  %v5293_v56 = vld [vmem:[#allocation3 + $0x30] sm:$0xc0] }
 0xe24   :  { %v5330_v46 = vpop.f32.mrb[116].mxu0  ;;  %v5371_v16 = vpop.f32.mrb[116].mxu1 }
 0xe25   :  { %v5382_v23 = vrot.slane %v5330_v46, 2  ;;  %v5332_v18 = vpop.f32.mrb[117].mxu0  ;;  %v5373_v17 = vpop.f32.mrb[117].mxu1  ;;  %v5384_v60 = vrot.slane %v5371_v16, 2 }
 0xe26   :  { %v5383_v22 = vrot.slane %v5332_v18, 2  ;;  %v5334_v57 = vpop.f32.mrb[118].mxu0  ;;  %v5375_v42 = vpop.f32.mrb[118].mxu1  ;;  %v5385_v32 = vrot.slane %v5373_v17, 2 }
 0xe27   :  { %v6951_v61 = vpop.eup %6950  ;;  %v5390_v20 = vadd.f32 %v5382_v23, %v5291_v15  ;;  %v5335_v2 = vpop.f32.mrb[119].mxu0  ;;  %v5392_v46 = vadd.f32 %v5384_v60, %v5293_v56 }
 0xe28   :  { %v5376_v43 = vpop.f32.mrb[119].mxu1  ;;  %v5414_v36 = vmul.f32 %v6951_v61, %v5406_v48  ;;  %v5391_v8 = vadd.f32 %v5383_v22, %v5292_v41  ;;  %v5393_v16 = vadd.f32 %v5385_v32, %v5294_v7  ;;  %v5429_v22 = vrot.slane %v9230_v53, 2  ;;  %v9962_v7 = vld [vmem:[#allocation54_spill] sm:$0xff] }
 0xe29   :  { %v5415_v62 = vmul.f32 0.5, %v5390_v20 }
 0xe2a   :  { %v5440_v29 = vpack.c.bf16 %v5414_v36, %v5414_v36  ;;  %v5419_v4 = vmul.f32 0.5, %v5391_v8  ;;  %v9952_v8 = vld [vmem:[#allocation47_spill] sm:$0xff] }
 0xe2b   :  { %6952 = vtanh.f32 %v5415_v62  ;;  %v9957_v62 = vld [vmem:[#allocation62_spill] sm:$0xff] }
 0xe2c   :  { %6954 = vtanh.f32 %v5419_v4  ;;  %5474 = vmatmul.mubr.bf16.vlgmr.msra.gmra.mrb[120].mxu0 %v5440_v29  ;;  %5515 = vmatmul.mubr.bf16.vlgmr.msra.gmra.mrb[120].mxu1 %v5440_v29  ;;  %v5424_v4 = vmul.f32 0.5, %v5393_v16  ;;  %v9958_v29 = vld [vmem:[#allocation52_spill] sm:$0xff]  ;;  %v9963_v16 = vld [vmem:[#allocation55_spill] sm:$0xff] }
 0xe2d   :  { %5548 = vmatpush1.bf16.msra.mxu0 %v9023_v13  ;;  %5589 = vmatpush1.bf16.msra.mxu1 %v9026_v14  ;;  %6956 = vtanh.f32 %v5392_v46  ;;  %v9961_v46 = vld [vmem:[#allocation42_spill] sm:$0xff] }
 0xe2e   :  { %5549 = vmatprep.subr.bf16.mxu0 %v9029_v47  ;;  %5590 = vmatprep.subr.bf16.mxu1 %v9032_v3  ;;  %6958 = vtanh.f32 %v5424_v4  ;;  %v9964_v4 = vld [vmem:[#allocation56_spill] sm:$0xff] }
 0xe2f   :  { %5579 = vmatprep.mubr.bf16.mxu0 %v9693_v28  ;;  %5620 = vmatprep.mubr.bf16.mxu1 %v9693_v28 }
 0xe31   :  { %5550 = vmatpush1.bf16.msra.mxu0 %v9037_v5  ;;  %5591 = vmatpush1.bf16.msra.mxu1 %v9040_v6 }
 0xe32   :  { %5551 = vmatprep.subr.bf16.mxu0 %v9043_v44  ;;  %5592 = vmatprep.subr.bf16.mxu1 %v9046_v51 }
 0xe35   :  { %v6953_v56 = vpop.eup %6952  ;;  %5552 = vmatpush1.bf16.msra.mxu0 %v9049_v63  ;;  %5593 = vmatpush1.bf16.msra.mxu1 %v9052_v34 }
 0xe36   :  { %v6955_v23 = vpop.eup %6954  ;;  %v5417_v32 = vmul.f32 0.5, %v6953_v56  ;;  %5553 = vmatprep.subr.bf16.mxu0 %v9055_v59  ;;  %5594 = vmatprep.subr.bf16.mxu1 %v9058_v35  ;;  %v9965_v56 = vld [vmem:[#allocation57_spill] sm:$0xff] }
 0xe37   :  { %v5421_v18 = vmul.f32 0.5, %v6955_v23  ;;  %v6957_v48 = vpop.eup %6956  ;;  %v9966_v23 = vld [vmem:[#allocation58_spill] sm:$0xff] }
 0xe38   :  { %v5418_v17 = vadd.f32 0.5, %v5417_v32  ;;  %v6959_v53 = vpop.eup %6958  ;;  %v9967_v32 = vld [vmem:[#allocation59_spill] sm:$0xff] }
 0xe39   :  { %v5422_v15 = vadd.f32 0.5, %v5421_v18  ;;  %5554 = vmatpush1.bf16.msra.mxu0 %v9062_v9  ;;  %5595 = vmatpush1.bf16.msra.mxu1 %v9065_v45  ;;  %v5426_v20 = vmul.f32 0.5, %v6959_v53  ;;  %v9968_v18 = vld [vmem:[#allocation43_spill] sm:$0xff]  ;;  %v9975_v53 = vld [vmem:[#allocation30_spill] sm:$0xff] }
 0xe3a   :  { %v5432_v57 = vmul.f32 %v6957_v48, %v5418_v17  ;;  %5555 = vmatprep.subr.bf16.mxu0 %v9068_v24  ;;  %5596 = vmatprep.subr.bf16.mxu1 %v9071_v31  ;;  %v9969_v17 = vld [vmem:[#allocation60_spill] sm:$0xff]  ;;  %v9970_v48 = vld [vmem:[#allocation61_spill] sm:$0xff] }
 0xe3b   :  { %v5431_v42 = vmul.f32 %v5429_v22, %v5422_v15  ;;  %v5427_v60 = vadd.f32 0.5, %v5426_v20  ;;  %v9971_v15 = vld [vmem:[#allocation26_spill] sm:$0xff]  ;;  %v9972_v22 = vld [vmem:[#allocation27_spill] sm:$0xff] }
 0xe3d   :  { %v9306_v61 = vadd.f32 %v5432_v57, %v5431_v42  ;;  %5556 = vmatpush1.bf16.msra.mxu0 %v9076_v11  ;;  %5597 = vmatpush1.bf16.msra.mxu1 %v9079_v12  ;;  %v9973_v57 = vld [vmem:[#allocation28_spill] sm:$0xff]  ;;  %v9974_v42 = vld [vmem:[#allocation29_spill] sm:$0xff] }
 0xe3e   :  { %5557 = vmatprep.subr.bf16.mxu0 %v9082_v54  ;;  %5598 = vmatprep.subr.bf16.mxu1 %v9085_v1 }
 0xe3f   :  { %6960 = vtanh.f32 %v9306_v61 }
 0xe41   :  { %5558 = vmatpush1.bf16.msra.mxu0 %v9089_v49  ;;  %5599 = vmatpush1.bf16.msra.mxu1 %v9092_v52 }
 0xe42   :  { %5559 = vmatprep.subr.bf16.mxu0 %v9095_v55  ;;  %5600 = vmatprep.subr.bf16.mxu1 %v9098_v33 }
 0xe45   :  { %5560 = vmatpush1.bf16.msra.mxu0 %v9101_v10  ;;  %5601 = vmatpush1.bf16.msra.mxu1 %v9104_v39 }
 0xe46   :  { %5561 = vmatprep.subr.bf16.mxu0 %v9107_v40  ;;  %5602 = vmatprep.subr.bf16.mxu1 %v9110_v38 }
 0xe49   :  { %v6961_v41 = vpop.eup %6960  ;;  %5562 = vmatpush1.bf16.msra.mxu0 %v9113_v50  ;;  %5603 = vmatpush1.bf16.msra.mxu1 %v9116_v58 }
 0xe4a   :  { %v5435_v2 = vmul.f32 %v6961_v41, %v5427_v60  ;;  %5695 = vmatprep.subr.bf16.mxu0 %v8967_v37  ;;  %5736 = vmatprep.subr.bf16.mxu1 %v8970_v21  ;;  %v9950_v37 = vld [vmem:[#allocation45_spill] sm:$0xff]  ;;  %v9951_v21 = vld [vmem:[#allocation46_spill] sm:$0xff] }
 0xe4c   :  { %v5543_v43 = vpack.c.bf16 %v5435_v2, %v5435_v2 }
 0xe4e   :  { %v5545_v36 = vrot.slane %v5543_v43, 3 }
 0xe50   :  { %5580 = vmatmul.mubr.bf16.vlgmr.msra.gmra.mrb[124].mxu0 %v5545_v36  ;;  %5621 = vmatmul.mubr.bf16.vlgmr.msra.gmra.mrb[124].mxu1 %v5545_v36  ;;  %v5436_v36 = vld [vmem:[#allocation3 + $0x40] sm:$0xc] }
 0xe51   :  { %5696 = vmatpush1.bf16.msra.mxu0 %v8973_v0  ;;  %5737 = vmatpush1.bf16.msra.mxu1 %v8976_v26  ;;  %v9953_v0 = vld [vmem:[#allocation50_spill] sm:$0xff]  ;;  %v9954_v26 = vld [vmem:[#allocation51_spill] sm:$0xff] }
 0xe52   :  { %5697 = vmatprep.subr.bf16.mxu0 %v8979_v25  ;;  %5738 = vmatprep.subr.bf16.mxu1 %v8982_v19  ;;  %v9955_v25 = vld [vmem:[#allocation53_spill] sm:$0xff]  ;;  %v9956_v19 = vld [vmem:[#allocation63_spill] sm:$0xff] }
 0xe53   :  { %5727 = vmatprep.mubr.bf16.mxu0 %v9693_v28  ;;  %5768 = vmatprep.mubr.bf16.mxu1 %v9693_v28 }
 0xe55   :  { %5698 = vmatpush1.bf16.msra.mxu0 %v8987_v27  ;;  %5739 = vmatpush1.bf16.msra.mxu1 %v8990_v30  ;;  %v9959_v27 = vld [vmem:[#allocation25_spill] sm:$0xff]  ;;  %v9960_v30 = vld [vmem:[#allocation48_spill] sm:$0xff] }
 0xe56   :  { %5699 = vmatprep.subr.bf16.mxu0 %v9950_v37  ;;  %5740 = vmatprep.subr.bf16.mxu1 %v9951_v21 }
 0xe59   :  { %5700 = vmatpush1.bf16.msra.mxu0 %v9952_v8  ;;  %5741 = vmatpush1.bf16.msra.mxu1 %v9953_v0 }
 0xe5a   :  { %5701 = vmatprep.subr.bf16.mxu0 %v9954_v26  ;;  %5742 = vmatprep.subr.bf16.mxu1 %v9955_v25 }
 0xe5d   :  { %5702 = vmatpush1.bf16.msra.mxu0 %v9956_v19  ;;  %5743 = vmatpush1.bf16.msra.mxu1 %v9957_v62 }
 0xe5e   :  { %5703 = vmatprep.subr.bf16.mxu0 %v9958_v29  ;;  %5744 = vmatprep.subr.bf16.mxu1 %v9959_v27 }
 0xe61   :  { %5704 = vmatpush1.bf16.msra.mxu0 %v9960_v30  ;;  %5745 = vmatpush1.bf16.msra.mxu1 %v9961_v46 }
 0xe62   :  { %5705 = vmatprep.subr.bf16.mxu0 %v9962_v7  ;;  %5746 = vmatprep.subr.bf16.mxu1 %v9963_v16  ;;  %v5438_v16 = vld [vmem:[#allocation3 + $0x50] sm:$0xc] }
 0xe65   :  { %5706 = vmatpush1.bf16.msra.mxu0 %v9964_v4  ;;  %5747 = vmatpush1.bf16.msra.mxu1 %v9965_v56 }
 0xe66   :  { %5707 = vmatprep.subr.bf16.mxu0 %v9966_v23  ;;  %5748 = vmatprep.subr.bf16.mxu1 %v9967_v32 }
 0xe69   :  { %5708 = vmatpush1.bf16.msra.mxu0 %v9968_v18  ;;  %5749 = vmatpush1.bf16.msra.mxu1 %v9969_v17 }
 0xe6a   :  { %5709 = vmatprep.subr.bf16.mxu0 %v9970_v48  ;;  %5750 = vmatprep.subr.bf16.mxu1 %v9971_v15  ;;  %v5437_v15 = vld [vmem:[#allocation3 + $0x48] sm:$0xc] }
 0xe6d   :  { %5710 = vmatpush1.bf16.msra.mxu0 %v9972_v22  ;;  %5751 = vmatpush1.bf16.msra.mxu1 %v9973_v57 }
 0xe6e   :  { %5801 = vmatprep.subr.bf16.mxu0 %v9974_v42  ;;  %5842 = vmatprep.subr.bf16.mxu1 %v9975_v53 }
 0xeff   :  { %v5475_v20 = vpop.f32.mrb[120].mxu0  ;;  %v5516_v60 = vpop.f32.mrb[120].mxu1 }
 0xf00   :  { %v5527_v41 = vrot.slane %v5475_v20, 6  ;;  %v5477_v2 = vpop.f32.mrb[121].mxu0  ;;  %v5518_v43 = vpop.f32.mrb[121].mxu1  ;;  %v5529_v23 = vrot.slane %v5516_v60, 6  ;;  %v5439_v20 = vld [vmem:[#allocation3 + $0x58] sm:$0xc] }
 0xf01   :  { %v5528_v18 = vrot.slane %v5477_v2, 6  ;;  %v5479_v17 = vpop.f32.mrb[122].mxu0  ;;  %v5520_v32 = vpop.f32.mrb[122].mxu1  ;;  %v5530_v7 = vrot.slane %v5518_v43, 6 }
 0xf02   :  { %v5535_v48 = vadd.f32 %v5527_v41, %v5436_v36  ;;  %v5480_v56 = vpop.f32.mrb[123].mxu0  ;;  %v5521_v22 = vpop.f32.mrb[123].mxu1  ;;  %v5537_v53 = vadd.f32 %v5529_v23, %v5438_v16 }
 0xf03   :  { %v5536_v4 = vadd.f32 %v5528_v18, %v5437_v15  ;;  %v5538_v46 = vadd.f32 %v5530_v7, %v5439_v20  ;;  %v9976_v18 = vld [vmem:[#allocation31_spill] sm:$0xff] }
 0xf04   :  { %v5645_v57 = vmul.f32 0.5, %v5535_v48  ;;  %v5659_v48 = vrot.slane %v9976_v18, 6  ;;  %v5539_v20 = vld [vmem:[#allocation3 + $0x20] sm:$0x30] }
 0xf05   :  { %v5649_v42 = vmul.f32 0.5, %v5536_v4  ;;  %v5654_v30 = vmul.f32 0.5, %v5538_v46 }
 0xf06   :  { %6962 = vtanh.f32 %v5645_v57 }
 0xf07   :  { %6964 = vtanh.f32 %v5649_v42 }
 0xf08   :  { %6966 = vtanh.f32 %v5537_v53 }
 0xf09   :  { %6968 = vtanh.f32 %v5654_v30 }
 0xf10   :  { %v6963_v2 = vpop.eup %6962 }
 0xf11   :  { %v6965_v17 = vpop.eup %6964  ;;  %v5647_v32 = vmul.f32 0.5, %v6963_v2 }
 0xf12   :  { %v5651_v41 = vmul.f32 0.5, %v6965_v17  ;;  %v6967_v56 = vpop.eup %6966 }
 0xf13   :  { %v5648_v60 = vadd.f32 0.5, %v5647_v32  ;;  %v6969_v16 = vpop.eup %6968 }
 0xf14   :  { %v5652_v22 = vadd.f32 0.5, %v5651_v41  ;;  %v5656_v23 = vmul.f32 0.5, %v6969_v16 }
 0xf15   :  { %v5662_v15 = vmul.f32 %v6967_v56, %v5648_v60 }
 0xf16   :  { %v5661_v4 = vmul.f32 %v5659_v48, %v5652_v22  ;;  %v5657_v7 = vadd.f32 0.5, %v5656_v23  ;;  %v5540_v22 = vld [vmem:[#allocation3 + $0x28] sm:$0x30]  ;;  %v5541_v23 = vld [vmem:[#allocation3 + $0x30] sm:$0x30] }
 0xf18   :  { %v9360_v57 = vadd.f32 %v5662_v15, %v5661_v4 }
 0xf1a   :  { %9977 = vst [vmem:[#allocation32_spill] sm:$0xff] %v9360_v57  ;;  %6970 = vtanh.f32 %v9360_v57 }
 0xf23   :  { %v5581_v46 = vpop.f32.mrb[124].mxu0  ;;  %v5622_v42 = vpop.f32.mrb[124].mxu1 }
 0xf24   :  { %v6971_v53 = vpop.eup %6970  ;;  %v5633_v43 = vrot.slane %v5581_v46, 4  ;;  %v5583_v36 = vpop.f32.mrb[125].mxu0  ;;  %v5635_v56 = vrot.slane %v5622_v42, 4 }
 0xf25   :  { %v5624_v30 = vpop.f32.mrb[125].mxu1  ;;  %v5634_v2 = vrot.slane %v5583_v36, 4  ;;  %v5585_v17 = vpop.f32.mrb[126].mxu0  ;;  %v5665_v41 = vmul.f32 %v6971_v53, %v5657_v7  ;;  %v5542_v7 = vld [vmem:[#allocation3 + $0x38] sm:$0x30]  ;;  %v9993_v53 = vld [vmem:[#allocation28_spill] sm:$0xff] }
 0xf26   :  { %v5626_v32 = vpop.f32.mrb[126].mxu1  ;;  %v5641_v60 = vadd.f32 %v5633_v43, %v5539_v20  ;;  %v5586_v18 = vpop.f32.mrb[127].mxu0  ;;  %v5643_v46 = vadd.f32 %v5635_v56, %v5541_v23  ;;  %v5636_v29 = vrot.slane %v5624_v30, 4  ;;  %v9994_v43 = vld [vmem:[#allocation29_spill] sm:$0xff]  ;;  %v9995_v36 = vld [vmem:[#allocation30_spill] sm:$0xff] }
 0xf27   :  { %v5627_v48 = vpop.f32.mrb[127].mxu1  ;;  %v5642_v15 = vadd.f32 %v5634_v2, %v5540_v22  ;;  %v5691_v4 = vpack.c.bf16 %v5665_v41, %v5665_v41  ;;  %v5687_v41 = vld [vmem:[#allocation3 + $0x40] sm:$0x30] }
 0xf28   :  { %v5666_v16 = vmul.f32 0.5, %v5641_v60  ;;  %v5644_v42 = vadd.f32 %v5636_v29, %v5542_v7  ;;  %v5689_v7 = vld [vmem:[#allocation3 + $0x50] sm:$0x30] }
 0xf29   :  { %v5670_v57 = vmul.f32 0.5, %v5642_v15  ;;  %v5693_v27 = vrot.slane %v5691_v4, 1  ;;  %v5688_v15 = vld [vmem:[#allocation3 + $0x48] sm:$0x30] }
 0xf2a   :  { %6972 = vtanh.f32 %v5666_v16 }
 0xf2b   :  { %6974 = vtanh.f32 %v5670_v57  ;;  %5728 = vmatmul.mubr.bf16.vlgmr.msra.gmra.mrb[128].mxu0 %v5693_v27  ;;  %5769 = vmatmul.mubr.bf16.vlgmr.msra.gmra.mrb[128].mxu1 %v5693_v27  ;;  %v9992_v57 = vld [vmem:[#allocation27_spill] sm:$0xff] }
 0xf2c   :  { %5802 = vmatpush1.bf16.msra.mxu0 %v9023_v13  ;;  %5843 = vmatpush1.bf16.msra.mxu1 %v9026_v14  ;;  %6976 = vtanh.f32 %v5643_v46  ;;  %v5675_v13 = vmul.f32 0.5, %v5644_v42 }
 0xf2d   :  { %5803 = vmatprep.subr.bf16.mxu0 %v9029_v47  ;;  %5844 = vmatprep.subr.bf16.mxu1 %v9032_v3 }
 0xf2e   :  { %5833 = vmatprep.mubr.bf16.mxu0 %v9693_v28  ;;  %5874 = vmatprep.mubr.bf16.mxu1 %v9693_v28  ;;  %6978 = vtanh.f32 %v5675_v13 }
 0xf30   :  { %5804 = vmatpush1.bf16.msra.mxu0 %v9037_v5  ;;  %5845 = vmatpush1.bf16.msra.mxu1 %v9040_v6 }
 0xf31   :  { %5805 = vmatprep.subr.bf16.mxu0 %v9043_v44  ;;  %5846 = vmatprep.subr.bf16.mxu1 %v9046_v51  ;;  %v5680_v44 = vrot.slane %v9306_v61, 2  ;;  %v9983_v61 = vld [vmem:[#allocation55_spill] sm:$0xff] }
 0xf34   :  { %v6973_v14 = vpop.eup %6972  ;;  %5806 = vmatpush1.bf16.msra.mxu0 %v9049_v63  ;;  %5847 = vmatpush1.bf16.msra.mxu1 %v9052_v34 }
 0xf35   :  { %v6975_v47 = vpop.eup %6974  ;;  %v5668_v3 = vmul.f32 0.5, %v6973_v14  ;;  %5807 = vmatprep.subr.bf16.mxu0 %v9055_v59  ;;  %5848 = vmatprep.subr.bf16.mxu1 %v9058_v35 }
 0xf36   :  { %v5672_v29 = vmul.f32 0.5, %v6975_v47  ;;  %v6977_v6 = vpop.eup %6976  ;;  %v5690_v47 = vld [vmem:[#allocation3 + $0x58] sm:$0x30] }
 0xf37   :  { %v5669_v5 = vadd.f32 0.5, %v5668_v3 }
 0xf38   :  { %v5673_v27 = vadd.f32 0.5, %v5672_v29  ;;  %5808 = vmatpush1.bf16.msra.mxu0 %v9062_v9  ;;  %5849 = vmatpush1.bf16.msra.mxu1 %v9065_v45  ;;  %v6979_v59 = vpop.eup %6978 }
 0xf39   :  { %v5683_v51 = vmul.f32 %v6977_v6, %v5669_v5  ;;  %5809 = vmatprep.subr.bf16.mxu0 %v9068_v24  ;;  %5850 = vmatprep.subr.bf16.mxu1 %v9071_v31  ;;  %v5677_v35 = vmul.f32 0.5, %v6979_v59  ;;  %v7214_v31 = vld [vmem:[#allocation15 + $0x4] ss:$16 sps:$4 sm:$0xff]  }
 0xf3a   :  { %v5682_v63 = vmul.f32 %v5680_v44, %v5673_v27 }
 0xf3b   :  { %v5678_v9 = vadd.f32 0.5, %v5677_v35  ;;  %v9996_v35 = vld [vmem:[#allocation32_spill] sm:$0xff] }
 0xf3c   :  { %v9382_v34 = vadd.f32 %v5683_v51, %v5682_v63  ;;  %5810 = vmatpush1.bf16.msra.mxu0 %v9076_v11  ;;  %5851 = vmatpush1.bf16.msra.mxu1 %v9079_v12  ;;  %v7215_v11 = vld [vmem:[#allocation15 + $0xc] ss:$16 sps:$4 sm:$0xff]  }
 0xf3d   :  { %5811 = vmatprep.subr.bf16.mxu0 %v9082_v54  ;;  %5852 = vmatprep.subr.bf16.mxu1 %v9085_v1  ;;  %v7216_v1 = vld [vmem:[#allocation15] ss:$16 sps:$4 sm:$0xff]  }
 0xf3e   :  { %6980 = vtanh.f32 %v9382_v34 }
 0xf40   :  { %5812 = vmatpush1.bf16.msra.mxu0 %v9089_v49  ;;  %5853 = vmatpush1.bf16.msra.mxu1 %v9092_v52  ;;  %v7217_v49 = vld [vmem:[#allocation15 + $0x8] ss:$16 sps:$4 sm:$0xff]   ;;  %v7218_v52 = vld [vmem:[#allocation15 + $0x24] ss:$16 sps:$4 sm:$0xff]  }
 0xf41   :  { %5813 = vmatprep.subr.bf16.mxu0 %v9095_v55  ;;  %5854 = vmatprep.subr.bf16.mxu1 %v9098_v33  ;;  %v7219_v55 = vld [vmem:[#allocation15 + $0x2c] ss:$16 sps:$4 sm:$0xff]   ;;  %v7220_v33 = vld [vmem:[#allocation15 + $0x20] ss:$16 sps:$4 sm:$0xff]  }
 0xf44   :  { %5814 = vmatpush1.bf16.msra.mxu0 %v9101_v10  ;;  %5855 = vmatpush1.bf16.msra.mxu1 %v9104_v39  ;;  %v7221_v10 = vld [vmem:[#allocation15 + $0x28] ss:$16 sps:$4 sm:$0xff]   ;;  %v9978_v39 = vld [vmem:[#allocation52_spill] sm:$0xff] }
 0xf45   :  { %5815 = vmatprep.subr.bf16.mxu0 %v9107_v40  ;;  %5856 = vmatprep.subr.bf16.mxu1 %v9110_v38  ;;  %v9979_v40 = vld [vmem:[#allocation25_spill] sm:$0xff]  ;;  %v9980_v38 = vld [vmem:[#allocation48_spill] sm:$0xff] }
 0xf48   :  { %v6981_v45 = vpop.eup %6980  ;;  %5816 = vmatpush1.bf16.msra.mxu0 %v9113_v50  ;;  %5857 = vmatpush1.bf16.msra.mxu1 %v9116_v58  ;;  %v9981_v50 = vld [vmem:[#allocation42_spill] sm:$0xff] }
 0xf49   :  { %v5686_v24 = vmul.f32 %v6981_v45, %v5678_v9  ;;  %5949 = vmatprep.subr.bf16.mxu0 %v7214_v31  ;;  %5990 = vmatprep.subr.bf16.mxu1 %v7215_v11  ;;  %v9982_v58 = vld [vmem:[#allocation54_spill] sm:$0xff]  ;;  %v5913_v9 = vrot.slane %v9996_v35, 6  ;;  %v7239_v35 = vld [vmem:[#allocation16 + $0x88] ss:$16 sps:$4 sm:$0xff]  }
 0xf4b   :  { %v5797_v12 = vpack.c.bf16 %v5686_v24, %v5686_v24 }
 0xf4d   :  { %v5799_v54 = vrot.slane %v5797_v12, 2 }
 0xf4f   :  { %5834 = vmatmul.mubr.bf16.vlgmr.msra.gmra.mrb[132].mxu0 %v5799_v54  ;;  %5875 = vmatmul.mubr.bf16.vlgmr.msra.gmra.mrb[132].mxu1 %v5799_v54 }
 0xf50   :  { %5950 = vmatpush1.bf16.msra.mxu0 %v7216_v1  ;;  %5991 = vmatpush1.bf16.msra.mxu1 %v7217_v49 }
 0xf51   :  { %5951 = vmatprep.subr.bf16.mxu0 %v7218_v52  ;;  %5992 = vmatprep.subr.bf16.mxu1 %v7219_v55 }
 0xf52   :  { %5981 = vmatprep.mubr.bf16.mxu0 %v9693_v28  ;;  %6022 = vmatprep.mubr.bf16.mxu1 %v9693_v28 }
 0xf54   :  { %5952 = vmatpush1.bf16.msra.mxu0 %v7220_v33  ;;  %5993 = vmatpush1.bf16.msra.mxu1 %v7221_v10 }
 0xf55   :  { %5953 = vmatprep.subr.bf16.mxu0 %v9950_v37  ;;  %5994 = vmatprep.subr.bf16.mxu1 %v9951_v21  ;;  %v9984_v37 = vld [vmem:[#allocation56_spill] sm:$0xff]  ;;  %v9985_v21 = vld [vmem:[#allocation57_spill] sm:$0xff] }
 0xf58   :  { %5954 = vmatpush1.bf16.msra.mxu0 %v9952_v8  ;;  %5995 = vmatpush1.bf16.msra.mxu1 %v9953_v0  ;;  %v9986_v8 = vld [vmem:[#allocation58_spill] sm:$0xff]  ;;  %v9987_v0 = vld [vmem:[#allocation59_spill] sm:$0xff] }
 0xf59   :  { %5955 = vmatprep.subr.bf16.mxu0 %v9954_v26  ;;  %5996 = vmatprep.subr.bf16.mxu1 %v9955_v25  ;;  %v9988_v26 = vld [vmem:[#allocation43_spill] sm:$0xff]  ;;  %v9989_v25 = vld [vmem:[#allocation60_spill] sm:$0xff] }
 0xf5c   :  { %5956 = vmatpush1.bf16.msra.mxu0 %v9956_v19  ;;  %5997 = vmatpush1.bf16.msra.mxu1 %v9957_v62  ;;  %v9990_v19 = vld [vmem:[#allocation61_spill] sm:$0xff]  ;;  %v9991_v62 = vld [vmem:[#allocation26_spill] sm:$0xff] }
 0xf5d   :  { %5957 = vmatprep.subr.bf16.mxu0 %v9978_v39  ;;  %5998 = vmatprep.subr.bf16.mxu1 %v9979_v40  ;;  %v5793_v39 = vld [vmem:[#allocation3 + $0x20] sm:$0xc] }
 0xf60   :  { %5958 = vmatpush1.bf16.msra.mxu0 %v9980_v38  ;;  %5999 = vmatpush1.bf16.msra.mxu1 %v9981_v50 }
 0xf61   :  { %5959 = vmatprep.subr.bf16.mxu0 %v9982_v58  ;;  %6000 = vmatprep.subr.bf16.mxu1 %v9983_v61 }
 0xf64   :  { %5960 = vmatpush1.bf16.msra.mxu0 %v9984_v37  ;;  %6001 = vmatpush1.bf16.msra.mxu1 %v9985_v21  ;;  %v5794_v21 = vld [vmem:[#allocation3 + $0x28] sm:$0xc] }
 0xf65   :  { %5961 = vmatprep.subr.bf16.mxu0 %v9986_v8  ;;  %6002 = vmatprep.subr.bf16.mxu1 %v9987_v0 }
 0xf68   :  { %5962 = vmatpush1.bf16.msra.mxu0 %v9988_v26  ;;  %6003 = vmatpush1.bf16.msra.mxu1 %v9989_v25 }
 0xf69   :  { %5963 = vmatprep.subr.bf16.mxu0 %v9990_v19  ;;  %6004 = vmatprep.subr.bf16.mxu1 %v9991_v62  ;;  %v5795_v62 = vld [vmem:[#allocation3 + $0x30] sm:$0xc] }
 0xf6c   :  { %5964 = vmatpush1.bf16.msra.mxu0 %v9992_v57  ;;  %6005 = vmatpush1.bf16.msra.mxu1 %v9993_v53 }
 0xf6d   :  { %6055 = vmatprep.subr.bf16.mxu0 %v9994_v43  ;;  %6096 = vmatprep.subr.bf16.mxu1 %v9995_v36 }
 0xffe   :  { %v5729_v30 = vpop.f32.mrb[128].mxu0  ;;  %v5770_v20 = vpop.f32.mrb[128].mxu1 }
 0xfff   :  { %v5781_v2 = vrot.slane %v5729_v30, 4  ;;  %v5731_v17 = vpop.f32.mrb[129].mxu0  ;;  %v5772_v32 = vpop.f32.mrb[129].mxu1  ;;  %v5783_v48 = vrot.slane %v5770_v20, 4  ;;  %v7222_v30 = vld [vmem:[#allocation16] ss:$16 sps:$4 sm:$0xff]  }
0x1000   :  { %v5782_v60 = vrot.slane %v5731_v17, 4  ;;  %v5733_v56 = vpop.f32.mrb[130].mxu0  ;;  %v5774_v22 = vpop.f32.mrb[130].mxu1  ;;  %v5784_v14 = vrot.slane %v5772_v32, 4  ;;  %v7223_v20 = vld [vmem:[#allocation16 + $0x8] ss:$16 sps:$4 sm:$0xff]  }
0x1001   :  { %v5789_v18 = vadd.f32 %v5781_v2, %v5687_v41  ;;  %v5734_v4 = vpop.f32.mrb[131].mxu0  ;;  %v5775_v16 = vpop.f32.mrb[131].mxu1  ;;  %v5791_v13 = vadd.f32 %v5783_v48, %v5689_v7  ;;  %v5796_v2 = vld [vmem:[#allocation3 + $0x38] sm:$0xc]  ;;  %v7224_v17 = vld [vmem:[#allocation16 + $0x24] ss:$16 sps:$4 sm:$0xff]  }
0x1002   :  { %v5790_v23 = vadd.f32 %v5782_v60, %v5688_v15  ;;  %v5792_v3 = vadd.f32 %v5784_v14, %v5690_v47  ;;  %v7225_v32 = vld [vmem:[#allocation16 + $0x2c] ss:$16 sps:$4 sm:$0xff]   ;;  %v7226_v60 = vld [vmem:[#allocation16 + $0x20] ss:$16 sps:$4 sm:$0xff]   ;;  %v7227_v56 = vld [vmem:[#allocation16 + $0x28] ss:$16 sps:$4 sm:$0xff]  }
0x1003   :  { %v5899_v46 = vmul.f32 0.5, %v5789_v18  ;;  %v7228_v22 = vld [vmem:[#allocation16 + $0x44] ss:$16 sps:$4 sm:$0xff]   ;;  %v7229_v18 = vld [vmem:[#allocation16 + $0x4c] ss:$16 sps:$4 sm:$0xff]  }
0x1004   :  { %v5903_v42 = vmul.f32 0.5, %v5790_v23  ;;  %v5908_v29 = vmul.f32 0.5, %v5792_v3  ;;  %v7230_v4 = vld [vmem:[#allocation16 + $0x40] ss:$16 sps:$4 sm:$0xff]   ;;  %v7231_v16 = vld [vmem:[#allocation16 + $0x48] ss:$16 sps:$4 sm:$0xff]  }
0x1005   :  { %6982 = vtanh.f32 %v5899_v46  ;;  %v7232_v7 = vld [vmem:[#allocation16 + $0x64] ss:$16 sps:$4 sm:$0xff]   ;;  %v5934_v3 = vrot.slane %v9382_v34, 2 }
0x1006   :  { %6984 = vtanh.f32 %v5903_v42  ;;  %v7233_v42 = vld [vmem:[#allocation16 + $0x6c] ss:$16 sps:$4 sm:$0xff]  }
0x1007   :  { %6986 = vtanh.f32 %v5791_v13 }
0x1008   :  { %6988 = vtanh.f32 %v5908_v29  ;;  %v7234_v29 = vld [vmem:[#allocation16 + $0x60] ss:$16 sps:$4 sm:$0xff]  }
0x100f   :  { %v6983_v5 = vpop.eup %6982 }
0x1010   :  { %v6985_v6 = vpop.eup %6984  ;;  %v5901_v27 = vmul.f32 0.5, %v6983_v5  ;;  %v7235_v5 = vld [vmem:[#allocation16 + $0x68] ss:$16 sps:$4 sm:$0xff]  }
0x1011   :  { %v5905_v44 = vmul.f32 0.5, %v6985_v6  ;;  %v6987_v63 = vpop.eup %6986 }
0x1012   :  { %v5902_v51 = vadd.f32 0.5, %v5901_v27  ;;  %v6989_v11 = vpop.eup %6988  ;;  %v7236_v27 = vld [vmem:[#allocation16 + $0x84] ss:$16 sps:$4 sm:$0xff]  }
0x1013   :  { %v5906_v59 = vadd.f32 0.5, %v5905_v44  ;;  %v5910_v12 = vmul.f32 0.5, %v6989_v11  ;;  %v7237_v44 = vld [vmem:[#allocation16 + $0x8c] ss:$16 sps:$4 sm:$0xff]   ;;  %v7243_v11 = vld [vmem:[#allocation16 + $0xa8] ss:$16 sps:$4 sm:$0xff]  }
0x1014   :  { %v5916_v45 = vmul.f32 %v6987_v63, %v5902_v51 }
0x1015   :  { %v5915_v24 = vmul.f32 %v5913_v9, %v5906_v59  ;;  %v5911_v54 = vadd.f32 0.5, %v5910_v12  ;;  %v7238_v59 = vld [vmem:[#allocation16 + $0x80] ss:$16 sps:$4 sm:$0xff]   ;;  %v7240_v9 = vld [vmem:[#allocation16 + $0xa4] ss:$16 sps:$4 sm:$0xff]  }
0x1016   :  { %v7244_v12 = vld [vmem:[#allocation16 + $0xc4] ss:$16 sps:$4 sm:$0xff]  }
0x1017   :  { %v9428_v31 = vadd.f32 %v5916_v45, %v5915_v24  ;;  %v7241_v45 = vld [vmem:[#allocation16 + $0xac] ss:$16 sps:$4 sm:$0xff]   ;;  %v7242_v24 = vld [vmem:[#allocation16 + $0xa0] ss:$16 sps:$4 sm:$0xff]  }
0x1019   :  { %6990 = vtanh.f32 %v9428_v31 }
0x1022   :  { %v5835_v1 = vpop.f32.mrb[132].mxu0  ;;  %v5876_v49 = vpop.f32.mrb[132].mxu1 }
0x1023   :  { %v6991_v52 = vpop.eup %6990  ;;  %v5887_v55 = vrot.slane %v5835_v1, 6  ;;  %v5837_v33 = vpop.f32.mrb[133].mxu0  ;;  %v5889_v37 = vrot.slane %v5876_v49, 6  ;;  %v7246_v49 = vld [vmem:[#allocation16 + $0xc0] ss:$16 sps:$4 sm:$0xff]  }
0x1024   :  { %v5878_v10 = vpop.f32.mrb[133].mxu1  ;;  %v5888_v40 = vrot.slane %v5837_v33, 6  ;;  %v5839_v38 = vpop.f32.mrb[134].mxu0  ;;  %v5919_v58 = vmul.f32 %v6991_v52, %v5911_v54  ;;  %v7245_v54 = vld [vmem:[#allocation16 + $0xcc] ss:$16 sps:$4 sm:$0xff]  }
0x1025   :  { %v5880_v50 = vpop.f32.mrb[134].mxu1  ;;  %v5895_v61 = vadd.f32 %v5887_v55, %v5793_v39  ;;  %v5840_v8 = vpop.f32.mrb[135].mxu0  ;;  %v5897_v43 = vadd.f32 %v5889_v37, %v5795_v62  ;;  %v5890_v36 = vrot.slane %v5878_v10, 6  ;;  %v7247_v52 = vld [vmem:[#allocation16 + $0xc8] ss:$16 sps:$4 sm:$0xff]  }
0x1026   :  { %v5881_v0 = vpop.f32.mrb[135].mxu1  ;;  %v5896_v26 = vadd.f32 %v5888_v40, %v5794_v21  ;;  %v5945_v25 = vpack.c.bf16 %v5919_v58, %v5919_v58  ;;  %v7248_v55 = vld [vmem:[#allocation16 + $0xe4] ss:$16 sps:$4 sm:$0xff]   ;;  %v7249_v33 = vld [vmem:[#allocation16 + $0xec] ss:$16 sps:$4 sm:$0xff]  }
0x1027   :  { %v5920_v19 = vmul.f32 0.5, %v5895_v61  ;;  %v5898_v41 = vadd.f32 %v5890_v36, %v5796_v2  ;;  %v7250_v40 = vld [vmem:[#allocation16 + $0xe0] ss:$16 sps:$4 sm:$0xff]   ;;  %v7251_v38 = vld [vmem:[#allocation16 + $0xe8] ss:$16 sps:$4 sm:$0xff]  }
0x1028   :  { %v5924_v57 = vmul.f32 0.5, %v5896_v26  ;;  %v5947_v53 = vrot.slane %v5945_v25, 2  ;;  %v5941_v25 = vld [vmem:[#allocation3 + $0x40] sm:$0xc0]  ;;  %v5942_v36 = vld [vmem:[#allocation3 + $0x48] sm:$0xc0] }
0x1029   :  { %6992 = vtanh.f32 %v5920_v19  ;;  %v5929_v48 = vmul.f32 0.5, %v5898_v41 }
0x102a   :  { %6994 = vtanh.f32 %v5924_v57  ;;  %5982 = vmatmul.mubr.bf16.vlgmr.msra.gmra.mrb[136].mxu0 %v5947_v53  ;;  %6023 = vmatmul.mubr.bf16.vlgmr.msra.gmra.mrb[136].mxu1 %v5947_v53 }
0x102b   :  { %6056 = vmatpush1.bf16.msra.mxu0 %v7222_v30  ;;  %6097 = vmatpush1.bf16.msra.mxu1 %v7223_v20  ;;  %6996 = vtanh.f32 %v5897_v43 }
0x102c   :  { %6057 = vmatprep.subr.bf16.mxu0 %v7224_v17  ;;  %6098 = vmatprep.subr.bf16.mxu1 %v7225_v32  ;;  %6998 = vtanh.f32 %v5929_v48  ;;  %v5943_v32 = vld [vmem:[#allocation3 + $0x50] sm:$0xc0] }
0x102d   :  { %6087 = vmatprep.mubr.bf16.mxu0 %v9693_v28  ;;  %6128 = vmatprep.mubr.bf16.mxu1 %v9693_v28 }
0x102f   :  { %6058 = vmatpush1.bf16.msra.mxu0 %v7226_v60  ;;  %6099 = vmatpush1.bf16.msra.mxu1 %v7227_v56 }
0x1030   :  { %6059 = vmatprep.subr.bf16.mxu0 %v7228_v22  ;;  %6100 = vmatprep.subr.bf16.mxu1 %v7229_v18  ;;  %v5944_v22 = vld [vmem:[#allocation3 + $0x58] sm:$0xc0] }
0x1033   :  { %v6993_v15 = vpop.eup %6992  ;;  %6060 = vmatpush1.bf16.msra.mxu0 %v7230_v4  ;;  %6101 = vmatpush1.bf16.msra.mxu1 %v7231_v16 }
0x1034   :  { %v6995_v23 = vpop.eup %6994  ;;  %v5922_v46 = vmul.f32 0.5, %v6993_v15  ;;  %6061 = vmatprep.subr.bf16.mxu0 %v7232_v7  ;;  %6102 = vmatprep.subr.bf16.mxu1 %v7233_v42 }
0x1035   :  { %v5926_v28 = vmul.f32 0.5, %v6995_v23  ;;  %v6997_v14 = vpop.eup %6996 }
0x1036   :  { %v5923_v13 = vadd.f32 0.5, %v5922_v46  ;;  %v6999_v34 = vpop.eup %6998 }
0x1037   :  { %v5927_v47 = vadd.f32 0.5, %v5926_v28  ;;  %6062 = vmatpush1.bf16.msra.mxu0 %v7234_v29  ;;  %6103 = vmatpush1.bf16.msra.mxu1 %v7235_v5  ;;  %v5931_v1 = vmul.f32 0.5, %v6999_v34  ;;  %v6155_v28 = vrot.slane %v9428_v31, 6  ;;  %v7477_v29 = vmov 1983009808  }
0x1038   :  { %v5937_v6 = vmul.f32 %v6997_v14, %v5923_v13  ;;  %6063 = vmatprep.subr.bf16.mxu0 %v7236_v27  ;;  %6104 = vmatprep.subr.bf16.mxu1 %v7237_v44  ;;  %v6186_v5 = vunpack.c.l.s4 %v7477_v29  ;;  %v6048_v34 = vld [vmem:[#allocation3 + $0x28] sm:$0x3] }
0x1039   :  { %v5936_v51 = vmul.f32 %v5934_v3, %v5927_v47  ;;  %v5932_v10 = vadd.f32 0.5, %v5931_v1 }
0x103a   :  { %v6187_v27 = vunpack.c.0.s8 %v6186_v5 }
0x103b   :  { %v9434_v63 = vadd.f32 %v5937_v6, %v5936_v51  ;;  %6064 = vmatpush1.bf16.msra.mxu0 %v7238_v59  ;;  %6105 = vmatpush1.bf16.msra.mxu1 %v7239_v35  ;;  %v6047_v51 = vld [vmem:[#allocation3 + $0x20] sm:$0x3] }
0x103c   :  { %6065 = vmatprep.subr.bf16.mxu0 %v7240_v9  ;;  %6106 = vmatprep.subr.bf16.mxu1 %v7241_v45 }
0x103d   :  { %7000 = vtanh.f32 %v9434_v63 }
0x103f   :  { %6066 = vmatpush1.bf16.msra.mxu0 %v7242_v24  ;;  %6107 = vmatpush1.bf16.msra.mxu1 %v7243_v11 }
0x1040   :  { %6067 = vmatprep.subr.bf16.mxu0 %v7244_v12  ;;  %6108 = vmatprep.subr.bf16.mxu1 %v7245_v54 }
0x1043   :  { %6068 = vmatpush1.bf16.msra.mxu0 %v7246_v49  ;;  %6109 = vmatpush1.bf16.msra.mxu1 %v7247_v52  ;;  %v9997_v49 = vld [vmem:[#allocation49_spill] sm:$0xff] }
0x1044   :  { %6069 = vmatprep.subr.bf16.mxu0 %v7248_v55  ;;  %6110 = vmatprep.subr.bf16.mxu1 %v7249_v33  ;;  %v6190_v52 = vsub.s32 %v6187_v27, %v9997_v49 }
0x1047   :  { %v7001_v39 = vpop.eup %7000  ;;  %6070 = vmatpush1.bf16.msra.mxu0 %v7250_v40  ;;  %6111 = vmatpush1.bf16.msra.mxu1 %v7251_v38 }
0x1048   :  { %v5940_v50 = vmul.f32 %v7001_v39, %v5932_v10  ;;  %v6049_v39 = vld [vmem:[#allocation3 + $0x30] sm:$0x3] }
0x104a   :  { %v6051_v58 = vpack.c.bf16 %v5940_v50, %v5940_v50 }
0x104c   :  { %v6053_v61 = vrot.slane %v6051_v58, 1 }
0x104e   :  { %6088 = vmatmul.mubr.bf16.vlgmr.msra.gmra.mrb[140].mxu0 %v6053_v61  ;;  %6129 = vmatmul.mubr.bf16.vlgmr.msra.gmra.mrb[140].mxu1 %v6053_v61  ;;  %v6050_v61 = vld [vmem:[#allocation3 + $0x38] sm:$0x3] }
0x10fd   :  { %v5983_v37 = vpop.f32.mrb[136].mxu0  ;;  %v6024_v21 = vpop.f32.mrb[136].mxu1 }
0x10fe   :  { %v6035_v8 = vrot.slane %v5983_v37, 2  ;;  %v5985_v0 = vpop.f32.mrb[137].mxu0  ;;  %v6026_v26 = vpop.f32.mrb[137].mxu1  ;;  %v6037_v43 = vrot.slane %v6024_v21, 2 }
0x10ff   :  { %v6036_v19 = vrot.slane %v5985_v0, 2  ;;  %v5987_v62 = vpop.f32.mrb[138].mxu0  ;;  %v6028_v57 = vpop.f32.mrb[138].mxu1  ;;  %v6038_v56 = vrot.slane %v6026_v26, 2 }
0x1100   :  { %v6043_v53 = vadd.f32 %v6035_v8, %v5941_v25  ;;  %v5988_v30 = vpop.f32.mrb[139].mxu0  ;;  %v6029_v20 = vpop.f32.mrb[139].mxu1  ;;  %v6045_v60 = vadd.f32 %v6037_v43, %v5943_v32  ;;  %v6176_v43 = vrot.slane %v9434_v63, 2 }
0x1101   :  { %v6044_v2 = vadd.f32 %v6036_v19, %v5942_v36  ;;  %v6046_v18 = vadd.f32 %v6038_v56, %v5944_v22 }
0x1102   :  { %v6141_v17 = vmul.f32 0.5, %v6043_v53 }
0x1103   :  { %v6145_v41 = vmul.f32 0.5, %v6044_v2  ;;  %v6150_v48 = vmul.f32 0.5, %v6046_v18 }
0x1104   :  { %7002 = vtanh.f32 %v6141_v17 }
0x1105   :  { %7004 = vtanh.f32 %v6145_v41 }
0x1106   :  { %7006 = vtanh.f32 %v6045_v60 }
0x1107   :  { %7008 = vtanh.f32 %v6150_v48 }
0x110e   :  { %v7003_v15 = vpop.eup %7002 }
0x110f   :  { %v7005_v4 = vpop.eup %7004  ;;  %v6143_v16 = vmul.f32 0.5, %v7003_v15 }
0x1110   :  { %v6147_v23 = vmul.f32 0.5, %v7005_v4  ;;  %v7007_v7 = vpop.eup %7006 }
0x1111   :  { %v6144_v46 = vadd.f32 0.5, %v6143_v16  ;;  %v7009_v3 = vpop.eup %7008 }
0x1112   :  { %v6148_v42 = vadd.f32 0.5, %v6147_v23  ;;  %v6152_v6 = vmul.f32 0.5, %v7009_v3 }
0x1113   :  { %v6158_v13 = vmul.f32 %v7007_v7, %v6144_v46 }
0x1114   :  { %v6157_v14 = vmul.f32 %v6155_v28, %v6148_v42  ;;  %v6153_v44 = vadd.f32 0.5, %v6152_v6 }
0x1116   :  { %v6159_v47 = vadd.f32 %v6158_v13, %v6157_v14 }
0x1118   :  { %7010 = vtanh.f32 %v6159_v47 }
0x1121   :  { %v6089_v59 = vpop.f32.mrb[140].mxu0  ;;  %v6130_v35 = vpop.f32.mrb[140].mxu1 }
0x1122   :  { %v7011_v9 = vpop.eup %7010  ;;  %v6137_v45 = vadd.f32 %v6089_v59, %v6047_v51  ;;  %v6091_v24 = vpop.f32.mrb[141].mxu0  ;;  %v6139_v50 = vadd.f32 %v6130_v35, %v6049_v39 }
0x1123   :  { %v6132_v11 = vpop.f32.mrb[141].mxu1  ;;  %v6138_v12 = vadd.f32 %v6091_v24, %v6048_v34  ;;  %v6093_v31 = vpop.f32.mrb[142].mxu0  ;;  %v6161_v1 = vmul.f32 %v7011_v9, %v6153_v44 }
0x1124   :  { %v6134_v54 = vpop.f32.mrb[142].mxu1  ;;  %v6162_v55 = vmul.f32 0.5, %v6137_v45  ;;  %v6094_v33 = vpop.f32.mrb[143].mxu0  ;;  %v6140_v21 = vadd.f32 %v6132_v11, %v6050_v61 }
0x1125   :  { %v6135_v10 = vpop.f32.mrb[143].mxu1  ;;  %v6166_v40 = vmul.f32 0.5, %v6138_v12  ;;  %v6184_v38 = vcombine.high %v6161_v1, %v6161_v1 }
0x1126   :  { %7012 = vtanh.f32 %v6162_v55  ;;  %v6171_v8 = vmul.f32 0.5, %v6140_v21 }
0x1127   :  { %7014 = vtanh.f32 %v6166_v40  ;;  %v6191_v58 = vrot.slane %v6184_v38, %v6190_v52 }
0x1128   :  { %7016 = vtanh.f32 %v6139_v50 }
0x1129   :  { %v6192_v37 = vcombine.high %v6191_v58, %v6191_v58  ;;  %7018 = vtanh.f32 %v6171_v8 }
0x112b   :  { %6194 = vst [vmem:[#allocation18] sm:$0x3] %v6192_v37 }
0x1130   :  { %v7013_v0 = vpop.eup %7012 }
0x1131   :  { %v7015_v26 = vpop.eup %7014  ;;  %v6164_v25 = vmul.f32 0.5, %v7013_v0 }
0x1132   :  { %v6168_v19 = vmul.f32 0.5, %v7015_v26  ;;  %v7017_v57 = vpop.eup %7016 }
0x1133   :  { %v6165_v62 = vadd.f32 0.5, %v6164_v25  ;;  %v7019_v2 = vpop.eup %7018 }
0x1134   :  { %v6169_v53 = vadd.f32 0.5, %v6168_v19  ;;  %v6173_v17 = vmul.f32 0.5, %v7019_v2 }
0x1135   :  { %v6179_v36 = vmul.f32 %v7017_v57, %v6165_v62 }
0x1136   :  { %v6178_v30 = vmul.f32 %v6176_v43, %v6169_v53  ;;  %v6174_v32 = vadd.f32 0.5, %v6173_v17 }
0x1138   :  { %v6180_v20 = vadd.f32 %v6179_v36, %v6178_v30 }
0x113a   :  { %7020 = vtanh.f32 %v6180_v20 }
0x1144   :  { %v7021_v41 = vpop.eup %7020 }
0x1145   :  { %v6182_v60 = vmul.f32 %v7021_v41, %v6174_v32 }
0x1147   :  { %6195 = vst [vmem:[#allocation18 + $0x2] sm:$0x3] %v6182_v60 }
0x1148   :  { %7439 = shalt.err (!%p7436_p12)
}
0x1149   :  { %s7440_s23 = scalar_lea.hbm %s9461_s9, 64 }
0x114a   :  { %p7441_p13 = scmp.ne.s32.totalorder %s9461_s9, %s7440_s23  ;;  %p7444_p0 = scmp.lt.u32.totalorder %s7440_s23, %s9461_s9 }
0x114c   :  { %p7446_p1 = pnand %p7444_p0, %p7441_p13 }
0x114e   :  { %7449 = shalt.err (!%p7446_p1)
}
0x114f   :  { %6205 = dma.vmem_to_hbm [thread:$0]  %s6203_s10, 64, %s9461_s9, [#allocation6]  }
0x1150   :  { %7460 = dma.done.wait [#allocation6], 64  }
0x1151   :  { %7461 = vsyncadd [#allocation6], 4294967232 }
0x1152   :  { %6209 = vsyncpa [#allocation5], 1 }
0x1153   :  { %6210 = vsyncpa [#allocation8], 1 }
0x1154   :  { %6211 = vsyncpa [#allocation11], 1 }
0x1155   :  { %6212 = vsyncpa [#allocation14], 1 }
0x1156   :  { %6213 = vsyncpa [#allocation17], 1 }
0x1157   :  { %6214 = vsyncpa [#allocation6], 1 }

</bundles_post_ra>
